<compile_context>
chip_gen: v7x
topology: tpu7x:2x2x1
jax: 0.10.0
libtpu: 0.0.40
codegen_flags: <defaults>
</compile_context>

<pallas_src>
import math
import jax
import jax.numpy as jnp
from jax.experimental import pallas as pl
from jax.experimental.pallas import tpu as pltpu

# ----- scaled-down hyper-parameters (structurally identical to CaT) -----------
D_MODEL = 128                 # stands in for 768
NHEAD = 4
HEAD_DIM = D_MODEL // NHEAD
FWD_SIZE = 256                # decoder feed-forward size
VIT_MLP = 4 * D_MODEL         # timm ViT mlp_ratio = 4
NUM_DEC_LAYERS = 2
NUM_VIT_BLOCKS = 2
VOCAB = 64
SEM_SIZE = 32
MAX_LEN = 8
PATCH = 16
IMG = 32
N_PATCH = (IMG // PATCH) ** 2          # 4 patches
N_TOK = N_PATCH + 1                    # + cls token
NEG_INF = -1e30
_ATTN_SCALE = 1.0 / math.sqrt(HEAD_DIM)
_SQRT2_INV = 1.0 / math.sqrt(2.0)


# ------------------------------ Pallas plumbing -------------------------------
def _zero_map(ndim):
    return lambda i: (0,) * ndim


def _fused_call(body, tree, out_shape):
    """Run `body(param_ref_tree, out_ref)` as ONE pallas_call.

    Every operand (activations + all weights for that stage) is mapped whole
    into VMEM so the entire fused forward runs without touching HBM in between.
    """
    leaves, treedef = jax.tree_util.tree_flatten(tree)

    def kernel(*refs):
        body(jax.tree_util.tree_unflatten(treedef, refs[:-1]), refs[-1])

    return pl.pallas_call(
        kernel,
        out_shape=out_shape,
        grid=(1,),
        in_specs=[pl.BlockSpec(l.shape, _zero_map(l.ndim)) for l in leaves],
        out_specs=pl.BlockSpec(out_shape.shape, _zero_map(len(out_shape.shape))),
        compiler_params=pltpu.CompilerParams(dimension_semantics=("arbitrary",)),
    )(*leaves)


# ------------------------------ in-kernel math ---------------------------------
def _bf16(x):
    return x.astype(jnp.bfloat16)


def _dot(x, w_ref, b_ref=None):
    """bf16 MXU matmul with f32 accumulation and fused bias epilogue."""
    out = jnp.dot(_bf16(x), w_ref[...], preferred_element_type=jnp.float32)
    if b_ref is not None:
        out = out + b_ref[...]
    return out


def _layer_norm(x, g_ref, b_ref, eps):
    mu = jnp.mean(x, axis=-1, keepdims=True)
    var = jnp.mean(jnp.square(x - mu), axis=-1, keepdims=True)
    return (x - mu) * jax.lax.rsqrt(var + eps) * g_ref[...] + b_ref[...]


def _gelu(x):
    # Exact GELU via erf polynomial (Abramowitz & Stegun 7.1.26, |err| < 1.6e-7).
    # Rides as a free epilogue inside the fused kernel (no extra launch / HBM trip).
    ax = jnp.abs(x) * _SQRT2_INV
    sgn = jnp.where(x >= 0.0, 1.0, -1.0)
    t = 1.0 / (1.0 + 0.3275911 * ax)
    poly = ((((1.061405429 * t - 1.453152027) * t + 1.421413741) * t
             - 0.284496736) * t + 0.254829592) * t
    erf = sgn * (1.0 - poly * jnp.exp(-ax * ax))
    return 0.5 * x * (1.0 + erf)


def _mha_core(q2, k2, v2, add_mask):
    """Multi-head attention on flat token rows.

    q2:[Nq,D], k2/v2:[Nk,D] f32; add_mask:[Nq,Nk] additive f32 (encodes causal /
    key-padding and the batch-block structure). Each head is selected with a lane
    mask so every MXU contraction runs over the full 128-wide packed feature dim
    (no 32-wide slices, no transposes, lane-dense [N,128] outputs).
    """
    d = q2.shape[-1]
    lane = jax.lax.broadcasted_iota(jnp.int32, (1, d), 1)
    k_b = _bf16(k2)
    out = jnp.zeros(q2.shape, jnp.float32)
    for h in range(NHEAD):
        sel = jnp.where(
            (lane >= h * HEAD_DIM) & (lane < (h + 1) * HEAD_DIM), 1.0, 0.0)
        q_h = _bf16(q2 * (sel * _ATTN_SCALE))
        s = jax.lax.dot_general(q_h, k_b, (((1,), (1,)), ((), ())),
                                preferred_element_type=jnp.float32)
        s = s + add_mask
        s = s - jnp.max(s, axis=-1, keepdims=True)
        p = jnp.exp(s)
        # divide -> EUP reciprocal (VALU stays free)
        p = p * pl.reciprocal(jnp.sum(p, axis=-1, keepdims=True), approx=True)
        out = out + jnp.dot(_bf16(p), _bf16(v2 * sel),
                            preferred_element_type=jnp.float32)
    return out


def _self_mha(x2, p, mask2):
    d = x2.shape[-1]
    qkv = _dot(x2, p["wqkv"], p["bqkv"])                 # fused QKV projection
    o = _mha_core(qkv[:, :d], qkv[:, d:2 * d], qkv[:, 2 * d:], mask2)
    return _dot(o, p["wo"], p["bo"])                     # fused output projection


def _cross_mha(x2, mem2, p, mask2):
    d = x2.shape[-1]
    q = _dot(x2, p["wq"], p["bq"])
    kv = _dot(mem2, p["wkv"], p["bkv"])                  # fused KV projection
    o = _mha_core(q, kv[:, :d], kv[:, d:], mask2)
    return _dot(o, p["wo"], p["bo"])


# ------------------------------ fused kernel bodies ----------------------------
def _encoder_body(p, o_ref):
    # Patch projection; cls token, pos-embed and the projection bias are folded
    # into a single additive per-token term (tok_add) prepared outside.
    x = _dot(p["patches"][...], p["patch_w"]) + p["tok_add"][...]
    vit_mask = p["vit_mask"][...]                        # batch-block mask only
    for bp in p["blocks"]:
        h = _layer_norm(x, bp["ln1_g"], bp["ln1_b"], 1e-6)   # timm eps = 1e-6
        x = x + _self_mha(h, bp, vit_mask)
        h = _layer_norm(x, bp["ln2_g"], bp["ln2_b"], 1e-6)
        f = _gelu(_dot(h, bp["fc1_w"], bp["fc1_b"]))         # bias+GELU epilogue
        x = x + _dot(f, bp["fc2_w"], bp["fc2_b"])
    o_ref[...] = _layer_norm(x, p["norm_g"], p["norm_b"], 1e-6)


def _decoder_body(p, o_ref):
    x1 = _dot(p["embed"][...], p["we_w"], p["we_b"])     # [B*T, D]
    x2 = _dot(p["sem"][...], p["ws_w"], p["ws_b"])       # [B*T, D] (sem repeated)
    x = x1 * x2 * math.sqrt(D_MODEL) + p["pe"][...]      # torch.mul, scale, pos-enc
    mem2 = p["memory"][...]
    self_mask = p["self_mask"][...]
    cross_mask = p["cross_mask"][...]
    for lp in p["layers"]:
        x = _layer_norm(x + _self_mha(x, lp["sa"], self_mask),
                        lp["ln1_g"], lp["ln1_b"], 1e-5)  # PyTorch eps = 1e-5
        x = _layer_norm(x + _cross_mha(x, mem2, lp["ca"], cross_mask),
                        lp["ln2_g"], lp["ln2_b"], 1e-5)
        f = _gelu(_dot(x, lp["ff1_w"], lp["ff1_b"]))
        x = _layer_norm(x + _dot(f, lp["ff2_w"], lp["ff2_b"]),
                        lp["ln3_g"], lp["ln3_b"], 1e-5)
    logits = _dot(x, p["out_w"], p["out_b"])             # [B*T, V]
    logits = logits - jnp.max(logits, axis=-1, keepdims=True)
    o_ref[...] = logits - jnp.log(jnp.sum(jnp.exp(logits), axis=-1, keepdims=True))


# ------------------------------ forward (glue + 2 fused calls) ------------------
def _bf(w):
    return w.astype(jnp.bfloat16)


def _row(b):
    return b.reshape(1, -1).astype(jnp.float32)


def cat_forward(params, images, tgt, semantics, tgt_mask, tgt_key_padding_mask):
    enc_p, dec_p = params["encoder"], params["decoder"]
    B = images.shape[0]
    T = tgt.shape[1]

    # ---------------- encoder: one fused pallas_call ----------------
    C, H, W = images.shape[1:]
    gh, gw = H // PATCH, W // PATCH
    pat = images.reshape(B, C, gh, PATCH, gw, PATCH)
    pat = jnp.transpose(pat, (0, 2, 4, 1, 3, 5)).reshape(B, N_PATCH, C * PATCH * PATCH)
    # row b*N_TOK+0 is the cls slot (zero patch); its value comes from tok_add.
    pat = jnp.concatenate(
        [jnp.zeros((B, 1, C * PATCH * PATCH), images.dtype), pat], axis=1)
    patches = pat.reshape(B * N_TOK, C * PATCH * PATCH)

    pos = enc_p["pos_embed"].reshape(N_TOK, D_MODEL)
    tok_add = jnp.concatenate(
        [enc_p["cls"].reshape(1, D_MODEL) + pos[:1],
         pos[1:] + enc_p["patch_b"].reshape(1, D_MODEL)], axis=0)
    tok_add = jnp.tile(tok_add, (B, 1))                               # [B*N_TOK, D]

    bs_batch = jnp.repeat(jnp.arange(B, dtype=jnp.int32), N_TOK)
    vit_mask = jnp.where(bs_batch[:, None] == bs_batch[None, :],
                         0.0, NEG_INF).astype(jnp.float32)

    blocks = []
    for bp in enc_p["blocks"]:
        blocks.append({
            "wqkv": _bf(bp["wqkv"]), "bqkv": _row(bp["bqkv"]),
            "wo": _bf(bp["wo"]), "bo": _row(bp["bo"]),
            "ln1_g": _row(bp["ln1_g"]), "ln1_b": _row(bp["ln1_b"]),
            "ln2_g": _row(bp["ln2_g"]), "ln2_b": _row(bp["ln2_b"]),
            "fc1_w": _bf(bp["fc1_w"]), "fc1_b": _row(bp["fc1_b"]),
            "fc2_w": _bf(bp["fc2_w"]), "fc2_b": _row(bp["fc2_b"]),
        })
    enc_tree = {
        "patches": patches,
        "patch_w": _bf(enc_p["patch_w"]),
        "tok_add": tok_add,
        "vit_mask": vit_mask,
        "blocks": blocks,
        "norm_g": _row(enc_p["norm_g"]),
        "norm_b": _row(enc_p["norm_b"]),
    }
    enc_out = _fused_call(
        _encoder_body, enc_tree,
        jax.ShapeDtypeStruct((B * N_TOK, D_MODEL), jnp.float32))
    memory2 = enc_out.reshape(B, N_TOK, D_MODEL)[:, 1:, :].reshape(
        B * N_PATCH, D_MODEL)                                         # drop cls

    # ---------------- decoder: one fused pallas_call ----------------
    embed = jnp.take(dec_p["emb"], tgt, axis=0).reshape(B * T, D_MODEL)
    sem_rep = jnp.repeat(semantics.astype(jnp.float32), T, axis=0)    # [B*T, SEM]
    pe = jnp.tile(dec_p["pe"][:T], (B, 1))                            # [B*T, D]

    bt_batch = jnp.repeat(jnp.arange(B, dtype=jnp.int32), T)
    bm_batch = jnp.repeat(jnp.arange(B, dtype=jnp.int32), N_PATCH)
    pad_add = jnp.where(tgt_key_padding_mask, NEG_INF, 0.0).astype(jnp.float32)
    self_mask = jnp.where(
        bt_batch[:, None] == bt_batch[None, :],
        jnp.tile(tgt_mask.astype(jnp.float32), (B, B)) + pad_add.reshape(-1)[None, :],
        NEG_INF).astype(jnp.float32)                                  # [B*T, B*T]
    cross_mask = jnp.where(bt_batch[:, None] == bm_batch[None, :],
                           0.0, NEG_INF).astype(jnp.float32)          # [B*T, B*Np]

    layers = []
    for lp in dec_p["layers"]:
        layers.append({
            "sa": {"wqkv": _bf(lp["sa_wqkv"]), "bqkv": _row(lp["sa_bqkv"]),
                   "wo": _bf(lp["sa_wo"]), "bo": _row(lp["sa_bo"])},
            "ca": {"wq": _bf(lp["ca_wq"]), "bq": _row(lp["ca_bq"]),
                   "wkv": _bf(lp["ca_wkv"]), "bkv": _row(lp["ca_bkv"]),
                   "wo": _bf(lp["ca_wo"]), "bo": _row(lp["ca_bo"])},
            "ln1_g": _row(lp["ln1_g"]), "ln1_b": _row(lp["ln1_b"]),
            "ln2_g": _row(lp["ln2_g"]), "ln2_b": _row(lp["ln2_b"]),
            "ln3_g": _row(lp["ln3_g"]), "ln3_b": _row(lp["ln3_b"]),
            "ff1_w": _bf(lp["ff1_w"]), "ff1_b": _row(lp["ff1_b"]),
            "ff2_w": _bf(lp["ff2_w"]), "ff2_b": _row(lp["ff2_b"]),
        })
    dec_tree = {
        "embed": embed, "sem": sem_rep, "memory": memory2,
        "self_mask": self_mask, "cross_mask": cross_mask, "pe": pe,
        "we_w": _bf(dec_p["we_w"]), "we_b": _row(dec_p["we_b"]),
        "ws_w": _bf(dec_p["ws_w"]), "ws_b": _row(dec_p["ws_b"]),
        "layers": layers,
        "out_w": _bf(dec_p["out_w"]), "out_b": _row(dec_p["out_b"]),
    }
    logp = _fused_call(
        _decoder_body, dec_tree,
        jax.ShapeDtypeStruct((B * T, VOCAB), jnp.float32))
    return logp.reshape(B, T, VOCAB)


# ------------------------------ parameter init ---------------------------------
def make_pe(max_len, d_model):
    position = jnp.arange(max_len, dtype=jnp.float32)[:, None]
    div_term = jnp.exp(
        jnp.arange(0, d_model, 2, dtype=jnp.float32) * (-math.log(10000.0) / d_model))
    ang = position * div_term
    pe = jnp.zeros((max_len, d_model), jnp.float32)
    pe = pe.at[:, 0::2].set(jnp.sin(ang))
    pe = pe.at[:, 1::2].set(jnp.cos(ang))
    return pe                                            # [max_len, D]


# TODO(synk): pretrained timm ViT weights are replaced by deterministic synthetic init.
def init_params(key):
    ks = iter(jax.random.split(key, 256))

    def rnd(shape):
        return jax.random.normal(next(ks), shape, jnp.float32) * 0.02

    def lin(fi, fo):
        return rnd((fi, fo)), rnd((fo,))

    def ones(n):
        return jnp.ones((n,), jnp.float32)

    def zeros(n):
        return jnp.zeros((n,), jnp.float32)

    enc = {}
    enc["patch_w"], enc["patch_b"] = lin(3 * PATCH * PATCH, D_MODEL)
    enc["cls"] = rnd((1, 1, D_MODEL))
    enc["pos_embed"] = rnd((1, N_TOK, D_MODEL))
    blocks = []
    for _ in range(NUM_VIT_BLOCKS):
        bp = {}
        bp["wqkv"], bp["bqkv"] = lin(D_MODEL, 3 * D_MODEL)   # fused QKV
        bp["wo"], bp["bo"] = lin(D_MODEL, D_MODEL)
        bp["ln1_g"], bp["ln1_b"] = ones(D_MODEL), zeros(D_MODEL)
        bp["ln2_g"], bp["ln2_b"] = ones(D_MODEL), zeros(D_MODEL)
        bp["fc1_w"], bp["fc1_b"] = lin(D_MODEL, VIT_MLP)
        bp["fc2_w"], bp["fc2_b"] = lin(VIT_MLP, D_MODEL)
        blocks.append(bp)
    enc["blocks"] = blocks
    enc["norm_g"], enc["norm_b"] = ones(D_MODEL), zeros(D_MODEL)

    dec = {}
    dec["emb"] = rnd((VOCAB, D_MODEL))
    dec["we_w"], dec["we_b"] = lin(D_MODEL, D_MODEL)
    dec["ws_w"], dec["ws_b"] = lin(SEM_SIZE, D_MODEL)
    dec["pe"] = make_pe(MAX_LEN, D_MODEL)
    layers = []
    for _ in range(NUM_DEC_LAYERS):
        lp = {}
        lp["sa_wqkv"], lp["sa_bqkv"] = lin(D_MODEL, 3 * D_MODEL)   # fused QKV
        lp["sa_wo"], lp["sa_bo"] = lin(D_MODEL, D_MODEL)
        lp["ca_wq"], lp["ca_bq"] = lin(D_MODEL, D_MODEL)
        lp["ca_wkv"], lp["ca_bkv"] = lin(D_MODEL, 2 * D_MODEL)     # fused KV
        lp["ca_wo"], lp["ca_bo"] = lin(D_MODEL, D_MODEL)
        for i in (1, 2, 3):
            lp[f"ln{i}_g"], lp[f"ln{i}_b"] = ones(D_MODEL), zeros(D_MODEL)
        lp["ff1_w"], lp["ff1_b"] = lin(D_MODEL, FWD_SIZE)
        lp["ff2_w"], lp["ff2_b"] = lin(FWD_SIZE, D_MODEL)
        layers.append(lp)
    dec["layers"] = layers
    dec["out_w"], dec["out_b"] = lin(D_MODEL, VOCAB)
    return {"encoder": enc, "decoder": dec}


# ------------------------------ main --------------------------------------------
if __name__ == "__main__":
    key = jax.random.PRNGKey(0)
    k_param, k_img, k_tgt, k_sem = jax.random.split(key, 4)
    params = init_params(k_param)

    B, T = 2, MAX_LEN
    images = jax.random.normal(k_img, (B, 3, IMG, IMG), jnp.float32)
    tgt = jax.random.randint(k_tgt, (B, T), 0, VOCAB, dtype=jnp.int32)
    semantics = jax.random.normal(k_sem, (B, SEM_SIZE), jnp.float32)
    # causal mask (as produced by generate_square_subsequent_mask)
    tgt_mask = jnp.where(
        jnp.triu(jnp.ones((T, T), jnp.bool_), k=1), NEG_INF, 0.0
    ).astype(jnp.float32)
    # key-padding mask: True = ignore; pad the last token of batch element 1
    tgt_key_padding_mask = jnp.zeros((B, T), jnp.bool_).at[1, T - 1].set(True)

    fwd = jax.jit(cat_forward)
    out = fwd(params, images, tgt, semantics, tgt_mask, tgt_key_padding_mask)
    jax.block_until_ready(out)
    assert out.shape == (B, T, VOCAB), out.shape
    assert out.dtype == jnp.float32
    print("KERNEL_OK")
</pallas_src>

<mosaic_0001>
module attributes {stable_mosaic.version = 11 : i64} {
  func.func @kernel(%arg0: i32, %arg1: memref<1x128xf32, #tpu.memory_space<vmem>>, %arg2: memref<1x384xf32, #tpu.memory_space<vmem>>, %arg3: memref<1x512xf32, #tpu.memory_space<vmem>>, %arg4: memref<128x512xbf16, #tpu.memory_space<vmem>>, %arg5: memref<1x128xf32, #tpu.memory_space<vmem>>, %arg6: memref<512x128xbf16, #tpu.memory_space<vmem>>, %arg7: memref<1x128xf32, #tpu.memory_space<vmem>>, %arg8: memref<1x128xf32, #tpu.memory_space<vmem>>, %arg9: memref<1x128xf32, #tpu.memory_space<vmem>>, %arg10: memref<1x128xf32, #tpu.memory_space<vmem>>, %arg11: memref<128x128xbf16, #tpu.memory_space<vmem>>, %arg12: memref<128x384xbf16, #tpu.memory_space<vmem>>, %arg13: memref<1x128xf32, #tpu.memory_space<vmem>>, %arg14: memref<1x384xf32, #tpu.memory_space<vmem>>, %arg15: memref<1x512xf32, #tpu.memory_space<vmem>>, %arg16: memref<128x512xbf16, #tpu.memory_space<vmem>>, %arg17: memref<1x128xf32, #tpu.memory_space<vmem>>, %arg18: memref<512x128xbf16, #tpu.memory_space<vmem>>, %arg19: memref<1x128xf32, #tpu.memory_space<vmem>>, %arg20: memref<1x128xf32, #tpu.memory_space<vmem>>, %arg21: memref<1x128xf32, #tpu.memory_space<vmem>>, %arg22: memref<1x128xf32, #tpu.memory_space<vmem>>, %arg23: memref<128x128xbf16, #tpu.memory_space<vmem>>, %arg24: memref<128x384xbf16, #tpu.memory_space<vmem>>, %arg25: memref<1x128xf32, #tpu.memory_space<vmem>>, %arg26: memref<1x128xf32, #tpu.memory_space<vmem>>, %arg27: memref<768x128xbf16, #tpu.memory_space<vmem>>, %arg28: memref<10x768xf32, #tpu.memory_space<vmem>>, %arg29: memref<10x128xf32, #tpu.memory_space<vmem>>, %arg30: memref<10x10xf32, #tpu.memory_space<vmem>>, %arg31: memref<10x128xf32, #tpu.memory_space<vmem>>) attributes {dimension_semantics = [#tpu.dimension_semantics<arbitrary>], iteration_bounds = array<i64: 1>, scalar_prefetch = 0 : i64, scratch_operands = 0 : i64, tpu.core_type = #tpu.core_type<tc>, window_params = [{pipeline_mode = #tpu.pipeline_mode<synchronous>, transform_indices = @transform_0, window_bounds = array<i64: 1, 128>}, {pipeline_mode = #tpu.pipeline_mode<synchronous>, transform_indices = @transform_1, window_bounds = array<i64: 1, 384>}, {pipeline_mode = #tpu.pipeline_mode<synchronous>, transform_indices = @transform_2, window_bounds = array<i64: 1, 512>}, {pipeline_mode = #tpu.pipeline_mode<synchronous>, transform_indices = @transform_3, window_bounds = array<i64: 128, 512>}, {pipeline_mode = #tpu.pipeline_mode<synchronous>, transform_indices = @transform_4, window_bounds = array<i64: 1, 128>}, {pipeline_mode = #tpu.pipeline_mode<synchronous>, transform_indices = @transform_5, window_bounds = array<i64: 512, 128>}, {pipeline_mode = #tpu.pipeline_mode<synchronous>, transform_indices = @transform_6, window_bounds = array<i64: 1, 128>}, {pipeline_mode = #tpu.pipeline_mode<synchronous>, transform_indices = @transform_7, window_bounds = array<i64: 1, 128>}, {pipeline_mode = #tpu.pipeline_mode<synchronous>, transform_indices = @transform_8, window_bounds = array<i64: 1, 128>}, {pipeline_mode = #tpu.pipeline_mode<synchronous>, transform_indices = @transform_9, window_bounds = array<i64: 1, 128>}, {pipeline_mode = #tpu.pipeline_mode<synchronous>, transform_indices = @transform_10, window_bounds = array<i64: 128, 128>}, {pipeline_mode = #tpu.pipeline_mode<synchronous>, transform_indices = @transform_11, window_bounds = array<i64: 128, 384>}, {pipeline_mode = #tpu.pipeline_mode<synchronous>, transform_indices = @transform_12, window_bounds = array<i64: 1, 128>}, {pipeline_mode = #tpu.pipeline_mode<synchronous>, transform_indices = @transform_13, window_bounds = array<i64: 1, 384>}, {pipeline_mode = #tpu.pipeline_mode<synchronous>, transform_indices = @transform_14, window_bounds = array<i64: 1, 512>}, {pipeline_mode = #tpu.pipeline_mode<synchronous>, transform_indices = @transform_15, window_bounds = array<i64: 128, 512>}, {pipeline_mode = #tpu.pipeline_mode<synchronous>, transform_indices = @transform_16, window_bounds = array<i64: 1, 128>}, {pipeline_mode = #tpu.pipeline_mode<synchronous>, transform_indices = @transform_17, window_bounds = array<i64: 512, 128>}, {pipeline_mode = #tpu.pipeline_mode<synchronous>, transform_indices = @transform_18, window_bounds = array<i64: 1, 128>}, {pipeline_mode = #tpu.pipeline_mode<synchronous>, transform_indices = @transform_19, window_bounds = array<i64: 1, 128>}, {pipeline_mode = #tpu.pipeline_mode<synchronous>, transform_indices = @transform_20, window_bounds = array<i64: 1, 128>}, {pipeline_mode = #tpu.pipeline_mode<synchronous>, transform_indices = @transform_21, window_bounds = array<i64: 1, 128>}, {pipeline_mode = #tpu.pipeline_mode<synchronous>, transform_indices = @transform_22, window_bounds = array<i64: 128, 128>}, {pipeline_mode = #tpu.pipeline_mode<synchronous>, transform_indices = @transform_23, window_bounds = array<i64: 128, 384>}, {pipeline_mode = #tpu.pipeline_mode<synchronous>, transform_indices = @transform_24, window_bounds = array<i64: 1, 128>}, {pipeline_mode = #tpu.pipeline_mode<synchronous>, transform_indices = @transform_25, window_bounds = array<i64: 1, 128>}, {pipeline_mode = #tpu.pipeline_mode<synchronous>, transform_indices = @transform_26, window_bounds = array<i64: 768, 128>}, {pipeline_mode = #tpu.pipeline_mode<synchronous>, transform_indices = @transform_27, window_bounds = array<i64: 10, 768>}, {pipeline_mode = #tpu.pipeline_mode<synchronous>, transform_indices = @transform_28, window_bounds = array<i64: 10, 128>}, {pipeline_mode = #tpu.pipeline_mode<synchronous>, transform_indices = @transform_29, window_bounds = array<i64: 10, 10>}, {pipeline_mode = #tpu.pipeline_mode<synchronous>, transform_indices = @transform_30, window_bounds = array<i64: 10, 128>}]} {
    %c0 = arith.constant 0 : index
    %c0_0 = arith.constant 0 : index
    %0 = vector.load %arg28[%c0, %c0_0] : memref<10x768xf32, #tpu.memory_space<vmem>>, vector<10x768xf32>
    %1 = arith.truncf %0 : vector<10x768xf32> to vector<10x768xbf16>
    %c0_1 = arith.constant 0 : index
    %c0_2 = arith.constant 0 : index
    %2 = vector.load %arg27[%c0_1, %c0_2] : memref<768x128xbf16, #tpu.memory_space<vmem>>, vector<768x128xbf16>
    %cst = arith.constant dense<0.000000e+00> : vector<10x128xf32>
    %3 = tpu.matmul %1, %2, %cst {dimension_numbers = #tpu.dot_dimension_numbers<[1], [0], [0], [1], [0, 0, 1, 1], [], []>} : vector<10x768xbf16>, vector<768x128xbf16>, vector<10x128xf32> -> vector<10x128xf32>
    %c0_3 = arith.constant 0 : index
    %c0_4 = arith.constant 0 : index
    %4 = vector.load %arg29[%c0_3, %c0_4] : memref<10x128xf32, #tpu.memory_space<vmem>>, vector<10x128xf32>
    %5 = arith.addf %3, %4 : vector<10x128xf32>
    %c0_5 = arith.constant 0 : index
    %c0_6 = arith.constant 0 : index
    %6 = vector.load %arg30[%c0_5, %c0_6] : memref<10x10xf32, #tpu.memory_space<vmem>>, vector<10x10xf32>
    %cst_7 = arith.constant dense<0.000000e+00> : vector<10xf32>
    %7 = vector.multi_reduction <add>, %5, %cst_7 [1] : vector<10x128xf32> to vector<10xf32>
    %8 = vector.shape_cast %7 : vector<10xf32> to vector<10x1xf32>
    %cst_8 = arith.constant 1.280000e+02 : f32
    %9 = vector.broadcast %cst_8 : f32 to vector<10x1xf32>
    %10 = arith.divf %8, %9 : vector<10x1xf32>
    %11 = vector.broadcast %10 : vector<10x1xf32> to vector<10x128xf32>
    %12 = arith.subf %5, %11 : vector<10x128xf32>
    %13 = arith.mulf %12, %12 : vector<10x128xf32>
    %cst_9 = arith.constant dense<0.000000e+00> : vector<10xf32>
    %14 = vector.multi_reduction <add>, %13, %cst_9 [1] : vector<10x128xf32> to vector<10xf32>
    %15 = vector.shape_cast %14 : vector<10xf32> to vector<10x1xf32>
    %cst_10 = arith.constant 1.280000e+02 : f32
    %16 = vector.broadcast %cst_10 : f32 to vector<10x1xf32>
    %17 = arith.divf %15, %16 : vector<10x1xf32>
    %18 = vector.broadcast %10 : vector<10x1xf32> to vector<10x128xf32>
    %19 = arith.subf %5, %18 : vector<10x128xf32>
    %cst_11 = arith.constant 9.99999997E-7 : f32
    %20 = vector.broadcast %cst_11 : f32 to vector<10x1xf32>
    %21 = arith.addf %17, %20 : vector<10x1xf32>
    %22 = math.rsqrt %21 : vector<10x1xf32>
    %23 = vector.broadcast %22 : vector<10x1xf32> to vector<10x128xf32>
    %24 = arith.mulf %19, %23 : vector<10x128xf32>
    %c0_12 = arith.constant 0 : index
    %c0_13 = arith.constant 0 : index
    %25 = vector.load %arg8[%c0_12, %c0_13] : memref<1x128xf32, #tpu.memory_space<vmem>>, vector<1x128xf32>
    %26 = vector.broadcast %25 : vector<1x128xf32> to vector<10x128xf32>
    %27 = arith.mulf %24, %26 : vector<10x128xf32>
    %c0_14 = arith.constant 0 : index
    %c0_15 = arith.constant 0 : index
    %28 = vector.load %arg7[%c0_14, %c0_15] : memref<1x128xf32, #tpu.memory_space<vmem>>, vector<1x128xf32>
    %29 = vector.broadcast %28 : vector<1x128xf32> to vector<10x128xf32>
    %30 = arith.addf %27, %29 : vector<10x128xf32>
    %31 = arith.truncf %30 : vector<10x128xf32> to vector<10x128xbf16>
    %c0_16 = arith.constant 0 : index
    %c0_17 = arith.constant 0 : index
    %32 = vector.load %arg12[%c0_16, %c0_17] : memref<128x384xbf16, #tpu.memory_space<vmem>>, vector<128x384xbf16>
    %cst_18 = arith.constant dense<0.000000e+00> : vector<10x384xf32>
    %33 = tpu.matmul %31, %32, %cst_18 {dimension_numbers = #tpu.dot_dimension_numbers<[1], [0], [0], [1], [0, 0, 1, 1], [], []>} : vector<10x128xbf16>, vector<128x384xbf16>, vector<10x384xf32> -> vector<10x384xf32>
    %c0_19 = arith.constant 0 : index
    %c0_20 = arith.constant 0 : index
    %34 = vector.load %arg2[%c0_19, %c0_20] : memref<1x384xf32, #tpu.memory_space<vmem>>, vector<1x384xf32>
    %35 = vector.broadcast %34 : vector<1x384xf32> to vector<10x384xf32>
    %36 = arith.addf %33, %35 : vector<10x384xf32>
    %37 = vector.extract_strided_slice %36 {offsets = [0, 0], sizes = [10, 128], strides = [1, 1]} : vector<10x384xf32> to vector<10x128xf32>
    %38 = vector.extract_strided_slice %36 {offsets = [0, 128], sizes = [10, 128], strides = [1, 1]} : vector<10x384xf32> to vector<10x128xf32>
    %39 = vector.extract_strided_slice %36 {offsets = [0, 256], sizes = [10, 128], strides = [1, 1]} : vector<10x384xf32> to vector<10x128xf32>
    %40 = tpu.iota {dimensions = array<i32: 1>} : vector<1x128xi32>
    %41 = arith.truncf %38 : vector<10x128xf32> to vector<10x128xbf16>
    %cst_21 = arith.constant 0.000000e+00 : f32
    %42 = vector.broadcast %cst_21 : f32 to vector<10x128xf32>
    %c0_i32 = arith.constant 0 : i32
    %43 = vector.broadcast %c0_i32 : i32 to vector<1x128xi32>
    %44 = arith.cmpi sge, %40, %43 : vector<1x128xi32>
    %c32_i32 = arith.constant 32 : i32
    %45 = vector.broadcast %c32_i32 : i32 to vector<1x128xi32>
    %46 = arith.cmpi slt, %40, %45 : vector<1x128xi32>
    %47 = arith.andi %44, %46 : vector<1x128xi1>
    %cst_22 = arith.constant 1.000000e+00 : f32
    %cst_23 = arith.constant 0.000000e+00 : f32
    %48 = vector.broadcast %cst_22 : f32 to vector<1x128xf32>
    %49 = vector.broadcast %cst_23 : f32 to vector<1x128xf32>
    %50 = arith.select %47, %48, %49 : vector<1x128xi1>, vector<1x128xf32>
    %cst_24 = arith.constant 0.176776692 : f32
    %51 = vector.broadcast %cst_24 : f32 to vector<1x128xf32>
    %52 = arith.mulf %50, %51 : vector<1x128xf32>
    %53 = vector.broadcast %52 : vector<1x128xf32> to vector<10x128xf32>
    %54 = arith.mulf %37, %53 : vector<10x128xf32>
    %55 = arith.truncf %54 : vector<10x128xf32> to vector<10x128xbf16>
    %cst_25 = arith.constant dense<0.000000e+00> : vector<10x10xf32>
    %56 = tpu.matmul %55, %41, %cst_25 {dimension_numbers = #tpu.dot_dimension_numbers<[1], [1], [0], [0], [0, 0, 1, 0], [], []>} : vector<10x128xbf16>, vector<10x128xbf16>, vector<10x10xf32> -> vector<10x10xf32>
    %57 = arith.addf %56, %6 : vector<10x10xf32>
    %cst_26 = arith.constant dense<0xFF800000> : vector<10xf32>
    %58 = vector.multi_reduction <maximumf>, %57, %cst_26 [1] : vector<10x10xf32> to vector<10xf32>
    %59 = vector.shape_cast %58 : vector<10xf32> to vector<10x1xf32>
    %60 = vector.broadcast %59 : vector<10x1xf32> to vector<10x10xf32>
    %61 = arith.subf %57, %60 : vector<10x10xf32>
    %62 = math.exp %61 : vector<10x10xf32>
    %cst_27 = arith.constant dense<0.000000e+00> : vector<10xf32>
    %63 = vector.multi_reduction <add>, %62, %cst_27 [1] : vector<10x10xf32> to vector<10xf32>
    %64 = vector.shape_cast %63 : vector<10xf32> to vector<10x1xf32>
    %65 = tpu.reciprocal %64 {approx = true} : vector<10x1xf32> -> vector<10x1xf32>
    %66 = vector.broadcast %65 : vector<10x1xf32> to vector<10x10xf32>
    %67 = arith.mulf %62, %66 : vector<10x10xf32>
    %68 = arith.truncf %67 : vector<10x10xf32> to vector<10x10xbf16>
    %69 = vector.broadcast %50 : vector<1x128xf32> to vector<10x128xf32>
    %70 = arith.mulf %39, %69 : vector<10x128xf32>
    %71 = arith.truncf %70 : vector<10x128xf32> to vector<10x128xbf16>
    %cst_28 = arith.constant dense<0.000000e+00> : vector<10x128xf32>
    %72 = tpu.matmul %68, %71, %cst_28 {dimension_numbers = #tpu.dot_dimension_numbers<[1], [0], [0], [1], [0, 0, 1, 1], [], []>} : vector<10x10xbf16>, vector<10x128xbf16>, vector<10x128xf32> -> vector<10x128xf32>
    %73 = arith.addf %42, %72 : vector<10x128xf32>
    %c32_i32_29 = arith.constant 32 : i32
    %74 = vector.broadcast %c32_i32_29 : i32 to vector<1x128xi32>
    %75 = arith.cmpi sge, %40, %74 : vector<1x128xi32>
    %c64_i32 = arith.constant 64 : i32
    %76 = vector.broadcast %c64_i32 : i32 to vector<1x128xi32>
    %77 = arith.cmpi slt, %40, %76 : vector<1x128xi32>
    %78 = arith.andi %75, %77 : vector<1x128xi1>
    %cst_30 = arith.constant 1.000000e+00 : f32
    %cst_31 = arith.constant 0.000000e+00 : f32
    %79 = vector.broadcast %cst_30 : f32 to vector<1x128xf32>
    %80 = vector.broadcast %cst_31 : f32 to vector<1x128xf32>
    %81 = arith.select %78, %79, %80 : vector<1x128xi1>, vector<1x128xf32>
    %cst_32 = arith.constant 0.176776692 : f32
    %82 = vector.broadcast %cst_32 : f32 to vector<1x128xf32>
    %83 = arith.mulf %81, %82 : vector<1x128xf32>
    %84 = vector.broadcast %83 : vector<1x128xf32> to vector<10x128xf32>
    %85 = arith.mulf %37, %84 : vector<10x128xf32>
    %86 = arith.truncf %85 : vector<10x128xf32> to vector<10x128xbf16>
    %cst_33 = arith.constant dense<0.000000e+00> : vector<10x10xf32>
    %87 = tpu.matmul %86, %41, %cst_33 {dimension_numbers = #tpu.dot_dimension_numbers<[1], [1], [0], [0], [0, 0, 1, 0], [], []>} : vector<10x128xbf16>, vector<10x128xbf16>, vector<10x10xf32> -> vector<10x10xf32>
    %88 = arith.addf %87, %6 : vector<10x10xf32>
    %cst_34 = arith.constant dense<0xFF800000> : vector<10xf32>
    %89 = vector.multi_reduction <maximumf>, %88, %cst_34 [1] : vector<10x10xf32> to vector<10xf32>
    %90 = vector.shape_cast %89 : vector<10xf32> to vector<10x1xf32>
    %91 = vector.broadcast %90 : vector<10x1xf32> to vector<10x10xf32>
    %92 = arith.subf %88, %91 : vector<10x10xf32>
    %93 = math.exp %92 : vector<10x10xf32>
    %cst_35 = arith.constant dense<0.000000e+00> : vector<10xf32>
    %94 = vector.multi_reduction <add>, %93, %cst_35 [1] : vector<10x10xf32> to vector<10xf32>
    %95 = vector.shape_cast %94 : vector<10xf32> to vector<10x1xf32>
    %96 = tpu.reciprocal %95 {approx = true} : vector<10x1xf32> -> vector<10x1xf32>
    %97 = vector.broadcast %96 : vector<10x1xf32> to vector<10x10xf32>
    %98 = arith.mulf %93, %97 : vector<10x10xf32>
    %99 = arith.truncf %98 : vector<10x10xf32> to vector<10x10xbf16>
    %100 = vector.broadcast %81 : vector<1x128xf32> to vector<10x128xf32>
    %101 = arith.mulf %39, %100 : vector<10x128xf32>
    %102 = arith.truncf %101 : vector<10x128xf32> to vector<10x128xbf16>
    %cst_36 = arith.constant dense<0.000000e+00> : vector<10x128xf32>
    %103 = tpu.matmul %99, %102, %cst_36 {dimension_numbers = #tpu.dot_dimension_numbers<[1], [0], [0], [1], [0, 0, 1, 1], [], []>} : vector<10x10xbf16>, vector<10x128xbf16>, vector<10x128xf32> -> vector<10x128xf32>
    %104 = arith.addf %73, %103 : vector<10x128xf32>
    %c64_i32_37 = arith.constant 64 : i32
    %105 = vector.broadcast %c64_i32_37 : i32 to vector<1x128xi32>
    %106 = arith.cmpi sge, %40, %105 : vector<1x128xi32>
    %c96_i32 = arith.constant 96 : i32
    %107 = vector.broadcast %c96_i32 : i32 to vector<1x128xi32>
    %108 = arith.cmpi slt, %40, %107 : vector<1x128xi32>
    %109 = arith.andi %106, %108 : vector<1x128xi1>
    %cst_38 = arith.constant 1.000000e+00 : f32
    %cst_39 = arith.constant 0.000000e+00 : f32
    %110 = vector.broadcast %cst_38 : f32 to vector<1x128xf32>
    %111 = vector.broadcast %cst_39 : f32 to vector<1x128xf32>
    %112 = arith.select %109, %110, %111 : vector<1x128xi1>, vector<1x128xf32>
    %cst_40 = arith.constant 0.176776692 : f32
    %113 = vector.broadcast %cst_40 : f32 to vector<1x128xf32>
    %114 = arith.mulf %112, %113 : vector<1x128xf32>
    %115 = vector.broadcast %114 : vector<1x128xf32> to vector<10x128xf32>
    %116 = arith.mulf %37, %115 : vector<10x128xf32>
    %117 = arith.truncf %116 : vector<10x128xf32> to vector<10x128xbf16>
    %cst_41 = arith.constant dense<0.000000e+00> : vector<10x10xf32>
    %118 = tpu.matmul %117, %41, %cst_41 {dimension_numbers = #tpu.dot_dimension_numbers<[1], [1], [0], [0], [0, 0, 1, 0], [], []>} : vector<10x128xbf16>, vector<10x128xbf16>, vector<10x10xf32> -> vector<10x10xf32>
    %119 = arith.addf %118, %6 : vector<10x10xf32>
    %cst_42 = arith.constant dense<0xFF800000> : vector<10xf32>
    %120 = vector.multi_reduction <maximumf>, %119, %cst_42 [1] : vector<10x10xf32> to vector<10xf32>
    %121 = vector.shape_cast %120 : vector<10xf32> to vector<10x1xf32>
    %122 = vector.broadcast %121 : vector<10x1xf32> to vector<10x10xf32>
    %123 = arith.subf %119, %122 : vector<10x10xf32>
    %124 = math.exp %123 : vector<10x10xf32>
    %cst_43 = arith.constant dense<0.000000e+00> : vector<10xf32>
    %125 = vector.multi_reduction <add>, %124, %cst_43 [1] : vector<10x10xf32> to vector<10xf32>
    %126 = vector.shape_cast %125 : vector<10xf32> to vector<10x1xf32>
    %127 = tpu.reciprocal %126 {approx = true} : vector<10x1xf32> -> vector<10x1xf32>
    %128 = vector.broadcast %127 : vector<10x1xf32> to vector<10x10xf32>
    %129 = arith.mulf %124, %128 : vector<10x10xf32>
    %130 = arith.truncf %129 : vector<10x10xf32> to vector<10x10xbf16>
    %131 = vector.broadcast %112 : vector<1x128xf32> to vector<10x128xf32>
    %132 = arith.mulf %39, %131 : vector<10x128xf32>
    %133 = arith.truncf %132 : vector<10x128xf32> to vector<10x128xbf16>
    %cst_44 = arith.constant dense<0.000000e+00> : vector<10x128xf32>
    %134 = tpu.matmul %130, %133, %cst_44 {dimension_numbers = #tpu.dot_dimension_numbers<[1], [0], [0], [1], [0, 0, 1, 1], [], []>} : vector<10x10xbf16>, vector<10x128xbf16>, vector<10x128xf32> -> vector<10x128xf32>
    %135 = arith.addf %104, %134 : vector<10x128xf32>
    %c96_i32_45 = arith.constant 96 : i32
    %136 = vector.broadcast %c96_i32_45 : i32 to vector<1x128xi32>
    %137 = arith.cmpi sge, %40, %136 : vector<1x128xi32>
    %c128_i32 = arith.constant 128 : i32
    %138 = vector.broadcast %c128_i32 : i32 to vector<1x128xi32>
    %139 = arith.cmpi slt, %40, %138 : vector<1x128xi32>
    %140 = arith.andi %137, %139 : vector<1x128xi1>
    %cst_46 = arith.constant 1.000000e+00 : f32
    %cst_47 = arith.constant 0.000000e+00 : f32
    %141 = vector.broadcast %cst_46 : f32 to vector<1x128xf32>
    %142 = vector.broadcast %cst_47 : f32 to vector<1x128xf32>
    %143 = arith.select %140, %141, %142 : vector<1x128xi1>, vector<1x128xf32>
    %cst_48 = arith.constant 0.176776692 : f32
    %144 = vector.broadcast %cst_48 : f32 to vector<1x128xf32>
    %145 = arith.mulf %143, %144 : vector<1x128xf32>
    %146 = vector.broadcast %145 : vector<1x128xf32> to vector<10x128xf32>
    %147 = arith.mulf %37, %146 : vector<10x128xf32>
    %148 = arith.truncf %147 : vector<10x128xf32> to vector<10x128xbf16>
    %cst_49 = arith.constant dense<0.000000e+00> : vector<10x10xf32>
    %149 = tpu.matmul %148, %41, %cst_49 {dimension_numbers = #tpu.dot_dimension_numbers<[1], [1], [0], [0], [0, 0, 1, 0], [], []>} : vector<10x128xbf16>, vector<10x128xbf16>, vector<10x10xf32> -> vector<10x10xf32>
    %150 = arith.addf %149, %6 : vector<10x10xf32>
    %cst_50 = arith.constant dense<0xFF800000> : vector<10xf32>
    %151 = vector.multi_reduction <maximumf>, %150, %cst_50 [1] : vector<10x10xf32> to vector<10xf32>
    %152 = vector.shape_cast %151 : vector<10xf32> to vector<10x1xf32>
    %153 = vector.broadcast %152 : vector<10x1xf32> to vector<10x10xf32>
    %154 = arith.subf %150, %153 : vector<10x10xf32>
    %155 = math.exp %154 : vector<10x10xf32>
    %cst_51 = arith.constant dense<0.000000e+00> : vector<10xf32>
    %156 = vector.multi_reduction <add>, %155, %cst_51 [1] : vector<10x10xf32> to vector<10xf32>
    %157 = vector.shape_cast %156 : vector<10xf32> to vector<10x1xf32>
    %158 = tpu.reciprocal %157 {approx = true} : vector<10x1xf32> -> vector<10x1xf32>
    %159 = vector.broadcast %158 : vector<10x1xf32> to vector<10x10xf32>
    %160 = arith.mulf %155, %159 : vector<10x10xf32>
    %161 = arith.truncf %160 : vector<10x10xf32> to vector<10x10xbf16>
    %162 = vector.broadcast %143 : vector<1x128xf32> to vector<10x128xf32>
    %163 = arith.mulf %39, %162 : vector<10x128xf32>
    %164 = arith.truncf %163 : vector<10x128xf32> to vector<10x128xbf16>
    %cst_52 = arith.constant dense<0.000000e+00> : vector<10x128xf32>
    %165 = tpu.matmul %161, %164, %cst_52 {dimension_numbers = #tpu.dot_dimension_numbers<[1], [0], [0], [1], [0, 0, 1, 1], [], []>} : vector<10x10xbf16>, vector<10x128xbf16>, vector<10x128xf32> -> vector<10x128xf32>
    %166 = arith.addf %135, %165 : vector<10x128xf32>
    %167 = arith.truncf %166 : vector<10x128xf32> to vector<10x128xbf16>
    %c0_53 = arith.constant 0 : index
    %c0_54 = arith.constant 0 : index
    %168 = vector.load %arg11[%c0_53, %c0_54] : memref<128x128xbf16, #tpu.memory_space<vmem>>, vector<128x128xbf16>
    %cst_55 = arith.constant dense<0.000000e+00> : vector<10x128xf32>
    %169 = tpu.matmul %167, %168, %cst_55 {dimension_numbers = #tpu.dot_dimension_numbers<[1], [0], [0], [1], [0, 0, 1, 1], [], []>} : vector<10x128xbf16>, vector<128x128xbf16>, vector<10x128xf32> -> vector<10x128xf32>
    %c0_56 = arith.constant 0 : index
    %c0_57 = arith.constant 0 : index
    %170 = vector.load %arg1[%c0_56, %c0_57] : memref<1x128xf32, #tpu.memory_space<vmem>>, vector<1x128xf32>
    %171 = vector.broadcast %170 : vector<1x128xf32> to vector<10x128xf32>
    %172 = arith.addf %169, %171 : vector<10x128xf32>
    %173 = arith.addf %5, %172 : vector<10x128xf32>
    %cst_58 = arith.constant dense<0.000000e+00> : vector<10xf32>
    %174 = vector.multi_reduction <add>, %173, %cst_58 [1] : vector<10x128xf32> to vector<10xf32>
    %175 = vector.shape_cast %174 : vector<10xf32> to vector<10x1xf32>
    %cst_59 = arith.constant 1.280000e+02 : f32
    %176 = vector.broadcast %cst_59 : f32 to vector<10x1xf32>
    %177 = arith.divf %175, %176 : vector<10x1xf32>
    %178 = vector.broadcast %177 : vector<10x1xf32> to vector<10x128xf32>
    %179 = arith.subf %173, %178 : vector<10x128xf32>
    %180 = arith.mulf %179, %179 : vector<10x128xf32>
    %cst_60 = arith.constant dense<0.000000e+00> : vector<10xf32>
    %181 = vector.multi_reduction <add>, %180, %cst_60 [1] : vector<10x128xf32> to vector<10xf32>
    %182 = vector.shape_cast %181 : vector<10xf32> to vector<10x1xf32>
    %cst_61 = arith.constant 1.280000e+02 : f32
    %183 = vector.broadcast %cst_61 : f32 to vector<10x1xf32>
    %184 = arith.divf %182, %183 : vector<10x1xf32>
    %185 = vector.broadcast %177 : vector<10x1xf32> to vector<10x128xf32>
    %186 = arith.subf %173, %185 : vector<10x128xf32>
    %cst_62 = arith.constant 9.99999997E-7 : f32
    %187 = vector.broadcast %cst_62 : f32 to vector<10x1xf32>
    %188 = arith.addf %184, %187 : vector<10x1xf32>
    %189 = math.rsqrt %188 : vector<10x1xf32>
    %190 = vector.broadcast %189 : vector<10x1xf32> to vector<10x128xf32>
    %191 = arith.mulf %186, %190 : vector<10x128xf32>
    %c0_63 = arith.constant 0 : index
    %c0_64 = arith.constant 0 : index
    %192 = vector.load %arg10[%c0_63, %c0_64] : memref<1x128xf32, #tpu.memory_space<vmem>>, vector<1x128xf32>
    %193 = vector.broadcast %192 : vector<1x128xf32> to vector<10x128xf32>
    %194 = arith.mulf %191, %193 : vector<10x128xf32>
    %c0_65 = arith.constant 0 : index
    %c0_66 = arith.constant 0 : index
    %195 = vector.load %arg9[%c0_65, %c0_66] : memref<1x128xf32, #tpu.memory_space<vmem>>, vector<1x128xf32>
    %196 = vector.broadcast %195 : vector<1x128xf32> to vector<10x128xf32>
    %197 = arith.addf %194, %196 : vector<10x128xf32>
    %198 = arith.truncf %197 : vector<10x128xf32> to vector<10x128xbf16>
    %c0_67 = arith.constant 0 : index
    %c0_68 = arith.constant 0 : index
    %199 = vector.load %arg4[%c0_67, %c0_68] : memref<128x512xbf16, #tpu.memory_space<vmem>>, vector<128x512xbf16>
    %cst_69 = arith.constant dense<0.000000e+00> : vector<10x512xf32>
    %200 = tpu.matmul %198, %199, %cst_69 {dimension_numbers = #tpu.dot_dimension_numbers<[1], [0], [0], [1], [0, 0, 1, 1], [], []>} : vector<10x128xbf16>, vector<128x512xbf16>, vector<10x512xf32> -> vector<10x512xf32>
    %c0_70 = arith.constant 0 : index
    %c0_71 = arith.constant 0 : index
    %201 = vector.load %arg3[%c0_70, %c0_71] : memref<1x512xf32, #tpu.memory_space<vmem>>, vector<1x512xf32>
    %202 = vector.broadcast %201 : vector<1x512xf32> to vector<10x512xf32>
    %203 = arith.addf %200, %202 : vector<10x512xf32>
    %204 = math.absf %203 : vector<10x512xf32>
    %cst_72 = arith.constant 0.707106769 : f32
    %205 = vector.broadcast %cst_72 : f32 to vector<10x512xf32>
    %206 = arith.mulf %204, %205 : vector<10x512xf32>
    %cst_73 = arith.constant 0.000000e+00 : f32
    %207 = vector.broadcast %cst_73 : f32 to vector<10x512xf32>
    %208 = arith.cmpf oge, %203, %207 : vector<10x512xf32>
    %cst_74 = arith.constant 1.000000e+00 : f32
    %cst_75 = arith.constant -1.000000e+00 : f32
    %209 = vector.broadcast %cst_74 : f32 to vector<10x512xf32>
    %210 = vector.broadcast %cst_75 : f32 to vector<10x512xf32>
    %211 = arith.select %208, %209, %210 : vector<10x512xi1>, vector<10x512xf32>
    %cst_76 = arith.constant 0.327591091 : f32
    %212 = vector.broadcast %cst_76 : f32 to vector<10x512xf32>
    %213 = arith.mulf %212, %206 : vector<10x512xf32>
    %cst_77 = arith.constant 1.000000e+00 : f32
    %214 = vector.broadcast %cst_77 : f32 to vector<10x512xf32>
    %215 = arith.addf %214, %213 : vector<10x512xf32>
    %cst_78 = arith.constant 1.000000e+00 : f32
    %216 = vector.broadcast %cst_78 : f32 to vector<10x512xf32>
    %217 = arith.divf %216, %215 : vector<10x512xf32>
    %cst_79 = arith.constant 1.06140542 : f32
    %218 = vector.broadcast %cst_79 : f32 to vector<10x512xf32>
    %219 = arith.mulf %218, %217 : vector<10x512xf32>
    %cst_80 = arith.constant 1.45315206 : f32
    %220 = vector.broadcast %cst_80 : f32 to vector<10x512xf32>
    %221 = arith.subf %219, %220 : vector<10x512xf32>
    %222 = arith.mulf %221, %217 : vector<10x512xf32>
    %cst_81 = arith.constant 1.42141378 : f32
    %223 = vector.broadcast %cst_81 : f32 to vector<10x512xf32>
    %224 = arith.addf %222, %223 : vector<10x512xf32>
    %225 = arith.mulf %224, %217 : vector<10x512xf32>
    %cst_82 = arith.constant 0.284496725 : f32
    %226 = vector.broadcast %cst_82 : f32 to vector<10x512xf32>
    %227 = arith.subf %225, %226 : vector<10x512xf32>
    %228 = arith.mulf %227, %217 : vector<10x512xf32>
    %cst_83 = arith.constant 0.254829586 : f32
    %229 = vector.broadcast %cst_83 : f32 to vector<10x512xf32>
    %230 = arith.addf %228, %229 : vector<10x512xf32>
    %231 = arith.mulf %230, %217 : vector<10x512xf32>
    %cst_84 = arith.constant 0.000000e+00 : f32
    %232 = vector.broadcast %cst_84 : f32 to vector<10x512xf32>
    %233 = arith.subf %232, %206 : vector<10x512xf32>
    %234 = arith.mulf %233, %206 : vector<10x512xf32>
    %235 = math.exp %234 : vector<10x512xf32>
    %236 = arith.mulf %231, %235 : vector<10x512xf32>
    %cst_85 = arith.constant 1.000000e+00 : f32
    %237 = vector.broadcast %cst_85 : f32 to vector<10x512xf32>
    %238 = arith.subf %237, %236 : vector<10x512xf32>
    %239 = arith.mulf %211, %238 : vector<10x512xf32>
    %cst_86 = arith.constant 5.000000e-01 : f32
    %240 = vector.broadcast %cst_86 : f32 to vector<10x512xf32>
    %241 = arith.mulf %240, %203 : vector<10x512xf32>
    %cst_87 = arith.constant 1.000000e+00 : f32
    %242 = vector.broadcast %cst_87 : f32 to vector<10x512xf32>
    %243 = arith.addf %242, %239 : vector<10x512xf32>
    %244 = arith.mulf %241, %243 : vector<10x512xf32>
    %245 = arith.truncf %244 : vector<10x512xf32> to vector<10x512xbf16>
    %c0_88 = arith.constant 0 : index
    %c0_89 = arith.constant 0 : index
    %246 = vector.load %arg6[%c0_88, %c0_89] : memref<512x128xbf16, #tpu.memory_space<vmem>>, vector<512x128xbf16>
    %cst_90 = arith.constant dense<0.000000e+00> : vector<10x128xf32>
    %247 = tpu.matmul %245, %246, %cst_90 {dimension_numbers = #tpu.dot_dimension_numbers<[1], [0], [0], [1], [0, 0, 1, 1], [], []>} : vector<10x512xbf16>, vector<512x128xbf16>, vector<10x128xf32> -> vector<10x128xf32>
    %c0_91 = arith.constant 0 : index
    %c0_92 = arith.constant 0 : index
    %248 = vector.load %arg5[%c0_91, %c0_92] : memref<1x128xf32, #tpu.memory_space<vmem>>, vector<1x128xf32>
    %249 = vector.broadcast %248 : vector<1x128xf32> to vector<10x128xf32>
    %250 = arith.addf %247, %249 : vector<10x128xf32>
    %251 = arith.addf %173, %250 : vector<10x128xf32>
    %cst_93 = arith.constant dense<0.000000e+00> : vector<10xf32>
    %252 = vector.multi_reduction <add>, %251, %cst_93 [1] : vector<10x128xf32> to vector<10xf32>
    %253 = vector.shape_cast %252 : vector<10xf32> to vector<10x1xf32>
    %cst_94 = arith.constant 1.280000e+02 : f32
    %254 = vector.broadcast %cst_94 : f32 to vector<10x1xf32>
    %255 = arith.divf %253, %254 : vector<10x1xf32>
    %256 = vector.broadcast %255 : vector<10x1xf32> to vector<10x128xf32>
    %257 = arith.subf %251, %256 : vector<10x128xf32>
    %258 = arith.mulf %257, %257 : vector<10x128xf32>
    %cst_95 = arith.constant dense<0.000000e+00> : vector<10xf32>
    %259 = vector.multi_reduction <add>, %258, %cst_95 [1] : vector<10x128xf32> to vector<10xf32>
    %260 = vector.shape_cast %259 : vector<10xf32> to vector<10x1xf32>
    %cst_96 = arith.constant 1.280000e+02 : f32
    %261 = vector.broadcast %cst_96 : f32 to vector<10x1xf32>
    %262 = arith.divf %260, %261 : vector<10x1xf32>
    %263 = vector.broadcast %255 : vector<10x1xf32> to vector<10x128xf32>
    %264 = arith.subf %251, %263 : vector<10x128xf32>
    %cst_97 = arith.constant 9.99999997E-7 : f32
    %265 = vector.broadcast %cst_97 : f32 to vector<10x1xf32>
    %266 = arith.addf %262, %265 : vector<10x1xf32>
    %267 = math.rsqrt %266 : vector<10x1xf32>
    %268 = vector.broadcast %267 : vector<10x1xf32> to vector<10x128xf32>
    %269 = arith.mulf %264, %268 : vector<10x128xf32>
    %c0_98 = arith.constant 0 : index
    %c0_99 = arith.constant 0 : index
    %270 = vector.load %arg20[%c0_98, %c0_99] : memref<1x128xf32, #tpu.memory_space<vmem>>, vector<1x128xf32>
    %271 = vector.broadcast %270 : vector<1x128xf32> to vector<10x128xf32>
    %272 = arith.mulf %269, %271 : vector<10x128xf32>
    %c0_100 = arith.constant 0 : index
    %c0_101 = arith.constant 0 : index
    %273 = vector.load %arg19[%c0_100, %c0_101] : memref<1x128xf32, #tpu.memory_space<vmem>>, vector<1x128xf32>
    %274 = vector.broadcast %273 : vector<1x128xf32> to vector<10x128xf32>
    %275 = arith.addf %272, %274 : vector<10x128xf32>
    %276 = arith.truncf %275 : vector<10x128xf32> to vector<10x128xbf16>
    %c0_102 = arith.constant 0 : index
    %c0_103 = arith.constant 0 : index
    %277 = vector.load %arg24[%c0_102, %c0_103] : memref<128x384xbf16, #tpu.memory_space<vmem>>, vector<128x384xbf16>
    %cst_104 = arith.constant dense<0.000000e+00> : vector<10x384xf32>
    %278 = tpu.matmul %276, %277, %cst_104 {dimension_numbers = #tpu.dot_dimension_numbers<[1], [0], [0], [1], [0, 0, 1, 1], [], []>} : vector<10x128xbf16>, vector<128x384xbf16>, vector<10x384xf32> -> vector<10x384xf32>
    %c0_105 = arith.constant 0 : index
    %c0_106 = arith.constant 0 : index
    %279 = vector.load %arg14[%c0_105, %c0_106] : memref<1x384xf32, #tpu.memory_space<vmem>>, vector<1x384xf32>
    %280 = vector.broadcast %279 : vector<1x384xf32> to vector<10x384xf32>
    %281 = arith.addf %278, %280 : vector<10x384xf32>
    %282 = vector.extract_strided_slice %281 {offsets = [0, 0], sizes = [10, 128], strides = [1, 1]} : vector<10x384xf32> to vector<10x128xf32>
    %283 = vector.extract_strided_slice %281 {offsets = [0, 128], sizes = [10, 128], strides = [1, 1]} : vector<10x384xf32> to vector<10x128xf32>
    %284 = vector.extract_strided_slice %281 {offsets = [0, 256], sizes = [10, 128], strides = [1, 1]} : vector<10x384xf32> to vector<10x128xf32>
    %285 = tpu.iota {dimensions = array<i32: 1>} : vector<1x128xi32>
    %286 = arith.truncf %283 : vector<10x128xf32> to vector<10x128xbf16>
    %cst_107 = arith.constant 0.000000e+00 : f32
    %287 = vector.broadcast %cst_107 : f32 to vector<10x128xf32>
    %c0_i32_108 = arith.constant 0 : i32
    %288 = vector.broadcast %c0_i32_108 : i32 to vector<1x128xi32>
    %289 = arith.cmpi sge, %285, %288 : vector<1x128xi32>
    %c32_i32_109 = arith.constant 32 : i32
    %290 = vector.broadcast %c32_i32_109 : i32 to vector<1x128xi32>
    %291 = arith.cmpi slt, %285, %290 : vector<1x128xi32>
    %292 = arith.andi %289, %291 : vector<1x128xi1>
    %cst_110 = arith.constant 1.000000e+00 : f32
    %cst_111 = arith.constant 0.000000e+00 : f32
    %293 = vector.broadcast %cst_110 : f32 to vector<1x128xf32>
    %294 = vector.broadcast %cst_111 : f32 to vector<1x128xf32>
    %295 = arith.select %292, %293, %294 : vector<1x128xi1>, vector<1x128xf32>
    %cst_112 = arith.constant 0.176776692 : f32
    %296 = vector.broadcast %cst_112 : f32 to vector<1x128xf32>
    %297 = arith.mulf %295, %296 : vector<1x128xf32>
    %298 = vector.broadcast %297 : vector<1x128xf32> to vector<10x128xf32>
    %299 = arith.mulf %282, %298 : vector<10x128xf32>
    %300 = arith.truncf %299 : vector<10x128xf32> to vector<10x128xbf16>
    %cst_113 = arith.constant dense<0.000000e+00> : vector<10x10xf32>
    %301 = tpu.matmul %300, %286, %cst_113 {dimension_numbers = #tpu.dot_dimension_numbers<[1], [1], [0], [0], [0, 0, 1, 0], [], []>} : vector<10x128xbf16>, vector<10x128xbf16>, vector<10x10xf32> -> vector<10x10xf32>
    %302 = arith.addf %301, %6 : vector<10x10xf32>
    %cst_114 = arith.constant dense<0xFF800000> : vector<10xf32>
    %303 = vector.multi_reduction <maximumf>, %302, %cst_114 [1] : vector<10x10xf32> to vector<10xf32>
    %304 = vector.shape_cast %303 : vector<10xf32> to vector<10x1xf32>
    %305 = vector.broadcast %304 : vector<10x1xf32> to vector<10x10xf32>
    %306 = arith.subf %302, %305 : vector<10x10xf32>
    %307 = math.exp %306 : vector<10x10xf32>
    %cst_115 = arith.constant dense<0.000000e+00> : vector<10xf32>
    %308 = vector.multi_reduction <add>, %307, %cst_115 [1] : vector<10x10xf32> to vector<10xf32>
    %309 = vector.shape_cast %308 : vector<10xf32> to vector<10x1xf32>
    %310 = tpu.reciprocal %309 {approx = true} : vector<10x1xf32> -> vector<10x1xf32>
    %311 = vector.broadcast %310 : vector<10x1xf32> to vector<10x10xf32>
    %312 = arith.mulf %307, %311 : vector<10x10xf32>
    %313 = arith.truncf %312 : vector<10x10xf32> to vector<10x10xbf16>
    %314 = vector.broadcast %295 : vector<1x128xf32> to vector<10x128xf32>
    %315 = arith.mulf %284, %314 : vector<10x128xf32>
    %316 = arith.truncf %315 : vector<10x128xf32> to vector<10x128xbf16>
    %cst_116 = arith.constant dense<0.000000e+00> : vector<10x128xf32>
    %317 = tpu.matmul %313, %316, %cst_116 {dimension_numbers = #tpu.dot_dimension_numbers<[1], [0], [0], [1], [0, 0, 1, 1], [], []>} : vector<10x10xbf16>, vector<10x128xbf16>, vector<10x128xf32> -> vector<10x128xf32>
    %318 = arith.addf %287, %317 : vector<10x128xf32>
    %c32_i32_117 = arith.constant 32 : i32
    %319 = vector.broadcast %c32_i32_117 : i32 to vector<1x128xi32>
    %320 = arith.cmpi sge, %285, %319 : vector<1x128xi32>
    %c64_i32_118 = arith.constant 64 : i32
    %321 = vector.broadcast %c64_i32_118 : i32 to vector<1x128xi32>
    %322 = arith.cmpi slt, %285, %321 : vector<1x128xi32>
    %323 = arith.andi %320, %322 : vector<1x128xi1>
    %cst_119 = arith.constant 1.000000e+00 : f32
    %cst_120 = arith.constant 0.000000e+00 : f32
    %324 = vector.broadcast %cst_119 : f32 to vector<1x128xf32>
    %325 = vector.broadcast %cst_120 : f32 to vector<1x128xf32>
    %326 = arith.select %323, %324, %325 : vector<1x128xi1>, vector<1x128xf32>
    %cst_121 = arith.constant 0.176776692 : f32
    %327 = vector.broadcast %cst_121 : f32 to vector<1x128xf32>
    %328 = arith.mulf %326, %327 : vector<1x128xf32>
    %329 = vector.broadcast %328 : vector<1x128xf32> to vector<10x128xf32>
    %330 = arith.mulf %282, %329 : vector<10x128xf32>
    %331 = arith.truncf %330 : vector<10x128xf32> to vector<10x128xbf16>
    %cst_122 = arith.constant dense<0.000000e+00> : vector<10x10xf32>
    %332 = tpu.matmul %331, %286, %cst_122 {dimension_numbers = #tpu.dot_dimension_numbers<[1], [1], [0], [0], [0, 0, 1, 0], [], []>} : vector<10x128xbf16>, vector<10x128xbf16>, vector<10x10xf32> -> vector<10x10xf32>
    %333 = arith.addf %332, %6 : vector<10x10xf32>
    %cst_123 = arith.constant dense<0xFF800000> : vector<10xf32>
    %334 = vector.multi_reduction <maximumf>, %333, %cst_123 [1] : vector<10x10xf32> to vector<10xf32>
    %335 = vector.shape_cast %334 : vector<10xf32> to vector<10x1xf32>
    %336 = vector.broadcast %335 : vector<10x1xf32> to vector<10x10xf32>
    %337 = arith.subf %333, %336 : vector<10x10xf32>
    %338 = math.exp %337 : vector<10x10xf32>
    %cst_124 = arith.constant dense<0.000000e+00> : vector<10xf32>
    %339 = vector.multi_reduction <add>, %338, %cst_124 [1] : vector<10x10xf32> to vector<10xf32>
    %340 = vector.shape_cast %339 : vector<10xf32> to vector<10x1xf32>
    %341 = tpu.reciprocal %340 {approx = true} : vector<10x1xf32> -> vector<10x1xf32>
    %342 = vector.broadcast %341 : vector<10x1xf32> to vector<10x10xf32>
    %343 = arith.mulf %338, %342 : vector<10x10xf32>
    %344 = arith.truncf %343 : vector<10x10xf32> to vector<10x10xbf16>
    %345 = vector.broadcast %326 : vector<1x128xf32> to vector<10x128xf32>
    %346 = arith.mulf %284, %345 : vector<10x128xf32>
    %347 = arith.truncf %346 : vector<10x128xf32> to vector<10x128xbf16>
    %cst_125 = arith.constant dense<0.000000e+00> : vector<10x128xf32>
    %348 = tpu.matmul %344, %347, %cst_125 {dimension_numbers = #tpu.dot_dimension_numbers<[1], [0], [0], [1], [0, 0, 1, 1], [], []>} : vector<10x10xbf16>, vector<10x128xbf16>, vector<10x128xf32> -> vector<10x128xf32>
    %349 = arith.addf %318, %348 : vector<10x128xf32>
    %c64_i32_126 = arith.constant 64 : i32
    %350 = vector.broadcast %c64_i32_126 : i32 to vector<1x128xi32>
    %351 = arith.cmpi sge, %285, %350 : vector<1x128xi32>
    %c96_i32_127 = arith.constant 96 : i32
    %352 = vector.broadcast %c96_i32_127 : i32 to vector<1x128xi32>
    %353 = arith.cmpi slt, %285, %352 : vector<1x128xi32>
    %354 = arith.andi %351, %353 : vector<1x128xi1>
    %cst_128 = arith.constant 1.000000e+00 : f32
    %cst_129 = arith.constant 0.000000e+00 : f32
    %355 = vector.broadcast %cst_128 : f32 to vector<1x128xf32>
    %356 = vector.broadcast %cst_129 : f32 to vector<1x128xf32>
    %357 = arith.select %354, %355, %356 : vector<1x128xi1>, vector<1x128xf32>
    %cst_130 = arith.constant 0.176776692 : f32
    %358 = vector.broadcast %cst_130 : f32 to vector<1x128xf32>
    %359 = arith.mulf %357, %358 : vector<1x128xf32>
    %360 = vector.broadcast %359 : vector<1x128xf32> to vector<10x128xf32>
    %361 = arith.mulf %282, %360 : vector<10x128xf32>
    %362 = arith.truncf %361 : vector<10x128xf32> to vector<10x128xbf16>
    %cst_131 = arith.constant dense<0.000000e+00> : vector<10x10xf32>
    %363 = tpu.matmul %362, %286, %cst_131 {dimension_numbers = #tpu.dot_dimension_numbers<[1], [1], [0], [0], [0, 0, 1, 0], [], []>} : vector<10x128xbf16>, vector<10x128xbf16>, vector<10x10xf32> -> vector<10x10xf32>
    %364 = arith.addf %363, %6 : vector<10x10xf32>
    %cst_132 = arith.constant dense<0xFF800000> : vector<10xf32>
    %365 = vector.multi_reduction <maximumf>, %364, %cst_132 [1] : vector<10x10xf32> to vector<10xf32>
    %366 = vector.shape_cast %365 : vector<10xf32> to vector<10x1xf32>
    %367 = vector.broadcast %366 : vector<10x1xf32> to vector<10x10xf32>
    %368 = arith.subf %364, %367 : vector<10x10xf32>
    %369 = math.exp %368 : vector<10x10xf32>
    %cst_133 = arith.constant dense<0.000000e+00> : vector<10xf32>
    %370 = vector.multi_reduction <add>, %369, %cst_133 [1] : vector<10x10xf32> to vector<10xf32>
    %371 = vector.shape_cast %370 : vector<10xf32> to vector<10x1xf32>
    %372 = tpu.reciprocal %371 {approx = true} : vector<10x1xf32> -> vector<10x1xf32>
    %373 = vector.broadcast %372 : vector<10x1xf32> to vector<10x10xf32>
    %374 = arith.mulf %369, %373 : vector<10x10xf32>
    %375 = arith.truncf %374 : vector<10x10xf32> to vector<10x10xbf16>
    %376 = vector.broadcast %357 : vector<1x128xf32> to vector<10x128xf32>
    %377 = arith.mulf %284, %376 : vector<10x128xf32>
    %378 = arith.truncf %377 : vector<10x128xf32> to vector<10x128xbf16>
    %cst_134 = arith.constant dense<0.000000e+00> : vector<10x128xf32>
    %379 = tpu.matmul %375, %378, %cst_134 {dimension_numbers = #tpu.dot_dimension_numbers<[1], [0], [0], [1], [0, 0, 1, 1], [], []>} : vector<10x10xbf16>, vector<10x128xbf16>, vector<10x128xf32> -> vector<10x128xf32>
    %380 = arith.addf %349, %379 : vector<10x128xf32>
    %c96_i32_135 = arith.constant 96 : i32
    %381 = vector.broadcast %c96_i32_135 : i32 to vector<1x128xi32>
    %382 = arith.cmpi sge, %285, %381 : vector<1x128xi32>
    %c128_i32_136 = arith.constant 128 : i32
    %383 = vector.broadcast %c128_i32_136 : i32 to vector<1x128xi32>
    %384 = arith.cmpi slt, %285, %383 : vector<1x128xi32>
    %385 = arith.andi %382, %384 : vector<1x128xi1>
    %cst_137 = arith.constant 1.000000e+00 : f32
    %cst_138 = arith.constant 0.000000e+00 : f32
    %386 = vector.broadcast %cst_137 : f32 to vector<1x128xf32>
    %387 = vector.broadcast %cst_138 : f32 to vector<1x128xf32>
    %388 = arith.select %385, %386, %387 : vector<1x128xi1>, vector<1x128xf32>
    %cst_139 = arith.constant 0.176776692 : f32
    %389 = vector.broadcast %cst_139 : f32 to vector<1x128xf32>
    %390 = arith.mulf %388, %389 : vector<1x128xf32>
    %391 = vector.broadcast %390 : vector<1x128xf32> to vector<10x128xf32>
    %392 = arith.mulf %282, %391 : vector<10x128xf32>
    %393 = arith.truncf %392 : vector<10x128xf32> to vector<10x128xbf16>
    %cst_140 = arith.constant dense<0.000000e+00> : vector<10x10xf32>
    %394 = tpu.matmul %393, %286, %cst_140 {dimension_numbers = #tpu.dot_dimension_numbers<[1], [1], [0], [0], [0, 0, 1, 0], [], []>} : vector<10x128xbf16>, vector<10x128xbf16>, vector<10x10xf32> -> vector<10x10xf32>
    %395 = arith.addf %394, %6 : vector<10x10xf32>
    %cst_141 = arith.constant dense<0xFF800000> : vector<10xf32>
    %396 = vector.multi_reduction <maximumf>, %395, %cst_141 [1] : vector<10x10xf32> to vector<10xf32>
    %397 = vector.shape_cast %396 : vector<10xf32> to vector<10x1xf32>
    %398 = vector.broadcast %397 : vector<10x1xf32> to vector<10x10xf32>
    %399 = arith.subf %395, %398 : vector<10x10xf32>
    %400 = math.exp %399 : vector<10x10xf32>
    %cst_142 = arith.constant dense<0.000000e+00> : vector<10xf32>
    %401 = vector.multi_reduction <add>, %400, %cst_142 [1] : vector<10x10xf32> to vector<10xf32>
    %402 = vector.shape_cast %401 : vector<10xf32> to vector<10x1xf32>
    %403 = tpu.reciprocal %402 {approx = true} : vector<10x1xf32> -> vector<10x1xf32>
    %404 = vector.broadcast %403 : vector<10x1xf32> to vector<10x10xf32>
    %405 = arith.mulf %400, %404 : vector<10x10xf32>
    %406 = arith.truncf %405 : vector<10x10xf32> to vector<10x10xbf16>
    %407 = vector.broadcast %388 : vector<1x128xf32> to vector<10x128xf32>
    %408 = arith.mulf %284, %407 : vector<10x128xf32>
    %409 = arith.truncf %408 : vector<10x128xf32> to vector<10x128xbf16>
    %cst_143 = arith.constant dense<0.000000e+00> : vector<10x128xf32>
    %410 = tpu.matmul %406, %409, %cst_143 {dimension_numbers = #tpu.dot_dimension_numbers<[1], [0], [0], [1], [0, 0, 1, 1], [], []>} : vector<10x10xbf16>, vector<10x128xbf16>, vector<10x128xf32> -> vector<10x128xf32>
    %411 = arith.addf %380, %410 : vector<10x128xf32>
    %412 = arith.truncf %411 : vector<10x128xf32> to vector<10x128xbf16>
    %c0_144 = arith.constant 0 : index
    %c0_145 = arith.constant 0 : index
    %413 = vector.load %arg23[%c0_144, %c0_145] : memref<128x128xbf16, #tpu.memory_space<vmem>>, vector<128x128xbf16>
    %cst_146 = arith.constant dense<0.000000e+00> : vector<10x128xf32>
    %414 = tpu.matmul %412, %413, %cst_146 {dimension_numbers = #tpu.dot_dimension_numbers<[1], [0], [0], [1], [0, 0, 1, 1], [], []>} : vector<10x128xbf16>, vector<128x128xbf16>, vector<10x128xf32> -> vector<10x128xf32>
    %c0_147 = arith.constant 0 : index
    %c0_148 = arith.constant 0 : index
    %415 = vector.load %arg13[%c0_147, %c0_148] : memref<1x128xf32, #tpu.memory_space<vmem>>, vector<1x128xf32>
    %416 = vector.broadcast %415 : vector<1x128xf32> to vector<10x128xf32>
    %417 = arith.addf %414, %416 : vector<10x128xf32>
    %418 = arith.addf %251, %417 : vector<10x128xf32>
    %cst_149 = arith.constant dense<0.000000e+00> : vector<10xf32>
    %419 = vector.multi_reduction <add>, %418, %cst_149 [1] : vector<10x128xf32> to vector<10xf32>
    %420 = vector.shape_cast %419 : vector<10xf32> to vector<10x1xf32>
    %cst_150 = arith.constant 1.280000e+02 : f32
    %421 = vector.broadcast %cst_150 : f32 to vector<10x1xf32>
    %422 = arith.divf %420, %421 : vector<10x1xf32>
    %423 = vector.broadcast %422 : vector<10x1xf32> to vector<10x128xf32>
    %424 = arith.subf %418, %423 : vector<10x128xf32>
    %425 = arith.mulf %424, %424 : vector<10x128xf32>
    %cst_151 = arith.constant dense<0.000000e+00> : vector<10xf32>
    %426 = vector.multi_reduction <add>, %425, %cst_151 [1] : vector<10x128xf32> to vector<10xf32>
    %427 = vector.shape_cast %426 : vector<10xf32> to vector<10x1xf32>
    %cst_152 = arith.constant 1.280000e+02 : f32
    %428 = vector.broadcast %cst_152 : f32 to vector<10x1xf32>
    %429 = arith.divf %427, %428 : vector<10x1xf32>
    %430 = vector.broadcast %422 : vector<10x1xf32> to vector<10x128xf32>
    %431 = arith.subf %418, %430 : vector<10x128xf32>
    %cst_153 = arith.constant 9.99999997E-7 : f32
    %432 = vector.broadcast %cst_153 : f32 to vector<10x1xf32>
    %433 = arith.addf %429, %432 : vector<10x1xf32>
    %434 = math.rsqrt %433 : vector<10x1xf32>
    %435 = vector.broadcast %434 : vector<10x1xf32> to vector<10x128xf32>
    %436 = arith.mulf %431, %435 : vector<10x128xf32>
    %c0_154 = arith.constant 0 : index
    %c0_155 = arith.constant 0 : index
    %437 = vector.load %arg22[%c0_154, %c0_155] : memref<1x128xf32, #tpu.memory_space<vmem>>, vector<1x128xf32>
    %438 = vector.broadcast %437 : vector<1x128xf32> to vector<10x128xf32>
    %439 = arith.mulf %436, %438 : vector<10x128xf32>
    %c0_156 = arith.constant 0 : index
    %c0_157 = arith.constant 0 : index
    %440 = vector.load %arg21[%c0_156, %c0_157] : memref<1x128xf32, #tpu.memory_space<vmem>>, vector<1x128xf32>
    %441 = vector.broadcast %440 : vector<1x128xf32> to vector<10x128xf32>
    %442 = arith.addf %439, %441 : vector<10x128xf32>
    %443 = arith.truncf %442 : vector<10x128xf32> to vector<10x128xbf16>
    %c0_158 = arith.constant 0 : index
    %c0_159 = arith.constant 0 : index
    %444 = vector.load %arg16[%c0_158, %c0_159] : memref<128x512xbf16, #tpu.memory_space<vmem>>, vector<128x512xbf16>
    %cst_160 = arith.constant dense<0.000000e+00> : vector<10x512xf32>
    %445 = tpu.matmul %443, %444, %cst_160 {dimension_numbers = #tpu.dot_dimension_numbers<[1], [0], [0], [1], [0, 0, 1, 1], [], []>} : vector<10x128xbf16>, vector<128x512xbf16>, vector<10x512xf32> -> vector<10x512xf32>
    %c0_161 = arith.constant 0 : index
    %c0_162 = arith.constant 0 : index
    %446 = vector.load %arg15[%c0_161, %c0_162] : memref<1x512xf32, #tpu.memory_space<vmem>>, vector<1x512xf32>
    %447 = vector.broadcast %446 : vector<1x512xf32> to vector<10x512xf32>
    %448 = arith.addf %445, %447 : vector<10x512xf32>
    %449 = math.absf %448 : vector<10x512xf32>
    %cst_163 = arith.constant 0.707106769 : f32
    %450 = vector.broadcast %cst_163 : f32 to vector<10x512xf32>
    %451 = arith.mulf %449, %450 : vector<10x512xf32>
    %cst_164 = arith.constant 0.000000e+00 : f32
    %452 = vector.broadcast %cst_164 : f32 to vector<10x512xf32>
    %453 = arith.cmpf oge, %448, %452 : vector<10x512xf32>
    %cst_165 = arith.constant 1.000000e+00 : f32
    %cst_166 = arith.constant -1.000000e+00 : f32
    %454 = vector.broadcast %cst_165 : f32 to vector<10x512xf32>
    %455 = vector.broadcast %cst_166 : f32 to vector<10x512xf32>
    %456 = arith.select %453, %454, %455 : vector<10x512xi1>, vector<10x512xf32>
    %cst_167 = arith.constant 0.327591091 : f32
    %457 = vector.broadcast %cst_167 : f32 to vector<10x512xf32>
    %458 = arith.mulf %457, %451 : vector<10x512xf32>
    %cst_168 = arith.constant 1.000000e+00 : f32
    %459 = vector.broadcast %cst_168 : f32 to vector<10x512xf32>
    %460 = arith.addf %459, %458 : vector<10x512xf32>
    %cst_169 = arith.constant 1.000000e+00 : f32
    %461 = vector.broadcast %cst_169 : f32 to vector<10x512xf32>
    %462 = arith.divf %461, %460 : vector<10x512xf32>
    %cst_170 = arith.constant 1.06140542 : f32
    %463 = vector.broadcast %cst_170 : f32 to vector<10x512xf32>
    %464 = arith.mulf %463, %462 : vector<10x512xf32>
    %cst_171 = arith.constant 1.45315206 : f32
    %465 = vector.broadcast %cst_171 : f32 to vector<10x512xf32>
    %466 = arith.subf %464, %465 : vector<10x512xf32>
    %467 = arith.mulf %466, %462 : vector<10x512xf32>
    %cst_172 = arith.constant 1.42141378 : f32
    %468 = vector.broadcast %cst_172 : f32 to vector<10x512xf32>
    %469 = arith.addf %467, %468 : vector<10x512xf32>
    %470 = arith.mulf %469, %462 : vector<10x512xf32>
    %cst_173 = arith.constant 0.284496725 : f32
    %471 = vector.broadcast %cst_173 : f32 to vector<10x512xf32>
    %472 = arith.subf %470, %471 : vector<10x512xf32>
    %473 = arith.mulf %472, %462 : vector<10x512xf32>
    %cst_174 = arith.constant 0.254829586 : f32
    %474 = vector.broadcast %cst_174 : f32 to vector<10x512xf32>
    %475 = arith.addf %473, %474 : vector<10x512xf32>
    %476 = arith.mulf %475, %462 : vector<10x512xf32>
    %cst_175 = arith.constant 0.000000e+00 : f32
    %477 = vector.broadcast %cst_175 : f32 to vector<10x512xf32>
    %478 = arith.subf %477, %451 : vector<10x512xf32>
    %479 = arith.mulf %478, %451 : vector<10x512xf32>
    %480 = math.exp %479 : vector<10x512xf32>
    %481 = arith.mulf %476, %480 : vector<10x512xf32>
    %cst_176 = arith.constant 1.000000e+00 : f32
    %482 = vector.broadcast %cst_176 : f32 to vector<10x512xf32>
    %483 = arith.subf %482, %481 : vector<10x512xf32>
    %484 = arith.mulf %456, %483 : vector<10x512xf32>
    %cst_177 = arith.constant 5.000000e-01 : f32
    %485 = vector.broadcast %cst_177 : f32 to vector<10x512xf32>
    %486 = arith.mulf %485, %448 : vector<10x512xf32>
    %cst_178 = arith.constant 1.000000e+00 : f32
    %487 = vector.broadcast %cst_178 : f32 to vector<10x512xf32>
    %488 = arith.addf %487, %484 : vector<10x512xf32>
    %489 = arith.mulf %486, %488 : vector<10x512xf32>
    %490 = arith.truncf %489 : vector<10x512xf32> to vector<10x512xbf16>
    %c0_179 = arith.constant 0 : index
    %c0_180 = arith.constant 0 : index
    %491 = vector.load %arg18[%c0_179, %c0_180] : memref<512x128xbf16, #tpu.memory_space<vmem>>, vector<512x128xbf16>
    %cst_181 = arith.constant dense<0.000000e+00> : vector<10x128xf32>
    %492 = tpu.matmul %490, %491, %cst_181 {dimension_numbers = #tpu.dot_dimension_numbers<[1], [0], [0], [1], [0, 0, 1, 1], [], []>} : vector<10x512xbf16>, vector<512x128xbf16>, vector<10x128xf32> -> vector<10x128xf32>
    %c0_182 = arith.constant 0 : index
    %c0_183 = arith.constant 0 : index
    %493 = vector.load %arg17[%c0_182, %c0_183] : memref<1x128xf32, #tpu.memory_space<vmem>>, vector<1x128xf32>
    %494 = vector.broadcast %493 : vector<1x128xf32> to vector<10x128xf32>
    %495 = arith.addf %492, %494 : vector<10x128xf32>
    %496 = arith.addf %418, %495 : vector<10x128xf32>
    %cst_184 = arith.constant dense<0.000000e+00> : vector<10xf32>
    %497 = vector.multi_reduction <add>, %496, %cst_184 [1] : vector<10x128xf32> to vector<10xf32>
    %498 = vector.shape_cast %497 : vector<10xf32> to vector<10x1xf32>
    %cst_185 = arith.constant 1.280000e+02 : f32
    %499 = vector.broadcast %cst_185 : f32 to vector<10x1xf32>
    %500 = arith.divf %498, %499 : vector<10x1xf32>
    %501 = vector.broadcast %500 : vector<10x1xf32> to vector<10x128xf32>
    %502 = arith.subf %496, %501 : vector<10x128xf32>
    %503 = arith.mulf %502, %502 : vector<10x128xf32>
    %cst_186 = arith.constant dense<0.000000e+00> : vector<10xf32>
    %504 = vector.multi_reduction <add>, %503, %cst_186 [1] : vector<10x128xf32> to vector<10xf32>
    %505 = vector.shape_cast %504 : vector<10xf32> to vector<10x1xf32>
    %cst_187 = arith.constant 1.280000e+02 : f32
    %506 = vector.broadcast %cst_187 : f32 to vector<10x1xf32>
    %507 = arith.divf %505, %506 : vector<10x1xf32>
    %508 = vector.broadcast %500 : vector<10x1xf32> to vector<10x128xf32>
    %509 = arith.subf %496, %508 : vector<10x128xf32>
    %cst_188 = arith.constant 9.99999997E-7 : f32
    %510 = vector.broadcast %cst_188 : f32 to vector<10x1xf32>
    %511 = arith.addf %507, %510 : vector<10x1xf32>
    %512 = math.rsqrt %511 : vector<10x1xf32>
    %513 = vector.broadcast %512 : vector<10x1xf32> to vector<10x128xf32>
    %514 = arith.mulf %509, %513 : vector<10x128xf32>
    %c0_189 = arith.constant 0 : index
    %c0_190 = arith.constant 0 : index
    %515 = vector.load %arg26[%c0_189, %c0_190] : memref<1x128xf32, #tpu.memory_space<vmem>>, vector<1x128xf32>
    %516 = vector.broadcast %515 : vector<1x128xf32> to vector<10x128xf32>
    %517 = arith.mulf %514, %516 : vector<10x128xf32>
    %c0_191 = arith.constant 0 : index
    %c0_192 = arith.constant 0 : index
    %518 = vector.load %arg25[%c0_191, %c0_192] : memref<1x128xf32, #tpu.memory_space<vmem>>, vector<1x128xf32>
    %519 = vector.broadcast %518 : vector<1x128xf32> to vector<10x128xf32>
    %520 = arith.addf %517, %519 : vector<10x128xf32>
    %c0_193 = arith.constant 0 : index
    %c0_194 = arith.constant 0 : index
    %521 = vector.load %arg31[%c0_193, %c0_194] : memref<10x128xf32, #tpu.memory_space<vmem>>, vector<10x128xf32>
    tpu.vector_store %arg31[%c0_193, %c0_194], %520 {strides = array<i32>} : memref<10x128xf32, #tpu.memory_space<vmem>>, vector<10x128xf32>,
    return
  }
  func.func @transform_0(%arg0: i32) -> (i32, i32) {
    %c0_i32 = arith.constant 0 : i32
    %c0_i32_0 = arith.constant 0 : i32
    %c0_i32_1 = arith.constant 0 : i32
    return %c0_i32, %c0_i32_0 : i32, i32
  }
  func.func @transform_1(%arg0: i32) -> (i32, i32) {
    %c0_i32 = arith.constant 0 : i32
    %c0_i32_0 = arith.constant 0 : i32
    %c0_i32_1 = arith.constant 0 : i32
    return %c0_i32, %c0_i32_0 : i32, i32
  }
  func.func @transform_2(%arg0: i32) -> (i32, i32) {
    %c0_i32 = arith.constant 0 : i32
    %c0_i32_0 = arith.constant 0 : i32
    %c0_i32_1 = arith.constant 0 : i32
    return %c0_i32, %c0_i32_0 : i32, i32
  }
  func.func @transform_3(%arg0: i32) -> (i32, i32) {
    %c0_i32 = arith.constant 0 : i32
    %c0_i32_0 = arith.constant 0 : i32
    %c0_i32_1 = arith.constant 0 : i32
    return %c0_i32, %c0_i32_0 : i32, i32
  }
  func.func @transform_4(%arg0: i32) -> (i32, i32) {
    %c0_i32 = arith.constant 0 : i32
    %c0_i32_0 = arith.constant 0 : i32
    %c0_i32_1 = arith.constant 0 : i32
    return %c0_i32, %c0_i32_0 : i32, i32
  }
  func.func @transform_5(%arg0: i32) -> (i32, i32) {
    %c0_i32 = arith.constant 0 : i32
    %c0_i32_0 = arith.constant 0 : i32
    %c0_i32_1 = arith.constant 0 : i32
    return %c0_i32, %c0_i32_0 : i32, i32
  }
  func.func @transform_6(%arg0: i32) -> (i32, i32) {
    %c0_i32 = arith.constant 0 : i32
    %c0_i32_0 = arith.constant 0 : i32
    %c0_i32_1 = arith.constant 0 : i32
    return %c0_i32, %c0_i32_0 : i32, i32
  }
  func.func @transform_7(%arg0: i32) -> (i32, i32) {
    %c0_i32 = arith.constant 0 : i32
    %c0_i32_0 = arith.constant 0 : i32
    %c0_i32_1 = arith.constant 0 : i32
    return %c0_i32, %c0_i32_0 : i32, i32
  }
  func.func @transform_8(%arg0: i32) -> (i32, i32) {
    %c0_i32 = arith.constant 0 : i32
    %c0_i32_0 = arith.constant 0 : i32
    %c0_i32_1 = arith.constant 0 : i32
    return %c0_i32, %c0_i32_0 : i32, i32
  }
  func.func @transform_9(%arg0: i32) -> (i32, i32) {
    %c0_i32 = arith.constant 0 : i32
    %c0_i32_0 = arith.constant 0 : i32
    %c0_i32_1 = arith.constant 0 : i32
    return %c0_i32, %c0_i32_0 : i32, i32
  }
  func.func @transform_10(%arg0: i32) -> (i32, i32) {
    %c0_i32 = arith.constant 0 : i32
    %c0_i32_0 = arith.constant 0 : i32
    %c0_i32_1 = arith.constant 0 : i32
    return %c0_i32, %c0_i32_0 : i32, i32
  }
  func.func @transform_11(%arg0: i32) -> (i32, i32) {
    %c0_i32 = arith.constant 0 : i32
    %c0_i32_0 = arith.constant 0 : i32
    %c0_i32_1 = arith.constant 0 : i32
    return %c0_i32, %c0_i32_0 : i32, i32
  }
  func.func @transform_12(%arg0: i32) -> (i32, i32) {
    %c0_i32 = arith.constant 0 : i32
    %c0_i32_0 = arith.constant 0 : i32
    %c0_i32_1 = arith.constant 0 : i32
    return %c0_i32, %c0_i32_0 : i32, i32
  }
  func.func @transform_13(%arg0: i32) -> (i32, i32) {
    %c0_i32 = arith.constant 0 : i32
    %c0_i32_0 = arith.constant 0 : i32
    %c0_i32_1 = arith.constant 0 : i32
    return %c0_i32, %c0_i32_0 : i32, i32
  }
  func.func @transform_14(%arg0: i32) -> (i32, i32) {
    %c0_i32 = arith.constant 0 : i32
    %c0_i32_0 = arith.constant 0 : i32
    %c0_i32_1 = arith.constant 0 : i32
    return %c0_i32, %c0_i32_0 : i32, i32
  }
  func.func @transform_15(%arg0: i32) -> (i32, i32) {
    %c0_i32 = arith.constant 0 : i32
    %c0_i32_0 = arith.constant 0 : i32
    %c0_i32_1 = arith.constant 0 : i32
    return %c0_i32, %c0_i32_0 : i32, i32
  }
  func.func @transform_16(%arg0: i32) -> (i32, i32) {
    %c0_i32 = arith.constant 0 : i32
    %c0_i32_0 = arith.constant 0 : i32
    %c0_i32_1 = arith.constant 0 : i32
    return %c0_i32, %c0_i32_0 : i32, i32
  }
  func.func @transform_17(%arg0: i32) -> (i32, i32) {
    %c0_i32 = arith.constant 0 : i32
    %c0_i32_0 = arith.constant 0 : i32
    %c0_i32_1 = arith.constant 0 : i32
    return %c0_i32, %c0_i32_0 : i32, i32
  }
  func.func @transform_18(%arg0: i32) -> (i32, i32) {
    %c0_i32 = arith.constant 0 : i32
    %c0_i32_0 = arith.constant 0 : i32
    %c0_i32_1 = arith.constant 0 : i32
    return %c0_i32, %c0_i32_0 : i32, i32
  }
  func.func @transform_19(%arg0: i32) -> (i32, i32) {
    %c0_i32 = arith.constant 0 : i32
    %c0_i32_0 = arith.constant 0 : i32
    %c0_i32_1 = arith.constant 0 : i32
    return %c0_i32, %c0_i32_0 : i32, i32
  }
  func.func @transform_20(%arg0: i32) -> (i32, i32) {
    %c0_i32 = arith.constant 0 : i32
    %c0_i32_0 = arith.constant 0 : i32
    %c0_i32_1 = arith.constant 0 : i32
    return %c0_i32, %c0_i32_0 : i32, i32
  }
  func.func @transform_21(%arg0: i32) -> (i32, i32) {
    %c0_i32 = arith.constant 0 : i32
    %c0_i32_0 = arith.constant 0 : i32
    %c0_i32_1 = arith.constant 0 : i32
    return %c0_i32, %c0_i32_0 : i32, i32
  }
  func.func @transform_22(%arg0: i32) -> (i32, i32) {
    %c0_i32 = arith.constant 0 : i32
    %c0_i32_0 = arith.constant 0 : i32
    %c0_i32_1 = arith.constant 0 : i32
    return %c0_i32, %c0_i32_0 : i32, i32
  }
  func.func @transform_23(%arg0: i32) -> (i32, i32) {
    %c0_i32 = arith.constant 0 : i32
    %c0_i32_0 = arith.constant 0 : i32
    %c0_i32_1 = arith.constant 0 : i32
    return %c0_i32, %c0_i32_0 : i32, i32
  }
  func.func @transform_24(%arg0: i32) -> (i32, i32) {
    %c0_i32 = arith.constant 0 : i32
    %c0_i32_0 = arith.constant 0 : i32
    %c0_i32_1 = arith.constant 0 : i32
    return %c0_i32, %c0_i32_0 : i32, i32
  }
  func.func @transform_25(%arg0: i32) -> (i32, i32) {
    %c0_i32 = arith.constant 0 : i32
    %c0_i32_0 = arith.constant 0 : i32
    %c0_i32_1 = arith.constant 0 : i32
    return %c0_i32, %c0_i32_0 : i32, i32
  }
  func.func @transform_26(%arg0: i32) -> (i32, i32) {
    %c0_i32 = arith.constant 0 : i32
    %c0_i32_0 = arith.constant 0 : i32
    %c0_i32_1 = arith.constant 0 : i32
    return %c0_i32, %c0_i32_0 : i32, i32
  }
  func.func @transform_27(%arg0: i32) -> (i32, i32) {
    %c0_i32 = arith.constant 0 : i32
    %c0_i32_0 = arith.constant 0 : i32
    %c0_i32_1 = arith.constant 0 : i32
    return %c0_i32, %c0_i32_0 : i32, i32
  }
  func.func @transform_28(%arg0: i32) -> (i32, i32) {
    %c0_i32 = arith.constant 0 : i32
    %c0_i32_0 = arith.constant 0 : i32
    %c0_i32_1 = arith.constant 0 : i32
    return %c0_i32, %c0_i32_0 : i32, i32
  }
  func.func @transform_29(%arg0: i32) -> (i32, i32) {
    %c0_i32 = arith.constant 0 : i32
    %c0_i32_0 = arith.constant 0 : i32
    %c0_i32_1 = arith.constant 0 : i32
    return %c0_i32, %c0_i32_0 : i32, i32
  }
  func.func @transform_30(%arg0: i32) -> (i32, i32) {
    %c0_i32 = arith.constant 0 : i32
    %c0_i32_0 = arith.constant 0 : i32
    %c0_i32_1 = arith.constant 0 : i32
    return %c0_i32, %c0_i32_0 : i32, i32
  }
}

module attributes {stable_mosaic.version = 11 : i64} {
  func.func @kernel(%arg0: i32, %arg1: memref<16x8xf32, #tpu.memory_space<vmem>>, %arg2: memref<16x128xf32, #tpu.memory_space<vmem>>, %arg3: memref<1x256xf32, #tpu.memory_space<vmem>>, %arg4: memref<1x128xf32, #tpu.memory_space<vmem>>, %arg5: memref<1x128xf32, #tpu.memory_space<vmem>>, %arg6: memref<128x256xbf16, #tpu.memory_space<vmem>>, %arg7: memref<128x128xbf16, #tpu.memory_space<vmem>>, %arg8: memref<128x128xbf16, #tpu.memory_space<vmem>>, %arg9: memref<1x256xf32, #tpu.memory_space<vmem>>, %arg10: memref<128x256xbf16, #tpu.memory_space<vmem>>, %arg11: memref<1x128xf32, #tpu.memory_space<vmem>>, %arg12: memref<256x128xbf16, #tpu.memory_space<vmem>>, %arg13: memref<1x128xf32, #tpu.memory_space<vmem>>, %arg14: memref<1x128xf32, #tpu.memory_space<vmem>>, %arg15: memref<1x128xf32, #tpu.memory_space<vmem>>, %arg16: memref<1x128xf32, #tpu.memory_space<vmem>>, %arg17: memref<1x128xf32, #tpu.memory_space<vmem>>, %arg18: memref<1x128xf32, #tpu.memory_space<vmem>>, %arg19: memref<1x128xf32, #tpu.memory_space<vmem>>, %arg20: memref<1x384xf32, #tpu.memory_space<vmem>>, %arg21: memref<128x128xbf16, #tpu.memory_space<vmem>>, %arg22: memref<128x384xbf16, #tpu.memory_space<vmem>>, %arg23: memref<1x256xf32, #tpu.memory_space<vmem>>, %arg24: memref<1x128xf32, #tpu.memory_space<vmem>>, %arg25: memref<1x128xf32, #tpu.memory_space<vmem>>, %arg26: memref<128x256xbf16, #tpu.memory_space<vmem>>, %arg27: memref<128x128xbf16, #tpu.memory_space<vmem>>, %arg28: memref<128x128xbf16, #tpu.memory_space<vmem>>, %arg29: memref<1x256xf32, #tpu.memory_space<vmem>>, %arg30: memref<128x256xbf16, #tpu.memory_space<vmem>>, %arg31: memref<1x128xf32, #tpu.memory_space<vmem>>, %arg32: memref<256x128xbf16, #tpu.memory_space<vmem>>, %arg33: memref<1x128xf32, #tpu.memory_space<vmem>>, %arg34: memref<1x128xf32, #tpu.memory_space<vmem>>, %arg35: memref<1x128xf32, #tpu.memory_space<vmem>>, %arg36: memref<1x128xf32, #tpu.memory_space<vmem>>, %arg37: memref<1x128xf32, #tpu.memory_space<vmem>>, %arg38: memref<1x128xf32, #tpu.memory_space<vmem>>, %arg39: memref<1x128xf32, #tpu.memory_space<vmem>>, %arg40: memref<1x384xf32, #tpu.memory_space<vmem>>, %arg41: memref<128x128xbf16, #tpu.memory_space<vmem>>, %arg42: memref<128x384xbf16, #tpu.memory_space<vmem>>, %arg43: memref<8x128xf32, #tpu.memory_space<vmem>>, %arg44: memref<1x64xf32, #tpu.memory_space<vmem>>, %arg45: memref<128x64xbf16, #tpu.memory_space<vmem>>, %arg46: memref<16x128xf32, #tpu.memory_space<vmem>>, %arg47: memref<16x16xf32, #tpu.memory_space<vmem>>, %arg48: memref<16x32xf32, #tpu.memory_space<vmem>>, %arg49: memref<1x128xf32, #tpu.memory_space<vmem>>, %arg50: memref<128x128xbf16, #tpu.memory_space<vmem>>, %arg51: memref<1x128xf32, #tpu.memory_space<vmem>>, %arg52: memref<32x128xbf16, #tpu.memory_space<vmem>>, %arg53: memref<16x64xf32, #tpu.memory_space<vmem>>) attributes {dimension_semantics = [#tpu.dimension_semantics<arbitrary>], iteration_bounds = array<i64: 1>, scalar_prefetch = 0 : i64, scratch_operands = 0 : i64, tpu.core_type = #tpu.core_type<tc>, window_params = [{pipeline_mode = #tpu.pipeline_mode<synchronous>, transform_indices = @transform_0, window_bounds = array<i64: 16, 8>}, {pipeline_mode = #tpu.pipeline_mode<synchronous>, transform_indices = @transform_1, window_bounds = array<i64: 16, 128>}, {pipeline_mode = #tpu.pipeline_mode<synchronous>, transform_indices = @transform_2, window_bounds = array<i64: 1, 256>}, {pipeline_mode = #tpu.pipeline_mode<synchronous>, transform_indices = @transform_3, window_bounds = array<i64: 1, 128>}, {pipeline_mode = #tpu.pipeline_mode<synchronous>, transform_indices = @transform_4, window_bounds = array<i64: 1, 128>}, {pipeline_mode = #tpu.pipeline_mode<synchronous>, transform_indices = @transform_5, window_bounds = array<i64: 128, 256>}, {pipeline_mode = #tpu.pipeline_mode<synchronous>, transform_indices = @transform_6, window_bounds = array<i64: 128, 128>}, {pipeline_mode = #tpu.pipeline_mode<synchronous>, transform_indices = @transform_7, window_bounds = array<i64: 128, 128>}, {pipeline_mode = #tpu.pipeline_mode<synchronous>, transform_indices = @transform_8, window_bounds = array<i64: 1, 256>}, {pipeline_mode = #tpu.pipeline_mode<synchronous>, transform_indices = @transform_9, window_bounds = array<i64: 128, 256>}, {pipeline_mode = #tpu.pipeline_mode<synchronous>, transform_indices = @transform_10, window_bounds = array<i64: 1, 128>}, {pipeline_mode = #tpu.pipeline_mode<synchronous>, transform_indices = @transform_11, window_bounds = array<i64: 256, 128>}, {pipeline_mode = #tpu.pipeline_mode<synchronous>, transform_indices = @transform_12, window_bounds = array<i64: 1, 128>}, {pipeline_mode = #tpu.pipeline_mode<synchronous>, transform_indices = @transform_13, window_bounds = array<i64: 1, 128>}, {pipeline_mode = #tpu.pipeline_mode<synchronous>, transform_indices = @transform_14, window_bounds = array<i64: 1, 128>}, {pipeline_mode = #tpu.pipeline_mode<synchronous>, transform_indices = @transform_15, window_bounds = array<i64: 1, 128>}, {pipeline_mode = #tpu.pipeline_mode<synchronous>, transform_indices = @transform_16, window_bounds = array<i64: 1, 128>}, {pipeline_mode = #tpu.pipeline_mode<synchronous>, transform_indices = @transform_17, window_bounds = array<i64: 1, 128>}, {pipeline_mode = #tpu.pipeline_mode<synchronous>, transform_indices = @transform_18, window_bounds = array<i64: 1, 128>}, {pipeline_mode = #tpu.pipeline_mode<synchronous>, transform_indices = @transform_19, window_bounds = array<i64: 1, 384>}, {pipeline_mode = #tpu.pipeline_mode<synchronous>, transform_indices = @transform_20, window_bounds = array<i64: 128, 128>}, {pipeline_mode = #tpu.pipeline_mode<synchronous>, transform_indices = @transform_21, window_bounds = array<i64: 128, 384>}, {pipeline_mode = #tpu.pipeline_mode<synchronous>, transform_indices = @transform_22, window_bounds = array<i64: 1, 256>}, {pipeline_mode = #tpu.pipeline_mode<synchronous>, transform_indices = @transform_23, window_bounds = array<i64: 1, 128>}, {pipeline_mode = #tpu.pipeline_mode<synchronous>, transform_indices = @transform_24, window_bounds = array<i64: 1, 128>}, {pipeline_mode = #tpu.pipeline_mode<synchronous>, transform_indices = @transform_25, window_bounds = array<i64: 128, 256>}, {pipeline_mode = #tpu.pipeline_mode<synchronous>, transform_indices = @transform_26, window_bounds = array<i64: 128, 128>}, {pipeline_mode = #tpu.pipeline_mode<synchronous>, transform_indices = @transform_27, window_bounds = array<i64: 128, 128>}, {pipeline_mode = #tpu.pipeline_mode<synchronous>, transform_indices = @transform_28, window_bounds = array<i64: 1, 256>}, {pipeline_mode = #tpu.pipeline_mode<synchronous>, transform_indices = @transform_29, window_bounds = array<i64: 128, 256>}, {pipeline_mode = #tpu.pipeline_mode<synchronous>, transform_indices = @transform_30, window_bounds = array<i64: 1, 128>}, {pipeline_mode = #tpu.pipeline_mode<synchronous>, transform_indices = @transform_31, window_bounds = array<i64: 256, 128>}, {pipeline_mode = #tpu.pipeline_mode<synchronous>, transform_indices = @transform_32, window_bounds = array<i64: 1, 128>}, {pipeline_mode = #tpu.pipeline_mode<synchronous>, transform_indices = @transform_33, window_bounds = array<i64: 1, 128>}, {pipeline_mode = #tpu.pipeline_mode<synchronous>, transform_indices = @transform_34, window_bounds = array<i64: 1, 128>}, {pipeline_mode = #tpu.pipeline_mode<synchronous>, transform_indices = @transform_35, window_bounds = array<i64: 1, 128>}, {pipeline_mode = #tpu.pipeline_mode<synchronous>, transform_indices = @transform_36, window_bounds = array<i64: 1, 128>}, {pipeline_mode = #tpu.pipeline_mode<synchronous>, transform_indices = @transform_37, window_bounds = array<i64: 1, 128>}, {pipeline_mode = #tpu.pipeline_mode<synchronous>, transform_indices = @transform_38, window_bounds = array<i64: 1, 128>}, {pipeline_mode = #tpu.pipeline_mode<synchronous>, transform_indices = @transform_39, window_bounds = array<i64: 1, 384>}, {pipeline_mode = #tpu.pipeline_mode<synchronous>, transform_indices = @transform_40, window_bounds = array<i64: 128, 128>}, {pipeline_mode = #tpu.pipeline_mode<synchronous>, transform_indices = @transform_41, window_bounds = array<i64: 128, 384>}, {pipeline_mode = #tpu.pipeline_mode<synchronous>, transform_indices = @transform_42, window_bounds = array<i64: 8, 128>}, {pipeline_mode = #tpu.pipeline_mode<synchronous>, transform_indices = @transform_43, window_bounds = array<i64: 1, 64>}, {pipeline_mode = #tpu.pipeline_mode<synchronous>, transform_indices = @transform_44, window_bounds = array<i64: 128, 64>}, {pipeline_mode = #tpu.pipeline_mode<synchronous>, transform_indices = @transform_45, window_bounds = array<i64: 16, 128>}, {pipeline_mode = #tpu.pipeline_mode<synchronous>, transform_indices = @transform_46, window_bounds = array<i64: 16, 16>}, {pipeline_mode = #tpu.pipeline_mode<synchronous>, transform_indices = @transform_47, window_bounds = array<i64: 16, 32>}, {pipeline_mode = #tpu.pipeline_mode<synchronous>, transform_indices = @transform_48, window_bounds = array<i64: 1, 128>}, {pipeline_mode = #tpu.pipeline_mode<synchronous>, transform_indices = @transform_49, window_bounds = array<i64: 128, 128>}, {pipeline_mode = #tpu.pipeline_mode<synchronous>, transform_indices = @transform_50, window_bounds = array<i64: 1, 128>}, {pipeline_mode = #tpu.pipeline_mode<synchronous>, transform_indices = @transform_51, window_bounds = array<i64: 32, 128>}, {pipeline_mode = #tpu.pipeline_mode<synchronous>, transform_indices = @transform_52, window_bounds = array<i64: 16, 64>}]} {
    %c0 = arith.constant 0 : index
    %c0_0 = arith.constant 0 : index
    %0 = vector.load %arg2[%c0, %c0_0] : memref<16x128xf32, #tpu.memory_space<vmem>>, vector<16x128xf32>
    %1 = arith.truncf %0 : vector<16x128xf32> to vector<16x128xbf16>
    %c0_1 = arith.constant 0 : index
    %c0_2 = arith.constant 0 : index
    %2 = vector.load %arg50[%c0_1, %c0_2] : memref<128x128xbf16, #tpu.memory_space<vmem>>, vector<128x128xbf16>
    %cst = arith.constant dense<0.000000e+00> : vector<16x128xf32>
    %3 = tpu.matmul %1, %2, %cst {dimension_numbers = #tpu.dot_dimension_numbers<[1], [0], [0], [1], [0, 0, 1, 1], [], []>} : vector<16x128xbf16>, vector<128x128xbf16>, vector<16x128xf32> -> vector<16x128xf32>
    %c0_3 = arith.constant 0 : index
    %c0_4 = arith.constant 0 : index
    %4 = vector.load %arg49[%c0_3, %c0_4] : memref<1x128xf32, #tpu.memory_space<vmem>>, vector<1x128xf32>
    %5 = vector.broadcast %4 : vector<1x128xf32> to vector<16x128xf32>
    %6 = arith.addf %3, %5 : vector<16x128xf32>
    %c0_5 = arith.constant 0 : index
    %c0_6 = arith.constant 0 : index
    %7 = vector.load %arg48[%c0_5, %c0_6] : memref<16x32xf32, #tpu.memory_space<vmem>>, vector<16x32xf32>
    %8 = arith.truncf %7 : vector<16x32xf32> to vector<16x32xbf16>
    %c0_7 = arith.constant 0 : index
    %c0_8 = arith.constant 0 : index
    %9 = vector.load %arg52[%c0_7, %c0_8] : memref<32x128xbf16, #tpu.memory_space<vmem>>, vector<32x128xbf16>
    %cst_9 = arith.constant dense<0.000000e+00> : vector<16x128xf32>
    %10 = tpu.matmul %8, %9, %cst_9 {dimension_numbers = #tpu.dot_dimension_numbers<[1], [0], [0], [1], [0, 0, 1, 1], [], []>} : vector<16x32xbf16>, vector<32x128xbf16>, vector<16x128xf32> -> vector<16x128xf32>
    %c0_10 = arith.constant 0 : index
    %c0_11 = arith.constant 0 : index
    %11 = vector.load %arg51[%c0_10, %c0_11] : memref<1x128xf32, #tpu.memory_space<vmem>>, vector<1x128xf32>
    %12 = vector.broadcast %11 : vector<1x128xf32> to vector<16x128xf32>
    %13 = arith.addf %10, %12 : vector<16x128xf32>
    %14 = arith.mulf %6, %13 : vector<16x128xf32>
    %cst_12 = arith.constant 11.3137083 : f32
    %15 = vector.broadcast %cst_12 : f32 to vector<16x128xf32>
    %16 = arith.mulf %14, %15 : vector<16x128xf32>
    %c0_13 = arith.constant 0 : index
    %c0_14 = arith.constant 0 : index
    %17 = vector.load %arg46[%c0_13, %c0_14] : memref<16x128xf32, #tpu.memory_space<vmem>>, vector<16x128xf32>
    %18 = arith.addf %16, %17 : vector<16x128xf32>
    %c0_15 = arith.constant 0 : index
    %c0_16 = arith.constant 0 : index
    %19 = vector.load %arg43[%c0_15, %c0_16] : memref<8x128xf32, #tpu.memory_space<vmem>>, vector<8x128xf32>
    %c0_17 = arith.constant 0 : index
    %c0_18 = arith.constant 0 : index
    %20 = vector.load %arg47[%c0_17, %c0_18] : memref<16x16xf32, #tpu.memory_space<vmem>>, vector<16x16xf32>
    %c0_19 = arith.constant 0 : index
    %c0_20 = arith.constant 0 : index
    %21 = vector.load %arg1[%c0_19, %c0_20] : memref<16x8xf32, #tpu.memory_space<vmem>>, vector<16x8xf32>
    %22 = arith.truncf %18 : vector<16x128xf32> to vector<16x128xbf16>
    %c0_21 = arith.constant 0 : index
    %c0_22 = arith.constant 0 : index
    %23 = vector.load %arg22[%c0_21, %c0_22] : memref<128x384xbf16, #tpu.memory_space<vmem>>, vector<128x384xbf16>
    %cst_23 = arith.constant dense<0.000000e+00> : vector<16x384xf32>
    %24 = tpu.matmul %22, %23, %cst_23 {dimension_numbers = #tpu.dot_dimension_numbers<[1], [0], [0], [1], [0, 0, 1, 1], [], []>} : vector<16x128xbf16>, vector<128x384xbf16>, vector<16x384xf32> -> vector<16x384xf32>
    %c0_24 = arith.constant 0 : index
    %c0_25 = arith.constant 0 : index
    %25 = vector.load %arg20[%c0_24, %c0_25] : memref<1x384xf32, #tpu.memory_space<vmem>>, vector<1x384xf32>
    %26 = vector.broadcast %25 : vector<1x384xf32> to vector<16x384xf32>
    %27 = arith.addf %24, %26 : vector<16x384xf32>
    %28 = vector.extract_strided_slice %27 {offsets = [0, 0], sizes = [16, 128], strides = [1, 1]} : vector<16x384xf32> to vector<16x128xf32>
    %29 = vector.extract_strided_slice %27 {offsets = [0, 128], sizes = [16, 128], strides = [1, 1]} : vector<16x384xf32> to vector<16x128xf32>
    %30 = vector.extract_strided_slice %27 {offsets = [0, 256], sizes = [16, 128], strides = [1, 1]} : vector<16x384xf32> to vector<16x128xf32>
    %31 = tpu.iota {dimensions = array<i32: 1>} : vector<1x128xi32>
    %32 = arith.truncf %29 : vector<16x128xf32> to vector<16x128xbf16>
    %cst_26 = arith.constant 0.000000e+00 : f32
    %33 = vector.broadcast %cst_26 : f32 to vector<16x128xf32>
    %c0_i32 = arith.constant 0 : i32
    %34 = vector.broadcast %c0_i32 : i32 to vector<1x128xi32>
    %35 = arith.cmpi sge, %31, %34 : vector<1x128xi32>
    %c32_i32 = arith.constant 32 : i32
    %36 = vector.broadcast %c32_i32 : i32 to vector<1x128xi32>
    %37 = arith.cmpi slt, %31, %36 : vector<1x128xi32>
    %38 = arith.andi %35, %37 : vector<1x128xi1>
    %cst_27 = arith.constant 1.000000e+00 : f32
    %cst_28 = arith.constant 0.000000e+00 : f32
    %39 = vector.broadcast %cst_27 : f32 to vector<1x128xf32>
    %40 = vector.broadcast %cst_28 : f32 to vector<1x128xf32>
    %41 = arith.select %38, %39, %40 : vector<1x128xi1>, vector<1x128xf32>
    %cst_29 = arith.constant 0.176776692 : f32
    %42 = vector.broadcast %cst_29 : f32 to vector<1x128xf32>
    %43 = arith.mulf %41, %42 : vector<1x128xf32>
    %44 = vector.broadcast %43 : vector<1x128xf32> to vector<16x128xf32>
    %45 = arith.mulf %28, %44 : vector<16x128xf32>
    %46 = arith.truncf %45 : vector<16x128xf32> to vector<16x128xbf16>
    %cst_30 = arith.constant dense<0.000000e+00> : vector<16x16xf32>
    %47 = tpu.matmul %46, %32, %cst_30 {dimension_numbers = #tpu.dot_dimension_numbers<[1], [1], [0], [0], [0, 0, 1, 0], [], []>} : vector<16x128xbf16>, vector<16x128xbf16>, vector<16x16xf32> -> vector<16x16xf32>
    %48 = arith.addf %47, %20 : vector<16x16xf32>
    %cst_31 = arith.constant dense<0xFF800000> : vector<16xf32>
    %49 = vector.multi_reduction <maximumf>, %48, %cst_31 [1] : vector<16x16xf32> to vector<16xf32>
    %50 = vector.shape_cast %49 : vector<16xf32> to vector<16x1xf32>
    %51 = vector.broadcast %50 : vector<16x1xf32> to vector<16x16xf32>
    %52 = arith.subf %48, %51 : vector<16x16xf32>
    %53 = math.exp %52 : vector<16x16xf32>
    %cst_32 = arith.constant dense<0.000000e+00> : vector<16xf32>
    %54 = vector.multi_reduction <add>, %53, %cst_32 [1] : vector<16x16xf32> to vector<16xf32>
    %55 = vector.shape_cast %54 : vector<16xf32> to vector<16x1xf32>
    %56 = tpu.reciprocal %55 {approx = true} : vector<16x1xf32> -> vector<16x1xf32>
    %57 = vector.broadcast %56 : vector<16x1xf32> to vector<16x16xf32>
    %58 = arith.mulf %53, %57 : vector<16x16xf32>
    %59 = arith.truncf %58 : vector<16x16xf32> to vector<16x16xbf16>
    %60 = vector.broadcast %41 : vector<1x128xf32> to vector<16x128xf32>
    %61 = arith.mulf %30, %60 : vector<16x128xf32>
    %62 = arith.truncf %61 : vector<16x128xf32> to vector<16x128xbf16>
    %cst_33 = arith.constant dense<0.000000e+00> : vector<16x128xf32>
    %63 = tpu.matmul %59, %62, %cst_33 {dimension_numbers = #tpu.dot_dimension_numbers<[1], [0], [0], [1], [0, 0, 1, 1], [], []>} : vector<16x16xbf16>, vector<16x128xbf16>, vector<16x128xf32> -> vector<16x128xf32>
    %64 = arith.addf %33, %63 : vector<16x128xf32>
    %c32_i32_34 = arith.constant 32 : i32
    %65 = vector.broadcast %c32_i32_34 : i32 to vector<1x128xi32>
    %66 = arith.cmpi sge, %31, %65 : vector<1x128xi32>
    %c64_i32 = arith.constant 64 : i32
    %67 = vector.broadcast %c64_i32 : i32 to vector<1x128xi32>
    %68 = arith.cmpi slt, %31, %67 : vector<1x128xi32>
    %69 = arith.andi %66, %68 : vector<1x128xi1>
    %cst_35 = arith.constant 1.000000e+00 : f32
    %cst_36 = arith.constant 0.000000e+00 : f32
    %70 = vector.broadcast %cst_35 : f32 to vector<1x128xf32>
    %71 = vector.broadcast %cst_36 : f32 to vector<1x128xf32>
    %72 = arith.select %69, %70, %71 : vector<1x128xi1>, vector<1x128xf32>
    %cst_37 = arith.constant 0.176776692 : f32
    %73 = vector.broadcast %cst_37 : f32 to vector<1x128xf32>
    %74 = arith.mulf %72, %73 : vector<1x128xf32>
    %75 = vector.broadcast %74 : vector<1x128xf32> to vector<16x128xf32>
    %76 = arith.mulf %28, %75 : vector<16x128xf32>
    %77 = arith.truncf %76 : vector<16x128xf32> to vector<16x128xbf16>
    %cst_38 = arith.constant dense<0.000000e+00> : vector<16x16xf32>
    %78 = tpu.matmul %77, %32, %cst_38 {dimension_numbers = #tpu.dot_dimension_numbers<[1], [1], [0], [0], [0, 0, 1, 0], [], []>} : vector<16x128xbf16>, vector<16x128xbf16>, vector<16x16xf32> -> vector<16x16xf32>
    %79 = arith.addf %78, %20 : vector<16x16xf32>
    %cst_39 = arith.constant dense<0xFF800000> : vector<16xf32>
    %80 = vector.multi_reduction <maximumf>, %79, %cst_39 [1] : vector<16x16xf32> to vector<16xf32>
    %81 = vector.shape_cast %80 : vector<16xf32> to vector<16x1xf32>
    %82 = vector.broadcast %81 : vector<16x1xf32> to vector<16x16xf32>
    %83 = arith.subf %79, %82 : vector<16x16xf32>
    %84 = math.exp %83 : vector<16x16xf32>
    %cst_40 = arith.constant dense<0.000000e+00> : vector<16xf32>
    %85 = vector.multi_reduction <add>, %84, %cst_40 [1] : vector<16x16xf32> to vector<16xf32>
    %86 = vector.shape_cast %85 : vector<16xf32> to vector<16x1xf32>
    %87 = tpu.reciprocal %86 {approx = true} : vector<16x1xf32> -> vector<16x1xf32>
    %88 = vector.broadcast %87 : vector<16x1xf32> to vector<16x16xf32>
    %89 = arith.mulf %84, %88 : vector<16x16xf32>
    %90 = arith.truncf %89 : vector<16x16xf32> to vector<16x16xbf16>
    %91 = vector.broadcast %72 : vector<1x128xf32> to vector<16x128xf32>
    %92 = arith.mulf %30, %91 : vector<16x128xf32>
    %93 = arith.truncf %92 : vector<16x128xf32> to vector<16x128xbf16>
    %cst_41 = arith.constant dense<0.000000e+00> : vector<16x128xf32>
    %94 = tpu.matmul %90, %93, %cst_41 {dimension_numbers = #tpu.dot_dimension_numbers<[1], [0], [0], [1], [0, 0, 1, 1], [], []>} : vector<16x16xbf16>, vector<16x128xbf16>, vector<16x128xf32> -> vector<16x128xf32>
    %95 = arith.addf %64, %94 : vector<16x128xf32>
    %c64_i32_42 = arith.constant 64 : i32
    %96 = vector.broadcast %c64_i32_42 : i32 to vector<1x128xi32>
    %97 = arith.cmpi sge, %31, %96 : vector<1x128xi32>
    %c96_i32 = arith.constant 96 : i32
    %98 = vector.broadcast %c96_i32 : i32 to vector<1x128xi32>
    %99 = arith.cmpi slt, %31, %98 : vector<1x128xi32>
    %100 = arith.andi %97, %99 : vector<1x128xi1>
    %cst_43 = arith.constant 1.000000e+00 : f32
    %cst_44 = arith.constant 0.000000e+00 : f32
    %101 = vector.broadcast %cst_43 : f32 to vector<1x128xf32>
    %102 = vector.broadcast %cst_44 : f32 to vector<1x128xf32>
    %103 = arith.select %100, %101, %102 : vector<1x128xi1>, vector<1x128xf32>
    %cst_45 = arith.constant 0.176776692 : f32
    %104 = vector.broadcast %cst_45 : f32 to vector<1x128xf32>
    %105 = arith.mulf %103, %104 : vector<1x128xf32>
    %106 = vector.broadcast %105 : vector<1x128xf32> to vector<16x128xf32>
    %107 = arith.mulf %28, %106 : vector<16x128xf32>
    %108 = arith.truncf %107 : vector<16x128xf32> to vector<16x128xbf16>
    %cst_46 = arith.constant dense<0.000000e+00> : vector<16x16xf32>
    %109 = tpu.matmul %108, %32, %cst_46 {dimension_numbers = #tpu.dot_dimension_numbers<[1], [1], [0], [0], [0, 0, 1, 0], [], []>} : vector<16x128xbf16>, vector<16x128xbf16>, vector<16x16xf32> -> vector<16x16xf32>
    %110 = arith.addf %109, %20 : vector<16x16xf32>
    %cst_47 = arith.constant dense<0xFF800000> : vector<16xf32>
    %111 = vector.multi_reduction <maximumf>, %110, %cst_47 [1] : vector<16x16xf32> to vector<16xf32>
    %112 = vector.shape_cast %111 : vector<16xf32> to vector<16x1xf32>
    %113 = vector.broadcast %112 : vector<16x1xf32> to vector<16x16xf32>
    %114 = arith.subf %110, %113 : vector<16x16xf32>
    %115 = math.exp %114 : vector<16x16xf32>
    %cst_48 = arith.constant dense<0.000000e+00> : vector<16xf32>
    %116 = vector.multi_reduction <add>, %115, %cst_48 [1] : vector<16x16xf32> to vector<16xf32>
    %117 = vector.shape_cast %116 : vector<16xf32> to vector<16x1xf32>
    %118 = tpu.reciprocal %117 {approx = true} : vector<16x1xf32> -> vector<16x1xf32>
    %119 = vector.broadcast %118 : vector<16x1xf32> to vector<16x16xf32>
    %120 = arith.mulf %115, %119 : vector<16x16xf32>
    %121 = arith.truncf %120 : vector<16x16xf32> to vector<16x16xbf16>
    %122 = vector.broadcast %103 : vector<1x128xf32> to vector<16x128xf32>
    %123 = arith.mulf %30, %122 : vector<16x128xf32>
    %124 = arith.truncf %123 : vector<16x128xf32> to vector<16x128xbf16>
    %cst_49 = arith.constant dense<0.000000e+00> : vector<16x128xf32>
    %125 = tpu.matmul %121, %124, %cst_49 {dimension_numbers = #tpu.dot_dimension_numbers<[1], [0], [0], [1], [0, 0, 1, 1], [], []>} : vector<16x16xbf16>, vector<16x128xbf16>, vector<16x128xf32> -> vector<16x128xf32>
    %126 = arith.addf %95, %125 : vector<16x128xf32>
    %c96_i32_50 = arith.constant 96 : i32
    %127 = vector.broadcast %c96_i32_50 : i32 to vector<1x128xi32>
    %128 = arith.cmpi sge, %31, %127 : vector<1x128xi32>
    %c128_i32 = arith.constant 128 : i32
    %129 = vector.broadcast %c128_i32 : i32 to vector<1x128xi32>
    %130 = arith.cmpi slt, %31, %129 : vector<1x128xi32>
    %131 = arith.andi %128, %130 : vector<1x128xi1>
    %cst_51 = arith.constant 1.000000e+00 : f32
    %cst_52 = arith.constant 0.000000e+00 : f32
    %132 = vector.broadcast %cst_51 : f32 to vector<1x128xf32>
    %133 = vector.broadcast %cst_52 : f32 to vector<1x128xf32>
    %134 = arith.select %131, %132, %133 : vector<1x128xi1>, vector<1x128xf32>
    %cst_53 = arith.constant 0.176776692 : f32
    %135 = vector.broadcast %cst_53 : f32 to vector<1x128xf32>
    %136 = arith.mulf %134, %135 : vector<1x128xf32>
    %137 = vector.broadcast %136 : vector<1x128xf32> to vector<16x128xf32>
    %138 = arith.mulf %28, %137 : vector<16x128xf32>
    %139 = arith.truncf %138 : vector<16x128xf32> to vector<16x128xbf16>
    %cst_54 = arith.constant dense<0.000000e+00> : vector<16x16xf32>
    %140 = tpu.matmul %139, %32, %cst_54 {dimension_numbers = #tpu.dot_dimension_numbers<[1], [1], [0], [0], [0, 0, 1, 0], [], []>} : vector<16x128xbf16>, vector<16x128xbf16>, vector<16x16xf32> -> vector<16x16xf32>
    %141 = arith.addf %140, %20 : vector<16x16xf32>
    %cst_55 = arith.constant dense<0xFF800000> : vector<16xf32>
    %142 = vector.multi_reduction <maximumf>, %141, %cst_55 [1] : vector<16x16xf32> to vector<16xf32>
    %143 = vector.shape_cast %142 : vector<16xf32> to vector<16x1xf32>
    %144 = vector.broadcast %143 : vector<16x1xf32> to vector<16x16xf32>
    %145 = arith.subf %141, %144 : vector<16x16xf32>
    %146 = math.exp %145 : vector<16x16xf32>
    %cst_56 = arith.constant dense<0.000000e+00> : vector<16xf32>
    %147 = vector.multi_reduction <add>, %146, %cst_56 [1] : vector<16x16xf32> to vector<16xf32>
    %148 = vector.shape_cast %147 : vector<16xf32> to vector<16x1xf32>
    %149 = tpu.reciprocal %148 {approx = true} : vector<16x1xf32> -> vector<16x1xf32>
    %150 = vector.broadcast %149 : vector<16x1xf32> to vector<16x16xf32>
    %151 = arith.mulf %146, %150 : vector<16x16xf32>
    %152 = arith.truncf %151 : vector<16x16xf32> to vector<16x16xbf16>
    %153 = vector.broadcast %134 : vector<1x128xf32> to vector<16x128xf32>
    %154 = arith.mulf %30, %153 : vector<16x128xf32>
    %155 = arith.truncf %154 : vector<16x128xf32> to vector<16x128xbf16>
    %cst_57 = arith.constant dense<0.000000e+00> : vector<16x128xf32>
    %156 = tpu.matmul %152, %155, %cst_57 {dimension_numbers = #tpu.dot_dimension_numbers<[1], [0], [0], [1], [0, 0, 1, 1], [], []>} : vector<16x16xbf16>, vector<16x128xbf16>, vector<16x128xf32> -> vector<16x128xf32>
    %157 = arith.addf %126, %156 : vector<16x128xf32>
    %158 = arith.truncf %157 : vector<16x128xf32> to vector<16x128xbf16>
    %c0_58 = arith.constant 0 : index
    %c0_59 = arith.constant 0 : index
    %159 = vector.load %arg21[%c0_58, %c0_59] : memref<128x128xbf16, #tpu.memory_space<vmem>>, vector<128x128xbf16>
    %cst_60 = arith.constant dense<0.000000e+00> : vector<16x128xf32>
    %160 = tpu.matmul %158, %159, %cst_60 {dimension_numbers = #tpu.dot_dimension_numbers<[1], [0], [0], [1], [0, 0, 1, 1], [], []>} : vector<16x128xbf16>, vector<128x128xbf16>, vector<16x128xf32> -> vector<16x128xf32>
    %c0_61 = arith.constant 0 : index
    %c0_62 = arith.constant 0 : index
    %161 = vector.load %arg19[%c0_61, %c0_62] : memref<1x128xf32, #tpu.memory_space<vmem>>, vector<1x128xf32>
    %162 = vector.broadcast %161 : vector<1x128xf32> to vector<16x128xf32>
    %163 = arith.addf %160, %162 : vector<16x128xf32>
    %164 = arith.addf %18, %163 : vector<16x128xf32>
    %cst_63 = arith.constant dense<0.000000e+00> : vector<16xf32>
    %165 = vector.multi_reduction <add>, %164, %cst_63 [1] : vector<16x128xf32> to vector<16xf32>
    %166 = vector.shape_cast %165 : vector<16xf32> to vector<16x1xf32>
    %cst_64 = arith.constant 1.280000e+02 : f32
    %167 = vector.broadcast %cst_64 : f32 to vector<16x1xf32>
    %168 = arith.divf %166, %167 : vector<16x1xf32>
    %169 = vector.broadcast %168 : vector<16x1xf32> to vector<16x128xf32>
    %170 = arith.subf %164, %169 : vector<16x128xf32>
    %171 = arith.mulf %170, %170 : vector<16x128xf32>
    %cst_65 = arith.constant dense<0.000000e+00> : vector<16xf32>
    %172 = vector.multi_reduction <add>, %171, %cst_65 [1] : vector<16x128xf32> to vector<16xf32>
    %173 = vector.shape_cast %172 : vector<16xf32> to vector<16x1xf32>
    %cst_66 = arith.constant 1.280000e+02 : f32
    %174 = vector.broadcast %cst_66 : f32 to vector<16x1xf32>
    %175 = arith.divf %173, %174 : vector<16x1xf32>
    %176 = vector.broadcast %168 : vector<16x1xf32> to vector<16x128xf32>
    %177 = arith.subf %164, %176 : vector<16x128xf32>
    %cst_67 = arith.constant 9.99999974E-6 : f32
    %178 = vector.broadcast %cst_67 : f32 to vector<16x1xf32>
    %179 = arith.addf %175, %178 : vector<16x1xf32>
    %180 = math.rsqrt %179 : vector<16x1xf32>
    %181 = vector.broadcast %180 : vector<16x1xf32> to vector<16x128xf32>
    %182 = arith.mulf %177, %181 : vector<16x128xf32>
    %c0_68 = arith.constant 0 : index
    %c0_69 = arith.constant 0 : index
    %183 = vector.load %arg14[%c0_68, %c0_69] : memref<1x128xf32, #tpu.memory_space<vmem>>, vector<1x128xf32>
    %184 = vector.broadcast %183 : vector<1x128xf32> to vector<16x128xf32>
    %185 = arith.mulf %182, %184 : vector<16x128xf32>
    %c0_70 = arith.constant 0 : index
    %c0_71 = arith.constant 0 : index
    %186 = vector.load %arg13[%c0_70, %c0_71] : memref<1x128xf32, #tpu.memory_space<vmem>>, vector<1x128xf32>
    %187 = vector.broadcast %186 : vector<1x128xf32> to vector<16x128xf32>
    %188 = arith.addf %185, %187 : vector<16x128xf32>
    %189 = arith.truncf %188 : vector<16x128xf32> to vector<16x128xbf16>
    %c0_72 = arith.constant 0 : index
    %c0_73 = arith.constant 0 : index
    %190 = vector.load %arg8[%c0_72, %c0_73] : memref<128x128xbf16, #tpu.memory_space<vmem>>, vector<128x128xbf16>
    %cst_74 = arith.constant dense<0.000000e+00> : vector<16x128xf32>
    %191 = tpu.matmul %189, %190, %cst_74 {dimension_numbers = #tpu.dot_dimension_numbers<[1], [0], [0], [1], [0, 0, 1, 1], [], []>} : vector<16x128xbf16>, vector<128x128xbf16>, vector<16x128xf32> -> vector<16x128xf32>
    %c0_75 = arith.constant 0 : index
    %c0_76 = arith.constant 0 : index
    %192 = vector.load %arg5[%c0_75, %c0_76] : memref<1x128xf32, #tpu.memory_space<vmem>>, vector<1x128xf32>
    %193 = vector.broadcast %192 : vector<1x128xf32> to vector<16x128xf32>
    %194 = arith.addf %191, %193 : vector<16x128xf32>
    %195 = arith.truncf %19 : vector<8x128xf32> to vector<8x128xbf16>
    %c0_77 = arith.constant 0 : index
    %c0_78 = arith.constant 0 : index
    %196 = vector.load %arg6[%c0_77, %c0_78] : memref<128x256xbf16, #tpu.memory_space<vmem>>, vector<128x256xbf16>
    %cst_79 = arith.constant dense<0.000000e+00> : vector<8x256xf32>
    %197 = tpu.matmul %195, %196, %cst_79 {dimension_numbers = #tpu.dot_dimension_numbers<[1], [0], [0], [1], [0, 0, 1, 1], [], []>} : vector<8x128xbf16>, vector<128x256xbf16>, vector<8x256xf32> -> vector<8x256xf32>
    %c0_80 = arith.constant 0 : index
    %c0_81 = arith.constant 0 : index
    %198 = vector.load %arg3[%c0_80, %c0_81] : memref<1x256xf32, #tpu.memory_space<vmem>>, vector<1x256xf32>
    %199 = vector.broadcast %198 : vector<1x256xf32> to vector<8x256xf32>
    %200 = arith.addf %197, %199 : vector<8x256xf32>
    %201 = vector.extract_strided_slice %200 {offsets = [0, 0], sizes = [8, 128], strides = [1, 1]} : vector<8x256xf32> to vector<8x128xf32>
    %202 = vector.extract_strided_slice %200 {offsets = [0, 128], sizes = [8, 128], strides = [1, 1]} : vector<8x256xf32> to vector<8x128xf32>
    %203 = tpu.iota {dimensions = array<i32: 1>} : vector<1x128xi32>
    %204 = arith.truncf %201 : vector<8x128xf32> to vector<8x128xbf16>
    %cst_82 = arith.constant 0.000000e+00 : f32
    %205 = vector.broadcast %cst_82 : f32 to vector<16x128xf32>
    %c0_i32_83 = arith.constant 0 : i32
    %206 = vector.broadcast %c0_i32_83 : i32 to vector<1x128xi32>
    %207 = arith.cmpi sge, %203, %206 : vector<1x128xi32>
    %c32_i32_84 = arith.constant 32 : i32
    %208 = vector.broadcast %c32_i32_84 : i32 to vector<1x128xi32>
    %209 = arith.cmpi slt, %203, %208 : vector<1x128xi32>
    %210 = arith.andi %207, %209 : vector<1x128xi1>
    %cst_85 = arith.constant 1.000000e+00 : f32
    %cst_86 = arith.constant 0.000000e+00 : f32
    %211 = vector.broadcast %cst_85 : f32 to vector<1x128xf32>
    %212 = vector.broadcast %cst_86 : f32 to vector<1x128xf32>
    %213 = arith.select %210, %211, %212 : vector<1x128xi1>, vector<1x128xf32>
    %cst_87 = arith.constant 0.176776692 : f32
    %214 = vector.broadcast %cst_87 : f32 to vector<1x128xf32>
    %215 = arith.mulf %213, %214 : vector<1x128xf32>
    %216 = vector.broadcast %215 : vector<1x128xf32> to vector<16x128xf32>
    %217 = arith.mulf %194, %216 : vector<16x128xf32>
    %218 = arith.truncf %217 : vector<16x128xf32> to vector<16x128xbf16>
    %cst_88 = arith.constant dense<0.000000e+00> : vector<16x8xf32>
    %219 = tpu.matmul %218, %204, %cst_88 {dimension_numbers = #tpu.dot_dimension_numbers<[1], [1], [0], [0], [0, 0, 1, 0], [], []>} : vector<16x128xbf16>, vector<8x128xbf16>, vector<16x8xf32> -> vector<16x8xf32>
    %220 = arith.addf %219, %21 : vector<16x8xf32>
    %cst_89 = arith.constant dense<0xFF800000> : vector<16xf32>
    %221 = vector.multi_reduction <maximumf>, %220, %cst_89 [1] : vector<16x8xf32> to vector<16xf32>
    %222 = vector.shape_cast %221 : vector<16xf32> to vector<16x1xf32>
    %223 = vector.broadcast %222 : vector<16x1xf32> to vector<16x8xf32>
    %224 = arith.subf %220, %223 : vector<16x8xf32>
    %225 = math.exp %224 : vector<16x8xf32>
    %cst_90 = arith.constant dense<0.000000e+00> : vector<16xf32>
    %226 = vector.multi_reduction <add>, %225, %cst_90 [1] : vector<16x8xf32> to vector<16xf32>
    %227 = vector.shape_cast %226 : vector<16xf32> to vector<16x1xf32>
    %228 = tpu.reciprocal %227 {approx = true} : vector<16x1xf32> -> vector<16x1xf32>
    %229 = vector.broadcast %228 : vector<16x1xf32> to vector<16x8xf32>
    %230 = arith.mulf %225, %229 : vector<16x8xf32>
    %231 = arith.truncf %230 : vector<16x8xf32> to vector<16x8xbf16>
    %232 = vector.broadcast %213 : vector<1x128xf32> to vector<8x128xf32>
    %233 = arith.mulf %202, %232 : vector<8x128xf32>
    %234 = arith.truncf %233 : vector<8x128xf32> to vector<8x128xbf16>
    %cst_91 = arith.constant dense<0.000000e+00> : vector<16x128xf32>
    %235 = tpu.matmul %231, %234, %cst_91 {dimension_numbers = #tpu.dot_dimension_numbers<[1], [0], [0], [1], [0, 0, 1, 1], [], []>} : vector<16x8xbf16>, vector<8x128xbf16>, vector<16x128xf32> -> vector<16x128xf32>
    %236 = arith.addf %205, %235 : vector<16x128xf32>
    %c32_i32_92 = arith.constant 32 : i32
    %237 = vector.broadcast %c32_i32_92 : i32 to vector<1x128xi32>
    %238 = arith.cmpi sge, %203, %237 : vector<1x128xi32>
    %c64_i32_93 = arith.constant 64 : i32
    %239 = vector.broadcast %c64_i32_93 : i32 to vector<1x128xi32>
    %240 = arith.cmpi slt, %203, %239 : vector<1x128xi32>
    %241 = arith.andi %238, %240 : vector<1x128xi1>
    %cst_94 = arith.constant 1.000000e+00 : f32
    %cst_95 = arith.constant 0.000000e+00 : f32
    %242 = vector.broadcast %cst_94 : f32 to vector<1x128xf32>
    %243 = vector.broadcast %cst_95 : f32 to vector<1x128xf32>
    %244 = arith.select %241, %242, %243 : vector<1x128xi1>, vector<1x128xf32>
    %cst_96 = arith.constant 0.176776692 : f32
    %245 = vector.broadcast %cst_96 : f32 to vector<1x128xf32>
    %246 = arith.mulf %244, %245 : vector<1x128xf32>
    %247 = vector.broadcast %246 : vector<1x128xf32> to vector<16x128xf32>
    %248 = arith.mulf %194, %247 : vector<16x128xf32>
    %249 = arith.truncf %248 : vector<16x128xf32> to vector<16x128xbf16>
    %cst_97 = arith.constant dense<0.000000e+00> : vector<16x8xf32>
    %250 = tpu.matmul %249, %204, %cst_97 {dimension_numbers = #tpu.dot_dimension_numbers<[1], [1], [0], [0], [0, 0, 1, 0], [], []>} : vector<16x128xbf16>, vector<8x128xbf16>, vector<16x8xf32> -> vector<16x8xf32>
    %251 = arith.addf %250, %21 : vector<16x8xf32>
    %cst_98 = arith.constant dense<0xFF800000> : vector<16xf32>
    %252 = vector.multi_reduction <maximumf>, %251, %cst_98 [1] : vector<16x8xf32> to vector<16xf32>
    %253 = vector.shape_cast %252 : vector<16xf32> to vector<16x1xf32>
    %254 = vector.broadcast %253 : vector<16x1xf32> to vector<16x8xf32>
    %255 = arith.subf %251, %254 : vector<16x8xf32>
    %256 = math.exp %255 : vector<16x8xf32>
    %cst_99 = arith.constant dense<0.000000e+00> : vector<16xf32>
    %257 = vector.multi_reduction <add>, %256, %cst_99 [1] : vector<16x8xf32> to vector<16xf32>
    %258 = vector.shape_cast %257 : vector<16xf32> to vector<16x1xf32>
    %259 = tpu.reciprocal %258 {approx = true} : vector<16x1xf32> -> vector<16x1xf32>
    %260 = vector.broadcast %259 : vector<16x1xf32> to vector<16x8xf32>
    %261 = arith.mulf %256, %260 : vector<16x8xf32>
    %262 = arith.truncf %261 : vector<16x8xf32> to vector<16x8xbf16>
    %263 = vector.broadcast %244 : vector<1x128xf32> to vector<8x128xf32>
    %264 = arith.mulf %202, %263 : vector<8x128xf32>
    %265 = arith.truncf %264 : vector<8x128xf32> to vector<8x128xbf16>
    %cst_100 = arith.constant dense<0.000000e+00> : vector<16x128xf32>
    %266 = tpu.matmul %262, %265, %cst_100 {dimension_numbers = #tpu.dot_dimension_numbers<[1], [0], [0], [1], [0, 0, 1, 1], [], []>} : vector<16x8xbf16>, vector<8x128xbf16>, vector<16x128xf32> -> vector<16x128xf32>
    %267 = arith.addf %236, %266 : vector<16x128xf32>
    %c64_i32_101 = arith.constant 64 : i32
    %268 = vector.broadcast %c64_i32_101 : i32 to vector<1x128xi32>
    %269 = arith.cmpi sge, %203, %268 : vector<1x128xi32>
    %c96_i32_102 = arith.constant 96 : i32
    %270 = vector.broadcast %c96_i32_102 : i32 to vector<1x128xi32>
    %271 = arith.cmpi slt, %203, %270 : vector<1x128xi32>
    %272 = arith.andi %269, %271 : vector<1x128xi1>
    %cst_103 = arith.constant 1.000000e+00 : f32
    %cst_104 = arith.constant 0.000000e+00 : f32
    %273 = vector.broadcast %cst_103 : f32 to vector<1x128xf32>
    %274 = vector.broadcast %cst_104 : f32 to vector<1x128xf32>
    %275 = arith.select %272, %273, %274 : vector<1x128xi1>, vector<1x128xf32>
    %cst_105 = arith.constant 0.176776692 : f32
    %276 = vector.broadcast %cst_105 : f32 to vector<1x128xf32>
    %277 = arith.mulf %275, %276 : vector<1x128xf32>
    %278 = vector.broadcast %277 : vector<1x128xf32> to vector<16x128xf32>
    %279 = arith.mulf %194, %278 : vector<16x128xf32>
    %280 = arith.truncf %279 : vector<16x128xf32> to vector<16x128xbf16>
    %cst_106 = arith.constant dense<0.000000e+00> : vector<16x8xf32>
    %281 = tpu.matmul %280, %204, %cst_106 {dimension_numbers = #tpu.dot_dimension_numbers<[1], [1], [0], [0], [0, 0, 1, 0], [], []>} : vector<16x128xbf16>, vector<8x128xbf16>, vector<16x8xf32> -> vector<16x8xf32>
    %282 = arith.addf %281, %21 : vector<16x8xf32>
    %cst_107 = arith.constant dense<0xFF800000> : vector<16xf32>
    %283 = vector.multi_reduction <maximumf>, %282, %cst_107 [1] : vector<16x8xf32> to vector<16xf32>
    %284 = vector.shape_cast %283 : vector<16xf32> to vector<16x1xf32>
    %285 = vector.broadcast %284 : vector<16x1xf32> to vector<16x8xf32>
    %286 = arith.subf %282, %285 : vector<16x8xf32>
    %287 = math.exp %286 : vector<16x8xf32>
    %cst_108 = arith.constant dense<0.000000e+00> : vector<16xf32>
    %288 = vector.multi_reduction <add>, %287, %cst_108 [1] : vector<16x8xf32> to vector<16xf32>
    %289 = vector.shape_cast %288 : vector<16xf32> to vector<16x1xf32>
    %290 = tpu.reciprocal %289 {approx = true} : vector<16x1xf32> -> vector<16x1xf32>
    %291 = vector.broadcast %290 : vector<16x1xf32> to vector<16x8xf32>
    %292 = arith.mulf %287, %291 : vector<16x8xf32>
    %293 = arith.truncf %292 : vector<16x8xf32> to vector<16x8xbf16>
    %294 = vector.broadcast %275 : vector<1x128xf32> to vector<8x128xf32>
    %295 = arith.mulf %202, %294 : vector<8x128xf32>
    %296 = arith.truncf %295 : vector<8x128xf32> to vector<8x128xbf16>
    %cst_109 = arith.constant dense<0.000000e+00> : vector<16x128xf32>
    %297 = tpu.matmul %293, %296, %cst_109 {dimension_numbers = #tpu.dot_dimension_numbers<[1], [0], [0], [1], [0, 0, 1, 1], [], []>} : vector<16x8xbf16>, vector<8x128xbf16>, vector<16x128xf32> -> vector<16x128xf32>
    %298 = arith.addf %267, %297 : vector<16x128xf32>
    %c96_i32_110 = arith.constant 96 : i32
    %299 = vector.broadcast %c96_i32_110 : i32 to vector<1x128xi32>
    %300 = arith.cmpi sge, %203, %299 : vector<1x128xi32>
    %c128_i32_111 = arith.constant 128 : i32
    %301 = vector.broadcast %c128_i32_111 : i32 to vector<1x128xi32>
    %302 = arith.cmpi slt, %203, %301 : vector<1x128xi32>
    %303 = arith.andi %300, %302 : vector<1x128xi1>
    %cst_112 = arith.constant 1.000000e+00 : f32
    %cst_113 = arith.constant 0.000000e+00 : f32
    %304 = vector.broadcast %cst_112 : f32 to vector<1x128xf32>
    %305 = vector.broadcast %cst_113 : f32 to vector<1x128xf32>
    %306 = arith.select %303, %304, %305 : vector<1x128xi1>, vector<1x128xf32>
    %cst_114 = arith.constant 0.176776692 : f32
    %307 = vector.broadcast %cst_114 : f32 to vector<1x128xf32>
    %308 = arith.mulf %306, %307 : vector<1x128xf32>
    %309 = vector.broadcast %308 : vector<1x128xf32> to vector<16x128xf32>
    %310 = arith.mulf %194, %309 : vector<16x128xf32>
    %311 = arith.truncf %310 : vector<16x128xf32> to vector<16x128xbf16>
    %cst_115 = arith.constant dense<0.000000e+00> : vector<16x8xf32>
    %312 = tpu.matmul %311, %204, %cst_115 {dimension_numbers = #tpu.dot_dimension_numbers<[1], [1], [0], [0], [0, 0, 1, 0], [], []>} : vector<16x128xbf16>, vector<8x128xbf16>, vector<16x8xf32> -> vector<16x8xf32>
    %313 = arith.addf %312, %21 : vector<16x8xf32>
    %cst_116 = arith.constant dense<0xFF800000> : vector<16xf32>
    %314 = vector.multi_reduction <maximumf>, %313, %cst_116 [1] : vector<16x8xf32> to vector<16xf32>
    %315 = vector.shape_cast %314 : vector<16xf32> to vector<16x1xf32>
    %316 = vector.broadcast %315 : vector<16x1xf32> to vector<16x8xf32>
    %317 = arith.subf %313, %316 : vector<16x8xf32>
    %318 = math.exp %317 : vector<16x8xf32>
    %cst_117 = arith.constant dense<0.000000e+00> : vector<16xf32>
    %319 = vector.multi_reduction <add>, %318, %cst_117 [1] : vector<16x8xf32> to vector<16xf32>
    %320 = vector.shape_cast %319 : vector<16xf32> to vector<16x1xf32>
    %321 = tpu.reciprocal %320 {approx = true} : vector<16x1xf32> -> vector<16x1xf32>
    %322 = vector.broadcast %321 : vector<16x1xf32> to vector<16x8xf32>
    %323 = arith.mulf %318, %322 : vector<16x8xf32>
    %324 = arith.truncf %323 : vector<16x8xf32> to vector<16x8xbf16>
    %325 = vector.broadcast %306 : vector<1x128xf32> to vector<8x128xf32>
    %326 = arith.mulf %202, %325 : vector<8x128xf32>
    %327 = arith.truncf %326 : vector<8x128xf32> to vector<8x128xbf16>
    %cst_118 = arith.constant dense<0.000000e+00> : vector<16x128xf32>
    %328 = tpu.matmul %324, %327, %cst_118 {dimension_numbers = #tpu.dot_dimension_numbers<[1], [0], [0], [1], [0, 0, 1, 1], [], []>} : vector<16x8xbf16>, vector<8x128xbf16>, vector<16x128xf32> -> vector<16x128xf32>
    %329 = arith.addf %298, %328 : vector<16x128xf32>
    %330 = arith.truncf %329 : vector<16x128xf32> to vector<16x128xbf16>
    %c0_119 = arith.constant 0 : index
    %c0_120 = arith.constant 0 : index
    %331 = vector.load %arg7[%c0_119, %c0_120] : memref<128x128xbf16, #tpu.memory_space<vmem>>, vector<128x128xbf16>
    %cst_121 = arith.constant dense<0.000000e+00> : vector<16x128xf32>
    %332 = tpu.matmul %330, %331, %cst_121 {dimension_numbers = #tpu.dot_dimension_numbers<[1], [0], [0], [1], [0, 0, 1, 1], [], []>} : vector<16x128xbf16>, vector<128x128xbf16>, vector<16x128xf32> -> vector<16x128xf32>
    %c0_122 = arith.constant 0 : index
    %c0_123 = arith.constant 0 : index
    %333 = vector.load %arg4[%c0_122, %c0_123] : memref<1x128xf32, #tpu.memory_space<vmem>>, vector<1x128xf32>
    %334 = vector.broadcast %333 : vector<1x128xf32> to vector<16x128xf32>
    %335 = arith.addf %332, %334 : vector<16x128xf32>
    %336 = arith.addf %188, %335 : vector<16x128xf32>
    %cst_124 = arith.constant dense<0.000000e+00> : vector<16xf32>
    %337 = vector.multi_reduction <add>, %336, %cst_124 [1] : vector<16x128xf32> to vector<16xf32>
    %338 = vector.shape_cast %337 : vector<16xf32> to vector<16x1xf32>
    %cst_125 = arith.constant 1.280000e+02 : f32
    %339 = vector.broadcast %cst_125 : f32 to vector<16x1xf32>
    %340 = arith.divf %338, %339 : vector<16x1xf32>
    %341 = vector.broadcast %340 : vector<16x1xf32> to vector<16x128xf32>
    %342 = arith.subf %336, %341 : vector<16x128xf32>
    %343 = arith.mulf %342, %342 : vector<16x128xf32>
    %cst_126 = arith.constant dense<0.000000e+00> : vector<16xf32>
    %344 = vector.multi_reduction <add>, %343, %cst_126 [1] : vector<16x128xf32> to vector<16xf32>
    %345 = vector.shape_cast %344 : vector<16xf32> to vector<16x1xf32>
    %cst_127 = arith.constant 1.280000e+02 : f32
    %346 = vector.broadcast %cst_127 : f32 to vector<16x1xf32>
    %347 = arith.divf %345, %346 : vector<16x1xf32>
    %348 = vector.broadcast %340 : vector<16x1xf32> to vector<16x128xf32>
    %349 = arith.subf %336, %348 : vector<16x128xf32>
    %cst_128 = arith.constant 9.99999974E-6 : f32
    %350 = vector.broadcast %cst_128 : f32 to vector<16x1xf32>
    %351 = arith.addf %347, %350 : vector<16x1xf32>
    %352 = math.rsqrt %351 : vector<16x1xf32>
    %353 = vector.broadcast %352 : vector<16x1xf32> to vector<16x128xf32>
    %354 = arith.mulf %349, %353 : vector<16x128xf32>
    %c0_129 = arith.constant 0 : index
    %c0_130 = arith.constant 0 : index
    %355 = vector.load %arg16[%c0_129, %c0_130] : memref<1x128xf32, #tpu.memory_space<vmem>>, vector<1x128xf32>
    %356 = vector.broadcast %355 : vector<1x128xf32> to vector<16x128xf32>
    %357 = arith.mulf %354, %356 : vector<16x128xf32>
    %c0_131 = arith.constant 0 : index
    %c0_132 = arith.constant 0 : index
    %358 = vector.load %arg15[%c0_131, %c0_132] : memref<1x128xf32, #tpu.memory_space<vmem>>, vector<1x128xf32>
    %359 = vector.broadcast %358 : vector<1x128xf32> to vector<16x128xf32>
    %360 = arith.addf %357, %359 : vector<16x128xf32>
    %361 = arith.truncf %360 : vector<16x128xf32> to vector<16x128xbf16>
    %c0_133 = arith.constant 0 : index
    %c0_134 = arith.constant 0 : index
    %362 = vector.load %arg10[%c0_133, %c0_134] : memref<128x256xbf16, #tpu.memory_space<vmem>>, vector<128x256xbf16>
    %cst_135 = arith.constant dense<0.000000e+00> : vector<16x256xf32>
    %363 = tpu.matmul %361, %362, %cst_135 {dimension_numbers = #tpu.dot_dimension_numbers<[1], [0], [0], [1], [0, 0, 1, 1], [], []>} : vector<16x128xbf16>, vector<128x256xbf16>, vector<16x256xf32> -> vector<16x256xf32>
    %c0_136 = arith.constant 0 : index
    %c0_137 = arith.constant 0 : index
    %364 = vector.load %arg9[%c0_136, %c0_137] : memref<1x256xf32, #tpu.memory_space<vmem>>, vector<1x256xf32>
    %365 = vector.broadcast %364 : vector<1x256xf32> to vector<16x256xf32>
    %366 = arith.addf %363, %365 : vector<16x256xf32>
    %367 = math.absf %366 : vector<16x256xf32>
    %cst_138 = arith.constant 0.707106769 : f32
    %368 = vector.broadcast %cst_138 : f32 to vector<16x256xf32>
    %369 = arith.mulf %367, %368 : vector<16x256xf32>
    %cst_139 = arith.constant 0.000000e+00 : f32
    %370 = vector.broadcast %cst_139 : f32 to vector<16x256xf32>
    %371 = arith.cmpf oge, %366, %370 : vector<16x256xf32>
    %cst_140 = arith.constant 1.000000e+00 : f32
    %cst_141 = arith.constant -1.000000e+00 : f32
    %372 = vector.broadcast %cst_140 : f32 to vector<16x256xf32>
    %373 = vector.broadcast %cst_141 : f32 to vector<16x256xf32>
    %374 = arith.select %371, %372, %373 : vector<16x256xi1>, vector<16x256xf32>
    %cst_142 = arith.constant 0.327591091 : f32
    %375 = vector.broadcast %cst_142 : f32 to vector<16x256xf32>
    %376 = arith.mulf %375, %369 : vector<16x256xf32>
    %cst_143 = arith.constant 1.000000e+00 : f32
    %377 = vector.broadcast %cst_143 : f32 to vector<16x256xf32>
    %378 = arith.addf %377, %376 : vector<16x256xf32>
    %cst_144 = arith.constant 1.000000e+00 : f32
    %379 = vector.broadcast %cst_144 : f32 to vector<16x256xf32>
    %380 = arith.divf %379, %378 : vector<16x256xf32>
    %cst_145 = arith.constant 1.06140542 : f32
    %381 = vector.broadcast %cst_145 : f32 to vector<16x256xf32>
    %382 = arith.mulf %381, %380 : vector<16x256xf32>
    %cst_146 = arith.constant 1.45315206 : f32
    %383 = vector.broadcast %cst_146 : f32 to vector<16x256xf32>
    %384 = arith.subf %382, %383 : vector<16x256xf32>
    %385 = arith.mulf %384, %380 : vector<16x256xf32>
    %cst_147 = arith.constant 1.42141378 : f32
    %386 = vector.broadcast %cst_147 : f32 to vector<16x256xf32>
    %387 = arith.addf %385, %386 : vector<16x256xf32>
    %388 = arith.mulf %387, %380 : vector<16x256xf32>
    %cst_148 = arith.constant 0.284496725 : f32
    %389 = vector.broadcast %cst_148 : f32 to vector<16x256xf32>
    %390 = arith.subf %388, %389 : vector<16x256xf32>
    %391 = arith.mulf %390, %380 : vector<16x256xf32>
    %cst_149 = arith.constant 0.254829586 : f32
    %392 = vector.broadcast %cst_149 : f32 to vector<16x256xf32>
    %393 = arith.addf %391, %392 : vector<16x256xf32>
    %394 = arith.mulf %393, %380 : vector<16x256xf32>
    %cst_150 = arith.constant 0.000000e+00 : f32
    %395 = vector.broadcast %cst_150 : f32 to vector<16x256xf32>
    %396 = arith.subf %395, %369 : vector<16x256xf32>
    %397 = arith.mulf %396, %369 : vector<16x256xf32>
    %398 = math.exp %397 : vector<16x256xf32>
    %399 = arith.mulf %394, %398 : vector<16x256xf32>
    %cst_151 = arith.constant 1.000000e+00 : f32
    %400 = vector.broadcast %cst_151 : f32 to vector<16x256xf32>
    %401 = arith.subf %400, %399 : vector<16x256xf32>
    %402 = arith.mulf %374, %401 : vector<16x256xf32>
    %cst_152 = arith.constant 5.000000e-01 : f32
    %403 = vector.broadcast %cst_152 : f32 to vector<16x256xf32>
    %404 = arith.mulf %403, %366 : vector<16x256xf32>
    %cst_153 = arith.constant 1.000000e+00 : f32
    %405 = vector.broadcast %cst_153 : f32 to vector<16x256xf32>
    %406 = arith.addf %405, %402 : vector<16x256xf32>
    %407 = arith.mulf %404, %406 : vector<16x256xf32>
    %408 = arith.truncf %407 : vector<16x256xf32> to vector<16x256xbf16>
    %c0_154 = arith.constant 0 : index
    %c0_155 = arith.constant 0 : index
    %409 = vector.load %arg12[%c0_154, %c0_155] : memref<256x128xbf16, #tpu.memory_space<vmem>>, vector<256x128xbf16>
    %cst_156 = arith.constant dense<0.000000e+00> : vector<16x128xf32>
    %410 = tpu.matmul %408, %409, %cst_156 {dimension_numbers = #tpu.dot_dimension_numbers<[1], [0], [0], [1], [0, 0, 1, 1], [], []>} : vector<16x256xbf16>, vector<256x128xbf16>, vector<16x128xf32> -> vector<16x128xf32>
    %c0_157 = arith.constant 0 : index
    %c0_158 = arith.constant 0 : index
    %411 = vector.load %arg11[%c0_157, %c0_158] : memref<1x128xf32, #tpu.memory_space<vmem>>, vector<1x128xf32>
    %412 = vector.broadcast %411 : vector<1x128xf32> to vector<16x128xf32>
    %413 = arith.addf %410, %412 : vector<16x128xf32>
    %414 = arith.addf %360, %413 : vector<16x128xf32>
    %cst_159 = arith.constant dense<0.000000e+00> : vector<16xf32>
    %415 = vector.multi_reduction <add>, %414, %cst_159 [1] : vector<16x128xf32> to vector<16xf32>
    %416 = vector.shape_cast %415 : vector<16xf32> to vector<16x1xf32>
    %cst_160 = arith.constant 1.280000e+02 : f32
    %417 = vector.broadcast %cst_160 : f32 to vector<16x1xf32>
    %418 = arith.divf %416, %417 : vector<16x1xf32>
    %419 = vector.broadcast %418 : vector<16x1xf32> to vector<16x128xf32>
    %420 = arith.subf %414, %419 : vector<16x128xf32>
    %421 = arith.mulf %420, %420 : vector<16x128xf32>
    %cst_161 = arith.constant dense<0.000000e+00> : vector<16xf32>
    %422 = vector.multi_reduction <add>, %421, %cst_161 [1] : vector<16x128xf32> to vector<16xf32>
    %423 = vector.shape_cast %422 : vector<16xf32> to vector<16x1xf32>
    %cst_162 = arith.constant 1.280000e+02 : f32
    %424 = vector.broadcast %cst_162 : f32 to vector<16x1xf32>
    %425 = arith.divf %423, %424 : vector<16x1xf32>
    %426 = vector.broadcast %418 : vector<16x1xf32> to vector<16x128xf32>
    %427 = arith.subf %414, %426 : vector<16x128xf32>
    %cst_163 = arith.constant 9.99999974E-6 : f32
    %428 = vector.broadcast %cst_163 : f32 to vector<16x1xf32>
    %429 = arith.addf %425, %428 : vector<16x1xf32>
    %430 = math.rsqrt %429 : vector<16x1xf32>
    %431 = vector.broadcast %430 : vector<16x1xf32> to vector<16x128xf32>
    %432 = arith.mulf %427, %431 : vector<16x128xf32>
    %c0_164 = arith.constant 0 : index
    %c0_165 = arith.constant 0 : index
    %433 = vector.load %arg18[%c0_164, %c0_165] : memref<1x128xf32, #tpu.memory_space<vmem>>, vector<1x128xf32>
    %434 = vector.broadcast %433 : vector<1x128xf32> to vector<16x128xf32>
    %435 = arith.mulf %432, %434 : vector<16x128xf32>
    %c0_166 = arith.constant 0 : index
    %c0_167 = arith.constant 0 : index
    %436 = vector.load %arg17[%c0_166, %c0_167] : memref<1x128xf32, #tpu.memory_space<vmem>>, vector<1x128xf32>
    %437 = vector.broadcast %436 : vector<1x128xf32> to vector<16x128xf32>
    %438 = arith.addf %435, %437 : vector<16x128xf32>
    %439 = arith.truncf %438 : vector<16x128xf32> to vector<16x128xbf16>
    %c0_168 = arith.constant 0 : index
    %c0_169 = arith.constant 0 : index
    %440 = vector.load %arg42[%c0_168, %c0_169] : memref<128x384xbf16, #tpu.memory_space<vmem>>, vector<128x384xbf16>
    %cst_170 = arith.constant dense<0.000000e+00> : vector<16x384xf32>
    %441 = tpu.matmul %439, %440, %cst_170 {dimension_numbers = #tpu.dot_dimension_numbers<[1], [0], [0], [1], [0, 0, 1, 1], [], []>} : vector<16x128xbf16>, vector<128x384xbf16>, vector<16x384xf32> -> vector<16x384xf32>
    %c0_171 = arith.constant 0 : index
    %c0_172 = arith.constant 0 : index
    %442 = vector.load %arg40[%c0_171, %c0_172] : memref<1x384xf32, #tpu.memory_space<vmem>>, vector<1x384xf32>
    %443 = vector.broadcast %442 : vector<1x384xf32> to vector<16x384xf32>
    %444 = arith.addf %441, %443 : vector<16x384xf32>
    %445 = vector.extract_strided_slice %444 {offsets = [0, 0], sizes = [16, 128], strides = [1, 1]} : vector<16x384xf32> to vector<16x128xf32>
    %446 = vector.extract_strided_slice %444 {offsets = [0, 128], sizes = [16, 128], strides = [1, 1]} : vector<16x384xf32> to vector<16x128xf32>
    %447 = vector.extract_strided_slice %444 {offsets = [0, 256], sizes = [16, 128], strides = [1, 1]} : vector<16x384xf32> to vector<16x128xf32>
    %448 = tpu.iota {dimensions = array<i32: 1>} : vector<1x128xi32>
    %449 = arith.truncf %446 : vector<16x128xf32> to vector<16x128xbf16>
    %cst_173 = arith.constant 0.000000e+00 : f32
    %450 = vector.broadcast %cst_173 : f32 to vector<16x128xf32>
    %c0_i32_174 = arith.constant 0 : i32
    %451 = vector.broadcast %c0_i32_174 : i32 to vector<1x128xi32>
    %452 = arith.cmpi sge, %448, %451 : vector<1x128xi32>
    %c32_i32_175 = arith.constant 32 : i32
    %453 = vector.broadcast %c32_i32_175 : i32 to vector<1x128xi32>
    %454 = arith.cmpi slt, %448, %453 : vector<1x128xi32>
    %455 = arith.andi %452, %454 : vector<1x128xi1>
    %cst_176 = arith.constant 1.000000e+00 : f32
    %cst_177 = arith.constant 0.000000e+00 : f32
    %456 = vector.broadcast %cst_176 : f32 to vector<1x128xf32>
    %457 = vector.broadcast %cst_177 : f32 to vector<1x128xf32>
    %458 = arith.select %455, %456, %457 : vector<1x128xi1>, vector<1x128xf32>
    %cst_178 = arith.constant 0.176776692 : f32
    %459 = vector.broadcast %cst_178 : f32 to vector<1x128xf32>
    %460 = arith.mulf %458, %459 : vector<1x128xf32>
    %461 = vector.broadcast %460 : vector<1x128xf32> to vector<16x128xf32>
    %462 = arith.mulf %445, %461 : vector<16x128xf32>
    %463 = arith.truncf %462 : vector<16x128xf32> to vector<16x128xbf16>
    %cst_179 = arith.constant dense<0.000000e+00> : vector<16x16xf32>
    %464 = tpu.matmul %463, %449, %cst_179 {dimension_numbers = #tpu.dot_dimension_numbers<[1], [1], [0], [0], [0, 0, 1, 0], [], []>} : vector<16x128xbf16>, vector<16x128xbf16>, vector<16x16xf32> -> vector<16x16xf32>
    %465 = arith.addf %464, %20 : vector<16x16xf32>
    %cst_180 = arith.constant dense<0xFF800000> : vector<16xf32>
    %466 = vector.multi_reduction <maximumf>, %465, %cst_180 [1] : vector<16x16xf32> to vector<16xf32>
    %467 = vector.shape_cast %466 : vector<16xf32> to vector<16x1xf32>
    %468 = vector.broadcast %467 : vector<16x1xf32> to vector<16x16xf32>
    %469 = arith.subf %465, %468 : vector<16x16xf32>
    %470 = math.exp %469 : vector<16x16xf32>
    %cst_181 = arith.constant dense<0.000000e+00> : vector<16xf32>
    %471 = vector.multi_reduction <add>, %470, %cst_181 [1] : vector<16x16xf32> to vector<16xf32>
    %472 = vector.shape_cast %471 : vector<16xf32> to vector<16x1xf32>
    %473 = tpu.reciprocal %472 {approx = true} : vector<16x1xf32> -> vector<16x1xf32>
    %474 = vector.broadcast %473 : vector<16x1xf32> to vector<16x16xf32>
    %475 = arith.mulf %470, %474 : vector<16x16xf32>
    %476 = arith.truncf %475 : vector<16x16xf32> to vector<16x16xbf16>
    %477 = vector.broadcast %458 : vector<1x128xf32> to vector<16x128xf32>
    %478 = arith.mulf %447, %477 : vector<16x128xf32>
    %479 = arith.truncf %478 : vector<16x128xf32> to vector<16x128xbf16>
    %cst_182 = arith.constant dense<0.000000e+00> : vector<16x128xf32>
    %480 = tpu.matmul %476, %479, %cst_182 {dimension_numbers = #tpu.dot_dimension_numbers<[1], [0], [0], [1], [0, 0, 1, 1], [], []>} : vector<16x16xbf16>, vector<16x128xbf16>, vector<16x128xf32> -> vector<16x128xf32>
    %481 = arith.addf %450, %480 : vector<16x128xf32>
    %c32_i32_183 = arith.constant 32 : i32
    %482 = vector.broadcast %c32_i32_183 : i32 to vector<1x128xi32>
    %483 = arith.cmpi sge, %448, %482 : vector<1x128xi32>
    %c64_i32_184 = arith.constant 64 : i32
    %484 = vector.broadcast %c64_i32_184 : i32 to vector<1x128xi32>
    %485 = arith.cmpi slt, %448, %484 : vector<1x128xi32>
    %486 = arith.andi %483, %485 : vector<1x128xi1>
    %cst_185 = arith.constant 1.000000e+00 : f32
    %cst_186 = arith.constant 0.000000e+00 : f32
    %487 = vector.broadcast %cst_185 : f32 to vector<1x128xf32>
    %488 = vector.broadcast %cst_186 : f32 to vector<1x128xf32>
    %489 = arith.select %486, %487, %488 : vector<1x128xi1>, vector<1x128xf32>
    %cst_187 = arith.constant 0.176776692 : f32
    %490 = vector.broadcast %cst_187 : f32 to vector<1x128xf32>
    %491 = arith.mulf %489, %490 : vector<1x128xf32>
    %492 = vector.broadcast %491 : vector<1x128xf32> to vector<16x128xf32>
    %493 = arith.mulf %445, %492 : vector<16x128xf32>
    %494 = arith.truncf %493 : vector<16x128xf32> to vector<16x128xbf16>
    %cst_188 = arith.constant dense<0.000000e+00> : vector<16x16xf32>
    %495 = tpu.matmul %494, %449, %cst_188 {dimension_numbers = #tpu.dot_dimension_numbers<[1], [1], [0], [0], [0, 0, 1, 0], [], []>} : vector<16x128xbf16>, vector<16x128xbf16>, vector<16x16xf32> -> vector<16x16xf32>
    %496 = arith.addf %495, %20 : vector<16x16xf32>
    %cst_189 = arith.constant dense<0xFF800000> : vector<16xf32>
    %497 = vector.multi_reduction <maximumf>, %496, %cst_189 [1] : vector<16x16xf32> to vector<16xf32>
    %498 = vector.shape_cast %497 : vector<16xf32> to vector<16x1xf32>
    %499 = vector.broadcast %498 : vector<16x1xf32> to vector<16x16xf32>
    %500 = arith.subf %496, %499 : vector<16x16xf32>
    %501 = math.exp %500 : vector<16x16xf32>
    %cst_190 = arith.constant dense<0.000000e+00> : vector<16xf32>
    %502 = vector.multi_reduction <add>, %501, %cst_190 [1] : vector<16x16xf32> to vector<16xf32>
    %503 = vector.shape_cast %502 : vector<16xf32> to vector<16x1xf32>
    %504 = tpu.reciprocal %503 {approx = true} : vector<16x1xf32> -> vector<16x1xf32>
    %505 = vector.broadcast %504 : vector<16x1xf32> to vector<16x16xf32>
    %506 = arith.mulf %501, %505 : vector<16x16xf32>
    %507 = arith.truncf %506 : vector<16x16xf32> to vector<16x16xbf16>
    %508 = vector.broadcast %489 : vector<1x128xf32> to vector<16x128xf32>
    %509 = arith.mulf %447, %508 : vector<16x128xf32>
    %510 = arith.truncf %509 : vector<16x128xf32> to vector<16x128xbf16>
    %cst_191 = arith.constant dense<0.000000e+00> : vector<16x128xf32>
    %511 = tpu.matmul %507, %510, %cst_191 {dimension_numbers = #tpu.dot_dimension_numbers<[1], [0], [0], [1], [0, 0, 1, 1], [], []>} : vector<16x16xbf16>, vector<16x128xbf16>, vector<16x128xf32> -> vector<16x128xf32>
    %512 = arith.addf %481, %511 : vector<16x128xf32>
    %c64_i32_192 = arith.constant 64 : i32
    %513 = vector.broadcast %c64_i32_192 : i32 to vector<1x128xi32>
    %514 = arith.cmpi sge, %448, %513 : vector<1x128xi32>
    %c96_i32_193 = arith.constant 96 : i32
    %515 = vector.broadcast %c96_i32_193 : i32 to vector<1x128xi32>
    %516 = arith.cmpi slt, %448, %515 : vector<1x128xi32>
    %517 = arith.andi %514, %516 : vector<1x128xi1>
    %cst_194 = arith.constant 1.000000e+00 : f32
    %cst_195 = arith.constant 0.000000e+00 : f32
    %518 = vector.broadcast %cst_194 : f32 to vector<1x128xf32>
    %519 = vector.broadcast %cst_195 : f32 to vector<1x128xf32>
    %520 = arith.select %517, %518, %519 : vector<1x128xi1>, vector<1x128xf32>
    %cst_196 = arith.constant 0.176776692 : f32
    %521 = vector.broadcast %cst_196 : f32 to vector<1x128xf32>
    %522 = arith.mulf %520, %521 : vector<1x128xf32>
    %523 = vector.broadcast %522 : vector<1x128xf32> to vector<16x128xf32>
    %524 = arith.mulf %445, %523 : vector<16x128xf32>
    %525 = arith.truncf %524 : vector<16x128xf32> to vector<16x128xbf16>
    %cst_197 = arith.constant dense<0.000000e+00> : vector<16x16xf32>
    %526 = tpu.matmul %525, %449, %cst_197 {dimension_numbers = #tpu.dot_dimension_numbers<[1], [1], [0], [0], [0, 0, 1, 0], [], []>} : vector<16x128xbf16>, vector<16x128xbf16>, vector<16x16xf32> -> vector<16x16xf32>
    %527 = arith.addf %526, %20 : vector<16x16xf32>
    %cst_198 = arith.constant dense<0xFF800000> : vector<16xf32>
    %528 = vector.multi_reduction <maximumf>, %527, %cst_198 [1] : vector<16x16xf32> to vector<16xf32>
    %529 = vector.shape_cast %528 : vector<16xf32> to vector<16x1xf32>
    %530 = vector.broadcast %529 : vector<16x1xf32> to vector<16x16xf32>
    %531 = arith.subf %527, %530 : vector<16x16xf32>
    %532 = math.exp %531 : vector<16x16xf32>
    %cst_199 = arith.constant dense<0.000000e+00> : vector<16xf32>
    %533 = vector.multi_reduction <add>, %532, %cst_199 [1] : vector<16x16xf32> to vector<16xf32>
    %534 = vector.shape_cast %533 : vector<16xf32> to vector<16x1xf32>
    %535 = tpu.reciprocal %534 {approx = true} : vector<16x1xf32> -> vector<16x1xf32>
    %536 = vector.broadcast %535 : vector<16x1xf32> to vector<16x16xf32>
    %537 = arith.mulf %532, %536 : vector<16x16xf32>
    %538 = arith.truncf %537 : vector<16x16xf32> to vector<16x16xbf16>
    %539 = vector.broadcast %520 : vector<1x128xf32> to vector<16x128xf32>
    %540 = arith.mulf %447, %539 : vector<16x128xf32>
    %541 = arith.truncf %540 : vector<16x128xf32> to vector<16x128xbf16>
    %cst_200 = arith.constant dense<0.000000e+00> : vector<16x128xf32>
    %542 = tpu.matmul %538, %541, %cst_200 {dimension_numbers = #tpu.dot_dimension_numbers<[1], [0], [0], [1], [0, 0, 1, 1], [], []>} : vector<16x16xbf16>, vector<16x128xbf16>, vector<16x128xf32> -> vector<16x128xf32>
    %543 = arith.addf %512, %542 : vector<16x128xf32>
    %c96_i32_201 = arith.constant 96 : i32
    %544 = vector.broadcast %c96_i32_201 : i32 to vector<1x128xi32>
    %545 = arith.cmpi sge, %448, %544 : vector<1x128xi32>
    %c128_i32_202 = arith.constant 128 : i32
    %546 = vector.broadcast %c128_i32_202 : i32 to vector<1x128xi32>
    %547 = arith.cmpi slt, %448, %546 : vector<1x128xi32>
    %548 = arith.andi %545, %547 : vector<1x128xi1>
    %cst_203 = arith.constant 1.000000e+00 : f32
    %cst_204 = arith.constant 0.000000e+00 : f32
    %549 = vector.broadcast %cst_203 : f32 to vector<1x128xf32>
    %550 = vector.broadcast %cst_204 : f32 to vector<1x128xf32>
    %551 = arith.select %548, %549, %550 : vector<1x128xi1>, vector<1x128xf32>
    %cst_205 = arith.constant 0.176776692 : f32
    %552 = vector.broadcast %cst_205 : f32 to vector<1x128xf32>
    %553 = arith.mulf %551, %552 : vector<1x128xf32>
    %554 = vector.broadcast %553 : vector<1x128xf32> to vector<16x128xf32>
    %555 = arith.mulf %445, %554 : vector<16x128xf32>
    %556 = arith.truncf %555 : vector<16x128xf32> to vector<16x128xbf16>
    %cst_206 = arith.constant dense<0.000000e+00> : vector<16x16xf32>
    %557 = tpu.matmul %556, %449, %cst_206 {dimension_numbers = #tpu.dot_dimension_numbers<[1], [1], [0], [0], [0, 0, 1, 0], [], []>} : vector<16x128xbf16>, vector<16x128xbf16>, vector<16x16xf32> -> vector<16x16xf32>
    %558 = arith.addf %557, %20 : vector<16x16xf32>
    %cst_207 = arith.constant dense<0xFF800000> : vector<16xf32>
    %559 = vector.multi_reduction <maximumf>, %558, %cst_207 [1] : vector<16x16xf32> to vector<16xf32>
    %560 = vector.shape_cast %559 : vector<16xf32> to vector<16x1xf32>
    %561 = vector.broadcast %560 : vector<16x1xf32> to vector<16x16xf32>
    %562 = arith.subf %558, %561 : vector<16x16xf32>
    %563 = math.exp %562 : vector<16x16xf32>
    %cst_208 = arith.constant dense<0.000000e+00> : vector<16xf32>
    %564 = vector.multi_reduction <add>, %563, %cst_208 [1] : vector<16x16xf32> to vector<16xf32>
    %565 = vector.shape_cast %564 : vector<16xf32> to vector<16x1xf32>
    %566 = tpu.reciprocal %565 {approx = true} : vector<16x1xf32> -> vector<16x1xf32>
    %567 = vector.broadcast %566 : vector<16x1xf32> to vector<16x16xf32>
    %568 = arith.mulf %563, %567 : vector<16x16xf32>
    %569 = arith.truncf %568 : vector<16x16xf32> to vector<16x16xbf16>
    %570 = vector.broadcast %551 : vector<1x128xf32> to vector<16x128xf32>
    %571 = arith.mulf %447, %570 : vector<16x128xf32>
    %572 = arith.truncf %571 : vector<16x128xf32> to vector<16x128xbf16>
    %cst_209 = arith.constant dense<0.000000e+00> : vector<16x128xf32>
    %573 = tpu.matmul %569, %572, %cst_209 {dimension_numbers = #tpu.dot_dimension_numbers<[1], [0], [0], [1], [0, 0, 1, 1], [], []>} : vector<16x16xbf16>, vector<16x128xbf16>, vector<16x128xf32> -> vector<16x128xf32>
    %574 = arith.addf %543, %573 : vector<16x128xf32>
    %575 = arith.truncf %574 : vector<16x128xf32> to vector<16x128xbf16>
    %c0_210 = arith.constant 0 : index
    %c0_211 = arith.constant 0 : index
    %576 = vector.load %arg41[%c0_210, %c0_211] : memref<128x128xbf16, #tpu.memory_space<vmem>>, vector<128x128xbf16>
    %cst_212 = arith.constant dense<0.000000e+00> : vector<16x128xf32>
    %577 = tpu.matmul %575, %576, %cst_212 {dimension_numbers = #tpu.dot_dimension_numbers<[1], [0], [0], [1], [0, 0, 1, 1], [], []>} : vector<16x128xbf16>, vector<128x128xbf16>, vector<16x128xf32> -> vector<16x128xf32>
    %c0_213 = arith.constant 0 : index
    %c0_214 = arith.constant 0 : index
    %578 = vector.load %arg39[%c0_213, %c0_214] : memref<1x128xf32, #tpu.memory_space<vmem>>, vector<1x128xf32>
    %579 = vector.broadcast %578 : vector<1x128xf32> to vector<16x128xf32>
    %580 = arith.addf %577, %579 : vector<16x128xf32>
    %581 = arith.addf %438, %580 : vector<16x128xf32>
    %cst_215 = arith.constant dense<0.000000e+00> : vector<16xf32>
    %582 = vector.multi_reduction <add>, %581, %cst_215 [1] : vector<16x128xf32> to vector<16xf32>
    %583 = vector.shape_cast %582 : vector<16xf32> to vector<16x1xf32>
    %cst_216 = arith.constant 1.280000e+02 : f32
    %584 = vector.broadcast %cst_216 : f32 to vector<16x1xf32>
    %585 = arith.divf %583, %584 : vector<16x1xf32>
    %586 = vector.broadcast %585 : vector<16x1xf32> to vector<16x128xf32>
    %587 = arith.subf %581, %586 : vector<16x128xf32>
    %588 = arith.mulf %587, %587 : vector<16x128xf32>
    %cst_217 = arith.constant dense<0.000000e+00> : vector<16xf32>
    %589 = vector.multi_reduction <add>, %588, %cst_217 [1] : vector<16x128xf32> to vector<16xf32>
    %590 = vector.shape_cast %589 : vector<16xf32> to vector<16x1xf32>
    %cst_218 = arith.constant 1.280000e+02 : f32
    %591 = vector.broadcast %cst_218 : f32 to vector<16x1xf32>
    %592 = arith.divf %590, %591 : vector<16x1xf32>
    %593 = vector.broadcast %585 : vector<16x1xf32> to vector<16x128xf32>
    %594 = arith.subf %581, %593 : vector<16x128xf32>
    %cst_219 = arith.constant 9.99999974E-6 : f32
    %595 = vector.broadcast %cst_219 : f32 to vector<16x1xf32>
    %596 = arith.addf %592, %595 : vector<16x1xf32>
    %597 = math.rsqrt %596 : vector<16x1xf32>
    %598 = vector.broadcast %597 : vector<16x1xf32> to vector<16x128xf32>
    %599 = arith.mulf %594, %598 : vector<16x128xf32>
    %c0_220 = arith.constant 0 : index
    %c0_221 = arith.constant 0 : index
    %600 = vector.load %arg34[%c0_220, %c0_221] : memref<1x128xf32, #tpu.memory_space<vmem>>, vector<1x128xf32>
    %601 = vector.broadcast %600 : vector<1x128xf32> to vector<16x128xf32>
    %602 = arith.mulf %599, %601 : vector<16x128xf32>
    %c0_222 = arith.constant 0 : index
    %c0_223 = arith.constant 0 : index
    %603 = vector.load %arg33[%c0_222, %c0_223] : memref<1x128xf32, #tpu.memory_space<vmem>>, vector<1x128xf32>
    %604 = vector.broadcast %603 : vector<1x128xf32> to vector<16x128xf32>
    %605 = arith.addf %602, %604 : vector<16x128xf32>
    %606 = arith.truncf %605 : vector<16x128xf32> to vector<16x128xbf16>
    %c0_224 = arith.constant 0 : index
    %c0_225 = arith.constant 0 : index
    %607 = vector.load %arg28[%c0_224, %c0_225] : memref<128x128xbf16, #tpu.memory_space<vmem>>, vector<128x128xbf16>
    %cst_226 = arith.constant dense<0.000000e+00> : vector<16x128xf32>
    %608 = tpu.matmul %606, %607, %cst_226 {dimension_numbers = #tpu.dot_dimension_numbers<[1], [0], [0], [1], [0, 0, 1, 1], [], []>} : vector<16x128xbf16>, vector<128x128xbf16>, vector<16x128xf32> -> vector<16x128xf32>
    %c0_227 = arith.constant 0 : index
    %c0_228 = arith.constant 0 : index
    %609 = vector.load %arg25[%c0_227, %c0_228] : memref<1x128xf32, #tpu.memory_space<vmem>>, vector<1x128xf32>
    %610 = vector.broadcast %609 : vector<1x128xf32> to vector<16x128xf32>
    %611 = arith.addf %608, %610 : vector<16x128xf32>
    %612 = arith.truncf %19 : vector<8x128xf32> to vector<8x128xbf16>
    %c0_229 = arith.constant 0 : index
    %c0_230 = arith.constant 0 : index
    %613 = vector.load %arg26[%c0_229, %c0_230] : memref<128x256xbf16, #tpu.memory_space<vmem>>, vector<128x256xbf16>
    %cst_231 = arith.constant dense<0.000000e+00> : vector<8x256xf32>
    %614 = tpu.matmul %612, %613, %cst_231 {dimension_numbers = #tpu.dot_dimension_numbers<[1], [0], [0], [1], [0, 0, 1, 1], [], []>} : vector<8x128xbf16>, vector<128x256xbf16>, vector<8x256xf32> -> vector<8x256xf32>
    %c0_232 = arith.constant 0 : index
    %c0_233 = arith.constant 0 : index
    %615 = vector.load %arg23[%c0_232, %c0_233] : memref<1x256xf32, #tpu.memory_space<vmem>>, vector<1x256xf32>
    %616 = vector.broadcast %615 : vector<1x256xf32> to vector<8x256xf32>
    %617 = arith.addf %614, %616 : vector<8x256xf32>
    %618 = vector.extract_strided_slice %617 {offsets = [0, 0], sizes = [8, 128], strides = [1, 1]} : vector<8x256xf32> to vector<8x128xf32>
    %619 = vector.extract_strided_slice %617 {offsets = [0, 128], sizes = [8, 128], strides = [1, 1]} : vector<8x256xf32> to vector<8x128xf32>
    %620 = tpu.iota {dimensions = array<i32: 1>} : vector<1x128xi32>
    %621 = arith.truncf %618 : vector<8x128xf32> to vector<8x128xbf16>
    %cst_234 = arith.constant 0.000000e+00 : f32
    %622 = vector.broadcast %cst_234 : f32 to vector<16x128xf32>
    %c0_i32_235 = arith.constant 0 : i32
    %623 = vector.broadcast %c0_i32_235 : i32 to vector<1x128xi32>
    %624 = arith.cmpi sge, %620, %623 : vector<1x128xi32>
    %c32_i32_236 = arith.constant 32 : i32
    %625 = vector.broadcast %c32_i32_236 : i32 to vector<1x128xi32>
    %626 = arith.cmpi slt, %620, %625 : vector<1x128xi32>
    %627 = arith.andi %624, %626 : vector<1x128xi1>
    %cst_237 = arith.constant 1.000000e+00 : f32
    %cst_238 = arith.constant 0.000000e+00 : f32
    %628 = vector.broadcast %cst_237 : f32 to vector<1x128xf32>
    %629 = vector.broadcast %cst_238 : f32 to vector<1x128xf32>
    %630 = arith.select %627, %628, %629 : vector<1x128xi1>, vector<1x128xf32>
    %cst_239 = arith.constant 0.176776692 : f32
    %631 = vector.broadcast %cst_239 : f32 to vector<1x128xf32>
    %632 = arith.mulf %630, %631 : vector<1x128xf32>
    %633 = vector.broadcast %632 : vector<1x128xf32> to vector<16x128xf32>
    %634 = arith.mulf %611, %633 : vector<16x128xf32>
    %635 = arith.truncf %634 : vector<16x128xf32> to vector<16x128xbf16>
    %cst_240 = arith.constant dense<0.000000e+00> : vector<16x8xf32>
    %636 = tpu.matmul %635, %621, %cst_240 {dimension_numbers = #tpu.dot_dimension_numbers<[1], [1], [0], [0], [0, 0, 1, 0], [], []>} : vector<16x128xbf16>, vector<8x128xbf16>, vector<16x8xf32> -> vector<16x8xf32>
    %637 = arith.addf %636, %21 : vector<16x8xf32>
    %cst_241 = arith.constant dense<0xFF800000> : vector<16xf32>
    %638 = vector.multi_reduction <maximumf>, %637, %cst_241 [1] : vector<16x8xf32> to vector<16xf32>
    %639 = vector.shape_cast %638 : vector<16xf32> to vector<16x1xf32>
    %640 = vector.broadcast %639 : vector<16x1xf32> to vector<16x8xf32>
    %641 = arith.subf %637, %640 : vector<16x8xf32>
    %642 = math.exp %641 : vector<16x8xf32>
    %cst_242 = arith.constant dense<0.000000e+00> : vector<16xf32>
    %643 = vector.multi_reduction <add>, %642, %cst_242 [1] : vector<16x8xf32> to vector<16xf32>
    %644 = vector.shape_cast %643 : vector<16xf32> to vector<16x1xf32>
    %645 = tpu.reciprocal %644 {approx = true} : vector<16x1xf32> -> vector<16x1xf32>
    %646 = vector.broadcast %645 : vector<16x1xf32> to vector<16x8xf32>
    %647 = arith.mulf %642, %646 : vector<16x8xf32>
    %648 = arith.truncf %647 : vector<16x8xf32> to vector<16x8xbf16>
    %649 = vector.broadcast %630 : vector<1x128xf32> to vector<8x128xf32>
    %650 = arith.mulf %619, %649 : vector<8x128xf32>
    %651 = arith.truncf %650 : vector<8x128xf32> to vector<8x128xbf16>
    %cst_243 = arith.constant dense<0.000000e+00> : vector<16x128xf32>
    %652 = tpu.matmul %648, %651, %cst_243 {dimension_numbers = #tpu.dot_dimension_numbers<[1], [0], [0], [1], [0, 0, 1, 1], [], []>} : vector<16x8xbf16>, vector<8x128xbf16>, vector<16x128xf32> -> vector<16x128xf32>
    %653 = arith.addf %622, %652 : vector<16x128xf32>
    %c32_i32_244 = arith.constant 32 : i32
    %654 = vector.broadcast %c32_i32_244 : i32 to vector<1x128xi32>
    %655 = arith.cmpi sge, %620, %654 : vector<1x128xi32>
    %c64_i32_245 = arith.constant 64 : i32
    %656 = vector.broadcast %c64_i32_245 : i32 to vector<1x128xi32>
    %657 = arith.cmpi slt, %620, %656 : vector<1x128xi32>
    %658 = arith.andi %655, %657 : vector<1x128xi1>
    %cst_246 = arith.constant 1.000000e+00 : f32
    %cst_247 = arith.constant 0.000000e+00 : f32
    %659 = vector.broadcast %cst_246 : f32 to vector<1x128xf32>
    %660 = vector.broadcast %cst_247 : f32 to vector<1x128xf32>
    %661 = arith.select %658, %659, %660 : vector<1x128xi1>, vector<1x128xf32>
    %cst_248 = arith.constant 0.176776692 : f32
    %662 = vector.broadcast %cst_248 : f32 to vector<1x128xf32>
    %663 = arith.mulf %661, %662 : vector<1x128xf32>
    %664 = vector.broadcast %663 : vector<1x128xf32> to vector<16x128xf32>
    %665 = arith.mulf %611, %664 : vector<16x128xf32>
    %666 = arith.truncf %665 : vector<16x128xf32> to vector<16x128xbf16>
    %cst_249 = arith.constant dense<0.000000e+00> : vector<16x8xf32>
    %667 = tpu.matmul %666, %621, %cst_249 {dimension_numbers = #tpu.dot_dimension_numbers<[1], [1], [0], [0], [0, 0, 1, 0], [], []>} : vector<16x128xbf16>, vector<8x128xbf16>, vector<16x8xf32> -> vector<16x8xf32>
    %668 = arith.addf %667, %21 : vector<16x8xf32>
    %cst_250 = arith.constant dense<0xFF800000> : vector<16xf32>
    %669 = vector.multi_reduction <maximumf>, %668, %cst_250 [1] : vector<16x8xf32> to vector<16xf32>
    %670 = vector.shape_cast %669 : vector<16xf32> to vector<16x1xf32>
    %671 = vector.broadcast %670 : vector<16x1xf32> to vector<16x8xf32>
    %672 = arith.subf %668, %671 : vector<16x8xf32>
    %673 = math.exp %672 : vector<16x8xf32>
    %cst_251 = arith.constant dense<0.000000e+00> : vector<16xf32>
    %674 = vector.multi_reduction <add>, %673, %cst_251 [1] : vector<16x8xf32> to vector<16xf32>
    %675 = vector.shape_cast %674 : vector<16xf32> to vector<16x1xf32>
    %676 = tpu.reciprocal %675 {approx = true} : vector<16x1xf32> -> vector<16x1xf32>
    %677 = vector.broadcast %676 : vector<16x1xf32> to vector<16x8xf32>
    %678 = arith.mulf %673, %677 : vector<16x8xf32>
    %679 = arith.truncf %678 : vector<16x8xf32> to vector<16x8xbf16>
    %680 = vector.broadcast %661 : vector<1x128xf32> to vector<8x128xf32>
    %681 = arith.mulf %619, %680 : vector<8x128xf32>
    %682 = arith.truncf %681 : vector<8x128xf32> to vector<8x128xbf16>
    %cst_252 = arith.constant dense<0.000000e+00> : vector<16x128xf32>
    %683 = tpu.matmul %679, %682, %cst_252 {dimension_numbers = #tpu.dot_dimension_numbers<[1], [0], [0], [1], [0, 0, 1, 1], [], []>} : vector<16x8xbf16>, vector<8x128xbf16>, vector<16x128xf32> -> vector<16x128xf32>
    %684 = arith.addf %653, %683 : vector<16x128xf32>
    %c64_i32_253 = arith.constant 64 : i32
    %685 = vector.broadcast %c64_i32_253 : i32 to vector<1x128xi32>
    %686 = arith.cmpi sge, %620, %685 : vector<1x128xi32>
    %c96_i32_254 = arith.constant 96 : i32
    %687 = vector.broadcast %c96_i32_254 : i32 to vector<1x128xi32>
    %688 = arith.cmpi slt, %620, %687 : vector<1x128xi32>
    %689 = arith.andi %686, %688 : vector<1x128xi1>
    %cst_255 = arith.constant 1.000000e+00 : f32
    %cst_256 = arith.constant 0.000000e+00 : f32
    %690 = vector.broadcast %cst_255 : f32 to vector<1x128xf32>
    %691 = vector.broadcast %cst_256 : f32 to vector<1x128xf32>
    %692 = arith.select %689, %690, %691 : vector<1x128xi1>, vector<1x128xf32>
    %cst_257 = arith.constant 0.176776692 : f32
    %693 = vector.broadcast %cst_257 : f32 to vector<1x128xf32>
    %694 = arith.mulf %692, %693 : vector<1x128xf32>
    %695 = vector.broadcast %694 : vector<1x128xf32> to vector<16x128xf32>
    %696 = arith.mulf %611, %695 : vector<16x128xf32>
    %697 = arith.truncf %696 : vector<16x128xf32> to vector<16x128xbf16>
    %cst_258 = arith.constant dense<0.000000e+00> : vector<16x8xf32>
    %698 = tpu.matmul %697, %621, %cst_258 {dimension_numbers = #tpu.dot_dimension_numbers<[1], [1], [0], [0], [0, 0, 1, 0], [], []>} : vector<16x128xbf16>, vector<8x128xbf16>, vector<16x8xf32> -> vector<16x8xf32>
    %699 = arith.addf %698, %21 : vector<16x8xf32>
    %cst_259 = arith.constant dense<0xFF800000> : vector<16xf32>
    %700 = vector.multi_reduction <maximumf>, %699, %cst_259 [1] : vector<16x8xf32> to vector<16xf32>
    %701 = vector.shape_cast %700 : vector<16xf32> to vector<16x1xf32>
    %702 = vector.broadcast %701 : vector<16x1xf32> to vector<16x8xf32>
    %703 = arith.subf %699, %702 : vector<16x8xf32>
    %704 = math.exp %703 : vector<16x8xf32>
    %cst_260 = arith.constant dense<0.000000e+00> : vector<16xf32>
    %705 = vector.multi_reduction <add>, %704, %cst_260 [1] : vector<16x8xf32> to vector<16xf32>
    %706 = vector.shape_cast %705 : vector<16xf32> to vector<16x1xf32>
    %707 = tpu.reciprocal %706 {approx = true} : vector<16x1xf32> -> vector<16x1xf32>
    %708 = vector.broadcast %707 : vector<16x1xf32> to vector<16x8xf32>
    %709 = arith.mulf %704, %708 : vector<16x8xf32>
    %710 = arith.truncf %709 : vector<16x8xf32> to vector<16x8xbf16>
    %711 = vector.broadcast %692 : vector<1x128xf32> to vector<8x128xf32>
    %712 = arith.mulf %619, %711 : vector<8x128xf32>
    %713 = arith.truncf %712 : vector<8x128xf32> to vector<8x128xbf16>
    %cst_261 = arith.constant dense<0.000000e+00> : vector<16x128xf32>
    %714 = tpu.matmul %710, %713, %cst_261 {dimension_numbers = #tpu.dot_dimension_numbers<[1], [0], [0], [1], [0, 0, 1, 1], [], []>} : vector<16x8xbf16>, vector<8x128xbf16>, vector<16x128xf32> -> vector<16x128xf32>
    %715 = arith.addf %684, %714 : vector<16x128xf32>
    %c96_i32_262 = arith.constant 96 : i32
    %716 = vector.broadcast %c96_i32_262 : i32 to vector<1x128xi32>
    %717 = arith.cmpi sge, %620, %716 : vector<1x128xi32>
    %c128_i32_263 = arith.constant 128 : i32
    %718 = vector.broadcast %c128_i32_263 : i32 to vector<1x128xi32>
    %719 = arith.cmpi slt, %620, %718 : vector<1x128xi32>
    %720 = arith.andi %717, %719 : vector<1x128xi1>
    %cst_264 = arith.constant 1.000000e+00 : f32
    %cst_265 = arith.constant 0.000000e+00 : f32
    %721 = vector.broadcast %cst_264 : f32 to vector<1x128xf32>
    %722 = vector.broadcast %cst_265 : f32 to vector<1x128xf32>
    %723 = arith.select %720, %721, %722 : vector<1x128xi1>, vector<1x128xf32>
    %cst_266 = arith.constant 0.176776692 : f32
    %724 = vector.broadcast %cst_266 : f32 to vector<1x128xf32>
    %725 = arith.mulf %723, %724 : vector<1x128xf32>
    %726 = vector.broadcast %725 : vector<1x128xf32> to vector<16x128xf32>
    %727 = arith.mulf %611, %726 : vector<16x128xf32>
    %728 = arith.truncf %727 : vector<16x128xf32> to vector<16x128xbf16>
    %cst_267 = arith.constant dense<0.000000e+00> : vector<16x8xf32>
    %729 = tpu.matmul %728, %621, %cst_267 {dimension_numbers = #tpu.dot_dimension_numbers<[1], [1], [0], [0], [0, 0, 1, 0], [], []>} : vector<16x128xbf16>, vector<8x128xbf16>, vector<16x8xf32> -> vector<16x8xf32>
    %730 = arith.addf %729, %21 : vector<16x8xf32>
    %cst_268 = arith.constant dense<0xFF800000> : vector<16xf32>
    %731 = vector.multi_reduction <maximumf>, %730, %cst_268 [1] : vector<16x8xf32> to vector<16xf32>
    %732 = vector.shape_cast %731 : vector<16xf32> to vector<16x1xf32>
    %733 = vector.broadcast %732 : vector<16x1xf32> to vector<16x8xf32>
    %734 = arith.subf %730, %733 : vector<16x8xf32>
    %735 = math.exp %734 : vector<16x8xf32>
    %cst_269 = arith.constant dense<0.000000e+00> : vector<16xf32>
    %736 = vector.multi_reduction <add>, %735, %cst_269 [1] : vector<16x8xf32> to vector<16xf32>
    %737 = vector.shape_cast %736 : vector<16xf32> to vector<16x1xf32>
    %738 = tpu.reciprocal %737 {approx = true} : vector<16x1xf32> -> vector<16x1xf32>
    %739 = vector.broadcast %738 : vector<16x1xf32> to vector<16x8xf32>
    %740 = arith.mulf %735, %739 : vector<16x8xf32>
    %741 = arith.truncf %740 : vector<16x8xf32> to vector<16x8xbf16>
    %742 = vector.broadcast %723 : vector<1x128xf32> to vector<8x128xf32>
    %743 = arith.mulf %619, %742 : vector<8x128xf32>
    %744 = arith.truncf %743 : vector<8x128xf32> to vector<8x128xbf16>
    %cst_270 = arith.constant dense<0.000000e+00> : vector<16x128xf32>
    %745 = tpu.matmul %741, %744, %cst_270 {dimension_numbers = #tpu.dot_dimension_numbers<[1], [0], [0], [1], [0, 0, 1, 1], [], []>} : vector<16x8xbf16>, vector<8x128xbf16>, vector<16x128xf32> -> vector<16x128xf32>
    %746 = arith.addf %715, %745 : vector<16x128xf32>
    %747 = arith.truncf %746 : vector<16x128xf32> to vector<16x128xbf16>
    %c0_271 = arith.constant 0 : index
    %c0_272 = arith.constant 0 : index
    %748 = vector.load %arg27[%c0_271, %c0_272] : memref<128x128xbf16, #tpu.memory_space<vmem>>, vector<128x128xbf16>
    %cst_273 = arith.constant dense<0.000000e+00> : vector<16x128xf32>
    %749 = tpu.matmul %747, %748, %cst_273 {dimension_numbers = #tpu.dot_dimension_numbers<[1], [0], [0], [1], [0, 0, 1, 1], [], []>} : vector<16x128xbf16>, vector<128x128xbf16>, vector<16x128xf32> -> vector<16x128xf32>
    %c0_274 = arith.constant 0 : index
    %c0_275 = arith.constant 0 : index
    %750 = vector.load %arg24[%c0_274, %c0_275] : memref<1x128xf32, #tpu.memory_space<vmem>>, vector<1x128xf32>
    %751 = vector.broadcast %750 : vector<1x128xf32> to vector<16x128xf32>
    %752 = arith.addf %749, %751 : vector<16x128xf32>
    %753 = arith.addf %605, %752 : vector<16x128xf32>
    %cst_276 = arith.constant dense<0.000000e+00> : vector<16xf32>
    %754 = vector.multi_reduction <add>, %753, %cst_276 [1] : vector<16x128xf32> to vector<16xf32>
    %755 = vector.shape_cast %754 : vector<16xf32> to vector<16x1xf32>
    %cst_277 = arith.constant 1.280000e+02 : f32
    %756 = vector.broadcast %cst_277 : f32 to vector<16x1xf32>
    %757 = arith.divf %755, %756 : vector<16x1xf32>
    %758 = vector.broadcast %757 : vector<16x1xf32> to vector<16x128xf32>
    %759 = arith.subf %753, %758 : vector<16x128xf32>
    %760 = arith.mulf %759, %759 : vector<16x128xf32>
    %cst_278 = arith.constant dense<0.000000e+00> : vector<16xf32>
    %761 = vector.multi_reduction <add>, %760, %cst_278 [1] : vector<16x128xf32> to vector<16xf32>
    %762 = vector.shape_cast %761 : vector<16xf32> to vector<16x1xf32>
    %cst_279 = arith.constant 1.280000e+02 : f32
    %763 = vector.broadcast %cst_279 : f32 to vector<16x1xf32>
    %764 = arith.divf %762, %763 : vector<16x1xf32>
    %765 = vector.broadcast %757 : vector<16x1xf32> to vector<16x128xf32>
    %766 = arith.subf %753, %765 : vector<16x128xf32>
    %cst_280 = arith.constant 9.99999974E-6 : f32
    %767 = vector.broadcast %cst_280 : f32 to vector<16x1xf32>
    %768 = arith.addf %764, %767 : vector<16x1xf32>
    %769 = math.rsqrt %768 : vector<16x1xf32>
    %770 = vector.broadcast %769 : vector<16x1xf32> to vector<16x128xf32>
    %771 = arith.mulf %766, %770 : vector<16x128xf32>
    %c0_281 = arith.constant 0 : index
    %c0_282 = arith.constant 0 : index
    %772 = vector.load %arg36[%c0_281, %c0_282] : memref<1x128xf32, #tpu.memory_space<vmem>>, vector<1x128xf32>
    %773 = vector.broadcast %772 : vector<1x128xf32> to vector<16x128xf32>
    %774 = arith.mulf %771, %773 : vector<16x128xf32>
    %c0_283 = arith.constant 0 : index
    %c0_284 = arith.constant 0 : index
    %775 = vector.load %arg35[%c0_283, %c0_284] : memref<1x128xf32, #tpu.memory_space<vmem>>, vector<1x128xf32>
    %776 = vector.broadcast %775 : vector<1x128xf32> to vector<16x128xf32>
    %777 = arith.addf %774, %776 : vector<16x128xf32>
    %778 = arith.truncf %777 : vector<16x128xf32> to vector<16x128xbf16>
    %c0_285 = arith.constant 0 : index
    %c0_286 = arith.constant 0 : index
    %779 = vector.load %arg30[%c0_285, %c0_286] : memref<128x256xbf16, #tpu.memory_space<vmem>>, vector<128x256xbf16>
    %cst_287 = arith.constant dense<0.000000e+00> : vector<16x256xf32>
    %780 = tpu.matmul %778, %779, %cst_287 {dimension_numbers = #tpu.dot_dimension_numbers<[1], [0], [0], [1], [0, 0, 1, 1], [], []>} : vector<16x128xbf16>, vector<128x256xbf16>, vector<16x256xf32> -> vector<16x256xf32>
    %c0_288 = arith.constant 0 : index
    %c0_289 = arith.constant 0 : index
    %781 = vector.load %arg29[%c0_288, %c0_289] : memref<1x256xf32, #tpu.memory_space<vmem>>, vector<1x256xf32>
    %782 = vector.broadcast %781 : vector<1x256xf32> to vector<16x256xf32>
    %783 = arith.addf %780, %782 : vector<16x256xf32>
    %784 = math.absf %783 : vector<16x256xf32>
    %cst_290 = arith.constant 0.707106769 : f32
    %785 = vector.broadcast %cst_290 : f32 to vector<16x256xf32>
    %786 = arith.mulf %784, %785 : vector<16x256xf32>
    %cst_291 = arith.constant 0.000000e+00 : f32
    %787 = vector.broadcast %cst_291 : f32 to vector<16x256xf32>
    %788 = arith.cmpf oge, %783, %787 : vector<16x256xf32>
    %cst_292 = arith.constant 1.000000e+00 : f32
    %cst_293 = arith.constant -1.000000e+00 : f32
    %789 = vector.broadcast %cst_292 : f32 to vector<16x256xf32>
    %790 = vector.broadcast %cst_293 : f32 to vector<16x256xf32>
    %791 = arith.select %788, %789, %790 : vector<16x256xi1>, vector<16x256xf32>
    %cst_294 = arith.constant 0.327591091 : f32
    %792 = vector.broadcast %cst_294 : f32 to vector<16x256xf32>
    %793 = arith.mulf %792, %786 : vector<16x256xf32>
    %cst_295 = arith.constant 1.000000e+00 : f32
    %794 = vector.broadcast %cst_295 : f32 to vector<16x256xf32>
    %795 = arith.addf %794, %793 : vector<16x256xf32>
    %cst_296 = arith.constant 1.000000e+00 : f32
    %796 = vector.broadcast %cst_296 : f32 to vector<16x256xf32>
    %797 = arith.divf %796, %795 : vector<16x256xf32>
    %cst_297 = arith.constant 1.06140542 : f32
    %798 = vector.broadcast %cst_297 : f32 to vector<16x256xf32>
    %799 = arith.mulf %798, %797 : vector<16x256xf32>
    %cst_298 = arith.constant 1.45315206 : f32
    %800 = vector.broadcast %cst_298 : f32 to vector<16x256xf32>
    %801 = arith.subf %799, %800 : vector<16x256xf32>
    %802 = arith.mulf %801, %797 : vector<16x256xf32>
    %cst_299 = arith.constant 1.42141378 : f32
    %803 = vector.broadcast %cst_299 : f32 to vector<16x256xf32>
    %804 = arith.addf %802, %803 : vector<16x256xf32>
    %805 = arith.mulf %804, %797 : vector<16x256xf32>
    %cst_300 = arith.constant 0.284496725 : f32
    %806 = vector.broadcast %cst_300 : f32 to vector<16x256xf32>
    %807 = arith.subf %805, %806 : vector<16x256xf32>
    %808 = arith.mulf %807, %797 : vector<16x256xf32>
    %cst_301 = arith.constant 0.254829586 : f32
    %809 = vector.broadcast %cst_301 : f32 to vector<16x256xf32>
    %810 = arith.addf %808, %809 : vector<16x256xf32>
    %811 = arith.mulf %810, %797 : vector<16x256xf32>
    %cst_302 = arith.constant 0.000000e+00 : f32
    %812 = vector.broadcast %cst_302 : f32 to vector<16x256xf32>
    %813 = arith.subf %812, %786 : vector<16x256xf32>
    %814 = arith.mulf %813, %786 : vector<16x256xf32>
    %815 = math.exp %814 : vector<16x256xf32>
    %816 = arith.mulf %811, %815 : vector<16x256xf32>
    %cst_303 = arith.constant 1.000000e+00 : f32
    %817 = vector.broadcast %cst_303 : f32 to vector<16x256xf32>
    %818 = arith.subf %817, %816 : vector<16x256xf32>
    %819 = arith.mulf %791, %818 : vector<16x256xf32>
    %cst_304 = arith.constant 5.000000e-01 : f32
    %820 = vector.broadcast %cst_304 : f32 to vector<16x256xf32>
    %821 = arith.mulf %820, %783 : vector<16x256xf32>
    %cst_305 = arith.constant 1.000000e+00 : f32
    %822 = vector.broadcast %cst_305 : f32 to vector<16x256xf32>
    %823 = arith.addf %822, %819 : vector<16x256xf32>
    %824 = arith.mulf %821, %823 : vector<16x256xf32>
    %825 = arith.truncf %824 : vector<16x256xf32> to vector<16x256xbf16>
    %c0_306 = arith.constant 0 : index
    %c0_307 = arith.constant 0 : index
    %826 = vector.load %arg32[%c0_306, %c0_307] : memref<256x128xbf16, #tpu.memory_space<vmem>>, vector<256x128xbf16>
    %cst_308 = arith.constant dense<0.000000e+00> : vector<16x128xf32>
    %827 = tpu.matmul %825, %826, %cst_308 {dimension_numbers = #tpu.dot_dimension_numbers<[1], [0], [0], [1], [0, 0, 1, 1], [], []>} : vector<16x256xbf16>, vector<256x128xbf16>, vector<16x128xf32> -> vector<16x128xf32>
    %c0_309 = arith.constant 0 : index
    %c0_310 = arith.constant 0 : index
    %828 = vector.load %arg31[%c0_309, %c0_310] : memref<1x128xf32, #tpu.memory_space<vmem>>, vector<1x128xf32>
    %829 = vector.broadcast %828 : vector<1x128xf32> to vector<16x128xf32>
    %830 = arith.addf %827, %829 : vector<16x128xf32>
    %831 = arith.addf %777, %830 : vector<16x128xf32>
    %cst_311 = arith.constant dense<0.000000e+00> : vector<16xf32>
    %832 = vector.multi_reduction <add>, %831, %cst_311 [1] : vector<16x128xf32> to vector<16xf32>
    %833 = vector.shape_cast %832 : vector<16xf32> to vector<16x1xf32>
    %cst_312 = arith.constant 1.280000e+02 : f32
    %834 = vector.broadcast %cst_312 : f32 to vector<16x1xf32>
    %835 = arith.divf %833, %834 : vector<16x1xf32>
    %836 = vector.broadcast %835 : vector<16x1xf32> to vector<16x128xf32>
    %837 = arith.subf %831, %836 : vector<16x128xf32>
    %838 = arith.mulf %837, %837 : vector<16x128xf32>
    %cst_313 = arith.constant dense<0.000000e+00> : vector<16xf32>
    %839 = vector.multi_reduction <add>, %838, %cst_313 [1] : vector<16x128xf32> to vector<16xf32>
    %840 = vector.shape_cast %839 : vector<16xf32> to vector<16x1xf32>
    %cst_314 = arith.constant 1.280000e+02 : f32
    %841 = vector.broadcast %cst_314 : f32 to vector<16x1xf32>
    %842 = arith.divf %840, %841 : vector<16x1xf32>
    %843 = vector.broadcast %835 : vector<16x1xf32> to vector<16x128xf32>
    %844 = arith.subf %831, %843 : vector<16x128xf32>
    %cst_315 = arith.constant 9.99999974E-6 : f32
    %845 = vector.broadcast %cst_315 : f32 to vector<16x1xf32>
    %846 = arith.addf %842, %845 : vector<16x1xf32>
    %847 = math.rsqrt %846 : vector<16x1xf32>
    %848 = vector.broadcast %847 : vector<16x1xf32> to vector<16x128xf32>
    %849 = arith.mulf %844, %848 : vector<16x128xf32>
    %c0_316 = arith.constant 0 : index
    %c0_317 = arith.constant 0 : index
    %850 = vector.load %arg38[%c0_316, %c0_317] : memref<1x128xf32, #tpu.memory_space<vmem>>, vector<1x128xf32>
    %851 = vector.broadcast %850 : vector<1x128xf32> to vector<16x128xf32>
    %852 = arith.mulf %849, %851 : vector<16x128xf32>
    %c0_318 = arith.constant 0 : index
    %c0_319 = arith.constant 0 : index
    %853 = vector.load %arg37[%c0_318, %c0_319] : memref<1x128xf32, #tpu.memory_space<vmem>>, vector<1x128xf32>
    %854 = vector.broadcast %853 : vector<1x128xf32> to vector<16x128xf32>
    %855 = arith.addf %852, %854 : vector<16x128xf32>
    %856 = arith.truncf %855 : vector<16x128xf32> to vector<16x128xbf16>
    %c0_320 = arith.constant 0 : index
    %c0_321 = arith.constant 0 : index
    %857 = vector.load %arg45[%c0_320, %c0_321] : memref<128x64xbf16, #tpu.memory_space<vmem>>, vector<128x64xbf16>
    %cst_322 = arith.constant dense<0.000000e+00> : vector<16x64xf32>
    %858 = tpu.matmul %856, %857, %cst_322 {dimension_numbers = #tpu.dot_dimension_numbers<[1], [0], [0], [1], [0, 0, 1, 1], [], []>} : vector<16x128xbf16>, vector<128x64xbf16>, vector<16x64xf32> -> vector<16x64xf32>
    %c0_323 = arith.constant 0 : index
    %c0_324 = arith.constant 0 : index
    %859 = vector.load %arg44[%c0_323, %c0_324] : memref<1x64xf32, #tpu.memory_space<vmem>>, vector<1x64xf32>
    %860 = vector.broadcast %859 : vector<1x64xf32> to vector<16x64xf32>
    %861 = arith.addf %858, %860 : vector<16x64xf32>
    %cst_325 = arith.constant dense<0xFF800000> : vector<16xf32>
    %862 = vector.multi_reduction <maximumf>, %861, %cst_325 [1] : vector<16x64xf32> to vector<16xf32>
    %863 = vector.shape_cast %862 : vector<16xf32> to vector<16x1xf32>
    %864 = vector.broadcast %863 : vector<16x1xf32> to vector<16x64xf32>
    %865 = arith.subf %861, %864 : vector<16x64xf32>
    %866 = math.exp %865 : vector<16x64xf32>
    %cst_326 = arith.constant dense<0.000000e+00> : vector<16xf32>
    %867 = vector.multi_reduction <add>, %866, %cst_326 [1] : vector<16x64xf32> to vector<16xf32>
    %868 = vector.shape_cast %867 : vector<16xf32> to vector<16x1xf32>
    %869 = math.log %868 : vector<16x1xf32>
    %870 = vector.broadcast %869 : vector<16x1xf32> to vector<16x64xf32>
    %871 = arith.subf %865, %870 : vector<16x64xf32>
    %c0_327 = arith.constant 0 : index
    %c0_328 = arith.constant 0 : index
    %872 = vector.load %arg53[%c0_327, %c0_328] : memref<16x64xf32, #tpu.memory_space<vmem>>, vector<16x64xf32>
    tpu.vector_store %arg53[%c0_327, %c0_328], %871 {strides = array<i32>} : memref<16x64xf32, #tpu.memory_space<vmem>>, vector<16x64xf32>,
    return
  }
  func.func @transform_0(%arg0: i32) -> (i32, i32) {
    %c0_i32 = arith.constant 0 : i32
    %c0_i32_0 = arith.constant 0 : i32
    %c0_i32_1 = arith.constant 0 : i32
    return %c0_i32, %c0_i32_0 : i32, i32
  }
  func.func @transform_1(%arg0: i32) -> (i32, i32) {
    %c0_i32 = arith.constant 0 : i32
    %c0_i32_0 = arith.constant 0 : i32
    %c0_i32_1 = arith.constant 0 : i32
    return %c0_i32, %c0_i32_0 : i32, i32
  }
  func.func @transform_2(%arg0: i32) -> (i32, i32) {
    %c0_i32 = arith.constant 0 : i32
    %c0_i32_0 = arith.constant 0 : i32
    %c0_i32_1 = arith.constant 0 : i32
    return %c0_i32, %c0_i32_0 : i32, i32
  }
  func.func @transform_3(%arg0: i32) -> (i32, i32) {
    %c0_i32 = arith.constant 0 : i32
    %c0_i32_0 = arith.constant 0 : i32
    %c0_i32_1 = arith.constant 0 : i32
    return %c0_i32, %c0_i32_0 : i32, i32
  }
  func.func @transform_4(%arg0: i32) -> (i32, i32) {
    %c0_i32 = arith.constant 0 : i32
    %c0_i32_0 = arith.constant 0 : i32
    %c0_i32_1 = arith.constant 0 : i32
    return %c0_i32, %c0_i32_0 : i32, i32
  }
  func.func @transform_5(%arg0: i32) -> (i32, i32) {
    %c0_i32 = arith.constant 0 : i32
    %c0_i32_0 = arith.constant 0 : i32
    %c0_i32_1 = arith.constant 0 : i32
    return %c0_i32, %c0_i32_0 : i32, i32
  }
  func.func @transform_6(%arg0: i32) -> (i32, i32) {
    %c0_i32 = arith.constant 0 : i32
    %c0_i32_0 = arith.constant 0 : i32
    %c0_i32_1 = arith.constant 0 : i32
    return %c0_i32, %c0_i32_0 : i32, i32
  }
  func.func @transform_7(%arg0: i32) -> (i32, i32) {
    %c0_i32 = arith.constant 0 : i32
    %c0_i32_0 = arith.constant 0 : i32
    %c0_i32_1 = arith.constant 0 : i32
    return %c0_i32, %c0_i32_0 : i32, i32
  }
  func.func @transform_8(%arg0: i32) -> (i32, i32) {
    %c0_i32 = arith.constant 0 : i32
    %c0_i32_0 = arith.constant 0 : i32
    %c0_i32_1 = arith.constant 0 : i32
    return %c0_i32, %c0_i32_0 : i32, i32
  }
  func.func @transform_9(%arg0: i32) -> (i32, i32) {
    %c0_i32 = arith.constant 0 : i32
    %c0_i32_0 = arith.constant 0 : i32
    %c0_i32_1 = arith.constant 0 : i32
    return %c0_i32, %c0_i32_0 : i32, i32
  }
  func.func @transform_10(%arg0: i32) -> (i32, i32) {
    %c0_i32 = arith.constant 0 : i32
    %c0_i32_0 = arith.constant 0 : i32
    %c0_i32_1 = arith.constant 0 : i32
    return %c0_i32, %c0_i32_0 : i32, i32
  }
  func.func @transform_11(%arg0: i32) -> (i32, i32) {
    %c0_i32 = arith.constant 0 : i32
    %c0_i32_0 = arith.constant 0 : i32
    %c0_i32_1 = arith.constant 0 : i32
    return %c0_i32, %c0_i32_0 : i32, i32
  }
  func.func @transform_12(%arg0: i32) -> (i32, i32) {
    %c0_i32 = arith.constant 0 : i32
    %c0_i32_0 = arith.constant 0 : i32
    %c0_i32_1 = arith.constant 0 : i32
    return %c0_i32, %c0_i32_0 : i32, i32
  }
  func.func @transform_13(%arg0: i32) -> (i32, i32) {
    %c0_i32 = arith.constant 0 : i32
    %c0_i32_0 = arith.constant 0 : i32
    %c0_i32_1 = arith.constant 0 : i32
    return %c0_i32, %c0_i32_0 : i32, i32
  }
  func.func @transform_14(%arg0: i32) -> (i32, i32) {
    %c0_i32 = arith.constant 0 : i32
    %c0_i32_0 = arith.constant 0 : i32
    %c0_i32_1 = arith.constant 0 : i32
    return %c0_i32, %c0_i32_0 : i32, i32
  }
  func.func @transform_15(%arg0: i32) -> (i32, i32) {
    %c0_i32 = arith.constant 0 : i32
    %c0_i32_0 = arith.constant 0 : i32
    %c0_i32_1 = arith.constant 0 : i32
    return %c0_i32, %c0_i32_0 : i32, i32
  }
  func.func @transform_16(%arg0: i32) -> (i32, i32) {
    %c0_i32 = arith.constant 0 : i32
    %c0_i32_0 = arith.constant 0 : i32
    %c0_i32_1 = arith.constant 0 : i32
    return %c0_i32, %c0_i32_0 : i32, i32
  }
  func.func @transform_17(%arg0: i32) -> (i32, i32) {
    %c0_i32 = arith.constant 0 : i32
    %c0_i32_0 = arith.constant 0 : i32
    %c0_i32_1 = arith.constant 0 : i32
    return %c0_i32, %c0_i32_0 : i32, i32
  }
  func.func @transform_18(%arg0: i32) -> (i32, i32) {
    %c0_i32 = arith.constant 0 : i32
    %c0_i32_0 = arith.constant 0 : i32
    %c0_i32_1 = arith.constant 0 : i32
    return %c0_i32, %c0_i32_0 : i32, i32
  }
  func.func @transform_19(%arg0: i32) -> (i32, i32) {
    %c0_i32 = arith.constant 0 : i32
    %c0_i32_0 = arith.constant 0 : i32
    %c0_i32_1 = arith.constant 0 : i32
    return %c0_i32, %c0_i32_0 : i32, i32
  }
  func.func @transform_20(%arg0: i32) -> (i32, i32) {
    %c0_i32 = arith.constant 0 : i32
    %c0_i32_0 = arith.constant 0 : i32
    %c0_i32_1 = arith.constant 0 : i32
    return %c0_i32, %c0_i32_0 : i32, i32
  }
  func.func @transform_21(%arg0: i32) -> (i32, i32) {
    %c0_i32 = arith.constant 0 : i32
    %c0_i32_0 = arith.constant 0 : i32
    %c0_i32_1 = arith.constant 0 : i32
    return %c0_i32, %c0_i32_0 : i32, i32
  }
  func.func @transform_22(%arg0: i32) -> (i32, i32) {
    %c0_i32 = arith.constant 0 : i32
    %c0_i32_0 = arith.constant 0 : i32
    %c0_i32_1 = arith.constant 0 : i32
    return %c0_i32, %c0_i32_0 : i32, i32
  }
  func.func @transform_23(%arg0: i32) -> (i32, i32) {
    %c0_i32 = arith.constant 0 : i32
    %c0_i32_0 = arith.constant 0 : i32
    %c0_i32_1 = arith.constant 0 : i32
    return %c0_i32, %c0_i32_0 : i32, i32
  }
  func.func @transform_24(%arg0: i32) -> (i32, i32) {
    %c0_i32 = arith.constant 0 : i32
    %c0_i32_0 = arith.constant 0 : i32
    %c0_i32_1 = arith.constant 0 : i32
    return %c0_i32, %c0_i32_0 : i32, i32
  }
  func.func @transform_25(%arg0: i32) -> (i32, i32) {
    %c0_i32 = arith.constant 0 : i32
    %c0_i32_0 = arith.constant 0 : i32
    %c0_i32_1 = arith.constant 0 : i32
    return %c0_i32, %c0_i32_0 : i32, i32
  }
  func.func @transform_26(%arg0: i32) -> (i32, i32) {
    %c0_i32 = arith.constant 0 : i32
    %c0_i32_0 = arith.constant 0 : i32
    %c0_i32_1 = arith.constant 0 : i32
    return %c0_i32, %c0_i32_0 : i32, i32
  }
  func.func @transform_27(%arg0: i32) -> (i32, i32) {
    %c0_i32 = arith.constant 0 : i32
    %c0_i32_0 = arith.constant 0 : i32
    %c0_i32_1 = arith.constant 0 : i32
    return %c0_i32, %c0_i32_0 : i32, i32
  }
  func.func @transform_28(%arg0: i32) -> (i32, i32) {
    %c0_i32 = arith.constant 0 : i32
    %c0_i32_0 = arith.constant 0 : i32
    %c0_i32_1 = arith.constant 0 : i32
    return %c0_i32, %c0_i32_0 : i32, i32
  }
  func.func @transform_29(%arg0: i32) -> (i32, i32) {
    %c0_i32 = arith.constant 0 : i32
    %c0_i32_0 = arith.constant 0 : i32
    %c0_i32_1 = arith.constant 0 : i32
    return %c0_i32, %c0_i32_0 : i32, i32
  }
  func.func @transform_30(%arg0: i32) -> (i32, i32) {
    %c0_i32 = arith.constant 0 : i32
    %c0_i32_0 = arith.constant 0 : i32
    %c0_i32_1 = arith.constant 0 : i32
    return %c0_i32, %c0_i32_0 : i32, i32
  }
  func.func @transform_31(%arg0: i32) -> (i32, i32) {
    %c0_i32 = arith.constant 0 : i32
    %c0_i32_0 = arith.constant 0 : i32
    %c0_i32_1 = arith.constant 0 : i32
    return %c0_i32, %c0_i32_0 : i32, i32
  }
  func.func @transform_32(%arg0: i32) -> (i32, i32) {
    %c0_i32 = arith.constant 0 : i32
    %c0_i32_0 = arith.constant 0 : i32
    %c0_i32_1 = arith.constant 0 : i32
    return %c0_i32, %c0_i32_0 : i32, i32
  }
  func.func @transform_33(%arg0: i32) -> (i32, i32) {
    %c0_i32 = arith.constant 0 : i32
    %c0_i32_0 = arith.constant 0 : i32
    %c0_i32_1 = arith.constant 0 : i32
    return %c0_i32, %c0_i32_0 : i32, i32
  }
  func.func @transform_34(%arg0: i32) -> (i32, i32) {
    %c0_i32 = arith.constant 0 : i32
    %c0_i32_0 = arith.constant 0 : i32
    %c0_i32_1 = arith.constant 0 : i32
    return %c0_i32, %c0_i32_0 : i32, i32
  }
  func.func @transform_35(%arg0: i32) -> (i32, i32) {
    %c0_i32 = arith.constant 0 : i32
    %c0_i32_0 = arith.constant 0 : i32
    %c0_i32_1 = arith.constant 0 : i32
    return %c0_i32, %c0_i32_0 : i32, i32
  }
  func.func @transform_36(%arg0: i32) -> (i32, i32) {
    %c0_i32 = arith.constant 0 : i32
    %c0_i32_0 = arith.constant 0 : i32
    %c0_i32_1 = arith.constant 0 : i32
    return %c0_i32, %c0_i32_0 : i32, i32
  }
  func.func @transform_37(%arg0: i32) -> (i32, i32) {
    %c0_i32 = arith.constant 0 : i32
    %c0_i32_0 = arith.constant 0 : i32
    %c0_i32_1 = arith.constant 0 : i32
    return %c0_i32, %c0_i32_0 : i32, i32
  }
  func.func @transform_38(%arg0: i32) -> (i32, i32) {
    %c0_i32 = arith.constant 0 : i32
    %c0_i32_0 = arith.constant 0 : i32
    %c0_i32_1 = arith.constant 0 : i32
    return %c0_i32, %c0_i32_0 : i32, i32
  }
  func.func @transform_39(%arg0: i32) -> (i32, i32) {
    %c0_i32 = arith.constant 0 : i32
    %c0_i32_0 = arith.constant 0 : i32
    %c0_i32_1 = arith.constant 0 : i32
    return %c0_i32, %c0_i32_0 : i32, i32
  }
  func.func @transform_40(%arg0: i32) -> (i32, i32) {
    %c0_i32 = arith.constant 0 : i32
    %c0_i32_0 = arith.constant 0 : i32
    %c0_i32_1 = arith.constant 0 : i32
    return %c0_i32, %c0_i32_0 : i32, i32
  }
  func.func @transform_41(%arg0: i32) -> (i32, i32) {
    %c0_i32 = arith.constant 0 : i32
    %c0_i32_0 = arith.constant 0 : i32
    %c0_i32_1 = arith.constant 0 : i32
    return %c0_i32, %c0_i32_0 : i32, i32
  }
  func.func @transform_42(%arg0: i32) -> (i32, i32) {
    %c0_i32 = arith.constant 0 : i32
    %c0_i32_0 = arith.constant 0 : i32
    %c0_i32_1 = arith.constant 0 : i32
    return %c0_i32, %c0_i32_0 : i32, i32
  }
  func.func @transform_43(%arg0: i32) -> (i32, i32) {
    %c0_i32 = arith.constant 0 : i32
    %c0_i32_0 = arith.constant 0 : i32
    %c0_i32_1 = arith.constant 0 : i32
    return %c0_i32, %c0_i32_0 : i32, i32
  }
  func.func @transform_44(%arg0: i32) -> (i32, i32) {
    %c0_i32 = arith.constant 0 : i32
    %c0_i32_0 = arith.constant 0 : i32
    %c0_i32_1 = arith.constant 0 : i32
    return %c0_i32, %c0_i32_0 : i32, i32
  }
  func.func @transform_45(%arg0: i32) -> (i32, i32) {
    %c0_i32 = arith.constant 0 : i32
    %c0_i32_0 = arith.constant 0 : i32
    %c0_i32_1 = arith.constant 0 : i32
    return %c0_i32, %c0_i32_0 : i32, i32
  }
  func.func @transform_46(%arg0: i32) -> (i32, i32) {
    %c0_i32 = arith.constant 0 : i32
    %c0_i32_0 = arith.constant 0 : i32
    %c0_i32_1 = arith.constant 0 : i32
    return %c0_i32, %c0_i32_0 : i32, i32
  }
  func.func @transform_47(%arg0: i32) -> (i32, i32) {
    %c0_i32 = arith.constant 0 : i32
    %c0_i32_0 = arith.constant 0 : i32
    %c0_i32_1 = arith.constant 0 : i32
    return %c0_i32, %c0_i32_0 : i32, i32
  }
  func.func @transform_48(%arg0: i32) -> (i32, i32) {
    %c0_i32 = arith.constant 0 : i32
    %c0_i32_0 = arith.constant 0 : i32
    %c0_i32_1 = arith.constant 0 : i32
    return %c0_i32, %c0_i32_0 : i32, i32
  }
  func.func @transform_49(%arg0: i32) -> (i32, i32) {
    %c0_i32 = arith.constant 0 : i32
    %c0_i32_0 = arith.constant 0 : i32
    %c0_i32_1 = arith.constant 0 : i32
    return %c0_i32, %c0_i32_0 : i32, i32
  }
  func.func @transform_50(%arg0: i32) -> (i32, i32) {
    %c0_i32 = arith.constant 0 : i32
    %c0_i32_0 = arith.constant 0 : i32
    %c0_i32_1 = arith.constant 0 : i32
    return %c0_i32, %c0_i32_0 : i32, i32
  }
  func.func @transform_51(%arg0: i32) -> (i32, i32) {
    %c0_i32 = arith.constant 0 : i32
    %c0_i32_0 = arith.constant 0 : i32
    %c0_i32_1 = arith.constant 0 : i32
    return %c0_i32, %c0_i32_0 : i32, i32
  }
  func.func @transform_52(%arg0: i32) -> (i32, i32) {
    %c0_i32 = arith.constant 0 : i32
    %c0_i32_0 = arith.constant 0 : i32
    %c0_i32_1 = arith.constant 0 : i32
    return %c0_i32, %c0_i32_0 : i32, i32
  }
}

</mosaic_0001>

<bundles_post_ra>
// kernel: tile.28
= control target key start
LH: loop header
LB: loop body
LE: loop exit
PB: predicated region body
PF: predicated region fallthrough
CT: control target
= control target key end

     0   :  { %s154_s0 = inlined_call_operand.vmem [shape: f32[8,8], index: 0, kind: input, shape index: {}]   ;;  %s155_s1 = inlined_call_operand.vmem [shape: f32[2,8,2,8], index: 1, kind: output, shape index: {}]  }
   0x1   :  { %v4_v0 = vld [vmem:[%s154_s0] ss:$0 sm:$0xff]  ;;  %v51_v1 = vld [vmem:[%s154_s0 + $0x1] ss:$0 sm:$0xff]  ;;  %v54_v2 = vld [vmem:[%s154_s0 + $0x2] ss:$0 sm:$0xff] }
   0x2   :  { %5 = vst [vmem:[%s155_s1] sm:$0x3] %v4_v0  ;;  %50 = vst [vmem:[%s155_s1 + $0x10] sm:$0x3] %v4_v0  ;;  %v57_v3 = vld [vmem:[%s154_s0 + $0x3] ss:$0 sm:$0xff] }
   0x3   :  { %52 = vst [vmem:[%s155_s1 + $0x2] sm:$0x3] %v51_v1  ;;  %53 = vst [vmem:[%s155_s1 + $0x12] sm:$0x3] %v51_v1  ;;  %v60_v4 = vld [vmem:[%s154_s0 + $0x4] ss:$0 sm:$0xff] }
   0x4   :  { %55 = vst [vmem:[%s155_s1 + $0x4] sm:$0x3] %v54_v2  ;;  %56 = vst [vmem:[%s155_s1 + $0x14] sm:$0x3] %v54_v2  ;;  %v63_v5 = vld [vmem:[%s154_s0 + $0x5] ss:$0 sm:$0xff] }
   0x5   :  { %58 = vst [vmem:[%s155_s1 + $0x6] sm:$0x3] %v57_v3  ;;  %59 = vst [vmem:[%s155_s1 + $0x16] sm:$0x3] %v57_v3  ;;  %v66_v6 = vld [vmem:[%s154_s0 + $0x6] ss:$0 sm:$0xff] }
   0x6   :  { %61 = vst [vmem:[%s155_s1 + $0x8] sm:$0x3] %v60_v4  ;;  %62 = vst [vmem:[%s155_s1 + $0x18] sm:$0x3] %v60_v4  ;;  %v69_v7 = vld [vmem:[%s154_s0 + $0x7] ss:$0 sm:$0xff] }
   0x7   :  { %64 = vst [vmem:[%s155_s1 + $0xa] sm:$0x3] %v63_v5  ;;  %65 = vst [vmem:[%s155_s1 + $0x1a] sm:$0x3] %v63_v5 }
   0x8   :  { %67 = vst [vmem:[%s155_s1 + $0xc] sm:$0x3] %v66_v6  ;;  %68 = vst [vmem:[%s155_s1 + $0x1c] sm:$0x3] %v66_v6 }
   0x9   :  { %70 = vst [vmem:[%s155_s1 + $0xe] sm:$0x3] %v69_v7  ;;  %71 = vst [vmem:[%s155_s1 + $0x1e] sm:$0x3] %v69_v7 }

// kernel: eq.36
= control target key start
LH: loop header
LB: loop body
LE: loop exit
PB: predicated region body
PF: predicated region fallthrough
CT: control target
= control target key end

     0   :  { %vm7_vm0 = vcmask 64512   ;;  %vm13_vm1 = vcmask 130112   ;;  %s39_s0 = inlined_call_operand.vmem [shape: s32[2,8], index: 0, kind: input, shape index: {}]   ;;  %s40_s1 = inlined_call_operand.vmem [shape: s32[16], index: 1, kind: output, shape index: {}]  }
   0x1   :  { %v4_v0 = vld [vmem:[%s39_s0] sm:$0x3]  ;;  %s22_s0 = smov 8  }
   0x2   :  { %5 = vst [vmem:[#allocation1] sm:$0x3] %v4_v0 }
   0x9   :  { %v10_v1 = vld [vmem:[#allocation1 + $0x1] sm:$0x1]   ;;  %v6_v2 = vld [vmem:[#allocation1] sm:$0x1]  }
   0xa   :  { %11 = vrot.lane.b32.xlu0 %v10_v1, %s22_s0  ;;  %8 = vst.msk [vmem:[#allocation0] sm:$0x1] %vm7_vm0, %v6_v2  }
  0x7c   :  { %v12_v3 = vpop.permute.xlu0 %11  }
  0x7d   :  { %14 = vst.msk [vmem:[#allocation0] sm:$0x1] %vm13_vm1, %v12_v3  }
  0x84   :  { %v18_v4 = vld [vmem:[#allocation0] sm:$0x1] }
  0x85   :  { %20 = vst [vmem:[%s40_s1] sm:$0x1] %v18_v4 }

// kernel: tile.29
= control target key start
LH: loop header
LB: loop body
LE: loop exit
PB: predicated region body
PF: predicated region fallthrough
CT: control target
= control target key end

     0   :  { %vm82_vm0 = vcmask 1047556   ;;  %vm84_vm1 = vcmask 64512   ;;  %vm103_vm2 = vcmask 130112   ;;  %s225_s0 = inlined_call_operand.vmem [shape: f32[2,8,2,8], index: 0, kind: input, shape index: {}]   ;;  %s226_s1 = inlined_call_operand.vmem [shape: f32[16,16], index: 1, kind: output, shape index: {}]  }
   0x1   :  { %v138_v0 = vld [vmem:[%s225_s0 + $0xe] sm:$0x3]  ;;  %v139_v1 = vld [vmem:[%s225_s0 + $0xc] sm:$0x3]  ;;  %v140_v2 = vld [vmem:[%s225_s0 + $0xa] sm:$0x3] }
   0x2   :  { %48 = vst [vmem:[#allocation0 + $0x38] sm:$0x3] %v138_v0  ;;  %53 = vst [vmem:[#allocation0 + $0x30] sm:$0x3] %v139_v1  ;;  %v141_v3 = vld [vmem:[%s225_s0 + $0x8] sm:$0x3] }
   0x3   :  { %58 = vst [vmem:[#allocation0 + $0x28] sm:$0x3] %v140_v2  ;;  %v142_v4 = vld [vmem:[%s225_s0 + $0x6] sm:$0x3]  ;;  %v143_v5 = vld [vmem:[%s225_s0 + $0x4] sm:$0x3] }
   0x4   :  { %63 = vst [vmem:[#allocation0 + $0x20] sm:$0x3] %v141_v3  ;;  %68 = vst [vmem:[#allocation0 + $0x18] sm:$0x3] %v142_v4  ;;  %v144_v6 = vld [vmem:[%s225_s0 + $0x2] sm:$0x3] }
   0x5   :  { %73 = vst [vmem:[#allocation0 + $0x10] sm:$0x3] %v143_v5  ;;  %v78_v7 = vld [vmem:[%s225_s0] sm:$0x3]  ;;  %77 = vst [vmem:[#allocation0 + $0x8] sm:$0x3] %v144_v6 }
   0x6   :  { %79 = vst [vmem:[#allocation0] sm:$0x3] %v78_v7  ;;  %v130_v8 = vld [vmem:[%s225_s0 + $0x1e] sm:$0x3]  ;;  %v131_v9 = vld [vmem:[%s225_s0 + $0x1c] sm:$0x3] }
   0x7   :  { %v132_v10 = vld [vmem:[%s225_s0 + $0x1a] sm:$0x3]  ;;  %8 = vst [vmem:[#allocation0 + $0x78] sm:$0x3] %v130_v8  ;;  %13 = vst [vmem:[#allocation0 + $0x70] sm:$0x3] %v131_v9 }
   0x8   :  { %18 = vst [vmem:[#allocation0 + $0x68] sm:$0x3] %v132_v10  ;;  %v133_v11 = vld [vmem:[%s225_s0 + $0x18] sm:$0x3]  ;;  %v134_v12 = vld [vmem:[%s225_s0 + $0x16] sm:$0x3] }
   0x9   :  { %v135_v13 = vld [vmem:[%s225_s0 + $0x14] sm:$0x3]  ;;  %23 = vst [vmem:[#allocation0 + $0x60] sm:$0x3] %v133_v11  ;;  %28 = vst [vmem:[#allocation0 + $0x58] sm:$0x3] %v134_v12 }
   0xa   :  { %33 = vst [vmem:[#allocation0 + $0x50] sm:$0x3] %v135_v13  ;;  %v136_v14 = vld [vmem:[%s225_s0 + $0x12] sm:$0x3]  ;;  %v137_v15 = vld [vmem:[%s225_s0 + $0x10] sm:$0x3] }
   0xb   :  { %38 = vst [vmem:[#allocation0 + $0x48] sm:$0x3] %v136_v14  ;;  %43 = vst [vmem:[#allocation0 + $0x40] sm:$0x3] %v137_v15  ;;  %s148_s0 = smov 8  }
   0xc   :  { %v98_v16 = vld [vmem:[#allocation0 + $0x1] ss:$8 sm:$0xf0]   ;;  %v81_v17 = vld [vmem:[#allocation0] ss:$8 sm:$0xf0]  }
   0xd   :  { %v96_v18 = vld [vmem:[#allocation0 + $0x1] ss:$8 sm:$0xf]   ;;  %v80_v19 = vld [vmem:[#allocation0] ss:$8 sm:$0xf]  }
   0xe   :  { %v100_v20 = vsel %vm82_vm0, %v98_v16, %v96_v18  ;;  %v83_v21 = vsel %vm82_vm0, %v81_v17, %v80_v19 }
   0xf   :  { %101 = vrot.lane.b32.xlu0 %v100_v20, %s148_s0  ;;  %85 = vst.msk [vmem:[%s226_s1] sm:$0xff] %vm84_vm1, %v83_v21  }
  0x10   :  { %v108_v22 = vld [vmem:[#allocation0 + $0x41] ss:$8 sm:$0xf0]   ;;  %v89_v23 = vld [vmem:[#allocation0 + $0x40] ss:$8 sm:$0xf0]  }
  0x12   :  { %v106_v24 = vld [vmem:[#allocation0 + $0x41] ss:$8 sm:$0xf]   ;;  %v87_v25 = vld [vmem:[#allocation0 + $0x40] ss:$8 sm:$0xf]  }
  0x13   :  { %v110_v26 = vsel %vm82_vm0, %v108_v22, %v106_v24  ;;  %v91_v27 = vsel %vm82_vm0, %v89_v23, %v87_v25 }
  0x14   :  { %145 = vst.msk [vmem:[%s226_s1 + $0x8] sm:$0xff] %vm84_vm1, %v91_v27   ;;  %111 = vrot.lane.b32.xlu0 %v110_v26, %s148_s0 }
  0x81   :  { %v102_v28 = vpop.permute.xlu0 %101  }
  0x82   :  { %104 = vst.msk [vmem:[%s226_s1] sm:$0xff] %vm103_vm2, %v102_v28  }
  0x86   :  { %v112_v29 = vpop.permute.xlu0 %111  }
  0x87   :  { %146 = vst.msk [vmem:[%s226_s1 + $0x8] sm:$0xff] %vm103_vm2, %v112_v29  }

// kernel: eq.39
= control target key start
LH: loop header
LB: loop body
LE: loop exit
PB: predicated region body
PF: predicated region fallthrough
CT: control target
= control target key end

     0   :  { %vm7_vm0 = vcmask 31744   ;;  %vm13_vm1 = vcmask 64544   ;;  %s39_s0 = inlined_call_operand.vmem [shape: s32[2,4], index: 0, kind: input, shape index: {}]   ;;  %s40_s1 = inlined_call_operand.vmem [shape: s32[8], index: 1, kind: output, shape index: {}]  }
   0x1   :  { %v4_v0 = vld [vmem:[%s39_s0] sm:$0x3]  ;;  %s22_s0 = smov 4  }
   0x2   :  { %5 = vst [vmem:[#allocation1] sm:$0x3] %v4_v0 }
   0x9   :  { %v10_v1 = vld [vmem:[#allocation1 + $0x1] sm:$0x1]   ;;  %v6_v2 = vld [vmem:[#allocation1] sm:$0x1]  }
   0xa   :  { %11 = vrot.lane.b32.xlu0 %v10_v1, %s22_s0  ;;  %8 = vst.msk [vmem:[#allocation0] sm:$0x1] %vm7_vm0, %v6_v2  }
  0x7c   :  { %v12_v3 = vpop.permute.xlu0 %11  }
  0x7d   :  { %14 = vst.msk [vmem:[#allocation0] sm:$0x1] %vm13_vm1, %v12_v3  }
  0x84   :  { %v18_v4 = vld [vmem:[#allocation0] sm:$0x1] }
  0x85   :  { %20 = vst [vmem:[%s40_s1] sm:$0x1] %v18_v4 }

// kernel: tile.19
= control target key start
LH: loop header
LB: loop body
LE: loop exit
PB: predicated region body
PF: predicated region fallthrough
CT: control target
= control target key end

     0   :  { %s32_s0 = inlined_call_operand.vmem [shape: f32[2,5,128], index: 0, kind: input, shape index: {}]   ;;  %s33_s1 = inlined_call_operand.vmem [shape: f32[10,128], index: 1, kind: output, shape index: {}]  }
   0x1   :  { %v2_v0 = vld [vmem:[%s32_s0] sm:$0x1f]   ;;  %v8_v1 = vld [vmem:[%s32_s0 + $0x8] sm:$0x1f]  }
   0x2   :  { %3 = vst [vmem:[%s33_s1] sm:$0x1f] %v2_v0   ;;  %9 = vst [vmem:[%s33_s1 + $0x5] sm:$0x1f] %v8_v1  }

// kernel: eq.22
= control target key start
LH: loop header
LB: loop body
LE: loop exit
PB: predicated region body
PF: predicated region fallthrough
CT: control target
= control target key end

     0   :  { %vm7_vm0 = vcmask 39936   ;;  %vm13_vm1 = vcmask 80936   ;;  %s39_s0 = inlined_call_operand.vmem [shape: s32[2,5], index: 0, kind: input, shape index: {}]   ;;  %s40_s1 = inlined_call_operand.vmem [shape: s32[10], index: 1, kind: output, shape index: {}]  }
   0x1   :  { %v4_v0 = vld [vmem:[%s39_s0] sm:$0x3]  ;;  %s22_s0 = smov 5  }
   0x2   :  { %5 = vst [vmem:[#allocation1] sm:$0x3] %v4_v0 }
   0x9   :  { %v10_v1 = vld [vmem:[#allocation1 + $0x1] sm:$0x1]   ;;  %v6_v2 = vld [vmem:[#allocation1] sm:$0x1]  }
   0xa   :  { %11 = vrot.lane.b32.xlu0 %v10_v1, %s22_s0  ;;  %8 = vst.msk [vmem:[#allocation0] sm:$0x1] %vm7_vm0, %v6_v2  }
  0x7c   :  { %v12_v3 = vpop.permute.xlu0 %11  }
  0x7d   :  { %14 = vst.msk [vmem:[#allocation0] sm:$0x1] %vm13_vm1, %v12_v3  }
  0x84   :  { %v18_v4 = vld [vmem:[#allocation0] sm:$0x1] }
  0x85   :  { %20 = vst [vmem:[%s40_s1] sm:$0x1] %v18_v4 }

// kernel: cat_forward.2
= control target key start
LH: loop header
LB: loop body
LE: loop exit
PB: predicated region body
PF: predicated region fallthrough
CT: control target
= control target key end

     0   :  { %s5553_s3 = smov 26   ;;  %s5554_s7 = smov 27   ;;  %vm658_vm0 = vcmask 1041408   ;;  %vm5559_vm1 = vmmov 0   ;;  %vm1120_vm10 = vcmask 1044480   ;;  %vm1014_vm11 = vcmask 80896   ;;  %s6658_s0 = inlined_call_operand.smem [shape: u32[31], index: -1, kind: input, shape index: {}] }
   0x1   :  { %s5595_s6 = sld [smem:[%s6658_s0 + %s5553_s3]]   ;;  %s5555_s11 = smov 28   ;;  %vm1018_vm12 = vcmask 74752  }
   0x2   :  { %s5624_s10 = sld [smem:[%s6658_s0 + %s5554_s7]]   ;;  %s5556_s15 = smov 11  }
   0x3   :  { %s4362_s14 = sld [smem:[%s6658_s0 + %s5555_s11]]   ;;  %s5560_s19 = smov 7  }
   0x4   :  { %s5675_s18 = sld [smem:[%s6658_s0 + %s5556_s15]]   ;;  %s5561_s23 = smov 6  }
   0x5   :  { %s4341_s22 = sld [smem:[%s6658_s0 + %s5560_s19]]   ;;  %s5562_s27 = smov 1  }
   0x6   :  { %s4340_s26 = sld [smem:[%s6658_s0 + %s5561_s23]]   ;;  %s5563_s1 = smov 29  }
   0x7   :  { %v5115_v0 = vld [vmem:[%s5595_s6 + $0x40] sm:$0xff]   ;;  %v5119_v4 = vld [vmem:[%s5595_s6 + $0x48] sm:$0xff]   ;;  %v5123_v8 = vld [vmem:[%s5595_s6 + $0x50] sm:$0xff]   ;;  %s4335_s30 = sld [smem:[%s6658_s0 + %s5562_s27]]   ;;  %s5564_s5 = smov 10  }
   0x8   :  { %v5116_v1 = vld [vmem:[%s5595_s6] sm:$0xff]   ;;  %4659 = vmatprep.subr.bf16.mxu0 %v5115_v0  ;;  %v5120_v5 = vld [vmem:[%s5595_s6 + $0x8] sm:$0xff]   ;;  %v5124_v9 = vld [vmem:[%s5595_s6 + $0x10] sm:$0xff]   ;;  %s5839_s4 = sld [smem:[%s6658_s0 + %s5563_s1]]   ;;  %s5565_s12 = smov 3  }
   0x9   :  { %v5117_v2 = vld [vmem:[%s5595_s6 + $0xc0] sm:$0xff]   ;;  %4660 = vmatpush3.bf16.msra.mxu0 %v5116_v1  ;;  %v5121_v6 = vld [vmem:[%s5595_s6 + $0xc8] sm:$0xff]   ;;  %v5125_v10 = vld [vmem:[%s5595_s6 + $0xd0] sm:$0xff]   ;;  %s5911_s8 = sld [smem:[%s6658_s0 + %s5564_s5]]   ;;  %s5566_s16 = smov 9  }
   0xa   :  { %v5118_v3 = vld [vmem:[%s5595_s6 + $0x80] sm:$0xff]   ;;  %4681 = vmatprep.subr.bf16.mxu1 %v5117_v2  ;;  %4661 = vmatprep.subr.bf16.mxu0 %v5119_v4  ;;  %v5122_v7 = vld [vmem:[%s5595_s6 + $0x88] sm:$0xff]   ;;  %v5126_v11 = vld [vmem:[%s5595_s6 + $0x90] sm:$0xff]   ;;  %s1_s11 = sld [smem:[%s6658_s0]]   ;;  %s5567_s20 = smov 8  }
   0xb   :  { %4682 = vmatpush3.bf16.msra.mxu1 %v5118_v3  ;;  %v5127_v12 = vld [vmem:[%s5595_s6 + $0x58] sm:$0xff]   ;;  %v5131_v16 = vld [vmem:[%s5595_s6 + $0x60] sm:$0xff]   ;;  %v5135_v20 = vld [vmem:[%s5595_s6 + $0x68] sm:$0xff]   ;;  %s5946_s15 = sld [smem:[%s6658_s0 + %s5565_s12]]   ;;  %s5568_s24 = smov 5  }
   0xc   :  { %4683 = vmatprep.subr.bf16.mxu1 %v5121_v6  ;;  %v5128_v13 = vld [vmem:[%s5595_s6 + $0x18] sm:$0xff]   ;;  %v5132_v17 = vld [vmem:[%s5595_s6 + $0x20] sm:$0xff]   ;;  %v5136_v21 = vld [vmem:[%s5595_s6 + $0x28] sm:$0xff]   ;;  %s4343_s19 = sld [smem:[%s6658_s0 + %s5566_s16]]   ;;  %s5569_s28 = smov 2  }
   0xd   :  { %4662 = vmatpush3.bf16.msra.mxu0 %v5120_v5  ;;  %v5129_v14 = vld [vmem:[%s5595_s6 + $0xd8] sm:$0xff]   ;;  %v5133_v18 = vld [vmem:[%s5595_s6 + $0xe0] sm:$0xff]   ;;  %v5137_v22 = vld [vmem:[%s5595_s6 + $0xe8] sm:$0xff]   ;;  %s4342_s23 = sld [smem:[%s6658_s0 + %s5567_s20]]   ;;  %s5571_s2 = smov 4  }
   0xe   :  { %4663 = vmatprep.subr.bf16.mxu0 %v5123_v8  ;;  %v5130_v15 = vld [vmem:[%s5595_s6 + $0x98] sm:$0xff]   ;;  %v5134_v19 = vld [vmem:[%s5595_s6 + $0xa0] sm:$0xff]   ;;  %v5138_v23 = vld [vmem:[%s5595_s6 + $0xa8] sm:$0xff]   ;;  %s6002_s27 = sld [smem:[%s6658_s0 + %s5568_s24]]   ;;  %s5572_s7 = smov 23  }
   0xf   :  { %4684 = vmatpush3.bf16.msra.mxu1 %v5122_v7  ;;  %v5139_v24 = vld [vmem:[%s5595_s6 + $0x70] sm:$0xff]   ;;  %v5143_v28 = vld [vmem:[%s5595_s6 + $0x78] sm:$0xff]   ;;  %v128_v31 = vld [vmem:[%s5624_s10 + $0x8] sm:$0xff]  ;;  %s4336_s1 = sld [smem:[%s6658_s0 + %s5569_s28]]   ;;  %s5579_s5 = smov 21  }
  0x10   :  { %4685 = vmatprep.subr.bf16.mxu1 %v5125_v10  ;;  %v5140_v25 = vld [vmem:[%s5595_s6 + $0x30] sm:$0xff]   ;;  %v5144_v29 = vld [vmem:[%s5595_s6 + $0x38] sm:$0xff]   ;;  %v127_v35 = vld [vmem:[%s5624_s10] sm:$0xff]  ;;  %s5580_s9 = smov 20   ;;  %s5581_s13 = smov 17  }
  0x11   :  { %4664 = vmatpush3.bf16.msra.mxu0 %v5124_v9  ;;  %v5141_v26 = vld [vmem:[%s5595_s6 + $0xf0] sm:$0xff]   ;;  %v5145_v30 = vld [vmem:[%s5595_s6 + $0xf8] sm:$0xff]   ;;  %v5147_v38 = vld [vmem:[%s5595_s6 + $0x140] sm:$0xff]   ;;  %s4354_s12 = sld [smem:[%s6658_s0 + %s5580_s9]]   ;;  %s5582_s17 = smov 14  }
  0x12   :  { %4665 = vmatprep.subr.bf16.mxu0 %v5127_v12  ;;  %v5142_v27 = vld [vmem:[%s5595_s6 + $0xb0] sm:$0xff]   ;;  %v134_v32 = vld [vmem:[%s5624_s10 + $0x38] sm:$0x3]  ;;  %v136_v40 = vld [vmem:[%s5624_s10 + $0x48] sm:$0x3]  ;;  %s6470_s16 = sld [smem:[%s6658_s0 + %s5581_s13]]   ;;  %s5583_s21 = smov 16  }
  0x13   :  { %4686 = vmatpush3.bf16.msra.mxu1 %v5126_v11  ;;  %v140_v33 = vpack.c.bf16 %v134_v32, %v128_v31  ;;  %v5146_v34 = vld [vmem:[%s5595_s6 + $0xb8] sm:$0xff]   ;;  %v133_v36 = vld [vmem:[%s5624_s10 + $0x30] sm:$0x3]  ;;  %v5148_v42 = vld [vmem:[%s5595_s6 + $0x100] sm:$0xff]   ;;  %s4348_s20 = sld [smem:[%s6658_s0 + %s5582_s17]]   ;;  %s5584_s24 = smov 25  }
  0x14   :  { %4687 = vmatprep.subr.bf16.mxu1 %v5129_v14  ;;  %v139_v37 = vpack.c.bf16 %v133_v36, %v127_v35  ;;  %v130_v39 = vld [vmem:[%s5624_s10 + $0x18] sm:$0xff]  ;;  %v129_v43 = vld [vmem:[%s5624_s10 + $0x10] sm:$0xff]  ;;  %v135_v44 = vld [vmem:[%s5624_s10 + $0x40] sm:$0x3]  ;;  %s5585_s28 = smov 24  }
  0x15   :  { %4666 = vmatpush3.bf16.msra.mxu0 %v5128_v13  ;;  %563 = vmatprep.mubr.bf16.mxu0 %v140_v33  ;;  %v142_v41 = vpack.c.bf16 %v136_v40, %v130_v39  ;;  %v141_v45 = vpack.c.bf16 %v135_v44, %v129_v43  ;;  %v5149_v46 = vld [vmem:[%s5595_s6 + $0x148] sm:$0xff]   ;;  %v5151_v48 = vld [vmem:[%s5595_s6 + $0x150] sm:$0xff]   ;;  %v5153_v50 = vld [vmem:[%s5595_s6 + $0x158] sm:$0xff]  }
  0x16   :  { %4667 = vmatprep.subr.bf16.mxu0 %v5131_v16  ;;  %v5150_v47 = vld [vmem:[%s5595_s6 + $0x108] sm:$0xff]   ;;  %v5152_v49 = vld [vmem:[%s5595_s6 + $0x110] sm:$0xff]   ;;  %v5154_v51 = vld [vmem:[%s5595_s6 + $0x118] sm:$0xff]  }
  0x17   :  { %4688 = vmatpush3.bf16.msra.mxu1 %v5130_v15  ;;  %604 = vmatprep.mubr.bf16.mxu1 %v142_v41  ;;  %v5155_v52 = vld [vmem:[%s5595_s6 + $0x160] sm:$0xff]   ;;  %v5157_v54 = vld [vmem:[%s5595_s6 + $0x168] sm:$0xff]   ;;  %v138_v56 = vld [vmem:[%s5624_s10 + $0x58] sm:$0x3] }
  0x18   :  { %4689 = vmatprep.subr.bf16.mxu1 %v5133_v18  ;;  %v5156_v53 = vld [vmem:[%s5595_s6 + $0x120] sm:$0xff]   ;;  %v132_v55 = vld [vmem:[%s5624_s10 + $0x28] sm:$0xff]  ;;  %v5159_v59 = vld [vmem:[%s5595_s6 + $0x170] sm:$0xff]  }
  0x19   :  { %4668 = vmatpush3.bf16.msra.mxu0 %v5132_v17  ;;  %v144_v57 = vpack.c.bf16 %v138_v56, %v132_v55  ;;  %v5158_v58 = vld [vmem:[%s5595_s6 + $0x128] sm:$0xff]   ;;  %v5160_v60 = vld [vmem:[%s5595_s6 + $0x130] sm:$0xff]   ;;  %v5161_v61 = vld [vmem:[%s5595_s6 + $0x178] sm:$0xff]  }
  0x1a   :  { %4669 = vmatprep.subr.bf16.mxu0 %v5135_v20  ;;  %v5162_v62 = vld [vmem:[%s5595_s6 + $0x138] sm:$0xff]   ;;  %v131_v63 = vld [vmem:[%s5624_s10 + $0x20] sm:$0xff]  ;;  %v137_v0 = vld [vmem:[%s5624_s10 + $0x50] sm:$0x3]  ;;  %s4338_s6 = sld [smem:[%s6658_s0 + %s5571_s2]]   ;;  %s5586_s2 = smov 30  }
  0x1b   :  { %4690 = vmatpush3.bf16.msra.mxu1 %v5134_v19  ;;  %v143_v1 = vpack.c.bf16 %v137_v0, %v131_v63  ;;  %v241_v3 = vld [vmem:[%s4362_s14] sm:$0xff]  ;;  %v242_v8 = vld [vmem:[%s4362_s14 + $0x8] sm:$0x3]  ;;  %v5558_v63 = vmov 0   ;;  %s6199_s10 = sld [smem:[%s6658_s0 + %s5572_s7]]  }
  0x1c   :  { %4691 = vmatprep.subr.bf16.mxu1 %v5137_v22  ;;  %v5165_v31 = vld [vmem:[%s5675_s18 + $0x4] ss:$12 sps:$4 sm:$0xff]   ;;  %v5166_v32 = vld [vmem:[%s5675_s18 + $0x8] ss:$12 sps:$4 sm:$0xff]   ;;  %v5170_v44 = vld [vmem:[%s5675_s18 + $0x20] ss:$12 sps:$4 sm:$0xff]  }
  0x1d   :  { %4670 = vmatpush3.bf16.msra.mxu0 %v5136_v21  ;;  %v5167_v43 = vld [vmem:[%s5675_s18 + $0x18] ss:$12 sps:$4 sm:$0xff]   ;;  %v5186_v56 = vld [vmem:[%s5675_s18 + $0x80] ss:$12 sps:$4 sm:$0xff]  }
  0x1e   :  { %4671 = vmatprep.subr.bf16.mxu0 %v5139_v24  ;;  %v5183_v55 = vld [vmem:[%s5675_s18 + $0x78] ss:$12 sps:$4 sm:$0xff]  }
  0x1f   :  { %4692 = vmatpush3.bf16.msra.mxu1 %v5138_v23 }
  0x20   :  { %4693 = vmatprep.subr.bf16.mxu1 %v5141_v26 }
  0x21   :  { %4672 = vmatpush3.bf16.msra.mxu0 %v5140_v25 }
  0x22   :  { %4673 = vmatprep.subr.bf16.mxu0 %v5143_v28 }
  0x23   :  { %4694 = vmatpush3.bf16.msra.mxu1 %v5142_v27 }
  0x24   :  { %4695 = vmatprep.subr.bf16.mxu1 %v5145_v30  ;;  %v5163_v30 = vld [vmem:[%s5675_s18] ss:$12 sps:$4 sm:$0xff]  }
  0x25   :  { %4674 = vmatpush3.bf16.msra.mxu0 %v5144_v29  ;;  %v5557_v29 = vmov 0.0  }
  0x26   :  { %4703 = vmatprep.subr.bf16.mxu0 %v5147_v38 }
  0x27   :  { %4696 = vmatpush3.bf16.msra.mxu1 %v5146_v34 }
  0x28   :  { %564 = vmatmul.mubr.bf16.vlgmr.msra.gmra.mrb[0].mxu0 %v139_v37  ;;  %878 = vmatprep.subr.bf16.mxu1 %v5165_v31 }
  0x29   :  { %4704 = vmatpush3.bf16.msra.mxu0 %v5148_v42  ;;  %645 = vmatprep.mubr.bf16.mxu0 %v144_v57  ;;  %v5169_v42 = vld [vmem:[%s5675_s18 + $0x1c] ss:$12 sps:$4 sm:$0xff]   ;;  %v5189_v57 = vld [vmem:[%s5675_s18 + $0x94] ss:$12 sps:$4 sm:$0xff]  }
  0x2a   :  { %605 = vmatmul.mubr.bf16.vlgmr.msra.gmra.mrb[0].mxu1 %v141_v45  ;;  %4705 = vmatprep.subr.bf16.mxu0 %v5149_v46  ;;  %v5173_v45 = vld [vmem:[%s5675_s18 + $0x34] ss:$12 sps:$4 sm:$0xff]   ;;  %v5171_v46 = vld [vmem:[%s5675_s18 + $0x30] ss:$12 sps:$4 sm:$0xff]  }
  0x2b   :  { %879 = vmatpush1.bf16.msra.mxu1 %v5163_v30  ;;  %910 = vmatprep.mubr.bf16.mxu1 %v5558_v63 }
  0x2c   :  { %880 = vmatprep.subr.bf16.mxu1 %v5169_v42 }
  0x2d   :  { %4706 = vmatpush3.bf16.msra.mxu0 %v5150_v47  ;;  %v5174_v47 = vld [vmem:[%s5675_s18 + $0x38] ss:$12 sps:$4 sm:$0xff]  }
  0x2e   :  { %4707 = vmatprep.subr.bf16.mxu0 %v5151_v48  ;;  %v5177_v48 = vld [vmem:[%s5675_s18 + $0x4c] ss:$12 sps:$4 sm:$0xff]  }
  0x2f   :  { %881 = vmatpush1.bf16.msra.mxu1 %v5167_v43 }
  0x30   :  { %882 = vmatprep.subr.bf16.mxu1 %v5173_v45 }
  0x31   :  { %4708 = vmatpush3.bf16.msra.mxu0 %v5152_v49  ;;  %v5175_v49 = vld [vmem:[%s5675_s18 + $0x48] ss:$12 sps:$4 sm:$0xff]  }
  0x32   :  { %4709 = vmatprep.subr.bf16.mxu0 %v5153_v50  ;;  %v5178_v50 = vld [vmem:[%s5675_s18 + $0x50] ss:$12 sps:$4 sm:$0xff]  }
  0x33   :  { %883 = vmatpush1.bf16.msra.mxu1 %v5171_v46 }
  0x34   :  { %884 = vmatprep.subr.bf16.mxu1 %v5177_v48 }
  0x35   :  { %4710 = vmatpush3.bf16.msra.mxu0 %v5154_v51  ;;  %v5181_v51 = vld [vmem:[%s5675_s18 + $0x64] ss:$12 sps:$4 sm:$0xff]  }
  0x36   :  { %4711 = vmatprep.subr.bf16.mxu0 %v5155_v52  ;;  %v5179_v52 = vld [vmem:[%s5675_s18 + $0x60] ss:$12 sps:$4 sm:$0xff]  }
  0x37   :  { %885 = vmatpush1.bf16.msra.mxu1 %v5175_v49 }
  0x38   :  { %886 = vmatprep.subr.bf16.mxu1 %v5181_v51 }
  0x39   :  { %4712 = vmatpush3.bf16.msra.mxu0 %v5156_v53  ;;  %v5182_v53 = vld [vmem:[%s5675_s18 + $0x68] ss:$12 sps:$4 sm:$0xff]  }
  0x3a   :  { %4713 = vmatprep.subr.bf16.mxu0 %v5157_v54  ;;  %v5185_v54 = vld [vmem:[%s5675_s18 + $0x7c] ss:$12 sps:$4 sm:$0xff]  }
  0x3b   :  { %887 = vmatpush1.bf16.msra.mxu1 %v5179_v52 }
  0x3c   :  { %888 = vmatprep.subr.bf16.mxu1 %v5185_v54 }
  0x3d   :  { %4714 = vmatpush3.bf16.msra.mxu0 %v5158_v58  ;;  %v5187_v58 = vld [vmem:[%s5675_s18 + $0x90] ss:$12 sps:$4 sm:$0xff]  }
  0x3e   :  { %4715 = vmatprep.subr.bf16.mxu0 %v5159_v59  ;;  %v5190_v59 = vld [vmem:[%s5675_s18 + $0x98] ss:$12 sps:$4 sm:$0xff]  }
  0x3f   :  { %889 = vmatpush1.bf16.msra.mxu1 %v5183_v55 }
  0x40   :  { %890 = vmatprep.subr.bf16.mxu1 %v5189_v57 }
  0x41   :  { %4716 = vmatpush3.bf16.msra.mxu0 %v5160_v60  ;;  %v5193_v60 = vld [vmem:[%s5675_s18 + $0xac] ss:$12 sps:$4 sm:$0xff]  }
  0x42   :  { %4717 = vmatprep.subr.bf16.mxu0 %v5161_v61  ;;  %v5191_v61 = vld [vmem:[%s5675_s18 + $0xa8] ss:$12 sps:$4 sm:$0xff]  }
  0x43   :  { %891 = vmatpush1.bf16.msra.mxu1 %v5187_v58 }
  0x44   :  { %892 = vmatprep.subr.bf16.mxu1 %v5193_v60 }
  0x45   :  { %4718 = vmatpush3.bf16.msra.mxu0 %v5162_v62  ;;  %v5194_v62 = vld [vmem:[%s5675_s18 + $0xb0] ss:$12 sps:$4 sm:$0xff]  }
  0x46   :  { %4881 = vmatprep.subr.bf16.mxu0 %v5557_v29 }
  0x47   :  { %893 = vmatpush1.bf16.msra.mxu1 %v5191_v61 }
  0x48   :  { %646 = vmatmul.mubr.bf16.vlgmr.msra.gmra.mrb[4].mxu0 %v143_v1  ;;  %4901 = vmatprep.subr.bf16.mxu1 %v5557_v29 }
  0x49   :  { %4882 = vmatpush3.bf16.msra.mxu0 %v5166_v32  ;;  %4897 = vmatprep.mubr.msk.bf16.mxu0 %vm5559_vm1, %v5557_v29 }
  0x4a   :  { %4883 = vmatprep.subr.bf16.mxu0 %v5557_v29 }
  0x4d   :  { %4884 = vmatpush3.bf16.msra.mxu0 %v5170_v44 }
  0x4e   :  { %4885 = vmatprep.subr.bf16.mxu0 %v5557_v29 }
  0x51   :  { %4886 = vmatpush3.bf16.msra.mxu0 %v5174_v47 }
  0x52   :  { %4887 = vmatprep.subr.bf16.mxu0 %v5557_v29 }
  0x55   :  { %4888 = vmatpush3.bf16.msra.mxu0 %v5178_v50 }
  0x56   :  { %4889 = vmatprep.subr.bf16.mxu0 %v5557_v29 }
  0x59   :  { %4890 = vmatpush3.bf16.msra.mxu0 %v5182_v53 }
  0x5a   :  { %4891 = vmatprep.subr.bf16.mxu0 %v5557_v29 }
  0x5d   :  { %4892 = vmatpush3.bf16.msra.mxu0 %v5186_v56 }
  0x5e   :  { %4893 = vmatprep.subr.bf16.mxu0 %v5557_v29 }
  0x61   :  { %4894 = vmatpush3.bf16.msra.mxu0 %v5190_v59 }
  0x62   :  { %4895 = vmatprep.subr.bf16.mxu0 %v5557_v29 }
  0x65   :  { %4896 = vmatpush3.bf16.msra.mxu0 %v5194_v62 }
  0x66   :  { %4949 = vmatprep.subr.bf16.mxu0 %v5557_v29 }
  0xfb   :  { %v4675_v2 = vpop.f32.mrb[0].mxu0 }
  0xfc   :  { %v4676_v4 = vpop.f32.mrb[1].mxu0 }
  0xfd   :  { %v4677_v5 = vadd.f32 %v4676_v4, %v4675_v2  ;;  %v4678_v6 = vpop.f32.mrb[2].mxu0  ;;  %v4697_v7 = vpop.f32.mrb[0].mxu1 }
  0xfe   :  { %v4679_v9 = vpop.f32.mrb[3].mxu0  ;;  %v4698_v12 = vpop.f32.mrb[1].mxu1 }
  0xff   :  { %v566_v10 = vadd.f32 %v4677_v5, %v241_v3  ;;  %v4680_v11 = vadd.f32 %v4679_v9, %v4678_v6  ;;  %v4699_v13 = vadd.f32 %v4698_v12, %v4697_v7  ;;  %v4700_v14 = vpop.f32.mrb[2].mxu1  ;;  %v4414_v12 = vld [vmem:[%s4340_s26] ss:$0 sm:$0xff]  ;;  %s5577_s26 = smov 12  }
 0x100   :  { %v4701_v16 = vpop.f32.mrb[3].mxu1  ;;  %s4346_s29 = sld [smem:[%s6658_s0 + %s5577_s26]]  }
 0x101   :  { %v569_v15 = vadd.f32 %v4680_v11, %v242_v8  ;;  %v607_v17 = vadd.f32 %v4699_v13, %v566_v10  ;;  %v4702_v18 = vadd.f32 %v4701_v16, %v4700_v14  ;;  %v4413_v8 = vld [vmem:[%s4341_s22] ss:$0 sm:$0xff] }
 0x103   :  { %v610_v19 = vadd.f32 %v4702_v18, %v569_v15 }
 0x11b   :  { %v4719_v20 = vpop.f32.mrb[4].mxu0 }
 0x11c   :  { %v4720_v21 = vpop.f32.mrb[5].mxu0 }
 0x11d   :  { %v4721_v22 = vadd.f32 %v4720_v21, %v4719_v20  ;;  %v4722_v23 = vpop.f32.mrb[6].mxu0 }
 0x11e   :  { %v4723_v24 = vpop.f32.mrb[7].mxu0 }
 0x11f   :  { %v5665_v25 = vadd.f32 %v4721_v22, %v607_v17  ;;  %v4724_v26 = vadd.f32 %v4723_v24, %v4722_v23  ;;  %v735_v17 = vlaneseq  ;;  %v733_v22 = vld [vmem:[%s4335_s30] sm:$0x7]  ;;  %s5578_s30 = smov 15  }
 0x120   :  { %s6414_s3 = sld [smem:[%s6658_s0 + %s5578_s30]]  }
 0x121   :  { %v5667_v27 = vadd.f32 %v4724_v26, %v610_v19  ;;  %v963_v18 = vand.u32 127, %v735_v17  ;;  %v5740_v19 = vshrl.u32 %v735_v17, 7 }
 0x123   :  { %v659_v28 = vsel %vm658_vm0, %v5667_v27, 0.0  ;;  %vm1042_vm2 = vcmp.ge.s32.totalorder %v963_v18, 32  ;;  %vm1043_vm3 = vcmp.lt.s32.totalorder %v963_v18, 64  ;;  %vm1212_vm4 = vcmp.ge.s32.totalorder %v963_v18, 64 }
 0x124   :  { %660 = vadd.xlane.f32.xlu0 %v659_v28  ;;  %vm1213_vm5 = vcmp.lt.s32.totalorder %v963_v18, 96  ;;  %vm1044_vm6 = vmand %vm1042_vm2, %vm1043_vm3  ;;  %v5743_v20 = vsub.s32 0, %v5740_v19  ;;  %vm966_vm7 = vcmp.lt.s32.totalorder %v963_v18, 32  ;;  %v5746_v21 = vsub.s32 2, %v5740_v19 }
 0x125   :  { %vm1214_vm8 = vmand %vm1212_vm4, %vm1213_vm5  ;;  %vm1336_vm9 = vcmp.ge.s32.totalorder %v963_v18, 96  ;;  %v5749_v23 = vsub.s32 1, %v5740_v19  ;;  %v5752_v24 = vsel %vm966_vm7, 1.0, %v5557_v29  ;;  %v5755_v26 = vsel %vm1044_vm6, 1.0, %v5557_v29 }
 0x126   :  { %v5758_v28 = vsel %vm1214_vm8, 1.0, %v5557_v29  ;;  %v738_v30 = vrot.slane %v733_v22, %v5743_v20  ;;  %v5762_v31 = vsel %vm1336_vm9, 1.0, %v5557_v29  ;;  %v746_v32 = vrot.slane %v733_v22, %v5746_v21 }
 0x128   :  { %656 = vadd.xlane.f32.xlu0 %v5665_v25 }
 0x1b1   :  { %v661_v33 = vpop.xlane.xlu0 %660 }
 0x1b2   :  { %v664_v34 = vmul.f32 0.0078125, %v661_v33  ;;  %v5766_v33 = vmul.f32 0.17677669, %v5752_v24 }
 0x1b4   :  { %v5683_v37 = vsub.f32 %v5667_v27, %v664_v34  ;;  %v5769_v34 = vmul.f32 0.17677669, %v5755_v26 }
 0x1b5   :  { %v657_v35 = vpop.xlane.xlu0 %656 }
 0x1b6   :  { %v663_v36 = vmul.f32 0.0078125, %v657_v35  ;;  %v668_v40 = vmul.f32 %v5683_v37, %v5683_v37  ;;  %v5772_v35 = vmul.f32 0.17677669, %v5758_v28 }
 0x1b8   :  { %v5686_v38 = vsub.f32 %v5665_v25, %v663_v36  ;;  %v671_v41 = vsel %vm658_vm0, %v668_v40, 0.0  ;;  %v742_v36 = vrot.slane %v733_v22, %v5749_v23  ;;  %v5842_v22 = vld [vmem:[%s5839_s4] sm:$0xff] }
 0x1ba   :  { %v667_v39 = vmul.f32 %v5686_v38, %v5686_v38 }
 0x1bc   :  { %669 = vadd.xlane.f32.xlu1 %v667_v39 }
 0x1c0   :  { %672 = vadd.xlane.f32.xlu1 %v671_v41 }
 0x249   :  { %v670_v0 = vpop.xlane.xlu1 %669 }
 0x24a   :  { %v674_v1 = vmul.f32 0.0078125, %v670_v0 }
 0x24c   :  { %v676_v2 = vadd.f32 1e-06, %v674_v1 }
 0x24d   :  { %v673_v3 = vpop.xlane.xlu1 %672 }
 0x24e   :  { %5403 = vrsqrt.f32 %v676_v2  ;;  %v675_v4 = vmul.f32 0.0078125, %v673_v3 }
 0x250   :  { %v677_v5 = vadd.f32 1e-06, %v675_v4 }
 0x252   :  { %5405 = vrsqrt.f32 %v677_v5 }
 0x258   :  { %v5404_v6 = vpop.eup %5403 }
 0x259   :  { %v680_v7 = vmul.f32 %v5404_v6, %v5686_v38  ;;  %v5776_v38 = vmul.f32 0.17677669, %v5762_v31 }
 0x25b   :  { %v689_v11 = vmul.f32 %v4413_v8, %v680_v7 }
 0x25c   :  { %v5406_v9 = vpop.eup %5405 }
 0x25d   :  { %v681_v10 = vmul.f32 %v5406_v9, %v5683_v37  ;;  %v698_v14 = vadd.f32 %v4414_v12, %v689_v11 }
 0x25f   :  { %v690_v13 = vmul.f32 %v4413_v8, %v681_v10 }
 0x261   :  { %v699_v15 = vadd.f32 %v4414_v12, %v690_v13 }
 0x263   :  { %v700_v16 = vpack.c.bf16 %v699_v15, %v698_v14 }
 0x265   :  { %911 = vmatmul.mubr.bf16.vlgmr.msra.gmra.mrb[4].mxu1 %v700_v16  ;;  %4898 = vmatmul.mubr.bf16.vlgmr.msra.gmra.mrb[8].mxu0 %v700_v16 }
 0x266   :  { %4903 = vmatprep.mubr.msk.bf16.mxu1 %vm5559_vm1, %v5557_v29  ;;  %4965 = vmatprep.mubr.msk.bf16.mxu0 %vm5559_vm1, %v5557_v29 }
 0x338   :  { %v912_v37 = vpop.f32.mrb[4].mxu1  ;;  %v955_v39 = vpop.f32.mrb[8].mxu0 }
 0x339   :  { %v913_v40 = vadd.f32 %v912_v37, %v738_v30  ;;  %v956_v41 = vadd.f32 %v955_v39, %v746_v32  ;;  %v914_v42 = vpop.f32.mrb[5].mxu1  ;;  %v4899_v43 = vpop.f32.mrb[9].mxu0  ;;  %v5846_v37 = vld [vmem:[%s5839_s4 + $0x8] sm:$0x3] }
 0x33a   :  { %v916_v44 = vpop.f32.mrb[6].mxu1  ;;  %v958_v45 = vpop.f32.mrb[10].mxu0  ;;  %v915_v49 = vadd.f32 %v914_v42, %v742_v36 }
 0x33b   :  { %v970_v46 = vmul.f32 %v5766_v33, %v913_v40  ;;  %v1047_v47 = vmul.f32 %v5769_v34, %v913_v40  ;;  %v5781_v48 = vmul.f32 %v5772_v35, %v913_v40  ;;  %v918_v50 = vpop.f32.mrb[7].mxu1  ;;  %v4900_v51 = vpop.f32.mrb[11].mxu0  ;;  %v5784_v52 = vmul.f32 %v5776_v38, %v913_v40 }
 0x33c   :  { %v917_v53 = vadd.f32 %v916_v44, %v738_v30  ;;  %v959_v54 = vadd.f32 %v958_v45, %v746_v32  ;;  %v919_v55 = vadd.f32 %v918_v50, %v742_v36  ;;  %v1114_v56 = vmul.f32 %v5755_v26, %v956_v41 }
 0x33d   :  { %v5788_v57 = vmul.f32 %v5752_v24, %v956_v41  ;;  %v5791_v58 = vmul.f32 %v5758_v28, %v956_v41  ;;  %v5794_v59 = vmul.f32 %v5762_v31, %v956_v41 }
 0x33e   :  { %v971_v60 = vmul.f32 %v5766_v33, %v917_v53  ;;  %v1048_v61 = vmul.f32 %v5769_v34, %v917_v53  ;;  %v5799_v62 = vmul.f32 %v5772_v35, %v917_v53  ;;  %v5802_v0 = vmul.f32 %v5776_v38, %v917_v53 }
 0x33f   :  { %v5804_v1 = vpack.c.bf16 %v919_v55, %v915_v49  ;;  %v1115_v2 = vmul.f32 %v5755_v26, %v959_v54  ;;  %v5808_v3 = vmul.f32 %v5752_v24, %v959_v54  ;;  %v5811_v4 = vmul.f32 %v5758_v28, %v959_v54 }
 0x340   :  { %v972_v5 = vpack.c.bf16 %v971_v60, %v970_v46  ;;  %v1049_v6 = vpack.c.bf16 %v1048_v61, %v1047_v47  ;;  %v1219_v7 = vpack.c.bf16 %v5799_v62, %v5781_v48  ;;  %v1343_v8 = vpack.c.bf16 %v5802_v0, %v5784_v52 }
 0x341   :  { %4902 = vmatpush3.bf16.xpose.msra.mxu1 %v5804_v1  ;;  %v1116_v9 = vpack.c.bf16 %v1115_v2, %v1114_v56  ;;  %v1041_v10 = vpack.c.bf16 %v5808_v3, %v5788_v57  ;;  %v1286_v11 = vpack.c.bf16 %v5811_v4, %v5791_v58  ;;  %v5823_v12 = vmul.f32 %v5762_v31, %v959_v54 }
 0x342   :  { %4907 = vmatprep.subr.bf16.mxu1 %v5557_v29 }
 0x343   :  { %v1410_v13 = vpack.c.bf16 %v5823_v12, %v5794_v59  ;;  %v1122_v14 = vsel %vm1120_vm10, %v1116_v9, 0  ;;  %v1291_v57 = vsel %vm1120_vm10, %v1286_v11, 0 }
 0x348   :  { %4904 = vmatmul.mubr.bf16.vlgmr.msra.gmra.mrb[8].mxu1 %v972_v5 }
 0x349   :  { %4908 = vmatpush3.bf16.xpose.msra.mxu1 %v5804_v1  ;;  %4909 = vmatprep.mubr.msk.bf16.mxu1 %vm5559_vm1, %v5557_v29 }
 0x34a   :  { %4913 = vmatprep.subr.bf16.mxu1 %v5557_v29 }
 0x350   :  { %4910 = vmatmul.mubr.bf16.vlgmr.msra.gmra.mrb[12].mxu1 %v1049_v6 }
 0x351   :  { %4914 = vmatpush3.bf16.msra.mxu1 %v1122_v14  ;;  %4915 = vmatprep.mubr.msk.bf16.mxu1 %vm5559_vm1, %v5557_v29 }
 0x352   :  { %4919 = vmatprep.subr.bf16.mxu1 %v5557_v29 }
 0x41b   :  { %v1007_v15 = vpop.f32.mrb[8].mxu1 }
 0x41c   :  { %v4905_v16 = vpop.f32.mrb[9].mxu1  ;;  %v1008_v40 = vadd.f32 %v1007_v15, %v5842_v22 }
 0x41d   :  { %v1010_v17 = vpop.f32.mrb[10].mxu1 }
 0x41e   :  { %v4906_v18 = vpop.f32.mrb[11].mxu1  ;;  %v1011_v44 = vadd.f32 %v1010_v17, %v5846_v37  ;;  %v1015_v46 = vsel %vm1014_vm11, %v1008_v40, -inf }
 0x420   :  { %v1019_v47 = vsel %vm1018_vm12, %v1011_v44, -inf }
 0x423   :  { %v1084_v30 = vpop.f32.mrb[12].mxu1 }
 0x424   :  { %v1085_v32 = vadd.f32 %v1084_v30, %v5842_v22  ;;  %v4911_v36 = vpop.f32.mrb[13].mxu1 }
 0x425   :  { %v1087_v39 = vpop.f32.mrb[14].mxu1 }
 0x426   :  { %v1088_v41 = vadd.f32 %v1087_v39, %v5846_v37  ;;  %v4912_v42 = vpop.f32.mrb[15].mxu1  ;;  %v1091_v43 = vsel %vm1014_vm11, %v1085_v32, -inf }
 0x427   :  { %1092 = vmax.xlane.f32.xlu0 %v1091_v43 }
 0x428   :  { %v1094_v45 = vsel %vm1018_vm12, %v1088_v41, -inf }
 0x429   :  { %1095 = vmax.xlane.f32.xlu1 %v1094_v45 }
 0x42b   :  { %1016 = vmax.xlane.f32.xlu0 %v1015_v46 }
 0x42d   :  { %1020 = vmax.xlane.f32.xlu1 %v1019_v47  ;;  %v1169_v47 = vsel %vm1120_vm10, %v1041_v10, 0 }
 0x4b4   :  { %v1093_v49 = vpop.xlane.xlu0 %1092 }
 0x4b5   :  { %v1097_v50 = vsub.f32 %v1085_v32, %v1093_v49 }
 0x4b6   :  { %v1096_v51 = vpop.xlane.xlu1 %1095 }
 0x4b7   :  { %v1099_v53 = vmul.f32 1.442695, %v1097_v50  ;;  %v1098_v54 = vsub.f32 %v1088_v41, %v1096_v51 }
 0x4b8   :  { %v1017_v55 = vpop.xlane.xlu0 %1016 }
 0x4b9   :  { %5407 = vpow2.f32 %v1099_v53  ;;  %v1101_v56 = vmul.f32 1.442695, %v1098_v54  ;;  %v1022_v60 = vsub.f32 %v1008_v40, %v1017_v55 }
 0x4ba   :  { %v1021_v61 = vpop.xlane.xlu1 %1020 }
 0x4bb   :  { %5409 = vpow2.f32 %v1101_v56  ;;  %v1024_v2 = vmul.f32 1.442695, %v1022_v60  ;;  %v1023_v5 = vsub.f32 %v1011_v44, %v1021_v61 }
 0x4bd   :  { %5411 = vpow2.f32 %v1024_v2  ;;  %v1026_v6 = vmul.f32 1.442695, %v1023_v5 }
 0x4bf   :  { %5413 = vpow2.f32 %v1026_v6 }
 0x4c3   :  { %v5408_v9 = vpop.eup %5407 }
 0x4c4   :  { %v1103_v14 = vsel %vm1014_vm11, %v5408_v9, 0.0 }
 0x4c5   :  { %v5410_v15 = vpop.eup %5409  ;;  %1104 = vadd.xlane.f32.xlu0 %v1103_v14 }
 0x4c6   :  { %v1106_v16 = vsel %vm1018_vm12, %v5410_v15, 0.0 }
 0x4c7   :  { %v5412_v17 = vpop.eup %5411  ;;  %1107 = vadd.xlane.f32.xlu1 %v1106_v16 }
 0x4c8   :  { %v1028_v18 = vsel %vm1014_vm11, %v5412_v17, 0.0 }
 0x4c9   :  { %v5414_v30 = vpop.eup %5413  ;;  %1029 = vadd.xlane.f32.xlu0 %v1028_v18 }
 0x4ca   :  { %v1031_v32 = vsel %vm1018_vm12, %v5414_v30, 0.0 }
 0x4cb   :  { %1032 = vadd.xlane.f32.xlu1 %v1031_v32 }
 0x552   :  { %v1105_v36 = vpop.xlane.xlu0 %1104 }
 0x553   :  { %5415 = vrcp.f32 %v1105_v36 }
 0x554   :  { %v1108_v39 = vpop.xlane.xlu1 %1107 }
 0x555   :  { %5417 = vrcp.f32 %v1108_v39 }
 0x556   :  { %v1030_v41 = vpop.xlane.xlu0 %1029 }
 0x558   :  { %v1033_v40 = vpop.xlane.xlu1 %1032 }
 0x559   :  { %5419 = vrcp.f32 %v1033_v40  ;;  %v1415_v40 = vsel %vm1120_vm10, %v1410_v13, 0 }
 0x55a   :  { %5421 = vrcp.f32 %v1030_v41 }
 0x55d   :  { %v5416_v42 = vpop.eup %5415 }
 0x55e   :  { %v1111_v44 = vmul.f32 %v5416_v42, %v5408_v9 }
 0x55f   :  { %v5418_v43 = vpop.eup %5417 }
 0x560   :  { %v1112_v45 = vmul.f32 %v5418_v43, %v5410_v15 }
 0x562   :  { %v1113_v46 = vpack.c.bf16 %v1112_v45, %v1111_v44 }
 0x563   :  { %v5420_v49 = vpop.eup %5419 }
 0x564   :  { %4916 = vmatmul.mubr.msk.bf16.vlgmr.msra.gmra.mrb[16].mxu1 %vm1014_vm11, %v1113_v46  ;;  %v5422_v50 = vpop.eup %5421  ;;  %v1037_v51 = vmul.f32 %v5420_v49, %v5414_v30 }
 0x565   :  { %4920 = vmatpush3.bf16.msra.mxu1 %v1169_v47  ;;  %4921 = vmatprep.mubr.msk.bf16.mxu1 %vm5559_vm1, %v5557_v29  ;;  %v1036_v53 = vmul.f32 %v5422_v50, %v5412_v17 }
 0x566   :  { %4925 = vmatprep.subr.bf16.mxu1 %v5557_v29 }
 0x567   :  { %v1038_v54 = vpack.c.bf16 %v1037_v51, %v1036_v53  ;;  %v5195_v51 = vld [vmem:[%s5911_s8] sm:$0xff]   ;;  %v5196_v53 = vld [vmem:[%s5911_s8 + $0x8] sm:$0xff]  }
 0x568   :  { %4950 = vmatpush3.bf16.msra.mxu0 %v5195_v51  ;;  %v5218_v51 = vld [vmem:[%s5946_s15 + $0x48] ss:$16 sps:$4 sm:$0xff]  }
 0x569   :  { %4951 = vmatprep.subr.bf16.mxu0 %v5557_v29 }
 0x56c   :  { %4952 = vmatpush3.bf16.msra.mxu0 %v5196_v53  ;;  %v5223_v53 = vld [vmem:[%s5946_s15 + $0x64] ss:$16 sps:$4 sm:$0xff]  }
 0x56d   :  { %4953 = vmatprep.subr.bf16.mxu0 %v5557_v29 }
 0x570   :  { %4922 = vmatmul.mubr.msk.bf16.vlgmr.msra.gmra.mrb[16].mxu1 %vm1014_vm11, %v1038_v54  ;;  %v5197_v54 = vld [vmem:[%s5911_s8 + $0x10] sm:$0xff]  }
 0x571   :  { %4926 = vmatpush3.bf16.xpose.msra.mxu1 %v5804_v1  ;;  %4927 = vmatprep.mubr.msk.bf16.mxu1 %vm5559_vm1, %v5557_v29 }
 0x572   :  { %4931 = vmatprep.subr.bf16.mxu1 %v5557_v29  ;;  %4954 = vmatpush3.bf16.msra.mxu0 %v5197_v54  ;;  %v5226_v54 = vld [vmem:[%s5946_s15 + $0x6c] ss:$16 sps:$4 sm:$0xff]  }
 0x573   :  { %4955 = vmatprep.subr.bf16.mxu0 %v5557_v29 }
 0x578   :  { %4928 = vmatmul.mubr.bf16.vlgmr.msra.gmra.mrb[20].mxu1 %v1219_v7 }
 0x579   :  { %4932 = vmatpush3.bf16.msra.mxu1 %v1291_v57  ;;  %4933 = vmatprep.mubr.msk.bf16.mxu1 %vm5559_vm1, %v5557_v29  ;;  %v5198_v57 = vld [vmem:[%s5911_s8 + $0x18] sm:$0xff]  }
 0x57a   :  { %4937 = vmatprep.subr.bf16.mxu1 %v5557_v29  ;;  %4956 = vmatpush3.bf16.msra.mxu0 %v5198_v57  ;;  %v5221_v57 = vld [vmem:[%s5946_s15 + $0x60] ss:$16 sps:$4 sm:$0xff]  }
 0x57b   :  { %4957 = vmatprep.subr.bf16.mxu0 %v5557_v29 }
 0x64b   :  { %v1254_v3 = vpop.f32.mrb[20].mxu1 }
 0x64c   :  { %v1255_v10 = vadd.f32 %v1254_v3, %v5842_v22  ;;  %v4929_v55 = vpop.f32.mrb[21].mxu1  ;;  %v5199_v3 = vld [vmem:[%s5911_s8 + $0x20] sm:$0xff]  }
 0x64d   :  { %v1257_v56 = vpop.f32.mrb[22].mxu1  ;;  %4958 = vmatpush3.bf16.msra.mxu0 %v5199_v3  ;;  %v5201_v55 = vld [vmem:[%s5911_s8 + $0x30] sm:$0xff]   ;;  %v5224_v3 = vld [vmem:[%s5946_s15 + $0x68] ss:$16 sps:$4 sm:$0xff]  }
 0x64e   :  { %v1258_v60 = vadd.f32 %v1257_v56, %v5846_v37  ;;  %v4930_v48 = vpop.f32.mrb[23].mxu1  ;;  %v1261_v62 = vsel %vm1014_vm11, %v1255_v10, -inf  ;;  %4959 = vmatprep.subr.bf16.mxu0 %v5557_v29 }
 0x64f   :  { %1262 = vmax.xlane.f32.xlu0 %v1261_v62 }
 0x650   :  { %v1264_v58 = vsel %vm1018_vm12, %v1258_v60, -inf }
 0x651   :  { %1265 = vmax.xlane.f32.xlu1 %v1264_v58 }
 0x6dc   :  { %v1263_v4 = vpop.xlane.xlu0 %1262 }
 0x6dd   :  { %v1267_v7 = vsub.f32 %v1255_v10, %v1263_v4  ;;  %v5200_v10 = vld [vmem:[%s5911_s8 + $0x28] sm:$0xff]  }
 0x6de   :  { %v1266_v11 = vpop.xlane.xlu1 %1265  ;;  %4960 = vmatpush3.bf16.msra.mxu0 %v5200_v10  ;;  %v5229_v10 = vld [vmem:[%s5946_s15 + $0x84] ss:$16 sps:$4 sm:$0xff]  }
 0x6df   :  { %v1269_v61 = vmul.f32 1.442695, %v1267_v7  ;;  %v1268_v2 = vsub.f32 %v1258_v60, %v1266_v11  ;;  %4961 = vmatprep.subr.bf16.mxu0 %v5557_v29  ;;  %v5202_v11 = vld [vmem:[%s5911_s8 + $0x38] sm:$0xff]   ;;  %s4355_s8 = sld [smem:[%s6658_s0 + %s5579_s5]]  }
 0x6e1   :  { %5423 = vpow2.f32 %v1269_v61  ;;  %v1271_v5 = vmul.f32 1.442695, %v1268_v2 }
 0x6e2   :  { %4962 = vmatpush3.bf16.msra.mxu0 %v5201_v55  ;;  %v5232_v55 = vld [vmem:[%s5946_s15 + $0x8c] ss:$16 sps:$4 sm:$0xff]  }
 0x6e3   :  { %5425 = vpow2.f32 %v1271_v5  ;;  %4963 = vmatprep.subr.bf16.mxu0 %v5557_v29 }
 0x6e6   :  { %4964 = vmatpush3.bf16.msra.mxu0 %v5202_v11  ;;  %v5241_v11 = vld [vmem:[%s5946_s15 + $0xc4] ss:$16 sps:$4 sm:$0xff]  }
 0x6eb   :  { %v5424_v6 = vpop.eup %5423 }
 0x6ec   :  { %v1273_v9 = vsel %vm1014_vm11, %v5424_v6, 0.0 }
 0x6ed   :  { %v5426_v14 = vpop.eup %5425  ;;  %1274 = vadd.xlane.f32.xlu0 %v1273_v9 }
 0x6ee   :  { %v1276_v15 = vsel %vm1018_vm12, %v5426_v14, 0.0 }
 0x6ef   :  { %1277 = vadd.xlane.f32.xlu1 %v1276_v15 }
 0x77a   :  { %v1275_v16 = vpop.xlane.xlu0 %1274 }
 0x77b   :  { %5427 = vrcp.f32 %v1275_v16 }
 0x77c   :  { %v1278_v17 = vpop.xlane.xlu1 %1277 }
 0x77d   :  { %5429 = vrcp.f32 %v1278_v17 }
 0x785   :  { %v5428_v18 = vpop.eup %5427 }
 0x786   :  { %v1281_v32 = vmul.f32 %v5428_v18, %v5424_v6 }
 0x787   :  { %v5430_v30 = vpop.eup %5429 }
 0x788   :  { %v1282_v36 = vmul.f32 %v5430_v30, %v5426_v14  ;;  %v4443_v14 = vld [vmem:[%s1_s11] ss:$0 sm:$0xff]  ;;  %s5573_s11 = smov 19  }
 0x789   :  { %s4353_s14 = sld [smem:[%s6658_s0 + %s5573_s11]]  }
 0x78a   :  { %v1283_v39 = vpack.c.bf16 %v1282_v36, %v1281_v32 }
 0x78c   :  { %4934 = vmatmul.mubr.msk.bf16.vlgmr.msra.gmra.mrb[16].mxu1 %vm1014_vm11, %v1283_v39 }
 0x78d   :  { %4938 = vmatpush3.bf16.xpose.msra.mxu1 %v5804_v1  ;;  %4939 = vmatprep.mubr.msk.bf16.mxu1 %vm5559_vm1, %v5557_v29 }
 0x78e   :  { %4943 = vmatprep.subr.bf16.mxu1 %v5557_v29 }
 0x794   :  { %4940 = vmatmul.mubr.bf16.vlgmr.msra.gmra.mrb[24].mxu1 %v1343_v8 }
 0x795   :  { %4944 = vmatpush3.bf16.msra.mxu1 %v1415_v40  ;;  %4945 = vmatprep.mubr.msk.bf16.mxu1 %vm5559_vm1, %v5557_v29 }
 0x867   :  { %v1378_v41 = vpop.f32.mrb[24].mxu1 }
 0x868   :  { %v1379_v1 = vadd.f32 %v1378_v41, %v5842_v22  ;;  %v4941_v42 = vpop.f32.mrb[25].mxu1  ;;  %v5206_v41 = vld [vmem:[%s5946_s15 + $0x8] ss:$16 sps:$4 sm:$0xff]  }
 0x869   :  { %v1381_v43 = vpop.f32.mrb[26].mxu1  ;;  %v5209_v42 = vld [vmem:[%s5946_s15 + $0x20] ss:$16 sps:$4 sm:$0xff]  }
 0x86a   :  { %v1382_v44 = vadd.f32 %v1381_v43, %v5846_v37  ;;  %v4942_v45 = vpop.f32.mrb[27].mxu1  ;;  %v1385_v52 = vsel %vm1014_vm11, %v1379_v1, -inf  ;;  %v5211_v43 = vld [vmem:[%s5946_s15 + $0x24] ss:$16 sps:$4 sm:$0xff]  }
 0x86b   :  { %1386 = vmax.xlane.f32.xlu0 %v1385_v52  ;;  %v5214_v45 = vld [vmem:[%s5946_s15 + $0x2c] ss:$16 sps:$4 sm:$0xff]  }
 0x86c   :  { %v1388_v0 = vsel %vm1018_vm12, %v1382_v44, -inf }
 0x86d   :  { %1389 = vmax.xlane.f32.xlu1 %v1388_v0 }
 0x8f8   :  { %v1387_v59 = vpop.xlane.xlu0 %1386 }
 0x8f9   :  { %v1391_v8 = vsub.f32 %v1379_v1, %v1387_v59  ;;  %v5208_v1 = vld [vmem:[%s5946_s15 + $0xc] ss:$16 sps:$4 sm:$0xff]  }
 0x8fa   :  { %v1390_v12 = vpop.xlane.xlu1 %1389  ;;  %1875 = vmatprep.subr.bf16.mxu0 %v5208_v1 }
 0x8fb   :  { %v1393_v13 = vmul.f32 1.442695, %v1391_v8  ;;  %v1392_v46 = vsub.f32 %v1382_v44, %v1390_v12  ;;  %v5212_v44 = vld [vmem:[%s5946_s15 + $0x28] ss:$16 sps:$4 sm:$0xff]  }
 0x8fd   :  { %5431 = vpow2.f32 %v1393_v13  ;;  %v1395_v47 = vmul.f32 1.442695, %v1392_v46 }
 0x8ff   :  { %5433 = vpow2.f32 %v1395_v47 }
 0x907   :  { %v5432_v22 = vpop.eup %5431 }
 0x908   :  { %v1397_v49 = vsel %vm1014_vm11, %v5432_v22, 0.0 }
 0x909   :  { %v5434_v50 = vpop.eup %5433  ;;  %1398 = vadd.xlane.f32.xlu0 %v1397_v49  ;;  %v5217_v49 = vld [vmem:[%s5946_s15 + $0x44] ss:$16 sps:$4 sm:$0xff]  }
 0x90a   :  { %v1400_v37 = vsel %vm1018_vm12, %v5434_v50, 0.0 }
 0x90b   :  { %1401 = vadd.xlane.f32.xlu1 %v1400_v37  ;;  %v5215_v37 = vld [vmem:[%s5946_s15 + $0x40] ss:$16 sps:$4 sm:$0xff]  }
 0x996   :  { %v1399_v56 = vpop.xlane.xlu0 %1398 }
 0x997   :  { %5435 = vrcp.f32 %v1399_v56  ;;  %v5227_v56 = vld [vmem:[%s5946_s15 + $0x80] ss:$16 sps:$4 sm:$0xff]  }
 0x998   :  { %v1402_v60 = vpop.xlane.xlu1 %1401 }
 0x999   :  { %5437 = vrcp.f32 %v1402_v60  ;;  %v5230_v60 = vld [vmem:[%s5946_s15 + $0x88] ss:$16 sps:$4 sm:$0xff]  }
 0x9a1   :  { %v5436_v48 = vpop.eup %5435 }
 0x9a2   :  { %v1405_v58 = vmul.f32 %v5436_v48, %v5432_v22  ;;  %v5235_v48 = vld [vmem:[%s5946_s15 + $0xa4] ss:$16 sps:$4 sm:$0xff]  }
 0x9a3   :  { %v5438_v62 = vpop.eup %5437 }
 0x9a4   :  { %v1406_v4 = vmul.f32 %v5438_v62, %v5434_v50  ;;  %v5220_v50 = vld [vmem:[%s5946_s15 + $0x4c] ss:$16 sps:$4 sm:$0xff]  }
 0x9a5   :  { %v5238_v62 = vld [vmem:[%s5946_s15 + $0xac] ss:$16 sps:$4 sm:$0xff]  }
 0x9a6   :  { %v1407_v7 = vpack.c.bf16 %v1406_v4, %v1405_v58  ;;  %v5233_v58 = vld [vmem:[%s5946_s15 + $0xa0] ss:$16 sps:$4 sm:$0xff]   ;;  %v5236_v4 = vld [vmem:[%s5946_s15 + $0xa8] ss:$16 sps:$4 sm:$0xff]  }
 0x9a8   :  { %4946 = vmatmul.mubr.msk.bf16.vlgmr.msra.gmra.mrb[16].mxu1 %vm1014_vm11, %v1407_v7  ;;  %v5239_v7 = vld [vmem:[%s5946_s15 + $0xc0] ss:$16 sps:$4 sm:$0xff]  }
 0x9a9   :  { %1864 = vmatprep.mubr.bf16.mxu1 %v5558_v63 }
 0xa7b   :  { %v1451_v61 = vpop.f32.mrb[16].mxu1 }
 0xa7c   :  { %v4947_v2 = vpop.f32.mrb[17].mxu1 }
 0xa7d   :  { %v1454_v5 = vpop.f32.mrb[18].mxu1  ;;  %v5244_v2 = vld [vmem:[%s5946_s15 + $0xcc] ss:$16 sps:$4 sm:$0xff]  }
 0xa7e   :  { %v1460_v6 = vpack.c.bf16 %v1454_v5, %v1451_v61  ;;  %v4948_v9 = vpop.f32.mrb[19].mxu1  ;;  %v5242_v61 = vld [vmem:[%s5946_s15 + $0xc8] ss:$16 sps:$4 sm:$0xff]   ;;  %v5247_v5 = vld [vmem:[%s5946_s15 + $0xe4] ss:$16 sps:$4 sm:$0xff]  }
 0xa7f   :  { %v5245_v9 = vld [vmem:[%s5946_s15 + $0xe0] ss:$16 sps:$4 sm:$0xff]  }
 0xa80   :  { %4966 = vmatmul.mubr.bf16.vlgmr.msra.gmra.mrb[12].mxu0 %v1460_v6  ;;  %v5250_v6 = vld [vmem:[%s5946_s15 + $0xec] ss:$16 sps:$4 sm:$0xff]  }
 0xa81   :  { %1907 = vmatprep.mubr.bf16.mxu0 %v5558_v63  ;;  %1876 = vmatpush1.bf16.msra.mxu0 %v5206_v41 }
 0xa82   :  { %1877 = vmatprep.subr.bf16.mxu0 %v5214_v45 }
 0xa85   :  { %1878 = vmatpush1.bf16.msra.mxu0 %v5212_v44 }
 0xa86   :  { %1879 = vmatprep.subr.bf16.mxu0 %v5220_v50  ;;  %v5259_v50 = vld [vmem:[%s6002_s27 + $0x50] sm:$0xff]  }
 0xa89   :  { %1880 = vmatpush1.bf16.msra.mxu0 %v5218_v51  ;;  %v5261_v51 = vld [vmem:[%s6002_s27 + $0x10] sm:$0xff]  }
 0xa8a   :  { %1881 = vmatprep.subr.bf16.mxu0 %v5226_v54  ;;  %v5263_v54 = vld [vmem:[%s6002_s27 + $0x58] sm:$0xff]  }
 0xa8d   :  { %1882 = vmatpush1.bf16.msra.mxu0 %v5224_v3  ;;  %v5265_v3 = vld [vmem:[%s6002_s27 + $0x18] sm:$0xff]  }
 0xa8e   :  { %1883 = vmatprep.subr.bf16.mxu0 %v5232_v55  ;;  %v5267_v55 = vld [vmem:[%s6002_s27 + $0x60] sm:$0xff]  }
 0xa91   :  { %1884 = vmatpush1.bf16.msra.mxu0 %v5230_v60  ;;  %v5269_v60 = vld [vmem:[%s6002_s27 + $0x20] sm:$0xff]  }
 0xa92   :  { %1885 = vmatprep.subr.bf16.mxu0 %v5238_v62  ;;  %v5271_v62 = vld [vmem:[%s6002_s27 + $0x68] sm:$0xff]  }
 0xa95   :  { %1886 = vmatpush1.bf16.msra.mxu0 %v5236_v4  ;;  %v5273_v4 = vld [vmem:[%s6002_s27 + $0x28] sm:$0xff]  }
 0xa96   :  { %1887 = vmatprep.subr.bf16.mxu0 %v5244_v2  ;;  %v5277_v2 = vld [vmem:[%s6002_s27 + $0x30] sm:$0xff]  }
 0xa99   :  { %1888 = vmatpush1.bf16.msra.mxu0 %v5242_v61  ;;  %v5276_v61 = vld [vmem:[%s6002_s27 + $0xf0] sm:$0xff]  }
 0xa9a   :  { %1889 = vmatprep.subr.bf16.mxu0 %v5250_v6  ;;  %v5279_v6 = vld [vmem:[%s6002_s27 + $0x78] sm:$0xff]  }
 0xb53   :  { %v1566_v15 = vpop.f32.mrb[12].mxu0 }
 0xb54   :  { %v1567_v16 = vadd.f32 %v4443_v14, %v1566_v15  ;;  %v4967_v17 = vpop.f32.mrb[13].mxu0 }
 0xb55   :  { %v1569_v18 = vpop.f32.mrb[14].mxu0 }
 0xb56   :  { %v5935_v30 = vadd.f32 %v1567_v16, %v5665_v25  ;;  %v1570_v32 = vadd.f32 %v4443_v14, %v1569_v18  ;;  %v4968_v36 = vpop.f32.mrb[15].mxu0  ;;  %v5203_v25 = vld [vmem:[%s5946_s15] ss:$16 sps:$4 sm:$0xff]   ;;  %v5248_v14 = vld [vmem:[%s5946_s15 + $0xe8] ss:$16 sps:$4 sm:$0xff]  }
 0xb57   :  { %1890 = vmatpush1.bf16.msra.mxu0 %v5248_v14  ;;  %v5281_v14 = vld [vmem:[%s6002_s27 + $0x38] sm:$0xff]  }
 0xb58   :  { %v5938_v39 = vadd.f32 %v1570_v32, %v5667_v27  ;;  %1575 = vadd.xlane.f32.xlu1 %v5935_v30  ;;  %v5205_v27 = vld [vmem:[%s5946_s15 + $0x4] ss:$16 sps:$4 sm:$0xff]   ;;  %s5574_s15 = smov 18  }
 0xb59   :  { %1832 = vmatprep.subr.bf16.mxu1 %v5205_v27  ;;  %v4452_v27 = vld [vmem:[%s4343_s19] ss:$0 sm:$0xff]  ;;  %s4352_s18 = sld [smem:[%s6658_s0 + %s5574_s15]]   ;;  %s5575_s19 = smov 13  }
 0xb5a   :  { %v1577_v40 = vsel %vm658_vm0, %v5938_v39, 0.0  ;;  %1833 = vmatpush1.bf16.msra.mxu1 %v5203_v25  ;;  %s4347_s22 = sld [smem:[%s6658_s0 + %s5575_s19]]  }
 0xb5b   :  { %1578 = vadd.xlane.f32.xlu0 %v1577_v40  ;;  %1834 = vmatprep.subr.bf16.mxu1 %v5211_v43  ;;  %v4453_v43 = vld [vmem:[%s4342_s23] ss:$0 sm:$0xff]  ;;  %s4350_s23 = sld [smem:[%s6658_s0 + %s5583_s21]]  }
 0xb5e   :  { %1835 = vmatpush1.bf16.msra.mxu1 %v5209_v42 }
 0xb5f   :  { %1836 = vmatprep.subr.bf16.mxu1 %v5217_v49  ;;  %v5258_v49 = vld [vmem:[%s6002_s27 + $0x88] sm:$0xff]  }
 0xb62   :  { %1837 = vmatpush1.bf16.msra.mxu1 %v5215_v37  ;;  %v5260_v37 = vld [vmem:[%s6002_s27 + $0xd0] sm:$0xff]  }
 0xb63   :  { %1838 = vmatprep.subr.bf16.mxu1 %v5223_v53  ;;  %v5262_v53 = vld [vmem:[%s6002_s27 + $0x90] sm:$0xff]  }
 0xb66   :  { %1839 = vmatpush1.bf16.msra.mxu1 %v5221_v57  ;;  %v5264_v57 = vld [vmem:[%s6002_s27 + $0xd8] sm:$0xff]  }
 0xb67   :  { %1840 = vmatprep.subr.bf16.mxu1 %v5229_v10  ;;  %v5266_v10 = vld [vmem:[%s6002_s27 + $0x98] sm:$0xff]  }
 0xb6a   :  { %1841 = vmatpush1.bf16.msra.mxu1 %v5227_v56  ;;  %v5268_v56 = vld [vmem:[%s6002_s27 + $0xe0] sm:$0xff]  }
 0xb6b   :  { %1842 = vmatprep.subr.bf16.mxu1 %v5235_v48  ;;  %v5270_v48 = vld [vmem:[%s6002_s27 + $0xa0] sm:$0xff]  }
 0xb6e   :  { %1843 = vmatpush1.bf16.msra.mxu1 %v5233_v58  ;;  %v5272_v58 = vld [vmem:[%s6002_s27 + $0xe8] sm:$0xff]  }
 0xb6f   :  { %1844 = vmatprep.subr.bf16.mxu1 %v5241_v11  ;;  %v5275_v11 = vld [vmem:[%s6002_s27 + $0x70] sm:$0xff]  }
 0xb72   :  { %1845 = vmatpush1.bf16.msra.mxu1 %v5239_v7  ;;  %v5274_v7 = vld [vmem:[%s6002_s27 + $0xa8] sm:$0xff]  }
 0xb73   :  { %1846 = vmatprep.subr.bf16.mxu1 %v5247_v5  ;;  %v5278_v5 = vld [vmem:[%s6002_s27 + $0xb0] sm:$0xff]  }
 0xb76   :  { %1847 = vmatpush1.bf16.msra.mxu1 %v5245_v9  ;;  %v5280_v9 = vld [vmem:[%s6002_s27 + $0xf8] sm:$0xff]  }
 0xbe5   :  { %v1576_v52 = vpop.xlane.xlu1 %1575 }
 0xbe6   :  { %v1580_v0 = vmul.f32 0.0078125, %v1576_v52 }
 0xbe8   :  { %v5957_v59 = vsub.f32 %v5935_v30, %v1580_v0  ;;  %v1579_v8 = vpop.xlane.xlu0 %1578 }
 0xbe9   :  { %v1581_v12 = vmul.f32 0.0078125, %v1579_v8  ;;  %v5252_v8 = vld [vmem:[%s6002_s27 + $0xc0] sm:$0xff]  }
 0xbea   :  { %v1584_v13 = vmul.f32 %v5957_v59, %v5957_v59  ;;  %4781 = vmatprep.subr.bf16.mxu0 %v5252_v8 }
 0xbeb   :  { %v5962_v46 = vsub.f32 %v5938_v39, %v1581_v12  ;;  %v5253_v12 = vld [vmem:[%s6002_s27] sm:$0xff]  }
 0xbec   :  { %1586 = vadd.xlane.f32.xlu0 %v1584_v13  ;;  %v5254_v13 = vld [vmem:[%s6002_s27 + $0x80] sm:$0xff]  }
 0xbed   :  { %v1585_v47 = vmul.f32 %v5962_v46, %v5962_v46 }
 0xbef   :  { %v1588_v22 = vsel %vm658_vm0, %v1585_v47, 0.0  ;;  %v5256_v47 = vld [vmem:[%s6002_s27 + $0xc8] sm:$0xff]  }
 0xbf0   :  { %1589 = vadd.xlane.f32.xlu1 %v1588_v22  ;;  %v5257_v22 = vld [vmem:[%s6002_s27 + $0x8] sm:$0xff]  }
 0xc79   :  { %v1587_v15 = vpop.xlane.xlu0 %1586 }
 0xc7a   :  { %v1591_v16 = vmul.f32 0.0078125, %v1587_v15  ;;  %v5282_v15 = vld [vmem:[%s6002_s27 + $0xb8] sm:$0xff]  }
 0xc7c   :  { %v1593_v17 = vadd.f32 1e-06, %v1591_v16  ;;  %v1650_v16 = vld [vmem:[%s4336_s1] sm:$0xf]  ;;  %s4358_s1 = sld [smem:[%s6658_s0 + %s5585_s28]]  }
 0xc7d   :  { %v1590_v18 = vpop.xlane.xlu1 %1589 }
 0xc7e   :  { %5439 = vrsqrt.f32 %v1593_v17  ;;  %v1592_v32 = vmul.f32 0.0078125, %v1590_v18  ;;  %v1666_v17 = vsub.s32 3, %v5740_v19  ;;  %v1655_v18 = vrot.slane %v1650_v16, %v5743_v20 }
 0xc80   :  { %v1594_v36 = vadd.f32 1e-06, %v1592_v32  ;;  %v1663_v32 = vrot.slane %v1650_v16, %v5746_v21 }
 0xc82   :  { %5441 = vrsqrt.f32 %v1594_v36  ;;  %v1659_v36 = vrot.slane %v1650_v16, %v5749_v23 }
 0xc88   :  { %v5440_v40 = vpop.eup %5439 }
 0xc89   :  { %v1597_v25 = vmul.f32 %v5440_v40, %v5957_v59  ;;  %v5251_v59 = vld [vmem:[%s6002_s27 + $0x40] sm:$0xff]   ;;  %v1667_v40 = vrot.slane %v1650_v16, %v1666_v17 }
 0xc8a   :  { %4759 = vmatprep.subr.bf16.mxu1 %v5251_v59 }
 0xc8b   :  { %v1606_v42 = vmul.f32 %v4452_v27, %v1597_v25 }
 0xc8c   :  { %v5442_v41 = vpop.eup %5441 }
 0xc8d   :  { %v1598_v1 = vmul.f32 %v5442_v41, %v5962_v46  ;;  %v1615_v45 = vadd.f32 %v4453_v43, %v1606_v42  ;;  %v5255_v46 = vld [vmem:[%s6002_s27 + $0x48] sm:$0xff]   ;;  %s4359_s27 = sld [smem:[%s6658_s0 + %s5584_s24]]  }
 0xc8f   :  { %v1607_v44 = vmul.f32 %v4452_v27, %v1598_v1 }
 0xc91   :  { %v1616_v52 = vadd.f32 %v4453_v43, %v1607_v44 }
 0xc93   :  { %v1617_v0 = vpack.c.bf16 %v1616_v52, %v1615_v45 }
 0xc95   :  { %1865 = vmatmul.mubr.bf16.vlgmr.msra.gmra.mrb[28].mxu1 %v1617_v0  ;;  %1908 = vmatmul.mubr.bf16.vlgmr.msra.gmra.mrb[16].mxu0 %v1617_v0 }
 0xc96   :  { %4760 = vmatpush3.bf16.msra.mxu1 %v5253_v12  ;;  %4782 = vmatpush3.bf16.msra.mxu0 %v5254_v13 }
 0xc97   :  { %4761 = vmatprep.subr.bf16.mxu1 %v5255_v46  ;;  %4783 = vmatprep.subr.bf16.mxu0 %v5256_v47 }
 0xc9a   :  { %4762 = vmatpush3.bf16.msra.mxu1 %v5257_v22  ;;  %4784 = vmatpush3.bf16.msra.mxu0 %v5258_v49 }
 0xc9b   :  { %4763 = vmatprep.subr.bf16.mxu1 %v5259_v50  ;;  %4785 = vmatprep.subr.bf16.mxu0 %v5260_v37 }
 0xc9e   :  { %4764 = vmatpush3.bf16.msra.mxu1 %v5261_v51  ;;  %4786 = vmatpush3.bf16.msra.mxu0 %v5262_v53 }
 0xc9f   :  { %4765 = vmatprep.subr.bf16.mxu1 %v5263_v54  ;;  %4787 = vmatprep.subr.bf16.mxu0 %v5264_v57 }
 0xca2   :  { %4766 = vmatpush3.bf16.msra.mxu1 %v5265_v3  ;;  %4788 = vmatpush3.bf16.msra.mxu0 %v5266_v10 }
 0xca3   :  { %4767 = vmatprep.subr.bf16.mxu1 %v5267_v55  ;;  %4789 = vmatprep.subr.bf16.mxu0 %v5268_v56 }
 0xca6   :  { %4768 = vmatpush3.bf16.msra.mxu1 %v5269_v60  ;;  %4790 = vmatpush3.bf16.msra.mxu0 %v5270_v48 }
 0xca7   :  { %4769 = vmatprep.subr.bf16.mxu1 %v5271_v62  ;;  %4791 = vmatprep.subr.bf16.mxu0 %v5272_v58 }
 0xcaa   :  { %4770 = vmatpush3.bf16.msra.mxu1 %v5273_v4  ;;  %4792 = vmatpush3.bf16.msra.mxu0 %v5274_v7 }
 0xcab   :  { %4771 = vmatprep.subr.bf16.mxu1 %v5275_v11  ;;  %4793 = vmatprep.subr.bf16.mxu0 %v5276_v61 }
 0xcae   :  { %4772 = vmatpush3.bf16.msra.mxu1 %v5277_v2  ;;  %4794 = vmatpush3.bf16.msra.mxu0 %v5278_v5 }
 0xcaf   :  { %4773 = vmatprep.subr.bf16.mxu1 %v5279_v6  ;;  %4795 = vmatprep.subr.bf16.mxu0 %v5280_v9 }
 0xcb2   :  { %4774 = vmatpush3.bf16.msra.mxu1 %v5281_v14  ;;  %4796 = vmatpush3.bf16.msra.mxu0 %v5282_v15 }
 0xcb3   :  { %4969 = vmatprep.subr.bf16.mxu0 %v5557_v29 }
 0xd68   :  { %v1866_v25 = vpop.f32.mrb[28].mxu1  ;;  %v1909_v27 = vpop.f32.mrb[16].mxu0 }
 0xd69   :  { %v1867_v41 = vadd.f32 %v1866_v25, %v1655_v18  ;;  %v6046_v1 = vadd.f32 %v1909_v27, %v1663_v32  ;;  %v1868_v42 = vpop.f32.mrb[29].mxu1  ;;  %v1911_v43 = vpop.f32.mrb[17].mxu0 }
 0xd6a   :  { %v6048_v44 = vadd.f32 %v1868_v42, %v1659_v36  ;;  %v6050_v45 = vadd.f32 %v1911_v43, %v1667_v40  ;;  %v1870_v52 = vpop.f32.mrb[30].mxu1  ;;  %v1913_v0 = vpop.f32.mrb[18].mxu0 }
 0xd6b   :  { %v1918_v59 = vand.u32 2147483647, %v1867_v41  ;;  %v1920_v8 = vand.u32 2147483647, %v6046_v1  ;;  %v1872_v13 = vpop.f32.mrb[31].mxu1  ;;  %v1915_v3 = vpop.f32.mrb[19].mxu0  ;;  %v6058_v60 = vadd.f32 %v1870_v52, %v1655_v18  ;;  %v6060_v48 = vadd.f32 %v1913_v0, %v1663_v32 }
 0xd6c   :  { %v1919_v12 = vand.u32 2147483647, %v6048_v44  ;;  %v1921_v49 = vand.u32 2147483647, %v6050_v45  ;;  %v6062_v62 = vadd.f32 %v1872_v13, %v1659_v36  ;;  %v6066_v61 = vadd.f32 %v1915_v3, %v1667_v40 }
 0xd6d   :  { %v1926_v46 = vmul.f32 0.70710677, %v1918_v59  ;;  %v1928_v47 = vmul.f32 0.70710677, %v1920_v8  ;;  %v1922_v58 = vand.u32 2147483647, %v6058_v60 }
 0xd6e   :  { %v1927_v22 = vmul.f32 0.70710677, %v1919_v12  ;;  %v6055_v53 = vmul.f32 0.70710677, %v1921_v49  ;;  %v1924_v4 = vand.u32 2147483647, %v6060_v48 }
 0xd6f   :  { %v1950_v50 = vmul.f32 0.3275911, %v1926_v46  ;;  %v1952_v37 = vmul.f32 0.3275911, %v1928_v47  ;;  %v2054_v7 = vsub.f32 0.0, %v1926_v46  ;;  %v2056_v2 = vsub.f32 0.0, %v1928_v47 }
 0xd70   :  { %v1951_v51 = vmul.f32 0.3275911, %v1927_v22  ;;  %v1953_v10 = vmul.f32 0.3275911, %v6055_v53  ;;  %v1930_v11 = vmul.f32 0.70710677, %v1922_v58 }
 0xd71   :  { %v1958_v54 = vadd.f32 1.0, %v1950_v50  ;;  %v1960_v57 = vadd.f32 1.0, %v1952_v37  ;;  %v1932_v5 = vmul.f32 0.70710677, %v1924_v4  ;;  %v1923_v6 = vand.u32 2147483647, %v6062_v62 }
 0xd72   :  { %v1959_v55 = vadd.f32 1.0, %v1951_v51  ;;  %v1961_v56 = vadd.f32 1.0, %v1953_v10  ;;  %v1954_v9 = vmul.f32 0.3275911, %v1930_v11  ;;  %vm1934_vm13 = vcmp.ge.f32.partialorder %v1867_v41, 0.0 }
 0xd73   :  { %5443 = vrcp.f32 %v1958_v54  ;;  %v1956_v14 = vmul.f32 0.3275911, %v1932_v5  ;;  %v6069_v15 = vmul.f32 0.70710677, %v1923_v6  ;;  %v2062_v18 = vmul.f32 %v2054_v7, %v1926_v46 }
 0xd74   :  { %5445 = vrcp.f32 %v1960_v57  ;;  %v2055_v32 = vsub.f32 0.0, %v1927_v22  ;;  %v1962_v36 = vadd.f32 1.0, %v1954_v9  ;;  %v1925_v25 = vand.u32 2147483647, %v6066_v61 }
 0xd75   :  { %5447 = vrcp.f32 %v1959_v55  ;;  %v2064_v42 = vmul.f32 %v2056_v2, %v1928_v47  ;;  %v1964_v43 = vadd.f32 1.0, %v1956_v14  ;;  %v1955_v52 = vmul.f32 0.3275911, %v6069_v15 }
 0xd76   :  { %5449 = vrcp.f32 %v1961_v56  ;;  %v5570_v0 = vmov -1.0   ;;  %v6081_v8 = vmul.f32 0.5, %v1867_v41  ;;  %v6085_v46 = vmul.f32 0.5, %v6046_v1 }
 0xd77   :  { %v6079_v59 = vsel %vm1934_vm13, 1.0, %v5570_v0  ;;  %5451 = vrcp.f32 %v1962_v36  ;;  %v1963_v49 = vadd.f32 1.0, %v1955_v52  ;;  %v2063_v37 = vmul.f32 %v2055_v32, %v1927_v22 }
 0xd78   :  { %5453 = vrcp.f32 %v1964_v43  ;;  %v2057_v51 = vsub.f32 0.0, %v6055_v53  ;;  %v6090_v54 = vmul.f32 0.70710677, %v1925_v25  ;;  %v2070_v57 = vmul.f32 1.442695, %v2062_v18 }
 0xd79   :  { %v2074_v3 = vmul.f32 1.442695, %v2064_v42  ;;  %v2058_v58 = vsub.f32 0.0, %v1930_v11  ;;  %5455 = vrcp.f32 %v1963_v49  ;;  %v2060_v14 = vsub.f32 0.0, %v1932_v5 }
 0xd7a   :  { %v1957_v4 = vmul.f32 0.3275911, %v6090_v54  ;;  %v2065_v9 = vmul.f32 %v2057_v51, %v6055_v53  ;;  %5457 = vpow2.f32 %v2070_v57  ;;  %v2072_v42 = vmul.f32 1.442695, %v2063_v37 }
 0xd7b   :  { %v2066_v43 = vmul.f32 %v2058_v58, %v1930_v11  ;;  %v2068_v51 = vmul.f32 %v2060_v14, %v1932_v5  ;;  %vm1936_vm14 = vcmp.ge.f32.partialorder %v6046_v1, 0.0  ;;  %vm1935_vm15 = vcmp.ge.f32.partialorder %v6048_v44, 0.0 }
 0xd7c   :  { %v1965_v18 = vadd.f32 1.0, %v1957_v4  ;;  %vm1937_vm2 = vcmp.ge.f32.partialorder %v6050_v45, 0.0  ;;  %vm1938_vm3 = vcmp.ge.f32.partialorder %v6058_v60, 0.0  ;;  %vm1940_vm4 = vcmp.ge.f32.partialorder %v6060_v48, 0.0 }
 0xd7d   :  { %v6071_v16 = vpop.eup %5443  ;;  %v2078_v58 = vmul.f32 1.442695, %v2066_v43  ;;  %vm1939_vm5 = vcmp.ge.f32.partialorder %v6062_v62, 0.0  ;;  %vm1941_vm6 = vcmp.ge.f32.partialorder %v6066_v61, 0.0 }
 0xd7e   :  { %v6074_v27 = vpop.eup %5445  ;;  %v1982_v40 = vmul.f32 1.0614054, %v6071_v16  ;;  %5459 = vrcp.f32 %v1965_v18  ;;  %v2082_v18 = vmul.f32 1.442695, %v2068_v51 }
 0xd7f   :  { %v1984_v12 = vmul.f32 1.0614054, %v6074_v27  ;;  %v6087_v50 = vpop.eup %5447  ;;  %5461 = vpow2.f32 %v2074_v3 }
 0xd80   :  { %v4486_v13 = vadd.f32 -1.4531521, %v1982_v40  ;;  %v1983_v10 = vmul.f32 1.0614054, %v6087_v50  ;;  %v6094_v55 = vpop.eup %5449  ;;  %5463 = vpow2.f32 %v2072_v42  ;;  %v2061_v42 = vsub.f32 0.0, %v6090_v54 }
 0xd81   :  { %v4488_v47 = vadd.f32 -1.4531521, %v1984_v12  ;;  %v1985_v2 = vmul.f32 1.0614054, %v6094_v55  ;;  %v6104_v49 = vpop.eup %5451 }
 0xd82   :  { %v1998_v41 = vmul.f32 %v6071_v16, %v4486_v13  ;;  %v4487_v22 = vadd.f32 -1.4531521, %v1983_v10  ;;  %v6107_v57 = vpop.eup %5453 }
 0xd83   :  { %v2000_v56 = vmul.f32 %v6074_v27, %v4488_v47  ;;  %v4489_v25 = vadd.f32 -1.4531521, %v1985_v2  ;;  %v2076_v47 = vmul.f32 1.442695, %v2065_v9  ;;  %v1988_v4 = vmul.f32 1.0614054, %v6107_v57 }
 0xd84   :  { %v2006_v7 = vadd.f32 1.4214138, %v1998_v41  ;;  %v1999_v36 = vmul.f32 %v6087_v50, %v4487_v22  ;;  %v2059_v41 = vsub.f32 0.0, %v6069_v15 }
 0xd85   :  { %v2008_v6 = vadd.f32 1.4214138, %v2000_v56  ;;  %v2001_v13 = vmul.f32 %v6094_v55, %v4489_v25  ;;  %v1986_v56 = vmul.f32 1.0614054, %v6104_v49  ;;  %v4492_v14 = vadd.f32 -1.4531521, %v1988_v4 }
 0xd86   :  { %v2014_v32 = vmul.f32 %v6071_v16, %v2006_v7  ;;  %v2007_v12 = vadd.f32 1.4214138, %v1999_v36  ;;  %5465 = vpow2.f32 %v2076_v47 }
 0xd87   :  { %v2016_v40 = vmul.f32 %v6074_v27, %v2008_v6  ;;  %v2009_v11 = vadd.f32 1.4214138, %v2001_v13  ;;  %v4490_v2 = vadd.f32 -1.4531521, %v1986_v56  ;;  %v6116_v6 = vpop.eup %5455  ;;  %5467 = vpow2.f32 %v2078_v58 }
 0xd88   :  { %v4494_v52 = vadd.f32 -0.28449672, %v2014_v32  ;;  %v2015_v37 = vmul.f32 %v6087_v50, %v2007_v12  ;;  %v2067_v32 = vmul.f32 %v2059_v41, %v6069_v15  ;;  %v1987_v12 = vmul.f32 1.0614054, %v6116_v6  ;;  %v5458_v13 = vpop.eup %5457 }
 0xd89   :  { %v4496_v53 = vadd.f32 -0.28449672, %v2016_v40  ;;  %v2017_v22 = vmul.f32 %v6094_v55, %v2009_v11  ;;  %v2002_v40 = vmul.f32 %v6104_v49, %v4490_v2  ;;  %5469 = vpow2.f32 %v2082_v18 }
 0xd8a   :  { %v2030_v10 = vmul.f32 %v6071_v16, %v4494_v52  ;;  %v4495_v7 = vadd.f32 -0.28449672, %v2015_v37  ;;  %v2004_v52 = vmul.f32 %v6107_v57, %v4492_v14  ;;  %v4491_v11 = vadd.f32 -1.4531521, %v1987_v12 }
 0xd8b   :  { %v2032_v3 = vmul.f32 %v6074_v27, %v4496_v53  ;;  %v4497_v25 = vadd.f32 -0.28449672, %v2017_v22  ;;  %v2010_v41 = vadd.f32 1.4214138, %v2002_v40  ;;  %v2080_v56 = vmul.f32 1.442695, %v2067_v32 }
 0xd8c   :  { %v2038_v5 = vadd.f32 0.2548296, %v2030_v10  ;;  %v2031_v36 = vmul.f32 %v6087_v50, %v4495_v7  ;;  %v6127_v10 = vpop.eup %5459  ;;  %v2012_v37 = vadd.f32 1.4214138, %v2004_v52 }
 0xd8d   :  { %v2040_v9 = vadd.f32 0.2548296, %v2032_v3  ;;  %v2033_v15 = vmul.f32 %v6094_v55, %v4497_v25  ;;  %v2018_v47 = vmul.f32 %v6104_v49, %v2010_v41  ;;  %v2069_v3 = vmul.f32 %v2061_v42, %v6090_v54 }
 0xd8e   :  { %v2046_v43 = vmul.f32 %v6071_v16, %v2038_v5  ;;  %v2039_v51 = vadd.f32 0.2548296, %v2031_v36  ;;  %v5462_v16 = vpop.eup %5461  ;;  %v2003_v5 = vmul.f32 %v6116_v6, %v4491_v11  ;;  %v1989_v7 = vmul.f32 1.0614054, %v6127_v10 }
 0xd8f   :  { %v2048_v53 = vmul.f32 %v6074_v27, %v2040_v9  ;;  %v2020_v27 = vmul.f32 %v6107_v57, %v2012_v37  ;;  %v2041_v58 = vadd.f32 0.2548296, %v2033_v15  ;;  %v4498_v9 = vadd.f32 -0.28449672, %v2018_v47  ;;  %v5464_v14 = vpop.eup %5463 }
 0xd90   :  { %v2086_v4 = vmul.f32 %v5458_v13, %v2046_v43  ;;  %v2047_v2 = vmul.f32 %v6087_v50, %v2039_v51  ;;  %v2011_v25 = vadd.f32 1.4214138, %v2003_v5  ;;  %v4493_v40 = vadd.f32 -1.4531521, %v1989_v7  ;;  %v5466_v1 = vpop.eup %5465 }
 0xd91   :  { %v2088_v22 = vmul.f32 %v5462_v16, %v2048_v53  ;;  %v4500_v36 = vadd.f32 -0.28449672, %v2020_v27  ;;  %v1944_v54 = vsel %vm1936_vm14, 1.0, %v5570_v0  ;;  %v2034_v18 = vmul.f32 %v6104_v49, %v4498_v9  ;;  %v5468_v47 = vpop.eup %5467 }
 0xd92   :  { %5471 = vpow2.f32 %v2080_v56  ;;  %v2084_v32 = vmul.f32 1.442695, %v2069_v3  ;;  %v1943_v42 = vsel %vm1935_vm15, 1.0, %v5570_v0  ;;  %v2019_v43 = vmul.f32 %v6116_v6, %v2011_v25 }
 0xd93   :  { %v2036_v50 = vmul.f32 %v6107_v57, %v4500_v36  ;;  %v2005_v52 = vmul.f32 %v6127_v10, %v4493_v40  ;;  %v2094_v12 = vsub.f32 1.0, %v2086_v4  ;;  %v2096_v13 = vsub.f32 1.0, %v2088_v22 }
 0xd94   :  { %v2087_v53 = vmul.f32 %v5464_v14, %v2047_v2  ;;  %v2042_v51 = vadd.f32 0.2548296, %v2034_v18  ;;  %v2049_v15 = vmul.f32 %v6094_v55, %v2041_v58  ;;  %v4499_v37 = vadd.f32 -0.28449672, %v2019_v43  ;;  %v5470_v55 = vpop.eup %5469 }
 0xd95   :  { %v2044_v41 = vadd.f32 0.2548296, %v2036_v50  ;;  %v2013_v11 = vadd.f32 1.4214138, %v2005_v52  ;;  %5473 = vpow2.f32 %v2084_v32  ;;  %v2102_v27 = vmul.f32 %v2094_v12, %v6079_v59 }
 0xd96   :  { %v2050_v16 = vmul.f32 %v6104_v49, %v2042_v51  ;;  %v2035_v3 = vmul.f32 %v6116_v6, %v4499_v37  ;;  %v2104_v5 = vmul.f32 %v2096_v13, %v1944_v54  ;;  %v2095_v7 = vsub.f32 1.0, %v2087_v53 }
 0xd97   :  { %v2052_v56 = vmul.f32 %v6107_v57, %v2044_v41  ;;  %v2021_v4 = vmul.f32 %v6127_v10, %v2013_v11  ;;  %v2089_v2 = vmul.f32 %v5466_v1, %v2049_v15  ;;  %v1945_v14 = vsel %vm1937_vm2, 1.0, %v5570_v0 }
 0xd98   :  { %v2090_v22 = vmul.f32 %v5468_v47, %v2050_v16  ;;  %v2043_v9 = vadd.f32 0.2548296, %v2035_v3  ;;  %v1946_v57 = vsel %vm1938_vm3, 1.0, %v5570_v0  ;;  %v1948_v59 = vsel %vm1940_vm4, 1.0, %v5570_v0 }
 0xd99   :  { %v2092_v58 = vmul.f32 %v5470_v55, %v2052_v56  ;;  %v4501_v49 = vadd.f32 -0.28449672, %v2021_v4  ;;  %v2118_v32 = vadd.f32 1.0, %v2102_v27  ;;  %v2120_v50 = vadd.f32 1.0, %v2104_v5 }
 0xd9a   :  { %v2098_v36 = vsub.f32 1.0, %v2090_v22  ;;  %v2051_v40 = vmul.f32 %v6116_v6, %v2043_v9  ;;  %v2103_v43 = vmul.f32 %v2095_v7, %v1943_v42  ;;  %v2097_v12 = vsub.f32 1.0, %v2089_v2 }
 0xd9b   :  { %v2100_v25 = vsub.f32 1.0, %v2092_v58  ;;  %v2037_v54 = vmul.f32 %v6127_v10, %v4501_v49  ;;  %v2114_v1 = vmul.f32 0.5, %v6058_v60  ;;  %v2116_v41 = vmul.f32 0.5, %v6060_v48 }
 0xd9c   :  { %v5472_v18 = vpop.eup %5471  ;;  %v2106_v52 = vmul.f32 %v2098_v36, %v1946_v57  ;;  %v1947_v37 = vsel %vm1939_vm5, 1.0, %v5570_v0  ;;  %v2126_v42 = vmul.f32 %v2118_v32, %v6081_v8  ;;  %v2128_v56 = vmul.f32 %v2120_v50, %v6085_v46 }
 0xd9d   :  { %v2108_v13 = vmul.f32 %v2100_v25, %v1948_v59  ;;  %v2091_v53 = vmul.f32 %v5472_v18, %v2051_v40  ;;  %v2045_v51 = vadd.f32 0.2548296, %v2037_v54  ;;  %v2119_v3 = vadd.f32 1.0, %v2103_v43 }
 0xd9e   :  { %v2122_v15 = vadd.f32 1.0, %v2106_v52  ;;  %v2105_v55 = vmul.f32 %v2097_v12, %v1945_v14  ;;  %v2111_v48 = vmul.f32 0.5, %v6048_v44  ;;  %v2115_v22 = vmul.f32 0.5, %v6062_v62 }
 0xd9f   :  { %v2124_v11 = vadd.f32 1.0, %v2108_v13  ;;  %v2099_v6 = vsub.f32 1.0, %v2091_v53  ;;  %v2053_v16 = vmul.f32 %v6127_v10, %v2045_v51  ;;  %v5474_v47 = vpop.eup %5473  ;;  %v1949_v8 = vsel %vm1941_vm6, 1.0, %v5570_v0 }
 0xda0   :  { %v2130_v4 = vmul.f32 %v2122_v15, %v2114_v1  ;;  %v2121_v10 = vadd.f32 1.0, %v2105_v55  ;;  %v2127_v49 = vmul.f32 %v2119_v3, %v2111_v48  ;;  %v2113_v14 = vmul.f32 0.5, %v6050_v45  ;;  %v5289_v3 = vld [vmem:[%s6199_s10 + $0x1c] ss:$12 sps:$4 sm:$0xff]  }
 0xda1   :  { %v2132_v60 = vmul.f32 %v2124_v11, %v2116_v41  ;;  %v2107_v27 = vmul.f32 %v2099_v6, %v1947_v37  ;;  %v2093_v5 = vmul.f32 %v5474_v47, %v2053_v16  ;;  %v2117_v36 = vmul.f32 0.5, %v6066_v61  ;;  %v4502_v61 = vld [vmem:[%s4338_s6] ss:$0 sm:$0xff]  ;;  %s4364_s6 = sld [smem:[%s6658_s0 + %s5586_s2]]  }
 0xda2   :  { %v2134_v7 = vpack.c.bf16 %v2130_v4, %v2126_v42  ;;  %v2129_v25 = vmul.f32 %v2121_v10, %v2113_v14  ;;  %v5286_v42 = vld [vmem:[%s6199_s10 + $0x8] ss:$12 sps:$4 sm:$0xff]   ;;  %v5294_v10 = vld [vmem:[%s6199_s10 + $0x38] ss:$12 sps:$4 sm:$0xff]  }
 0xda3   :  { %v2123_v2 = vadd.f32 1.0, %v2107_v27  ;;  %v2101_v58 = vsub.f32 1.0, %v2093_v5  ;;  %v2136_v9 = vpack.c.bf16 %v2132_v60, %v2128_v56  ;;  %v5287_v56 = vld [vmem:[%s6199_s10 + $0x18] ss:$12 sps:$4 sm:$0xff]  }
 0xda4   :  { %v5301_v14 = vld [vmem:[%s6199_s10 + $0x64] ss:$12 sps:$4 sm:$0xff]  }
 0xda5   :  { %v2109_v46 = vmul.f32 %v2101_v58, %v1949_v8  ;;  %v2131_v57 = vmul.f32 %v2123_v2, %v2115_v22  ;;  %v5290_v58 = vld [vmem:[%s6199_s10 + $0x20] ss:$12 sps:$4 sm:$0xff]   ;;  %v5291_v8 = vld [vmem:[%s6199_s10 + $0x30] ss:$12 sps:$4 sm:$0xff]  }
 0xda7   :  { %v2125_v59 = vadd.f32 1.0, %v2109_v46  ;;  %v2135_v44 = vpack.c.bf16 %v2131_v57, %v2127_v49  ;;  %v5297_v46 = vld [vmem:[%s6199_s10 + $0x4c] ss:$12 sps:$4 sm:$0xff]   ;;  %v5295_v49 = vld [vmem:[%s6199_s10 + $0x48] ss:$12 sps:$4 sm:$0xff]  }
 0xda8   :  { %v5298_v57 = vld [vmem:[%s6199_s10 + $0x50] ss:$12 sps:$4 sm:$0xff]  }
 0xda9   :  { %2433 = vmatprep.mubr.bf16.mxu1 %v2135_v44  ;;  %v2133_v62 = vmul.f32 %v2125_v59, %v2117_v36  ;;  %v5299_v36 = vld [vmem:[%s6199_s10 + $0x60] ss:$12 sps:$4 sm:$0xff]   ;;  %v5302_v59 = vld [vmem:[%s6199_s10 + $0x68] ss:$12 sps:$4 sm:$0xff]  }
 0xdaa   :  { %2434 = vmatmul.mubr.bf16.vlgmr.msra.gmra.mrb[32].mxu1 %v2134_v7  ;;  %v5305_v44 = vld [vmem:[%s6199_s10 + $0x7c] ss:$12 sps:$4 sm:$0xff]  }
 0xdab   :  { %v2137_v40 = vpack.c.bf16 %v2133_v62, %v2129_v25  ;;  %2737 = vmatprep.mubr.bf16.mxu1 %v5558_v63  ;;  %v5303_v25 = vld [vmem:[%s6199_s10 + $0x78] ss:$12 sps:$4 sm:$0xff]   ;;  %v5306_v62 = vld [vmem:[%s6199_s10 + $0x80] ss:$12 sps:$4 sm:$0xff]  }
 0xdad   :  { %2474 = vmatprep.mubr.bf16.mxu0 %v2137_v40  ;;  %v5309_v40 = vld [vmem:[%s6199_s10 + $0x94] ss:$12 sps:$4 sm:$0xff]  }
 0xdae   :  { %2475 = vmatmul.mubr.bf16.vlgmr.msra.gmra.mrb[20].mxu0 %v2136_v9  ;;  %v5293_v9 = vld [vmem:[%s6199_s10 + $0x34] ss:$12 sps:$4 sm:$0xff]  }
 0xdaf   :  { %4985 = vmatprep.mubr.msk.bf16.mxu0 %vm5559_vm1, %v5557_v29  ;;  %4970 = vmatpush3.bf16.msra.mxu0 %v5286_v42 }
 0xdb0   :  { %4971 = vmatprep.subr.bf16.mxu0 %v5557_v29 }
 0xdb3   :  { %4972 = vmatpush3.bf16.msra.mxu0 %v5290_v58 }
 0xdb4   :  { %4973 = vmatprep.subr.bf16.mxu0 %v5557_v29 }
 0xdb7   :  { %4974 = vmatpush3.bf16.msra.mxu0 %v5294_v10 }
 0xdb8   :  { %4975 = vmatprep.subr.bf16.mxu0 %v5557_v29 }
 0xdbb   :  { %4976 = vmatpush3.bf16.msra.mxu0 %v5298_v57 }
 0xdbc   :  { %4977 = vmatprep.subr.bf16.mxu0 %v5557_v29 }
 0xdbf   :  { %4978 = vmatpush3.bf16.msra.mxu0 %v5302_v59 }
 0xdc0   :  { %4979 = vmatprep.subr.bf16.mxu0 %v5557_v29 }
 0xdc3   :  { %4980 = vmatpush3.bf16.msra.mxu0 %v5306_v62 }
 0xdc4   :  { %4981 = vmatprep.subr.bf16.mxu0 %v5557_v29 }
 0xe7d   :  { %v4775_v45 = vpop.f32.mrb[32].mxu1 }
 0xe7e   :  { %v4776_v54 = vpop.f32.mrb[33].mxu1 }
 0xe7f   :  { %v4777_v18 = vadd.f32 %v4776_v54, %v4775_v45  ;;  %v4778_v32 = vpop.f32.mrb[34].mxu1  ;;  %v5307_v45 = vld [vmem:[%s6199_s10 + $0x90] ss:$12 sps:$4 sm:$0xff]   ;;  %v5313_v54 = vld [vmem:[%s6199_s10 + $0xac] ss:$12 sps:$4 sm:$0xff]  }
 0xe80   :  { %v4779_v50 = vpop.f32.mrb[35].mxu1 }
 0xe81   :  { %v4797_v43 = vpop.f32.mrb[20].mxu0  ;;  %v2436_v52 = vadd.f32 %v4777_v18, %v4502_v61  ;;  %v4780_v12 = vadd.f32 %v4779_v50, %v4778_v32  ;;  %v5311_v18 = vld [vmem:[%s6199_s10 + $0xa8] ss:$12 sps:$4 sm:$0xff]   ;;  %v5314_v32 = vld [vmem:[%s6199_s10 + $0xb0] ss:$12 sps:$4 sm:$0xff]  }
 0xe82   :  { %v4798_v13 = vpop.f32.mrb[21].mxu0 }
 0xe83   :  { %v4799_v53 = vadd.f32 %v4798_v13, %v4797_v43  ;;  %v4800_v51 = vpop.f32.mrb[22].mxu0  ;;  %v2439_v1 = vadd.f32 %v4780_v12, %v4502_v61  ;;  %v5310_v61 = vld [vmem:[%s6199_s10 + $0x98] ss:$12 sps:$4 sm:$0xff]  }
 0xe84   :  { %v4801_v15 = vpop.f32.mrb[23].mxu0  ;;  %4982 = vmatpush3.bf16.msra.mxu0 %v5310_v61 }
 0xe85   :  { %v2477_v41 = vadd.f32 %v4799_v53, %v2436_v52  ;;  %v4802_v37 = vadd.f32 %v4801_v15, %v4800_v51  ;;  %4983 = vmatprep.subr.bf16.mxu0 %v5557_v29  ;;  %v4535_v15 = vld [vmem:[%s4353_s14] ss:$0 sm:$0xff] }
 0xe87   :  { %v2480_v11 = vadd.f32 %v4802_v37, %v2439_v1  ;;  %v6188_v6 = vadd.f32 %v2477_v41, %v5935_v30  ;;  %v5283_v30 = vld [vmem:[%s6199_s10] ss:$12 sps:$4 sm:$0xff]  }
 0xe88   :  { %4984 = vmatpush3.bf16.msra.mxu0 %v5314_v32 }
 0xe89   :  { %v6191_v16 = vadd.f32 %v2480_v11, %v5938_v39  ;;  %2485 = vadd.xlane.f32.xlu1 %v6188_v6  ;;  %v5285_v39 = vld [vmem:[%s6199_s10 + $0x4] ss:$12 sps:$4 sm:$0xff]   ;;  %5013 = vmatprep.subr.bf16.mxu0 %v5557_v29 }
 0xe8a   :  { %2705 = vmatprep.subr.bf16.mxu1 %v5285_v39 }
 0xe8b   :  { %v2487_v47 = vsel %vm658_vm0, %v6191_v16, 0.0  ;;  %2706 = vmatpush1.bf16.msra.mxu1 %v5283_v30 }
 0xe8c   :  { %2488 = vadd.xlane.f32.xlu0 %v2487_v47  ;;  %2707 = vmatprep.subr.bf16.mxu1 %v5289_v3  ;;  %v4536_v47 = vld [vmem:[%s4352_s18] ss:$0 sm:$0xff] }
 0xe8d   :  { %v2560_v3 = vld [vmem:[%s4347_s22] sm:$0x7] }
 0xe8f   :  { %2708 = vmatpush1.bf16.msra.mxu1 %v5287_v56 }
 0xe90   :  { %2709 = vmatprep.subr.bf16.mxu1 %v5293_v9 }
 0xe93   :  { %2710 = vmatpush1.bf16.msra.mxu1 %v5291_v8 }
 0xe94   :  { %2711 = vmatprep.subr.bf16.mxu1 %v5297_v46 }
 0xe97   :  { %2712 = vmatpush1.bf16.msra.mxu1 %v5295_v49 }
 0xe98   :  { %2713 = vmatprep.subr.bf16.mxu1 %v5301_v14 }
 0xe9b   :  { %2714 = vmatpush1.bf16.msra.mxu1 %v5299_v36 }
 0xe9c   :  { %2715 = vmatprep.subr.bf16.mxu1 %v5305_v44 }
 0xe9f   :  { %2716 = vmatpush1.bf16.msra.mxu1 %v5303_v25 }
 0xea0   :  { %2717 = vmatprep.subr.bf16.mxu1 %v5309_v40 }
 0xea3   :  { %2718 = vmatpush1.bf16.msra.mxu1 %v5307_v45 }
 0xea4   :  { %2719 = vmatprep.subr.bf16.mxu1 %v5313_v54 }
 0xea7   :  { %2720 = vmatpush1.bf16.msra.mxu1 %v5311_v18 }
 0xea8   :  { %4989 = vmatprep.subr.bf16.mxu1 %v5557_v29 }
 0xf16   :  { %v2486_v4 = vpop.xlane.xlu1 %2485 }
 0xf17   :  { %v2490_v55 = vmul.f32 0.0078125, %v2486_v4  ;;  %v2565_v4 = vrot.slane %v2560_v3, %v5743_v20 }
 0xf19   :  { %v6208_v60 = vsub.f32 %v6188_v6, %v2490_v55  ;;  %v2489_v27 = vpop.xlane.xlu0 %2488  ;;  %v2573_v55 = vrot.slane %v2560_v3, %v5746_v21 }
 0xf1a   :  { %v2491_v5 = vmul.f32 0.0078125, %v2489_v27 }
 0xf1b   :  { %v2494_v48 = vmul.f32 %v6208_v60, %v6208_v60 }
 0xf1c   :  { %v6213_v7 = vsub.f32 %v6191_v16, %v2491_v5 }
 0xf1d   :  { %2496 = vadd.xlane.f32.xlu0 %v2494_v48 }
 0xf1e   :  { %v2495_v22 = vmul.f32 %v6213_v7, %v6213_v7 }
 0xf20   :  { %v2498_v2 = vsel %vm658_vm0, %v2495_v22, 0.0 }
 0xf21   :  { %2499 = vadd.xlane.f32.xlu1 %v2498_v2 }
 0xfaa   :  { %v2497_v50 = vpop.xlane.xlu0 %2496 }
 0xfab   :  { %v2501_v43 = vmul.f32 0.0078125, %v2497_v50 }
 0xfad   :  { %v2503_v52 = vadd.f32 1e-06, %v2501_v43 }
 0xfae   :  { %v2500_v12 = vpop.xlane.xlu1 %2499 }
 0xfaf   :  { %5475 = vrsqrt.f32 %v2503_v52  ;;  %v2502_v13 = vmul.f32 0.0078125, %v2500_v12 }
 0xfb1   :  { %v2504_v53 = vadd.f32 1e-06, %v2502_v13 }
 0xfb3   :  { %5477 = vrsqrt.f32 %v2504_v53 }
 0xfb9   :  { %v5476_v51 = vpop.eup %5475 }
 0xfba   :  { %v2507_v1 = vmul.f32 %v5476_v51, %v6208_v60  ;;  %v2569_v60 = vrot.slane %v2560_v3, %v5749_v23  ;;  %v5551_v3 = vld [vmem:[%s5839_s4] sm:$0xff] }
 0xfbc   :  { %v2516_v11 = vmul.f32 %v4535_v15, %v2507_v1 }
 0xfbd   :  { %v5478_v41 = vpop.eup %5477 }
 0xfbe   :  { %v2508_v37 = vmul.f32 %v5478_v41, %v6213_v7  ;;  %v2525_v39 = vadd.f32 %v4536_v47, %v2516_v11 }
 0xfc0   :  { %v2517_v30 = vmul.f32 %v4535_v15, %v2508_v37 }
 0xfc2   :  { %v2526_v42 = vadd.f32 %v4536_v47, %v2517_v30 }
 0xfc4   :  { %v2527_v56 = vpack.c.bf16 %v2526_v42, %v2525_v39 }
 0xfc6   :  { %2738 = vmatmul.mubr.bf16.vlgmr.msra.gmra.mrb[36].mxu1 %v2527_v56  ;;  %4986 = vmatmul.mubr.bf16.vlgmr.msra.gmra.mrb[24].mxu0 %v2527_v56 }
 0xfc7   :  { %4991 = vmatprep.mubr.msk.bf16.mxu1 %vm5559_vm1, %v5557_v29  ;;  %5015 = vmatprep.mubr.msk.bf16.mxu0 %vm5559_vm1, %v5557_v29 }
0x1099   :  { %v2739_v27 = vpop.f32.mrb[36].mxu1  ;;  %v2782_v5 = vpop.f32.mrb[24].mxu0 }
0x109a   :  { %v2740_v48 = vadd.f32 %v2739_v27, %v2565_v4  ;;  %v2783_v7 = vadd.f32 %v2782_v5, %v2573_v55  ;;  %v2741_v22 = vpop.f32.mrb[37].mxu1  ;;  %v4987_v2 = vpop.f32.mrb[25].mxu0 }
0x109b   :  { %v2743_v58 = vpop.f32.mrb[38].mxu1  ;;  %v2785_v9 = vpop.f32.mrb[26].mxu0  ;;  %v2742_v46 = vadd.f32 %v2741_v22, %v2569_v60 }
0x109c   :  { %v2790_v8 = vmul.f32 %v2740_v48, %v5766_v33  ;;  %v2860_v10 = vmul.f32 %v2740_v48, %v5769_v34  ;;  %v2745_v49 = vpop.f32.mrb[39].mxu1  ;;  %v4988_v57 = vpop.f32.mrb[27].mxu0  ;;  %v3024_v14 = vmul.f32 %v2740_v48, %v5772_v35  ;;  %v2744_v36 = vadd.f32 %v2743_v58, %v2565_v4 }
0x109d   :  { %v2786_v59 = vadd.f32 %v2785_v9, %v2573_v55  ;;  %v2746_v44 = vadd.f32 %v2745_v49, %v2569_v60  ;;  %v3143_v25 = vmul.f32 %v2740_v48, %v5776_v38  ;;  %v2927_v62 = vmul.f32 %v2783_v7, %v5755_v26 }
0x109e   :  { %v6269_v40 = vmul.f32 %v2783_v7, %v5752_v24  ;;  %v6272_v45 = vmul.f32 %v2783_v7, %v5758_v28  ;;  %v2791_v61 = vmul.f32 %v2744_v36, %v5766_v33  ;;  %v2861_v54 = vmul.f32 %v2744_v36, %v5769_v34 }
0x109f   :  { %v3025_v18 = vmul.f32 %v2744_v36, %v5772_v35  ;;  %v3144_v32 = vmul.f32 %v2744_v36, %v5776_v38  ;;  %v2789_v50 = vpack.c.bf16 %v2746_v44, %v2742_v46  ;;  %v2928_v43 = vmul.f32 %v2786_v59, %v5755_v26 }
0x10a0   :  { %v6280_v52 = vmul.f32 %v2786_v59, %v5752_v24  ;;  %v6283_v12 = vmul.f32 %v2786_v59, %v5758_v28  ;;  %v2792_v13 = vpack.c.bf16 %v2791_v61, %v2790_v8  ;;  %v2862_v51 = vpack.c.bf16 %v2861_v54, %v2860_v10 }
0x10a1   :  { %v3026_v53 = vpack.c.bf16 %v3025_v18, %v3024_v14  ;;  %v3145_v1 = vpack.c.bf16 %v3144_v32, %v3143_v25  ;;  %4990 = vmatpush3.bf16.xpose.msra.mxu1 %v2789_v50  ;;  %5014 = vmatpush3.bf16.xpose.msra.mxu0 %v2789_v50  ;;  %v2929_v33 = vpack.c.bf16 %v2928_v43, %v2927_v62 }
0x10a2   :  { %v2859_v34 = vpack.c.bf16 %v6280_v52, %v6269_v40  ;;  %v3093_v35 = vpack.c.bf16 %v6283_v12, %v6272_v45  ;;  %4995 = vmatprep.subr.bf16.mxu1 %v5557_v29  ;;  %5025 = vmatprep.subr.bf16.mxu0 %v5557_v29  ;;  %v6292_v24 = vmul.f32 %v2783_v7, %v5762_v31  ;;  %v5552_v7 = vld [vmem:[%s5839_s4 + $0x8] sm:$0x3]  ;;  %s5576_s4 = smov 22  }
0x10a3   :  { %v6295_v26 = vmul.f32 %v2786_v59, %v5762_v31  ;;  %v2934_v31 = vsel %vm1120_vm10, %v2929_v33, 0  ;;  %s6350_s25 = sld [smem:[%s6658_s0 + %s5576_s4]]  }
0x10a4   :  { %v3098_v40 = vsel %vm1120_vm10, %v3093_v35, 0 }
0x10a5   :  { %v3212_v28 = vpack.c.bf16 %v6295_v26, %v6292_v24 }
0x10a7   :  { %v3217_v12 = vsel %vm1120_vm10, %v3212_v28, 0 }
0x10a8   :  { %4992 = vmatmul.mubr.bf16.vlgmr.msra.gmra.mrb[40].mxu1 %v2792_v13  ;;  %5016 = vmatmul.mubr.bf16.vlgmr.msra.gmra.mrb[28].mxu0 %v3026_v53 }
0x10a9   :  { %4996 = vmatpush3.bf16.xpose.msra.mxu1 %v2789_v50  ;;  %5026 = vmatpush3.bf16.xpose.msra.mxu0 %v2789_v50 }
0x10aa   :  { %4997 = vmatprep.mubr.msk.bf16.mxu1 %vm5559_vm1, %v5557_v29  ;;  %5027 = vmatprep.mubr.msk.bf16.mxu0 %vm5559_vm1, %v5557_v29 }
0x10ab   :  { %5001 = vmatprep.subr.bf16.mxu1 %v5557_v29  ;;  %5037 = vmatprep.subr.bf16.mxu0 %v5557_v29 }
0x10b0   :  { %4998 = vmatmul.mubr.bf16.vlgmr.msra.gmra.mrb[44].mxu1 %v2862_v51  ;;  %5028 = vmatmul.mubr.bf16.vlgmr.msra.gmra.mrb[32].mxu0 %v3145_v1 }
0x10b1   :  { %5002 = vmatpush3.bf16.msra.mxu1 %v2934_v31  ;;  %5003 = vmatprep.mubr.msk.bf16.mxu1 %vm5559_vm1, %v5557_v29 }
0x10b2   :  { %5007 = vmatprep.subr.bf16.mxu1 %v5557_v29  ;;  %5053 = vmatprep.mubr.msk.bf16.mxu0 %vm5559_vm1, %v5557_v29 }
0x117b   :  { %v2827_v38 = vpop.f32.mrb[40].mxu1  ;;  %v3061_v15 = vpop.f32.mrb[28].mxu0 }
0x117c   :  { %v4993_v41 = vpop.f32.mrb[41].mxu1  ;;  %v5017_v37 = vpop.f32.mrb[29].mxu0  ;;  %v2828_v48 = vadd.f32 %v5551_v3, %v2827_v38  ;;  %v3062_v46 = vadd.f32 %v5551_v3, %v3061_v15 }
0x117d   :  { %v2830_v11 = vpop.f32.mrb[42].mxu1  ;;  %v3064_v47 = vpop.f32.mrb[30].mxu0 }
0x117e   :  { %v4994_v30 = vpop.f32.mrb[43].mxu1  ;;  %v5018_v39 = vpop.f32.mrb[31].mxu0  ;;  %v2831_v8 = vadd.f32 %v5552_v7, %v2830_v11  ;;  %v2834_v49 = vsel %vm1014_vm11, %v2828_v48, -inf  ;;  %v3065_v57 = vadd.f32 %v5552_v7, %v3064_v47  ;;  %v3068_v59 = vsel %vm1014_vm11, %v3062_v46, -inf }
0x1180   :  { %v2837_v14 = vsel %vm1018_vm12, %v2831_v8, -inf  ;;  %v3071_v25 = vsel %vm1018_vm12, %v3065_v57, -inf }
0x1183   :  { %v2897_v42 = vpop.f32.mrb[44].mxu1  ;;  %v3180_v56 = vpop.f32.mrb[32].mxu0 }
0x1184   :  { %v2898_v4 = vadd.f32 %v5551_v3, %v2897_v42  ;;  %v4999_v55 = vpop.f32.mrb[45].mxu1  ;;  %v5029_v60 = vpop.f32.mrb[33].mxu0  ;;  %v3181_v36 = vadd.f32 %v5551_v3, %v3180_v56 }
0x1185   :  { %v2900_v27 = vpop.f32.mrb[46].mxu1  ;;  %v3183_v5 = vpop.f32.mrb[34].mxu0 }
0x1186   :  { %v2901_v22 = vadd.f32 %v5552_v7, %v2900_v27  ;;  %v5000_v2 = vpop.f32.mrb[47].mxu1  ;;  %v5030_v58 = vpop.f32.mrb[35].mxu0  ;;  %v2904_v9 = vsel %vm1014_vm11, %v2898_v4, -inf  ;;  %v3184_v44 = vadd.f32 %v5552_v7, %v3183_v5  ;;  %v3187_v62 = vsel %vm1014_vm11, %v3181_v36, -inf }
0x1187   :  { %2905 = vmax.xlane.f32.xlu0 %v2904_v9 }
0x1188   :  { %v2907_v10 = vsel %vm1018_vm12, %v2901_v22, -inf  ;;  %v3190_v61 = vsel %vm1018_vm12, %v3184_v44, -inf }
0x1189   :  { %2908 = vmax.xlane.f32.xlu1 %v2907_v10 }
0x118b   :  { %2835 = vmax.xlane.f32.xlu0 %v2834_v49 }
0x118d   :  { %2838 = vmax.xlane.f32.xlu1 %v2837_v14 }
0x118f   :  { %3069 = vmax.xlane.f32.xlu0 %v3068_v59  ;;  %v5315_v59 = vld [vmem:[%s6350_s25] sm:$0xff]  }
0x1190   :  { %5038 = vmatpush3.bf16.msra.mxu0 %v5315_v59  ;;  %v5329_v59 = vld [vmem:[%s6414_s3 + $0x20] ss:$16 sps:$4 sm:$0xff]  }
0x1191   :  { %3072 = vmax.xlane.f32.xlu1 %v3071_v25  ;;  %5039 = vmatprep.subr.bf16.mxu0 %v5557_v29  ;;  %v5317_v25 = vld [vmem:[%s6350_s25 + $0x10] sm:$0xff]  }
0x1193   :  { %3188 = vmax.xlane.f32.xlu0 %v3187_v62  ;;  %v5318_v62 = vld [vmem:[%s6350_s25 + $0x18] sm:$0xff]  }
0x1195   :  { %3191 = vmax.xlane.f32.xlu1 %v3190_v61  ;;  %v5319_v61 = vld [vmem:[%s6350_s25 + $0x20] sm:$0xff]  }
0x1214   :  { %v2906_v54 = vpop.xlane.xlu0 %2905 }
0x1215   :  { %v2910_v18 = vsub.f32 %v2898_v4, %v2906_v54  ;;  %v5320_v54 = vld [vmem:[%s6350_s25 + $0x28] sm:$0xff]  }
0x1216   :  { %v2909_v32 = vpop.xlane.xlu1 %2908 }
0x1217   :  { %v2912_v50 = vmul.f32 1.442695, %v2910_v18  ;;  %v2911_v43 = vsub.f32 %v2901_v22, %v2909_v32  ;;  %v5321_v18 = vld [vmem:[%s6350_s25 + $0x30] sm:$0xff]  }
0x1218   :  { %v2836_v13 = vpop.xlane.xlu0 %2835 }
0x1219   :  { %5479 = vpow2.f32 %v2912_v50  ;;  %v2914_v53 = vmul.f32 1.442695, %v2911_v43  ;;  %v2840_v51 = vsub.f32 %v2828_v48, %v2836_v13 }
0x121a   :  { %v2839_v1 = vpop.xlane.xlu1 %2838 }
0x121b   :  { %5481 = vpow2.f32 %v2914_v53  ;;  %v2842_v33 = vmul.f32 1.442695, %v2840_v51  ;;  %v2841_v31 = vsub.f32 %v2831_v8, %v2839_v1 }
0x121c   :  { %v3070_v38 = vpop.xlane.xlu0 %3069 }
0x121d   :  { %5483 = vpow2.f32 %v2842_v33  ;;  %v2844_v15 = vmul.f32 1.442695, %v2841_v31  ;;  %v3074_v41 = vsub.f32 %v3062_v46, %v3070_v38  ;;  %v2981_v38 = vsel %vm1120_vm10, %v2859_v34, 0 }
0x121e   :  { %v3073_v37 = vpop.xlane.xlu1 %3072 }
0x121f   :  { %5485 = vpow2.f32 %v2844_v15  ;;  %v3076_v11 = vmul.f32 1.442695, %v3074_v41  ;;  %v3075_v47 = vsub.f32 %v3065_v57, %v3073_v37 }
0x1220   :  { %v3189_v30 = vpop.xlane.xlu0 %3188 }
0x1221   :  { %5487 = vpow2.f32 %v3076_v11  ;;  %v3078_v39 = vmul.f32 1.442695, %v3075_v47  ;;  %v3193_v42 = vsub.f32 %v3181_v36, %v3189_v30 }
0x1222   :  { %v3192_v56 = vpop.xlane.xlu1 %3191 }
0x1223   :  { %v6321_v3 = vpop.eup %5479  ;;  %5489 = vpow2.f32 %v3078_v39  ;;  %v3195_v4 = vmul.f32 1.442695, %v3193_v42  ;;  %v3194_v55 = vsub.f32 %v3184_v44, %v3192_v56  ;;  %v5316_v44 = vld [vmem:[%s6350_s25 + $0x8] sm:$0xff]  }
0x1224   :  { %v2916_v60 = vsel %vm1014_vm11, %v6321_v3, 0.0  ;;  %5040 = vmatpush3.bf16.msra.mxu0 %v5316_v44  ;;  %v5331_v44 = vld [vmem:[%s6414_s3 + $0x24] ss:$16 sps:$4 sm:$0xff]  }
0x1225   :  { %v5482_v27 = vpop.eup %5481  ;;  %5491 = vpow2.f32 %v3195_v4  ;;  %v3197_v5 = vmul.f32 1.442695, %v3194_v55  ;;  %2917 = vadd.xlane.f32.xlu0 %v2916_v60  ;;  %5041 = vmatprep.subr.bf16.mxu0 %v5557_v29 }
0x1226   :  { %v2919_v48 = vsel %vm1018_vm12, %v5482_v27, 0.0 }
0x1227   :  { %v6326_v7 = vpop.eup %5483  ;;  %5493 = vpow2.f32 %v3197_v5  ;;  %2920 = vadd.xlane.f32.xlu1 %v2919_v48  ;;  %v5322_v48 = vld [vmem:[%s6350_s25 + $0x38] sm:$0xff]  }
0x1228   :  { %v2846_v22 = vsel %vm1014_vm11, %v6326_v7, 0.0  ;;  %5042 = vmatpush3.bf16.msra.mxu0 %v5317_v25  ;;  %v5332_v25 = vld [vmem:[%s6414_s3 + $0x28] ss:$16 sps:$4 sm:$0xff]  }
0x1229   :  { %v5486_v2 = vpop.eup %5485  ;;  %2847 = vadd.xlane.f32.xlu0 %v2846_v22  ;;  %5043 = vmatprep.subr.bf16.mxu0 %v5557_v29 }
0x122a   :  { %v2849_v58 = vsel %vm1018_vm12, %v5486_v2, 0.0 }
0x122b   :  { %v6331_v9 = vpop.eup %5487  ;;  %2850 = vadd.xlane.f32.xlu1 %v2849_v58 }
0x122c   :  { %v3080_v8 = vsel %vm1014_vm11, %v6331_v9, 0.0  ;;  %5044 = vmatpush3.bf16.msra.mxu0 %v5318_v62  ;;  %v5334_v62 = vld [vmem:[%s6414_s3 + $0x2c] ss:$16 sps:$4 sm:$0xff]  }
0x122d   :  { %v6335_v10 = vpop.eup %5489  ;;  %3081 = vadd.xlane.f32.xlu0 %v3080_v8  ;;  %5045 = vmatprep.subr.bf16.mxu0 %v5557_v29 }
0x122e   :  { %v3083_v46 = vsel %vm1018_vm12, %v6335_v10, 0.0 }
0x122f   :  { %v6339_v49 = vpop.eup %5491  ;;  %3084 = vadd.xlane.f32.xlu1 %v3083_v46 }
0x1230   :  { %v3199_v57 = vsel %vm1014_vm11, %v6339_v49, 0.0  ;;  %5046 = vmatpush3.bf16.msra.mxu0 %v5319_v61 }
0x1231   :  { %v6343_v14 = vpop.eup %5493  ;;  %3200 = vadd.xlane.f32.xlu0 %v3199_v57  ;;  %5047 = vmatprep.subr.bf16.mxu0 %v5557_v29 }
0x1232   :  { %v3202_v36 = vsel %vm1018_vm12, %v6343_v14, 0.0 }
0x1233   :  { %3203 = vadd.xlane.f32.xlu1 %v3202_v36  ;;  %v5328_v36 = vld [vmem:[%s6414_s3 + $0xc] ss:$16 sps:$4 sm:$0xff]  }
0x1234   :  { %5048 = vmatpush3.bf16.msra.mxu0 %v5320_v54 }
0x1235   :  { %5049 = vmatprep.subr.bf16.mxu0 %v5557_v29 }
0x1238   :  { %5050 = vmatpush3.bf16.msra.mxu0 %v5321_v18 }
0x1239   :  { %5051 = vmatprep.subr.bf16.mxu0 %v5557_v29 }
0x123c   :  { %5052 = vmatpush3.bf16.msra.mxu0 %v5322_v48 }
0x123d   :  { %3677 = vmatprep.subr.bf16.mxu0 %v5328_v36  ;;  %v5372_v36 = vld [vmem:[%s6470_s16 + $0xc0] sm:$0xff]  }
0x12b2   :  { %v2918_v32 = vpop.xlane.xlu0 %2917 }
0x12b3   :  { %5495 = vrcp.f32 %v2918_v32 }
0x12b4   :  { %v2921_v50 = vpop.xlane.xlu1 %2920 }
0x12b5   :  { %5497 = vrcp.f32 %v2921_v50 }
0x12b6   :  { %v2848_v13 = vpop.xlane.xlu0 %2847 }
0x12b8   :  { %v2851_v43 = vpop.xlane.xlu1 %2850 }
0x12b9   :  { %5499 = vrcp.f32 %v2851_v43 }
0x12ba   :  { %5501 = vrcp.f32 %v2848_v13  ;;  %v3082_v37 = vpop.xlane.xlu0 %3081 }
0x12bc   :  { %v3085_v15 = vpop.xlane.xlu1 %3084 }
0x12bd   :  { %v5496_v53 = vpop.eup %5495  ;;  %5503 = vrcp.f32 %v3085_v15  ;;  %v5343_v15 = vld [vmem:[%s6414_s3 + $0x64] ss:$16 sps:$4 sm:$0xff]  }
0x12be   :  { %v2924_v1 = vmul.f32 %v5496_v53, %v6321_v3  ;;  %5505 = vrcp.f32 %v3082_v37  ;;  %v3201_v42 = vpop.xlane.xlu0 %3200  ;;  %v5341_v37 = vld [vmem:[%s6414_s3 + $0x60] ss:$16 sps:$4 sm:$0xff]  }
0x12bf   :  { %v5498_v51 = vpop.eup %5497 }
0x12c0   :  { %v2925_v33 = vmul.f32 %v5498_v51, %v5482_v27  ;;  %v3204_v52 = vpop.xlane.xlu1 %3203 }
0x12c1   :  { %5507 = vrcp.f32 %v3204_v52  ;;  %v5353_v52 = vld [vmem:[%s6414_s3 + $0xa0] ss:$16 sps:$4 sm:$0xff]  }
0x12c2   :  { %v2926_v31 = vpack.c.bf16 %v2925_v33, %v2924_v1  ;;  %5509 = vrcp.f32 %v3201_v42  ;;  %v5337_v1 = vld [vmem:[%s6414_s3 + $0x44] ss:$16 sps:$4 sm:$0xff]   ;;  %v5340_v33 = vld [vmem:[%s6414_s3 + $0x4c] ss:$16 sps:$4 sm:$0xff]   ;;  %v5356_v42 = vld [vmem:[%s6414_s3 + $0xa8] ss:$16 sps:$4 sm:$0xff]  }
0x12c3   :  { %v5500_v41 = vpop.eup %5499 }
0x12c4   :  { %5004 = vmatmul.mubr.msk.bf16.vlgmr.msra.gmra.mrb[48].mxu1 %vm1014_vm11, %v2926_v31  ;;  %v5502_v11 = vpop.eup %5501  ;;  %v2855_v47 = vmul.f32 %v5500_v41, %v5486_v2  ;;  %v5335_v31 = vld [vmem:[%s6414_s3 + $0x40] ss:$16 sps:$4 sm:$0xff]   ;;  %v5346_v41 = vld [vmem:[%s6414_s3 + $0x6c] ss:$16 sps:$4 sm:$0xff]  }
0x12c5   :  { %5008 = vmatpush3.bf16.msra.mxu1 %v2981_v38  ;;  %5009 = vmatprep.mubr.msk.bf16.mxu1 %vm5559_vm1, %v5557_v29  ;;  %v2854_v30 = vmul.f32 %v5502_v11, %v6326_v7  ;;  %v5338_v38 = vld [vmem:[%s6414_s3 + $0x48] ss:$16 sps:$4 sm:$0xff]  }
0x12c6   :  { %5019 = vmatprep.subr.bf16.mxu1 %v5557_v29  ;;  %v5344_v11 = vld [vmem:[%s6414_s3 + $0x68] ss:$16 sps:$4 sm:$0xff]  }
0x12c7   :  { %v2856_v39 = vpack.c.bf16 %v2855_v47, %v2854_v30  ;;  %v5504_v34 = vpop.eup %5503  ;;  %v5349_v47 = vld [vmem:[%s6414_s3 + $0x84] ss:$16 sps:$4 sm:$0xff]   ;;  %v5352_v30 = vld [vmem:[%s6414_s3 + $0x8c] ss:$16 sps:$4 sm:$0xff]  }
0x12c8   :  { %v5506_v56 = vpop.eup %5505  ;;  %v3089_v3 = vmul.f32 %v5504_v34, %v6335_v10  ;;  %v5355_v34 = vld [vmem:[%s6414_s3 + $0xa4] ss:$16 sps:$4 sm:$0xff]  }
0x12c9   :  { %v3088_v4 = vmul.f32 %v5506_v56, %v6331_v9  ;;  %v5358_v56 = vld [vmem:[%s6414_s3 + $0xac] ss:$16 sps:$4 sm:$0xff]  }
0x12cb   :  { %v3090_v45 = vpack.c.bf16 %v3089_v3, %v3088_v4  ;;  %v5508_v35 = vpop.eup %5507  ;;  %v5361_v3 = vld [vmem:[%s6414_s3 + $0xc4] ss:$16 sps:$4 sm:$0xff]   ;;  %v5364_v4 = vld [vmem:[%s6414_s3 + $0xcc] ss:$16 sps:$4 sm:$0xff]  }
0x12cc   :  { %v5510_v55 = vpop.eup %5509  ;;  %v3208_v60 = vmul.f32 %v5508_v35, %v6343_v14  ;;  %v5326_v14 = vld [vmem:[%s6414_s3 + $0x8] ss:$16 sps:$4 sm:$0xff]   ;;  %v5367_v35 = vld [vmem:[%s6414_s3 + $0xe4] ss:$16 sps:$4 sm:$0xff]  }
0x12cd   :  { %v3207_v27 = vmul.f32 %v5510_v55, %v6339_v49  ;;  %v5370_v55 = vld [vmem:[%s6414_s3 + $0xec] ss:$16 sps:$4 sm:$0xff]  }
0x12cf   :  { %v3209_v5 = vpack.c.bf16 %v3208_v60, %v3207_v27  ;;  %v5365_v60 = vld [vmem:[%s6414_s3 + $0xe0] ss:$16 sps:$4 sm:$0xff]   ;;  %v5368_v27 = vld [vmem:[%s6414_s3 + $0xe8] ss:$16 sps:$4 sm:$0xff]  }
0x12d0   :  { %5010 = vmatmul.mubr.msk.bf16.vlgmr.msra.gmra.mrb[48].mxu1 %vm1014_vm11, %v2856_v39  ;;  %v5347_v39 = vld [vmem:[%s6414_s3 + $0x80] ss:$16 sps:$4 sm:$0xff]  }
0x12d1   :  { %5020 = vmatpush3.bf16.msra.mxu1 %v3098_v40  ;;  %5021 = vmatprep.mubr.msk.bf16.mxu1 %vm5559_vm1, %v5557_v29  ;;  %v5350_v40 = vld [vmem:[%s6414_s3 + $0x88] ss:$16 sps:$4 sm:$0xff]  }
0x12d2   :  { %5031 = vmatprep.subr.bf16.mxu1 %v5557_v29 }
0x12dc   :  { %5022 = vmatmul.mubr.msk.bf16.vlgmr.msra.gmra.mrb[48].mxu1 %vm1014_vm11, %v3090_v45  ;;  %v5359_v45 = vld [vmem:[%s6414_s3 + $0xc0] ss:$16 sps:$4 sm:$0xff]  }
0x12dd   :  { %5032 = vmatpush3.bf16.msra.mxu1 %v3217_v12  ;;  %5033 = vmatprep.mubr.msk.bf16.mxu1 %vm5559_vm1, %v5557_v29  ;;  %v4565_v29 = vld [vmem:[%s4346_s29] ss:$0 sm:$0xff]  ;;  %v5362_v12 = vld [vmem:[%s6414_s3 + $0xc8] ss:$16 sps:$4 sm:$0xff]  }
0x12e8   :  { %5034 = vmatmul.mubr.msk.bf16.vlgmr.msra.gmra.mrb[48].mxu1 %vm1014_vm11, %v3209_v5 }
0x12e9   :  { %3666 = vmatprep.mubr.bf16.mxu1 %v5558_v63 }
0x13bb   :  { %v3253_v24 = vpop.f32.mrb[48].mxu1 }
0x13bc   :  { %v5035_v26 = vpop.f32.mrb[49].mxu1 }
0x13bd   :  { %v3256_v28 = vpop.f32.mrb[50].mxu1 }
0x13be   :  { %v3262_v7 = vpack.c.bf16 %v3256_v28, %v3253_v24  ;;  %v5036_v22 = vpop.f32.mrb[51].mxu1 }
0x13c0   :  { %5054 = vmatmul.mubr.bf16.vlgmr.msra.gmra.mrb[36].mxu0 %v3262_v7 }
0x13c1   :  { %3709 = vmatprep.mubr.bf16.mxu0 %v5558_v63  ;;  %3678 = vmatpush1.bf16.msra.mxu0 %v5326_v14  ;;  %v5371_v14 = vld [vmem:[%s6470_s16 + $0x40] sm:$0xff]  }
0x13c2   :  { %3679 = vmatprep.subr.bf16.mxu0 %v5334_v62  ;;  %v5376_v62 = vld [vmem:[%s6470_s16 + $0xc8] sm:$0xff]  }
0x13c5   :  { %3680 = vmatpush1.bf16.msra.mxu0 %v5332_v25  ;;  %v5375_v25 = vld [vmem:[%s6470_s16 + $0x48] sm:$0xff]  }
0x13c6   :  { %3681 = vmatprep.subr.bf16.mxu0 %v5340_v33  ;;  %v5387_v33 = vld [vmem:[%s6470_s16 + $0x60] sm:$0xff]  }
0x13c9   :  { %3682 = vmatpush1.bf16.msra.mxu0 %v5338_v38  ;;  %v5389_v38 = vld [vmem:[%s6470_s16 + $0x20] sm:$0xff]  }
0x13ca   :  { %3683 = vmatprep.subr.bf16.mxu0 %v5346_v41  ;;  %v5391_v41 = vld [vmem:[%s6470_s16 + $0x68] sm:$0xff]  }
0x13cd   :  { %3684 = vmatpush1.bf16.msra.mxu0 %v5344_v11  ;;  %v5393_v11 = vld [vmem:[%s6470_s16 + $0x28] sm:$0xff]  }
0x13ce   :  { %3685 = vmatprep.subr.bf16.mxu0 %v5352_v30  ;;  %v5395_v30 = vld [vmem:[%s6470_s16 + $0x70] sm:$0xff]  }
0x13d1   :  { %3686 = vmatpush1.bf16.msra.mxu0 %v5350_v40  ;;  %v5397_v40 = vld [vmem:[%s6470_s16 + $0x30] sm:$0xff]  }
0x13d2   :  { %3687 = vmatprep.subr.bf16.mxu0 %v5358_v56  ;;  %v5401_v56 = vld [vmem:[%s6470_s16 + $0x38] sm:$0xff]  }
0x13d5   :  { %3688 = vmatpush1.bf16.msra.mxu0 %v5356_v42  ;;  %v5400_v42 = vld [vmem:[%s6470_s16 + $0xf8] sm:$0xff]  }
0x13d6   :  { %3689 = vmatprep.subr.bf16.mxu0 %v5364_v4  ;;  %v3452_v4 = vld [vmem:[%s4348_s20] sm:$0xf] }
0x13d9   :  { %3690 = vmatpush1.bf16.msra.mxu0 %v5362_v12  ;;  %v3465_v12 = vrot.slane %v3452_v4, %v5746_v21 }
0x13da   :  { %3691 = vmatprep.subr.bf16.mxu0 %v5370_v55  ;;  %v3469_v55 = vrot.slane %v3452_v4, %v1666_v17 }
0x13dd   :  { %3692 = vmatpush1.bf16.msra.mxu0 %v5368_v27 }
0x13de   :  { %4859 = vmatprep.subr.bf16.mxu0 %v5372_v36 }
0x1493   :  { %v3368_v2 = vpop.f32.mrb[36].mxu0 }
0x1494   :  { %v3369_v58 = vadd.f32 %v4565_v29, %v3368_v2  ;;  %v5055_v9 = vpop.f32.mrb[37].mxu0  ;;  %v4574_v2 = vld [vmem:[%s4355_s8] ss:$0 sm:$0xff] }
0x1495   :  { %v3371_v8 = vpop.f32.mrb[38].mxu0 }
0x1496   :  { %v6403_v10 = vadd.f32 %v3369_v58, %v6188_v6  ;;  %v3372_v46 = vadd.f32 %v4565_v29, %v3371_v8  ;;  %v5056_v49 = vpop.f32.mrb[39].mxu0  ;;  %v5323_v6 = vld [vmem:[%s6414_s3] ss:$16 sps:$4 sm:$0xff]  }
0x1498   :  { %v6406_v57 = vadd.f32 %v3372_v46, %v6191_v16  ;;  %3377 = vadd.xlane.f32.xlu1 %v6403_v10  ;;  %v5325_v16 = vld [vmem:[%s6414_s3 + $0x4] ss:$16 sps:$4 sm:$0xff]   ;;  %v4575_v46 = vld [vmem:[%s4354_s12] ss:$0 sm:$0xff] }
0x1499   :  { %3634 = vmatprep.subr.bf16.mxu1 %v5325_v16 }
0x149a   :  { %v3379_v63 = vsel %vm658_vm0, %v6406_v57, 0.0  ;;  %3635 = vmatpush1.bf16.msra.mxu1 %v5323_v6 }
0x149b   :  { %3380 = vadd.xlane.f32.xlu0 %v3379_v63  ;;  %3636 = vmatprep.subr.bf16.mxu1 %v5331_v44  ;;  %v5374_v44 = vld [vmem:[%s6470_s16 + $0x80] sm:$0xff]  }
0x149e   :  { %3637 = vmatpush1.bf16.msra.mxu1 %v5329_v59  ;;  %v5373_v59 = vld [vmem:[%s6470_s16] sm:$0xff]  }
0x149f   :  { %3638 = vmatprep.subr.bf16.mxu1 %v5337_v1  ;;  %v5386_v1 = vld [vmem:[%s6470_s16 + $0x98] sm:$0xff]  }
0x14a2   :  { %3639 = vmatpush1.bf16.msra.mxu1 %v5335_v31  ;;  %v5388_v31 = vld [vmem:[%s6470_s16 + $0xe0] sm:$0xff]  }
0x14a3   :  { %3640 = vmatprep.subr.bf16.mxu1 %v5343_v15  ;;  %v5390_v15 = vld [vmem:[%s6470_s16 + $0xa0] sm:$0xff]  }
0x14a6   :  { %3641 = vmatpush1.bf16.msra.mxu1 %v5341_v37  ;;  %v5392_v37 = vld [vmem:[%s6470_s16 + $0xe8] sm:$0xff]  }
0x14a7   :  { %3642 = vmatprep.subr.bf16.mxu1 %v5349_v47  ;;  %v5394_v47 = vld [vmem:[%s6470_s16 + $0xa8] sm:$0xff]  }
0x14aa   :  { %3643 = vmatpush1.bf16.msra.mxu1 %v5347_v39  ;;  %v5396_v39 = vld [vmem:[%s6470_s16 + $0xf0] sm:$0xff]  }
0x14ab   :  { %3644 = vmatprep.subr.bf16.mxu1 %v5355_v34  ;;  %v5399_v34 = vld [vmem:[%s6470_s16 + $0x78] sm:$0xff]  }
0x14ae   :  { %3645 = vmatpush1.bf16.msra.mxu1 %v5353_v52  ;;  %v5398_v52 = vld [vmem:[%s6470_s16 + $0xb0] sm:$0xff]  }
0x14af   :  { %3646 = vmatprep.subr.bf16.mxu1 %v5361_v3  ;;  %v5402_v3 = vld [vmem:[%s6470_s16 + $0xb8] sm:$0xff]  }
0x14b2   :  { %3647 = vmatpush1.bf16.msra.mxu1 %v5359_v45  ;;  %v3457_v45 = vrot.slane %v3452_v4, %v5743_v20 }
0x14b3   :  { %3648 = vmatprep.subr.bf16.mxu1 %v5367_v35  ;;  %v3461_v35 = vrot.slane %v3452_v4, %v5749_v23 }
0x14b6   :  { %3649 = vmatpush1.bf16.msra.mxu1 %v5365_v60 }
0x14b7   :  { %4837 = vmatprep.subr.bf16.mxu1 %v5371_v14 }
0x1525   :  { %v3378_v61 = vpop.xlane.xlu1 %3377 }
0x1526   :  { %v3382_v54 = vmul.f32 0.0078125, %v3378_v61  ;;  %v5377_v61 = vld [vmem:[%s6470_s16 + $0x8] sm:$0xff]  }
0x1528   :  { %v6425_v18 = vsub.f32 %v6403_v10, %v3382_v54  ;;  %v3381_v32 = vpop.xlane.xlu0 %3380  ;;  %v5378_v54 = vld [vmem:[%s6470_s16 + $0x88] sm:$0xff]  }
0x1529   :  { %v3383_v50 = vmul.f32 0.0078125, %v3381_v32  ;;  %v5380_v32 = vld [vmem:[%s6470_s16 + $0xd0] sm:$0xff]  }
0x152a   :  { %v3386_v43 = vmul.f32 %v6425_v18, %v6425_v18 }
0x152b   :  { %v6430_v13 = vsub.f32 %v6406_v57, %v3383_v50  ;;  %v5381_v50 = vld [vmem:[%s6470_s16 + $0x10] sm:$0xff]  }
0x152c   :  { %3388 = vadd.xlane.f32.xlu0 %v3386_v43  ;;  %v5382_v43 = vld [vmem:[%s6470_s16 + $0x90] sm:$0xff]  }
0x152d   :  { %v3387_v53 = vmul.f32 %v6430_v13, %v6430_v13 }
0x152f   :  { %v3390_v51 = vsel %vm658_vm0, %v3387_v53, 0.0  ;;  %v5384_v53 = vld [vmem:[%s6470_s16 + $0xd8] sm:$0xff]  }
0x1530   :  { %3391 = vadd.xlane.f32.xlu1 %v3390_v51  ;;  %v5385_v51 = vld [vmem:[%s6470_s16 + $0x18] sm:$0xff]  }
0x15b9   :  { %v3389_v5 = vpop.xlane.xlu0 %3388 }
0x15ba   :  { %v3393_v48 = vmul.f32 0.0078125, %v3389_v5 }
0x15bc   :  { %v3395_v24 = vadd.f32 1e-06, %v3393_v48 }
0x15bd   :  { %v3392_v26 = vpop.xlane.xlu1 %3391 }
0x15be   :  { %5511 = vrsqrt.f32 %v3395_v24  ;;  %v3394_v28 = vmul.f32 0.0078125, %v3392_v26 }
0x15c0   :  { %v3396_v7 = vadd.f32 1e-06, %v3394_v28 }
0x15c2   :  { %5513 = vrsqrt.f32 %v3396_v7 }
0x15c8   :  { %v5512_v22 = vpop.eup %5511 }
0x15c9   :  { %v3399_v29 = vmul.f32 %v5512_v22, %v6425_v18  ;;  %v5379_v18 = vld [vmem:[%s6470_s16 + $0x50] sm:$0xff]  }
0x15cb   :  { %v3408_v8 = vmul.f32 %v4574_v2, %v3399_v29 }
0x15cc   :  { %v5514_v58 = vpop.eup %5513 }
0x15cd   :  { %v3400_v9 = vmul.f32 %v5514_v58, %v6430_v13  ;;  %v3417_v63 = vadd.f32 %v4575_v46, %v3408_v8  ;;  %v5383_v13 = vld [vmem:[%s6470_s16 + $0x58] sm:$0xff]  }
0x15cf   :  { %v3409_v49 = vmul.f32 %v4574_v2, %v3400_v9 }
0x15d1   :  { %v3418_v6 = vadd.f32 %v4575_v46, %v3409_v49 }
0x15d3   :  { %v3419_v16 = vpack.c.bf16 %v3418_v6, %v3417_v63 }
0x15d5   :  { %3667 = vmatmul.mubr.bf16.vlgmr.msra.gmra.mrb[52].mxu1 %v3419_v16  ;;  %3710 = vmatmul.mubr.bf16.vlgmr.msra.gmra.mrb[40].mxu0 %v3419_v16 }
0x15d6   :  { %4838 = vmatpush3.bf16.msra.mxu1 %v5373_v59  ;;  %4860 = vmatpush3.bf16.msra.mxu0 %v5374_v44 }
0x15d7   :  { %4839 = vmatprep.subr.bf16.mxu1 %v5375_v25  ;;  %4861 = vmatprep.subr.bf16.mxu0 %v5376_v62 }
0x15da   :  { %4840 = vmatpush3.bf16.msra.mxu1 %v5377_v61  ;;  %4862 = vmatpush3.bf16.msra.mxu0 %v5378_v54 }
0x15db   :  { %4841 = vmatprep.subr.bf16.mxu1 %v5379_v18  ;;  %4863 = vmatprep.subr.bf16.mxu0 %v5380_v32 }
0x15de   :  { %4842 = vmatpush3.bf16.msra.mxu1 %v5381_v50  ;;  %4864 = vmatpush3.bf16.msra.mxu0 %v5382_v43 }
0x15df   :  { %4843 = vmatprep.subr.bf16.mxu1 %v5383_v13  ;;  %4865 = vmatprep.subr.bf16.mxu0 %v5384_v53 }
0x15e2   :  { %4844 = vmatpush3.bf16.msra.mxu1 %v5385_v51  ;;  %4866 = vmatpush3.bf16.msra.mxu0 %v5386_v1 }
0x15e3   :  { %4845 = vmatprep.subr.bf16.mxu1 %v5387_v33  ;;  %4867 = vmatprep.subr.bf16.mxu0 %v5388_v31 }
0x15e6   :  { %4846 = vmatpush3.bf16.msra.mxu1 %v5389_v38  ;;  %4868 = vmatpush3.bf16.msra.mxu0 %v5390_v15 }
0x15e7   :  { %4847 = vmatprep.subr.bf16.mxu1 %v5391_v41  ;;  %4869 = vmatprep.subr.bf16.mxu0 %v5392_v37 }
0x15ea   :  { %4848 = vmatpush3.bf16.msra.mxu1 %v5393_v11  ;;  %4870 = vmatpush3.bf16.msra.mxu0 %v5394_v47 }
0x15eb   :  { %4849 = vmatprep.subr.bf16.mxu1 %v5395_v30  ;;  %4871 = vmatprep.subr.bf16.mxu0 %v5396_v39 }
0x15ee   :  { %4850 = vmatpush3.bf16.msra.mxu1 %v5397_v40  ;;  %4872 = vmatpush3.bf16.msra.mxu0 %v5398_v52 }
0x15ef   :  { %4851 = vmatprep.subr.bf16.mxu1 %v5399_v34  ;;  %4873 = vmatprep.subr.bf16.mxu0 %v5400_v42 }
0x15f2   :  { %4852 = vmatpush3.bf16.msra.mxu1 %v5401_v56  ;;  %4874 = vmatpush3.bf16.msra.mxu0 %v5402_v3 }
0x16a8   :  { %v3668_v60 = vpop.f32.mrb[52].mxu1  ;;  %v3711_v27 = vpop.f32.mrb[40].mxu0 }
0x16a9   :  { %v3669_v5 = vadd.f32 %v3668_v60, %v3457_v45  ;;  %v6512_v48 = vadd.f32 %v3711_v27, %v3465_v12  ;;  %v3670_v24 = vpop.f32.mrb[53].mxu1  ;;  %v3713_v26 = vpop.f32.mrb[41].mxu0 }
0x16aa   :  { %v6514_v28 = vadd.f32 %v3670_v24, %v3461_v35  ;;  %v6516_v7 = vadd.f32 %v3713_v26, %v3469_v55  ;;  %v3672_v22 = vpop.f32.mrb[54].mxu1  ;;  %v3715_v20 = vpop.f32.mrb[42].mxu0 }
0x16ab   :  { %v3720_v29 = vand.u32 2147483647, %v3669_v5  ;;  %v3722_v21 = vand.u32 2147483647, %v6512_v48  ;;  %v3674_v19 = vpop.f32.mrb[55].mxu1  ;;  %v3717_v14 = vpop.f32.mrb[43].mxu0  ;;  %v6521_v25 = vadd.f32 %v3672_v22, %v3457_v45  ;;  %v6523_v62 = vadd.f32 %v3715_v20, %v3465_v12 }
0x16ac   :  { %v3721_v23 = vand.u32 2147483647, %v6514_v28  ;;  %v3723_v9 = vand.u32 2147483647, %v6516_v7  ;;  %v6525_v61 = vadd.f32 %v3674_v19, %v3461_v35  ;;  %v6529_v43 = vadd.f32 %v3717_v14, %v3469_v55 }
0x16ad   :  { %v3728_v17 = vmul.f32 0.70710677, %v3720_v29  ;;  %v3730_v2 = vmul.f32 0.70710677, %v3722_v21  ;;  %v3724_v54 = vand.u32 2147483647, %v6521_v25 }
0x16ae   :  { %v3729_v58 = vmul.f32 0.70710677, %v3721_v23  ;;  %v3731_v63 = vmul.f32 0.70710677, %v3723_v9  ;;  %v3726_v18 = vand.u32 2147483647, %v6523_v62 }
0x16af   :  { %v3752_v8 = vmul.f32 0.3275911, %v3728_v17  ;;  %v3754_v46 = vmul.f32 0.3275911, %v3730_v2  ;;  %v3856_v32 = vsub.f32 0.0, %v3728_v17  ;;  %v3858_v13 = vsub.f32 0.0, %v3730_v2 }
0x16b0   :  { %v3753_v49 = vmul.f32 0.3275911, %v3729_v58  ;;  %v3755_v36 = vmul.f32 0.3275911, %v3731_v63  ;;  %v3732_v50 = vmul.f32 0.70710677, %v3724_v54 }
0x16b1   :  { %v3760_v6 = vadd.f32 1.0, %v3752_v8  ;;  %v3762_v16 = vadd.f32 1.0, %v3754_v46  ;;  %v3734_v53 = vmul.f32 0.70710677, %v3726_v18  ;;  %v3725_v51 = vand.u32 2147483647, %v6525_v61 }
0x16b2   :  { %v3761_v59 = vadd.f32 1.0, %v3753_v49  ;;  %v3763_v44 = vadd.f32 1.0, %v3755_v36  ;;  %v3756_v1 = vmul.f32 0.3275911, %v3732_v50  ;;  %vm3736_vm1 = vcmp.ge.f32.partialorder %v3669_v5, 0.0 }
0x16b3   :  { %5515 = vrcp.f32 %v3760_v6  ;;  %v3758_v33 = vmul.f32 0.3275911, %v3734_v53  ;;  %v6532_v31 = vmul.f32 0.70710677, %v3725_v51  ;;  %v3864_v15 = vmul.f32 %v3856_v32, %v3728_v17 }
0x16b4   :  { %5517 = vrcp.f32 %v3762_v16  ;;  %v3857_v41 = vsub.f32 0.0, %v3729_v58  ;;  %v3764_v37 = vadd.f32 1.0, %v3756_v1  ;;  %v3727_v11 = vand.u32 2147483647, %v6529_v43 }
0x16b5   :  { %5519 = vrcp.f32 %v3761_v59  ;;  %v3866_v39 = vmul.f32 %v3858_v13, %v3730_v2  ;;  %v3766_v40 = vadd.f32 1.0, %v3758_v33  ;;  %v3757_v52 = vmul.f32 0.3275911, %v6532_v31 }
0x16b6   :  { %5521 = vrcp.f32 %v3763_v44  ;;  %v6542_v34 = vsel %vm3736_vm1, 1.0, %v5570_v0  ;;  %v6544_v42 = vmul.f32 0.5, %v3669_v5  ;;  %v6548_v4 = vmul.f32 0.5, %v6512_v48 }
0x16b7   :  { %5523 = vrcp.f32 %v3764_v37  ;;  %v3765_v45 = vadd.f32 1.0, %v3757_v52  ;;  %v3865_v55 = vmul.f32 %v3857_v41, %v3729_v58  ;;  %v3859_v60 = vsub.f32 0.0, %v3731_v63 }
0x16b8   :  { %5525 = vrcp.f32 %v3766_v40  ;;  %v6552_v27 = vmul.f32 0.70710677, %v3727_v11  ;;  %v3872_v5 = vmul.f32 1.442695, %v3864_v15  ;;  %v3876_v26 = vmul.f32 1.442695, %v3866_v39 }
0x16b9   :  { %v3860_v21 = vsub.f32 0.0, %v3732_v50  ;;  %5527 = vrcp.f32 %v3765_v45  ;;  %v3867_v9 = vmul.f32 %v3859_v60, %v3731_v63  ;;  %v3862_v8 = vsub.f32 0.0, %v3734_v53 }
0x16ba   :  { %v3759_v23 = vmul.f32 0.3275911, %v6552_v27  ;;  %5529 = vpow2.f32 %v3872_v5  ;;  %v3874_v36 = vmul.f32 1.442695, %v3865_v55  ;;  %v3861_v1 = vsub.f32 0.0, %v6532_v31 }
0x16bb   :  { %v3868_v59 = vmul.f32 %v3860_v21, %v3732_v50  ;;  %v3878_v13 = vmul.f32 1.442695, %v3867_v9  ;;  %v3870_v51 = vmul.f32 %v3862_v8, %v3734_v53  ;;  %vm3738_vm7 = vcmp.ge.f32.partialorder %v6512_v48, 0.0 }
0x16bc   :  { %v3767_v46 = vadd.f32 1.0, %v3759_v23  ;;  %v3869_v60 = vmul.f32 %v3861_v1, %v6532_v31  ;;  %vm3737_vm8 = vcmp.ge.f32.partialorder %v6514_v28, 0.0  ;;  %vm3739_vm9 = vcmp.ge.f32.partialorder %v6516_v7, 0.0 }
0x16bd   :  { %v6534_v38 = vpop.eup %5515  ;;  %v3884_v55 = vmul.f32 1.442695, %v3870_v51  ;;  %vm3740_vm10 = vcmp.ge.f32.partialorder %v6521_v25, 0.0  ;;  %vm3742_vm11 = vcmp.ge.f32.partialorder %v6523_v62, 0.0  ;;  %vm3741_vm12 = vcmp.ge.f32.partialorder %v6525_v61, 0.0 }
0x16be   :  { %v6537_v47 = vpop.eup %5517  ;;  %v3784_v30 = vmul.f32 1.0614054, %v6534_v38  ;;  %5531 = vrcp.f32 %v3767_v46  ;;  %vm3743_vm13 = vcmp.ge.f32.partialorder %v6529_v43, 0.0 }
0x16bf   :  { %v3786_v56 = vmul.f32 1.0614054, %v6537_v47  ;;  %v6550_v12 = vpop.eup %5519  ;;  %5533 = vpow2.f32 %v3876_v26 }
0x16c0   :  { %v4608_v3 = vadd.f32 -1.4531521, %v3784_v30  ;;  %v3785_v22 = vmul.f32 1.0614054, %v6550_v12  ;;  %v6556_v20 = vpop.eup %5521  ;;  %5535 = vpow2.f32 %v3874_v36  ;;  %v3880_v30 = vmul.f32 1.442695, %v3868_v59 }
0x16c1   :  { %v4610_v35 = vadd.f32 -1.4531521, %v3786_v56  ;;  %v3787_v2 = vmul.f32 1.0614054, %v6556_v20  ;;  %v6565_v32 = vpop.eup %5523  ;;  %5537 = vpow2.f32 %v3878_v13 }
0x16c2   :  { %v3800_v24 = vmul.f32 %v6534_v38, %v4608_v3  ;;  %v4609_v17 = vadd.f32 -1.4531521, %v3785_v22  ;;  %v6568_v33 = vpop.eup %5525  ;;  %v3788_v37 = vmul.f32 1.0614054, %v6565_v32  ;;  %v3863_v22 = vsub.f32 0.0, %v6552_v27 }
0x16c3   :  { %v3802_v29 = vmul.f32 %v6537_v47, %v4610_v35  ;;  %v4611_v16 = vadd.f32 -1.4531521, %v3787_v2  ;;  %v3790_v39 = vmul.f32 1.0614054, %v6568_v33  ;;  %v6577_v3 = vpop.eup %5527  ;;  %5539 = vpow2.f32 %v3880_v30 }
0x16c4   :  { %v3808_v19 = vadd.f32 1.4214138, %v3800_v24  ;;  %v3801_v6 = vmul.f32 %v6550_v12, %v4609_v17  ;;  %v4612_v56 = vadd.f32 -1.4531521, %v3788_v37  ;;  %v3789_v23 = vmul.f32 1.0614054, %v6577_v3 }
0x16c5   :  { %v3810_v58 = vadd.f32 1.4214138, %v3802_v29  ;;  %v3803_v18 = vmul.f32 %v6556_v20, %v4611_v16  ;;  %v4614_v35 = vadd.f32 -1.4531521, %v3790_v39  ;;  %5541 = vpow2.f32 %v3884_v55 }
0x16c6   :  { %v3816_v49 = vmul.f32 %v6534_v38, %v3808_v19  ;;  %v3809_v54 = vadd.f32 1.4214138, %v3801_v6  ;;  %v3804_v26 = vmul.f32 %v6565_v32, %v4612_v56  ;;  %v5530_v19 = vpop.eup %5529  ;;  %v4613_v46 = vadd.f32 -1.4531521, %v3789_v23 }
0x16c7   :  { %v3818_v14 = vmul.f32 %v6537_v47, %v3810_v58  ;;  %v3811_v50 = vadd.f32 1.4214138, %v3803_v18  ;;  %v3806_v21 = vmul.f32 %v6568_v33, %v4614_v35  ;;  %v3882_v6 = vmul.f32 1.442695, %v3869_v60 }
0x16c8   :  { %v4616_v44 = vadd.f32 -0.28449672, %v3816_v49  ;;  %v3817_v41 = vmul.f32 %v6550_v12, %v3809_v54  ;;  %v3812_v58 = vadd.f32 1.4214138, %v3804_v26  ;;  %v6588_v9 = vpop.eup %5531  ;;  %v3871_v16 = vmul.f32 %v3863_v22, %v6552_v27 }
0x16c9   :  { %v4618_v63 = vadd.f32 -0.28449672, %v3818_v14  ;;  %v3819_v52 = vmul.f32 %v6556_v20, %v3811_v50  ;;  %v3814_v8 = vadd.f32 1.4214138, %v3806_v21  ;;  %v3805_v36 = vmul.f32 %v6577_v3, %v4613_v46 }
0x16ca   :  { %v3832_v15 = vmul.f32 %v6534_v38, %v4616_v44  ;;  %v4617_v40 = vadd.f32 -0.28449672, %v3817_v41  ;;  %v3820_v49 = vmul.f32 %v6565_v32, %v3812_v58  ;;  %v3791_v59 = vmul.f32 1.0614054, %v6588_v9 }
0x16cb   :  { %v3834_v11 = vmul.f32 %v6537_v47, %v4618_v63  ;;  %v4619_v5 = vadd.f32 -0.28449672, %v3819_v52  ;;  %v3813_v1 = vadd.f32 1.4214138, %v3805_v36  ;;  %v3746_v27 = vsel %vm3738_vm7, 1.0, %v5570_v0 }
0x16cc   :  { %v3840_v53 = vadd.f32 0.2548296, %v3832_v15  ;;  %v3833_v24 = vmul.f32 %v6550_v12, %v4617_v40  ;;  %v4620_v63 = vadd.f32 -0.28449672, %v3820_v49  ;;  %v4615_v15 = vadd.f32 -1.4531521, %v3791_v59 }
0x16cd   :  { %v3842_v45 = vadd.f32 0.2548296, %v3834_v11  ;;  %v3835_v31 = vmul.f32 %v6556_v20, %v4619_v5  ;;  %5543 = vpow2.f32 %v3882_v6  ;;  %v3886_v50 = vmul.f32 1.442695, %v3871_v16 }
0x16ce   :  { %v3848_v29 = vmul.f32 %v6534_v38, %v3840_v53  ;;  %v3841_v2 = vadd.f32 0.2548296, %v3833_v24  ;;  %v5534_v38 = vpop.eup %5533  ;;  %v3836_v41 = vmul.f32 %v6565_v32, %v4620_v63  ;;  %v3745_v37 = vsel %vm3737_vm8, 1.0, %v5570_v0 }
0x16cf   :  { %v3850_v17 = vmul.f32 %v6537_v47, %v3842_v45  ;;  %v3822_v47 = vmul.f32 %v6568_v33, %v3814_v8  ;;  %v3843_v18 = vadd.f32 0.2548296, %v3835_v31  ;;  %v5536_v13 = vpop.eup %5535  ;;  %v3821_v11 = vmul.f32 %v6577_v3, %v3813_v1 }
0x16d0   :  { %v3888_v14 = vmul.f32 %v5530_v19, %v3848_v29  ;;  %v3849_v54 = vmul.f32 %v6550_v12, %v3841_v2  ;;  %v3807_v30 = vmul.f32 %v6588_v9, %v4615_v15  ;;  %v3844_v52 = vadd.f32 0.2548296, %v3836_v41  ;;  %v5538_v48 = vpop.eup %5537 }
0x16d1   :  { %v3890_v44 = vmul.f32 %v5534_v38, %v3850_v17  ;;  %v4622_v51 = vadd.f32 -0.28449672, %v3822_v47  ;;  %v3851_v56 = vmul.f32 %v6556_v20, %v3843_v18  ;;  %v4621_v35 = vadd.f32 -0.28449672, %v3821_v11  ;;  %v5540_v24 = vpop.eup %5539 }
0x16d2   :  { %v3896_v39 = vsub.f32 1.0, %v3888_v14  ;;  %v3889_v40 = vmul.f32 %v5536_v13, %v3849_v54  ;;  %v3815_v55 = vadd.f32 1.4214138, %v3807_v30  ;;  %v3852_v60 = vmul.f32 %v6565_v32, %v3844_v52  ;;  %v5542_v20 = vpop.eup %5541 }
0x16d3   :  { %v3838_v12 = vmul.f32 %v6568_v33, %v4622_v51  ;;  %v3898_v53 = vsub.f32 1.0, %v3890_v44  ;;  %5545 = vpow2.f32 %v3886_v50  ;;  %v3837_v26 = vmul.f32 %v6577_v3, %v4621_v35 }
0x16d4   :  { %v3823_v22 = vmul.f32 %v6588_v9, %v3815_v55  ;;  %v3904_v29 = vmul.f32 %v3896_v39, %v6542_v34  ;;  %v3897_v23 = vsub.f32 1.0, %v3889_v40  ;;  %v3892_v19 = vmul.f32 %v5540_v24, %v3852_v60 }
0x16d5   :  { %v3846_v45 = vadd.f32 0.2548296, %v3838_v12  ;;  %v3906_v21 = vmul.f32 %v3898_v53, %v3746_v27  ;;  %v3891_v17 = vmul.f32 %v5538_v48, %v3851_v56  ;;  %v3845_v31 = vadd.f32 0.2548296, %v3837_v26 }
0x16d6   :  { %v4623_v32 = vadd.f32 -0.28449672, %v3823_v22  ;;  %v3747_v58 = vsel %vm3739_vm9, 1.0, %v5570_v0  ;;  %v3900_v8 = vsub.f32 1.0, %v3892_v19  ;;  %v3750_v34 = vsel %vm3742_vm11, 1.0, %v5570_v0 }
0x16d7   :  { %v3854_v5 = vmul.f32 %v6568_v33, %v3846_v45  ;;  %v3748_v33 = vsel %vm3740_vm10, 1.0, %v5570_v0  ;;  %v3853_v38 = vmul.f32 %v6577_v3, %v3845_v31  ;;  %v5544_v6 = vpop.eup %5543  ;;  %v3920_v16 = vadd.f32 1.0, %v3904_v29 }
0x16d8   :  { %v3839_v49 = vmul.f32 %v6588_v9, %v4623_v32  ;;  %v3922_v14 = vadd.f32 1.0, %v3906_v21  ;;  %v3905_v47 = vmul.f32 %v3897_v23, %v3745_v37  ;;  %v3908_v36 = vmul.f32 %v3900_v8, %v3748_v33 }
0x16d9   :  { %v3894_v2 = vmul.f32 %v5542_v20, %v3854_v5  ;;  %v3899_v59 = vsub.f32 1.0, %v3891_v17  ;;  %v3893_v54 = vmul.f32 %v5544_v6, %v3853_v38  ;;  %v3916_v63 = vmul.f32 0.5, %v6521_v25  ;;  %v4624_v20 = vld [vmem:[%s4350_s23] ss:$0 sm:$0xff] }
0x16da   :  { %v3847_v18 = vadd.f32 0.2548296, %v3839_v49  ;;  %v3924_v13 = vadd.f32 1.0, %v3908_v36  ;;  %v3918_v51 = vmul.f32 0.5, %v6523_v62  ;;  %v3749_v1 = vsel %vm3741_vm12, 1.0, %v5570_v0 }
0x16db   :  { %v3902_v46 = vsub.f32 1.0, %v3894_v2  ;;  %v3901_v3 = vsub.f32 1.0, %v3893_v54  ;;  %v3928_v50 = vmul.f32 %v3920_v16, %v6544_v42  ;;  %v3930_v37 = vmul.f32 %v3922_v14, %v6548_v4 }
0x16dc   :  { %v3855_v27 = vmul.f32 %v6588_v9, %v3847_v18  ;;  %v3921_v12 = vadd.f32 1.0, %v3905_v47  ;;  %v3932_v11 = vmul.f32 %v3924_v13, %v3916_v63  ;;  %v3907_v30 = vmul.f32 %v3899_v59, %v3747_v58 }
0x16dd   :  { %v3910_v44 = vmul.f32 %v3902_v46, %v3750_v34  ;;  %v5546_v41 = vpop.eup %5545  ;;  %v3909_v39 = vmul.f32 %v3901_v3, %v3749_v1  ;;  %v3913_v62 = vmul.f32 0.5, %v6514_v28  ;;  %v3917_v52 = vmul.f32 0.5, %v6525_v61 }
0x16de   :  { %v3895_v53 = vmul.f32 %v5546_v41, %v3855_v27  ;;  %v3936_v40 = vpack.c.bf16 %v3932_v11, %v3928_v50  ;;  %v3751_v42 = vsel %vm3743_vm13, 1.0, %v5570_v0  ;;  %v3923_v9 = vadd.f32 1.0, %v3907_v30  ;;  %v4657_v27 = vld [vmem:[%s4359_s27] ss:$0 sm:$0xff] }
0x16df   :  { %v3926_v15 = vadd.f32 1.0, %v3910_v44  ;;  %v3925_v48 = vadd.f32 1.0, %v3909_v39  ;;  %v3929_v35 = vmul.f32 %v3921_v12, %v3913_v62  ;;  %v3915_v60 = vmul.f32 0.5, %v6516_v7  ;;  %v4658_v50 = vld [vmem:[%s4358_s1] ss:$0 sm:$0xff] }
0x16e0   :  { %v3903_v56 = vsub.f32 1.0, %v3895_v53  ;;  %v3919_v24 = vmul.f32 0.5, %v6529_v43 }
0x16e1   :  { %v3934_v25 = vmul.f32 %v3926_v15, %v3918_v51  ;;  %v3933_v55 = vmul.f32 %v3925_v48, %v3917_v52  ;;  %v3931_v26 = vmul.f32 %v3923_v9, %v3915_v60 }
0x16e2   :  { %v3911_v4 = vmul.f32 %v3903_v56, %v3751_v42 }
0x16e3   :  { %v3938_v45 = vpack.c.bf16 %v3934_v25, %v3930_v37  ;;  %v3937_v28 = vpack.c.bf16 %v3933_v55, %v3929_v35 }
0x16e4   :  { %v3927_v5 = vadd.f32 1.0, %v3911_v4 }
0x16e5   :  { %4235 = vmatprep.mubr.bf16.mxu1 %v3937_v28 }
0x16e6   :  { %v3935_v61 = vmul.f32 %v3927_v5, %v3919_v24  ;;  %4236 = vmatmul.mubr.bf16.vlgmr.msra.gmra.mrb[56].mxu1 %v3936_v40 }
0x16e8   :  { %v3939_v22 = vpack.c.bf16 %v3935_v61, %v3931_v26 }
0x16ea   :  { %4276 = vmatprep.mubr.bf16.mxu0 %v3939_v22 }
0x16eb   :  { %4277 = vmatmul.mubr.bf16.vlgmr.msra.gmra.mrb[44].mxu0 %v3938_v45 }
0x17b9   :  { %v4853_v0 = vpop.f32.mrb[56].mxu1 }
0x17ba   :  { %v4854_v29 = vpop.f32.mrb[57].mxu1 }
0x17bb   :  { %v4855_v7 = vadd.f32 %v4854_v29, %v4853_v0  ;;  %v4856_v21 = vpop.f32.mrb[58].mxu1 }
0x17bc   :  { %v4857_v43 = vpop.f32.mrb[59].mxu1 }
0x17bd   :  { %v4238_v19 = vadd.f32 %v4855_v7, %v4624_v20  ;;  %v4858_v17 = vadd.f32 %v4857_v43, %v4856_v21 }
0x17be   :  { %v4875_v23 = vpop.f32.mrb[44].mxu0 }
0x17bf   :  { %v4876_v2 = vpop.f32.mrb[45].mxu0  ;;  %v4241_v58 = vadd.f32 %v4858_v17, %v4624_v20 }
0x17c0   :  { %v4877_v31 = vadd.f32 %v4876_v2, %v4875_v23  ;;  %v4878_v32 = vpop.f32.mrb[46].mxu0 }
0x17c1   :  { %v4879_v33 = vpop.f32.mrb[47].mxu0 }
0x17c2   :  { %v4279_v8 = vadd.f32 %v4877_v31, %v4238_v19  ;;  %v4880_v34 = vadd.f32 %v4879_v33, %v4878_v32 }
0x17c4   :  { %v4282_v46 = vadd.f32 %v4880_v34, %v4241_v58  ;;  %v4285_v38 = vadd.f32 %v4279_v8, %v6403_v10 }
0x17c6   :  { %4287 = vadd.xlane.f32.xlu1 %v4285_v38  ;;  %v4286_v49 = vadd.f32 %v4282_v46, %v6406_v57 }
0x17c8   :  { %v4289_v6 = vsel %vm658_vm0, %v4286_v49, 0.0 }
0x17c9   :  { %4290 = vadd.xlane.f32.xlu0 %v4289_v6 }
0x1853   :  { %v4288_v16 = vpop.xlane.xlu1 %4287 }
0x1854   :  { %v4292_v14 = vmul.f32 0.0078125, %v4288_v16 }
0x1856   :  { %v4294_v47 = vsub.f32 %v4285_v38, %v4292_v14  ;;  %v4291_v36 = vpop.xlane.xlu0 %4290 }
0x1857   :  { %v4293_v59 = vmul.f32 0.0078125, %v4291_v36 }
0x1858   :  { %v4296_v44 = vmul.f32 %v4294_v47, %v4294_v47 }
0x1859   :  { %v4295_v54 = vsub.f32 %v4286_v49, %v4293_v59 }
0x185a   :  { %4298 = vadd.xlane.f32.xlu0 %v4296_v44 }
0x185b   :  { %v4297_v18 = vmul.f32 %v4295_v54, %v4295_v54 }
0x185d   :  { %v4300_v63 = vsel %vm658_vm0, %v4297_v18, 0.0 }
0x185e   :  { %4301 = vadd.xlane.f32.xlu1 %v4300_v63 }
0x18e7   :  { %v4299_v13 = vpop.xlane.xlu0 %4298 }
0x18e8   :  { %v4303_v10 = vmul.f32 0.0078125, %v4299_v13 }
0x18ea   :  { %v4305_v51 = vadd.f32 1e-06, %v4303_v10 }
0x18eb   :  { %v4302_v1 = vpop.xlane.xlu1 %4301 }
0x18ec   :  { %5547 = vrsqrt.f32 %v4305_v51  ;;  %v4304_v57 = vmul.f32 0.0078125, %v4302_v1 }
0x18ee   :  { %v4306_v15 = vadd.f32 1e-06, %v4304_v57 }
0x18f0   :  { %5549 = vrsqrt.f32 %v4306_v15 }
0x18f6   :  { %v5548_v3 = vpop.eup %5547 }
0x18f7   :  { %v4309_v41 = vmul.f32 %v5548_v3, %v4294_v47 }
0x18f9   :  { %v4318_v37 = vmul.f32 %v4657_v27, %v4309_v41 }
0x18fa   :  { %v5550_v12 = vpop.eup %5549 }
0x18fb   :  { %v4327_v11 = vadd.f32 %v4658_v50, %v4318_v37  ;;  %v4310_v30 = vmul.f32 %v5550_v12, %v4295_v54 }
0x18fd   :  { %4329 = vst [vmem:[%s4364_s6] sm:$0xff] %v4327_v11  ;;  %v4319_v25 = vmul.f32 %v4657_v27, %v4310_v30 }
0x18ff   :  { %v4328_v39 = vadd.f32 %v4658_v50, %v4319_v25 }
0x1901   :  { %4330 = vst [vmem:[%s4364_s6 + $0x8] sm:$0x3] %v4328_v39 }

// kernel: cat_forward.3
= control target key start
LH: loop header
LB: loop body
LE: loop exit
PB: predicated region body
PF: predicated region fallthrough
CT: control target
= control target key end

     0   :  { %s6590_s6 = smov 1   ;;  %s6591_s10 = smov 2   ;;  %s7832_s0 = inlined_call_operand.smem [shape: u32[53], index: -1, kind: input, shape index: {}] }
   0x1   :  { %s6657_s5 = sld [smem:[%s7832_s0]]   ;;  %s6592_s14 = smov 3  }
   0x2   :  { %s6662_s9 = sld [smem:[%s7832_s0 + %s6590_s6]]   ;;  %s6593_s18 = smov 4  }
   0x3   :  { %s6667_s13 = sld [smem:[%s7832_s0 + %s6591_s10]]   ;;  %s6594_s22 = smov 5  }
   0x4   :  { %s6672_s17 = sld [smem:[%s7832_s0 + %s6592_s14]]   ;;  %s6595_s26 = smov 6  }
   0x5   :  { %s6677_s21 = sld [smem:[%s7832_s0 + %s6593_s18]]   ;;  %s6596_s30 = smov 7  }
   0x6   :  { %s6682_s25 = sld [smem:[%s7832_s0 + %s6594_s22]]   ;;  %s6597_s4 = smov 8  }
   0x7   :  { %7845 = sst [smem:[#allocation5_spill]] %s6657_s5  ;;  %s6598_s10 = smov 9  }
   0x8   :  { %s6687_s29 = sld [smem:[%s7832_s0 + %s6595_s26]]   ;;  %s6599_s15 = smov 10  }
   0x9   :  { %7846 = sst [smem:[#allocation6_spill]] %s6667_s13  ;;  %s6600_s20 = smov 11  }
   0xa   :  { %7847 = sst [smem:[#allocation7_spill]] %s6672_s17  ;;  %s6601_s26 = smov 12  }
   0xb   :  { %7848 = sst [smem:[#allocation8_spill]] %s6677_s21  ;;  %s6602_s1 = smov 13  }
   0xc   :  { %s6692_s3 = sld [smem:[%s7832_s0 + %s6596_s30]]   ;;  %s6603_s7 = smov 14  }
   0xd   :  { %s6697_s8 = sld [smem:[%s7832_s0 + %s6597_s4]]   ;;  %s6605_s22 = smov 16  }
   0xe   :  { %7849 = sst [smem:[#allocation9_spill]] %s6687_s29  ;;  %s6606_s28 = smov 17  }
   0xf   :  { %s6702_s14 = sld [smem:[%s7832_s0 + %s6598_s10]]   ;;  %s6641_s23 = smov 52  }
  0x10   :  { %s6707_s19 = sld [smem:[%s7832_s0 + %s6599_s15]]   ;;  %s6604_s15 = smov 15  }
  0x11   :  { %s6712_s24 = sld [smem:[%s7832_s0 + %s6600_s20]]  }
  0x12   :  { %s6717_s30 = sld [smem:[%s7832_s0 + %s6601_s26]]  }
  0x13   :  { %7850 = sst [smem:[#allocation10_spill]] %s6697_s8 }
  0x14   :  { %s6722_s6 = sld [smem:[%s7832_s0 + %s6602_s1]]  }
  0x15   :  { %7851 = sst [smem:[#allocation11_spill]] %s6702_s14 }
  0x16   :  { %7852 = sst [smem:[#allocation12_spill]] %s6707_s19 }
  0x17   :  { %7853 = sst [smem:[#allocation13_spill]] %s6712_s24 }
  0x18   :  { %s6727_s12 = sld [smem:[%s7832_s0 + %s6603_s7]]   ;;  %s6607_s7 = smov 18  }
  0x19   :  { %s6732_s20 = sld [smem:[%s7832_s0 + %s6604_s15]]   ;;  %s6608_s15 = smov 19  }
  0x1a   :  { %s6737_s27 = sld [smem:[%s7832_s0 + %s6605_s22]]   ;;  %s6609_s22 = smov 20  }
  0x1b   :  { %s6742_s4 = sld [smem:[%s7832_s0 + %s6606_s28]]   ;;  %s6610_s28 = smov 21  }
  0x1c   :  { %s6747_s19 = sld [smem:[%s7832_s0 + %s6607_s7]]   ;;  %s6611_s7 = smov 22  }
  0x1d   :  { %s6752_s8 = sld [smem:[%s7832_s0 + %s6608_s15]]   ;;  %s6612_s15 = smov 23  }
  0x1e   :  { %7854 = sst [smem:[#allocation14_spill]] %s6727_s12 }
  0x1f   :  { %7855 = sst [smem:[#allocation15_spill]] %s6732_s20 }
  0x20   :  { %7856 = sst [smem:[#allocation16_spill]] %s6737_s27 }
  0x21   :  { %7857 = sst [smem:[#allocation17_spill]] %s6742_s4 }
  0x22   :  { %s6757_s27 = sld [smem:[%s7832_s0 + %s6609_s22]]   ;;  %s6613_s22 = smov 24  }
  0x23   :  { %s6762_s4 = sld [smem:[%s7832_s0 + %s6610_s28]]   ;;  %s6614_s28 = smov 25  }
  0x24   :  { %s6767_s24 = sld [smem:[%s7832_s0 + %s6611_s7]]   ;;  %s6615_s7 = smov 26  }
  0x25   :  { %s6772_s12 = sld [smem:[%s7832_s0 + %s6612_s15]]   ;;  %s6616_s15 = smov 27  }
  0x26   :  { %s6777_s20 = sld [smem:[%s7832_s0 + %s6613_s22]]   ;;  %s6617_s22 = smov 28  }
  0x27   :  { %s6782_s14 = sld [smem:[%s7832_s0 + %s6614_s28]]   ;;  %s6618_s28 = smov 29  }
  0x28   :  { %s6915_s13 = sld [smem:[%s7832_s0 + %s6641_s23]]  }
  0x2a   :  { %7858 = sst [smem:[#allocation18_spill]] %s6767_s24 }
  0x2b   :  { %7859 = sst [smem:[#allocation19_spill]] %s6772_s12 }
  0x2c   :  { %7860 = sst [smem:[#allocation20_spill]] %s6777_s20 }
  0x2d   :  { %7861 = sst [smem:[#allocation21_spill]] %s6782_s14 }
  0x2e   :  { %s6787_s24 = sld [smem:[%s7832_s0 + %s6615_s7]]   ;;  %s6619_s7 = smov 30  }
  0x2f   :  { %s6792_s12 = sld [smem:[%s7832_s0 + %s6616_s15]]   ;;  %s6620_s15 = smov 31  }
  0x30   :  { %s6797_s20 = sld [smem:[%s7832_s0 + %s6617_s22]]   ;;  %s6621_s22 = smov 32  }
  0x31   :  { %s6802_s14 = sld [smem:[%s7832_s0 + %s6618_s28]]   ;;  %s6622_s28 = smov 33  }
  0x34   :  { %7862 = sst [smem:[#allocation22_spill]] %s6787_s24 }
  0x35   :  { %7863 = sst [smem:[#allocation23_spill]] %s6792_s12 }
  0x36   :  { %7864 = sst [smem:[#allocation24_spill]] %s6797_s20 }
  0x37   :  { %7865 = sst [smem:[#allocation25_spill]] %s6802_s14 }
  0x38   :  { %s6807_s24 = sld [smem:[%s7832_s0 + %s6619_s7]]   ;;  %s6623_s7 = smov 34  }
  0x39   :  { %s6812_s12 = sld [smem:[%s7832_s0 + %s6620_s15]]   ;;  %s6624_s15 = smov 35  }
  0x3a   :  { %s6817_s20 = sld [smem:[%s7832_s0 + %s6621_s22]]   ;;  %s6625_s22 = smov 36  }
  0x3b   :  { %s6822_s14 = sld [smem:[%s7832_s0 + %s6622_s28]]   ;;  %s6626_s28 = smov 37  }
  0x3e   :  { %7866 = sst [smem:[#allocation26_spill]] %s6807_s24 }
  0x3f   :  { %7867 = sst [smem:[#allocation27_spill]] %s6812_s12 }
  0x40   :  { %7868 = sst [smem:[#allocation28_spill]] %s6817_s20 }
  0x41   :  { %7869 = sst [smem:[#allocation29_spill]] %s6822_s14 }
  0x42   :  { %s6827_s24 = sld [smem:[%s7832_s0 + %s6623_s7]]   ;;  %s6627_s7 = smov 38  }
  0x43   :  { %s6832_s12 = sld [smem:[%s7832_s0 + %s6624_s15]]   ;;  %s6628_s15 = smov 39  }
  0x44   :  { %s6837_s20 = sld [smem:[%s7832_s0 + %s6625_s22]]   ;;  %s6629_s22 = smov 40  }
  0x45   :  { %s6842_s14 = sld [smem:[%s7832_s0 + %s6626_s28]]   ;;  %s6630_s28 = smov 41  }
  0x48   :  { %7870 = sst [smem:[#allocation30_spill]] %s6827_s24 }
  0x49   :  { %7871 = sst [smem:[#allocation31_spill]] %s6832_s12 }
  0x4a   :  { %7872 = sst [smem:[#allocation32_spill]] %s6837_s20 }
  0x4b   :  { %7873 = sst [smem:[#allocation33_spill]] %s6842_s14 }
  0x4c   :  { %s6847_s24 = sld [smem:[%s7832_s0 + %s6627_s7]]   ;;  %s6631_s7 = smov 42  }
  0x4d   :  { %s6852_s12 = sld [smem:[%s7832_s0 + %s6628_s15]]   ;;  %s6632_s15 = smov 43  }
  0x4e   :  { %s6857_s20 = sld [smem:[%s7832_s0 + %s6629_s22]]   ;;  %s6633_s22 = smov 44  }
  0x4f   :  { %s6862_s14 = sld [smem:[%s7832_s0 + %s6630_s28]]   ;;  %s6634_s28 = smov 45  }
  0x52   :  { %7874 = sst [smem:[#allocation34_spill]] %s6847_s24 }
  0x53   :  { %7875 = sst [smem:[#allocation35_spill]] %s6852_s12 }
  0x54   :  { %7876 = sst [smem:[#allocation36_spill]] %s6857_s20 }
  0x55   :  { %7877 = sst [smem:[#allocation37_spill]] %s6862_s14 }
  0x56   :  { %s6867_s24 = sld [smem:[%s7832_s0 + %s6631_s7]]   ;;  %s6635_s7 = smov 46  }
  0x57   :  { %s6872_s12 = sld [smem:[%s7832_s0 + %s6632_s15]]   ;;  %s6636_s15 = smov 47  }
  0x58   :  { %s6877_s20 = sld [smem:[%s7832_s0 + %s6633_s22]]   ;;  %s6637_s22 = smov 48  }
  0x59   :  { %s6882_s14 = sld [smem:[%s7832_s0 + %s6634_s28]]   ;;  %s6638_s28 = smov 49  }
  0x5a   :  { %s6887_s17 = sld [smem:[%s7832_s0 + %s6635_s7]]   ;;  %s6639_s7 = smov 50  }
  0x5b   :  { %s6902_s29 = sld [smem:[%s7832_s0 + %s6638_s28]]  }
  0x5c   :  { %s6907_s5 = sld [smem:[%s7832_s0 + %s6639_s7]]  }
  0x5d   :  { %7878 = sst [smem:[#allocation38_spill]] %s6872_s12 }
  0x5e   :  { %7879 = sst [smem:[#allocation39_spill]] %s6877_s20 }
  0x5f   :  { %s6892_s12 = sld [smem:[%s7832_s0 + %s6636_s15]]   ;;  %s6640_s15 = smov 51  }
  0x60   :  { %s6897_s20 = sld [smem:[%s7832_s0 + %s6637_s22]]  }
  0x61   :  { %s5136_s21 = sld [smem:[%s7832_s0 + %s6640_s15]]  }
  0x62   :  { %v6112_v0 = vld [vmem:[%s6902_s29] sm:$0xff]   ;;  %v6642_v1 = vmov 0.0   ;;  %v6113_v2 = vld [vmem:[%s6902_s29 + $0x8] sm:$0xff]   ;;  %vm6643_vm0 = vmmov 0   ;;  %v6114_v3 = vld [vmem:[%s6902_s29 + $0x10] sm:$0xff]   ;;  %vm357_vm1 = vcmask 261120  }
  0x63   :  { %5605 = vmatprep.subr.bf16.mxu0 %v6642_v1  ;;  %5625 = vmatprep.subr.bf16.mxu1 %v6642_v1  ;;  %v6115_v6 = vld [vmem:[%s6902_s29 + $0x18] sm:$0xff]   ;;  %v6122_v10 = vld [vmem:[%s6762_s4] ss:$12 sps:$4 sm:$0xff]   ;;  %v6124_v11 = vld [vmem:[%s6762_s4 + $0x4] ss:$12 sps:$4 sm:$0xff]  }
  0x64   :  { %5606 = vmatpush3.bf16.msra.mxu0 %v6112_v0  ;;  %5629 = vmatprep.mubr.msk.bf16.mxu1 %vm6643_vm0, %v6642_v1  ;;  %v6116_v12 = vld [vmem:[%s6902_s29 + $0x20] sm:$0xff]   ;;  %v6128_v13 = vld [vmem:[%s6762_s4 + $0x1c] ss:$12 sps:$4 sm:$0xff]   ;;  %v6119_v17 = vld [vmem:[%s6902_s29 + $0x30] sm:$0xff]  }
  0x65   :  { %5607 = vmatprep.subr.bf16.mxu0 %v6642_v1  ;;  %5621 = vmatprep.mubr.msk.bf16.mxu0 %vm6643_vm0, %v6642_v1  ;;  %v331_v7 = vld [vmem:[%s6892_s12] sm:$0xff]  ;;  %v332_v8 = vld [vmem:[%s6892_s12 + $0x8] sm:$0xff]  ;;  %v6130_v18 = vld [vmem:[%s6762_s4 + $0x30] ss:$12 sps:$4 sm:$0xff]  }
  0x66   :  { %v333_v9 = vpack.c.bf16 %v332_v8, %v331_v7  ;;  %v6126_v14 = vld [vmem:[%s6762_s4 + $0x18] ss:$12 sps:$4 sm:$0xff]   ;;  %v6132_v15 = vld [vmem:[%s6762_s4 + $0x34] ss:$12 sps:$4 sm:$0xff]   ;;  %v6117_v16 = vld [vmem:[%s6902_s29 + $0x28] sm:$0xff]  }
  0x67   :  { %v6118_v4 = vld [vmem:[%s5136_s21] sm:$0xff]   ;;  %v6120_v5 = vld [vmem:[%s5136_s21 + $0x8] sm:$0xff]   ;;  %v6121_v21 = vld [vmem:[%s6902_s29 + $0x38] sm:$0xff]  }
  0x68   :  { %5608 = vmatpush3.bf16.msra.mxu0 %v6113_v2  ;;  %5626 = vmatpush3.bf16.msra.mxu1 %v6118_v4  ;;  %v6136_v19 = vld [vmem:[%s6762_s4 + $0x4c] ss:$12 sps:$4 sm:$0xff]   ;;  %v6134_v20 = vld [vmem:[%s6762_s4 + $0x48] ss:$12 sps:$4 sm:$0xff]   ;;  %v216_v22 = vld [vmem:[%s6662_s9] sm:$0xff] }
  0x69   :  { %5609 = vmatprep.subr.bf16.mxu0 %v6642_v1  ;;  %5627 = vmatprep.subr.bf16.mxu1 %v6642_v1  ;;  %v217_v23 = vld [vmem:[%s6662_s9 + $0x8] sm:$0xff]  ;;  %v6133_v27 = vld [vmem:[%s6762_s4 + $0x38] ss:$12 sps:$4 sm:$0xff]   ;;  %v6137_v28 = vld [vmem:[%s6762_s4 + $0x50] ss:$12 sps:$4 sm:$0xff]  }
  0x6a   :  { %v6125_v24 = vld [vmem:[%s6762_s4 + $0x8] ss:$12 sps:$4 sm:$0xff]   ;;  %v218_v25 = vpack.c.bf16 %v217_v23, %v216_v22  ;;  %v6129_v26 = vld [vmem:[%s6762_s4 + $0x20] ss:$12 sps:$4 sm:$0xff]   ;;  %v6140_v30 = vld [vmem:[%s6762_s4 + $0x64] ss:$12 sps:$4 sm:$0xff]  }
  0x6b   :  { %v6138_v29 = vld [vmem:[%s6762_s4 + $0x60] ss:$12 sps:$4 sm:$0xff]   ;;  %v6141_v31 = vld [vmem:[%s6762_s4 + $0x68] ss:$12 sps:$4 sm:$0xff]   ;;  %v6142_v33 = vld [vmem:[%s6762_s4 + $0x78] ss:$12 sps:$4 sm:$0xff]  }
  0x6c   :  { %5610 = vmatpush3.bf16.msra.mxu0 %v6114_v3  ;;  %5628 = vmatpush3.bf16.msra.mxu1 %v6120_v5  ;;  %v6144_v32 = vld [vmem:[%s6762_s4 + $0x7c] ss:$12 sps:$4 sm:$0xff]   ;;  %v6145_v34 = vld [vmem:[%s6762_s4 + $0x80] ss:$12 sps:$4 sm:$0xff]  }
  0x6d   :  { %5611 = vmatprep.subr.bf16.mxu0 %v6642_v1  ;;  %593 = vmatprep.subr.bf16.mxu1 %v6124_v11  ;;  %v6148_v35 = vld [vmem:[%s6762_s4 + $0x94] ss:$12 sps:$4 sm:$0xff]  }
  0x6f   :  { %5630 = vmatmul.mubr.msk.bf16.vlgmr.msra.gmra.mrb[0].mxu1 %vm357_vm1, %v333_v9 }
  0x70   :  { %5612 = vmatpush3.bf16.msra.mxu0 %v6115_v6  ;;  %594 = vmatpush1.bf16.msra.mxu1 %v6122_v10 }
  0x71   :  { %5613 = vmatprep.subr.bf16.mxu0 %v6642_v1  ;;  %595 = vmatprep.subr.bf16.mxu1 %v6128_v13 }
  0x74   :  { %5614 = vmatpush3.bf16.msra.mxu0 %v6116_v12  ;;  %596 = vmatpush1.bf16.msra.mxu1 %v6126_v14 }
  0x75   :  { %5615 = vmatprep.subr.bf16.mxu0 %v6642_v1  ;;  %597 = vmatprep.subr.bf16.mxu1 %v6132_v15 }
  0x78   :  { %5616 = vmatpush3.bf16.msra.mxu0 %v6117_v16  ;;  %598 = vmatpush1.bf16.msra.mxu1 %v6130_v18 }
  0x79   :  { %5617 = vmatprep.subr.bf16.mxu0 %v6642_v1  ;;  %599 = vmatprep.subr.bf16.mxu1 %v6136_v19 }
  0x7c   :  { %5618 = vmatpush3.bf16.msra.mxu0 %v6119_v17  ;;  %600 = vmatpush1.bf16.msra.mxu1 %v6134_v20 }
  0x7d   :  { %5619 = vmatprep.subr.bf16.mxu0 %v6642_v1  ;;  %601 = vmatprep.subr.bf16.mxu1 %v6140_v30 }
  0x80   :  { %5620 = vmatpush3.bf16.msra.mxu0 %v6121_v21  ;;  %602 = vmatpush1.bf16.msra.mxu1 %v6138_v29 }
  0x81   :  { %5633 = vmatprep.subr.bf16.mxu0 %v6642_v1  ;;  %603 = vmatprep.subr.bf16.mxu1 %v6144_v32 }
  0x83   :  { %5622 = vmatmul.mubr.bf16.vlgmr.msra.gmra.mrb[0].mxu0 %v218_v25 }
  0x84   :  { %5634 = vmatpush3.bf16.msra.mxu0 %v6125_v24  ;;  %5649 = vmatprep.mubr.msk.bf16.mxu0 %vm6643_vm0, %v6642_v1 }
  0x85   :  { %5635 = vmatprep.subr.bf16.mxu0 %v6642_v1  ;;  %604 = vmatpush1.bf16.msra.mxu1 %v6142_v33 }
  0x88   :  { %5636 = vmatpush3.bf16.msra.mxu0 %v6129_v26 }
  0x89   :  { %5637 = vmatprep.subr.bf16.mxu0 %v6642_v1 }
  0x8c   :  { %5638 = vmatpush3.bf16.msra.mxu0 %v6133_v27 }
  0x8d   :  { %5639 = vmatprep.subr.bf16.mxu0 %v6642_v1 }
  0x90   :  { %5640 = vmatpush3.bf16.msra.mxu0 %v6137_v28 }
  0x91   :  { %5641 = vmatprep.subr.bf16.mxu0 %v6642_v1 }
  0x94   :  { %5642 = vmatpush3.bf16.msra.mxu0 %v6141_v31 }
  0x95   :  { %5643 = vmatprep.subr.bf16.mxu0 %v6642_v1 }
  0x98   :  { %5644 = vmatpush3.bf16.msra.mxu0 %v6145_v34 }
  0x99   :  { %5645 = vmatprep.subr.bf16.mxu0 %v6642_v1 }
  0x9a   :  { %110 = vsyncpa [#allocation3], 0  ;;  %v6146_v36 = vld [vmem:[%s6762_s4 + $0x90] ss:$12 sps:$4 sm:$0xff]   ;;  %v6149_v37 = vld [vmem:[%s6762_s4 + $0x98] ss:$12 sps:$4 sm:$0xff]   ;;  %605 = vmatprep.subr.bf16.mxu1 %v6148_v35  ;;  %v450_v2 = vlaneseq }
  0x9b   :  { %606 = vmatpush1.bf16.msra.mxu1 %v6146_v36  ;;  %v6152_v38 = vld [vmem:[%s6762_s4 + $0xac] ss:$12 sps:$4 sm:$0xff]   ;;  %v6150_v39 = vld [vmem:[%s6762_s4 + $0xa8] ss:$12 sps:$4 sm:$0xff]   ;;  %v6153_v40 = vld [vmem:[%s6762_s4 + $0xb0] ss:$12 sps:$4 sm:$0xff]  }
  0x9c   :  { %5646 = vmatpush3.bf16.msra.mxu0 %v6149_v37  ;;  %607 = vmatprep.subr.bf16.mxu1 %v6152_v38  ;;  %v6644_v41 = vmov 0   ;;  %v5147_v46 = vld [vmem:[%s6907_s5] ss:$0 sm:$0xff]  ;;  %v407_v60 = vld [vmem:[%s6882_s14 + $0x8] sm:$0xff]  ;;  %v678_v3 = vand.u32 127, %v450_v2  ;;  %v6994_v4 = vshrl.u32 %v450_v2, 7 }
  0x9d   :  { %5647 = vmatprep.subr.bf16.mxu0 %v6642_v1  ;;  %625 = vmatprep.mubr.bf16.mxu1 %v6644_v41  ;;  %v5138_v47 = vld [vmem:[%s6897_s20] ss:$0 sm:$0xff]  ;;  %v412_v2 = vld [vmem:[%s6887_s17 + $0x8] sm:$0xff]  ;;  %vm729_vm10 = vcmask 130048   ;;  %s7880_s0 = sld [smem:[#allocation6_spill]]  ;;  %s7881_s5 = sld [smem:[#allocation8_spill]] }
  0x9e   :  { %v406_v59 = vld [vmem:[%s6882_s14] sm:$0xff]  ;;  %vm756_vm2 = vcmp.ge.s32.totalorder %v678_v3, 32  ;;  %vm757_vm3 = vcmp.lt.s32.totalorder %v678_v3, 64  ;;  %vm919_vm4 = vcmp.ge.s32.totalorder %v678_v3, 64  ;;  %vm920_vm5 = vcmp.lt.s32.totalorder %v678_v3, 96  ;;  %s7882_s9 = sld [smem:[#allocation5_spill]] }
  0x9f   :  { %608 = vmatpush1.bf16.msra.mxu1 %v6150_v39  ;;  %v6997_v5 = vsub.s32 0, %v6994_v4  ;;  %vm681_vm6 = vcmp.lt.s32.totalorder %v678_v3, 32  ;;  %vm758_vm7 = vmand %vm756_vm2, %vm757_vm3  ;;  %v448_v6 = vld [vmem:[%s6752_s8] sm:$0x7]  ;;  %v460_v7 = vsub.s32 2, %v6994_v4  ;;  %vm1040_vm9 = vcmp.ge.s32.totalorder %v678_v3, 96 }
  0xa0   :  { %5648 = vmatpush3.bf16.msra.mxu0 %v6153_v40  ;;  %5653 = vmatprep.subr.bf16.mxu1 %v6642_v1  ;;  %vm921_vm8 = vmand %vm919_vm4, %vm920_vm5  ;;  %v7002_v8 = vsel %vm681_vm6, 1.0, %v6642_v1  ;;  %v7005_v9 = vsub.s32 1, %v6994_v4  ;;  %v7009_v11 = vsel %vm758_vm7, 1.0, %v6642_v1  ;;  %v7015_v13 = vsel %vm1040_vm9, 1.0, %v6642_v1  ;;  %s7883_s21 = sld [smem:[#allocation9_spill]]  ;;  %s7885_s29 = sld [smem:[#allocation11_spill]] }
  0xa1   :  { %5677 = vmatprep.subr.bf16.mxu0 %v6642_v1  ;;  %v453_v10 = vrot.slane %v448_v6, %v6997_v5  ;;  %v7012_v12 = vsel %vm921_vm8, 1.0, %v6642_v1  ;;  %v461_v14 = vrot.slane %v448_v6, %v460_v7  ;;  %v7020_v15 = vmul.f32 0.17677669, %v7002_v8  ;;  %s7887_s8 = sld [smem:[#allocation14_spill]]  ;;  %s7888_s14 = sld [smem:[#allocation13_spill]] }
  0xa2   :  { %v7023_v17 = vmul.f32 0.17677669, %v7009_v11  ;;  %v7026_v18 = vmul.f32 0.17677669, %v7012_v12  ;;  %v457_v20 = vrot.slane %v448_v6, %v7005_v9  ;;  %v7030_v22 = vmul.f32 0.17677669, %v7015_v13 }
  0xa3   :  { %vm1723_vm11 = vcmask 1043456   ;;  %vm1625_vm12 = vcmask 64512   ;;  %s7893_s12 = sld [smem:[#allocation16_spill]]  ;;  %s7894_s20 = sld [smem:[#allocation35_spill]]  ;;  %vm5043_vm5 = vcmask 523264  }
  0xa4   :  { %s7897_s4 = sld [smem:[#allocation21_spill]]  ;;  %s7898_s28 = sld [smem:[#allocation23_spill]] }
  0xa5   :  { %s7899_s1 = sld [smem:[#allocation29_spill]]  ;;  %s7900_s2 = sld [smem:[#allocation28_spill]] }
  0xa6   :  { %s7901_s7 = sld [smem:[#allocation18_spill]]  ;;  %s7902_s10 = sld [smem:[#allocation20_spill]] }
  0xa7   :  { %s7903_s11 = sld [smem:[#allocation22_spill]]  ;;  %s7904_s15 = sld [smem:[#allocation19_spill]] }
  0xa8   :  { %s7905_s16 = sld [smem:[#allocation25_spill]]  ;;  %s7906_s18 = sld [smem:[#allocation31_spill]] }
  0xa9   :  { %s7907_s23 = sld [smem:[#allocation30_spill]]  ;;  %s7908_s22 = sld [smem:[#allocation27_spill]] }
  0xaa   :  { %s7909_s26 = sld [smem:[#allocation24_spill]] }
 0x142   :  { %v395_v42 = vpop.f32.mrb[0].mxu1 }
 0x143   :  { %v5631_v43 = vpop.f32.mrb[1].mxu1  ;;  %v396_v48 = vadd.f32 %v5147_v46, %v395_v42 }
 0x144   :  { %v398_v44 = vpop.f32.mrb[2].mxu1 }
 0x145   :  { %v5632_v45 = vpop.f32.mrb[3].mxu1  ;;  %v399_v53 = vadd.f32 %v5147_v46, %v398_v44 }
 0x156   :  { %v324_v49 = vpop.f32.mrb[0].mxu0 }
 0x157   :  { %v325_v50 = vadd.f32 %v5138_v47, %v324_v49  ;;  %v5623_v51 = vpop.f32.mrb[1].mxu0 }
 0x158   :  { %v327_v52 = vpop.f32.mrb[2].mxu0 }
 0x159   :  { %v402_v54 = vmul.f32 %v396_v48, %v325_v50  ;;  %v328_v55 = vadd.f32 %v5138_v47, %v327_v52  ;;  %v5624_v56 = vpop.f32.mrb[3].mxu0 }
 0x15b   :  { %v404_v57 = vmul.f32 11.313708, %v402_v54  ;;  %v403_v58 = vmul.f32 %v399_v53, %v328_v55 }
 0x15d   :  { %v405_v61 = vmul.f32 11.313708, %v403_v58  ;;  %v6984_v62 = vadd.f32 %v406_v59, %v404_v57 }
 0x15f   :  { %v6986_v63 = vadd.f32 %v407_v60, %v405_v61  ;;  %v411_v60 = vld [vmem:[%s6887_s17] sm:$0xff] }
 0x161   :  { %v415_v0 = vpack.c.bf16 %v6986_v63, %v6984_v62 }
 0x163   :  { %626 = vmatmul.mubr.bf16.vlgmr.msra.gmra.mrb[4].mxu1 %v415_v0  ;;  %5650 = vmatmul.mubr.bf16.vlgmr.msra.gmra.mrb[4].mxu0 %v415_v0 }
 0x164   :  { %5655 = vmatprep.mubr.msk.bf16.mxu1 %vm6643_vm0, %v6642_v1  ;;  %5679 = vmatprep.mubr.msk.bf16.mxu0 %vm6643_vm0, %v6642_v1 }
 0x236   :  { %v627_v16 = vpop.f32.mrb[4].mxu1  ;;  %v670_v19 = vpop.f32.mrb[4].mxu0 }
 0x237   :  { %v628_v21 = vadd.f32 %v627_v16, %v453_v10  ;;  %v629_v23 = vpop.f32.mrb[5].mxu1  ;;  %v5651_v24 = vpop.f32.mrb[5].mxu0  ;;  %v671_v25 = vadd.f32 %v670_v19, %v461_v14 }
 0x238   :  { %v631_v26 = vpop.f32.mrb[6].mxu1  ;;  %v673_v27 = vpop.f32.mrb[6].mxu0  ;;  %v630_v33 = vadd.f32 %v629_v23, %v457_v20 }
 0x239   :  { %v633_v28 = vpop.f32.mrb[7].mxu1  ;;  %v5652_v29 = vpop.f32.mrb[7].mxu0  ;;  %v685_v30 = vmul.f32 %v7020_v15, %v628_v21  ;;  %v761_v31 = vmul.f32 %v7023_v17, %v628_v21  ;;  %v924_v32 = vmul.f32 %v7026_v18, %v628_v21  ;;  %v1045_v34 = vmul.f32 %v7030_v22, %v628_v21 }
 0x23a   :  { %v632_v35 = vadd.f32 %v631_v26, %v453_v10  ;;  %v674_v36 = vadd.f32 %v673_v27, %v461_v14  ;;  %v634_v37 = vadd.f32 %v633_v28, %v457_v20  ;;  %v7037_v38 = vmul.f32 %v7002_v8, %v671_v25 }
 0x23b   :  { %v828_v39 = vmul.f32 %v7009_v11, %v671_v25  ;;  %v7041_v40 = vmul.f32 %v7012_v12, %v671_v25  ;;  %v7044_v42 = vmul.f32 %v7015_v13, %v671_v25 }
 0x23c   :  { %v686_v43 = vmul.f32 %v7020_v15, %v632_v35  ;;  %v762_v44 = vmul.f32 %v7023_v17, %v632_v35  ;;  %v925_v45 = vmul.f32 %v7026_v18, %v632_v35  ;;  %v1046_v46 = vmul.f32 %v7030_v22, %v632_v35 }
 0x23d   :  { %v7051_v47 = vmul.f32 %v7002_v8, %v674_v36  ;;  %v829_v48 = vmul.f32 %v7009_v11, %v674_v36  ;;  %v7055_v49 = vmul.f32 %v7012_v12, %v674_v36  ;;  %v7058_v50 = vmul.f32 %v7015_v13, %v674_v36 }
 0x23e   :  { %v679_v51 = vpack.c.bf16 %v634_v37, %v630_v33  ;;  %v687_v52 = vpack.c.bf16 %v686_v43, %v685_v30  ;;  %v926_v53 = vpack.c.bf16 %v925_v45, %v924_v32  ;;  %v763_v54 = vpack.c.bf16 %v762_v44, %v761_v31 }
 0x23f   :  { %v1047_v55 = vpack.c.bf16 %v1046_v46, %v1045_v34  ;;  %v830_v56 = vpack.c.bf16 %v829_v48, %v828_v39  ;;  %v755_v57 = vpack.c.bf16 %v7051_v47, %v7037_v38  ;;  %v993_v58 = vpack.c.bf16 %v7055_v49, %v7041_v40 }
 0x240   :  { %5654 = vmatpush3.bf16.xpose.msra.mxu1 %v679_v51  ;;  %5678 = vmatpush3.bf16.xpose.msra.mxu0 %v679_v51  ;;  %v1114_v59 = vpack.c.bf16 %v7058_v50, %v7044_v42  ;;  %v6161_v42 = vld [vmem:[%s6757_s27 + $0x38] sm:$0xff]  }
 0x241   :  { %5659 = vmatprep.subr.bf16.mxu1 %v6642_v1  ;;  %5689 = vmatprep.subr.bf16.mxu0 %v6642_v1 }
 0x247   :  { %5656 = vmatmul.mubr.bf16.vlgmr.msra.gmra.mrb[8].mxu1 %v687_v52  ;;  %5680 = vmatmul.mubr.bf16.vlgmr.msra.gmra.mrb[8].mxu0 %v926_v53 }
 0x248   :  { %5660 = vmatpush3.bf16.xpose.msra.mxu1 %v679_v51  ;;  %5690 = vmatpush3.bf16.xpose.msra.mxu0 %v679_v51 }
 0x249   :  { %5661 = vmatprep.mubr.msk.bf16.mxu1 %vm6643_vm0, %v6642_v1  ;;  %5691 = vmatprep.mubr.msk.bf16.mxu0 %vm6643_vm0, %v6642_v1 }
 0x24a   :  { %5665 = vmatprep.subr.bf16.mxu1 %v6642_v1  ;;  %5701 = vmatprep.subr.bf16.mxu0 %v6642_v1 }
 0x24f   :  { %5662 = vmatmul.mubr.bf16.vlgmr.msra.gmra.mrb[12].mxu1 %v763_v54  ;;  %5692 = vmatmul.mubr.bf16.vlgmr.msra.gmra.mrb[12].mxu0 %v1047_v55 }
 0x250   :  { %5666 = vmatpush3.bf16.msra.mxu1 %v830_v56  ;;  %5667 = vmatprep.mubr.msk.bf16.mxu1 %vm6643_vm0, %v6642_v1 }
 0x251   :  { %5671 = vmatprep.subr.bf16.mxu1 %v6642_v1  ;;  %5717 = vmatprep.mubr.msk.bf16.mxu0 %vm6643_vm0, %v6642_v1 }
 0x31a   :  { %v722_v61 = vpop.f32.mrb[8].mxu1  ;;  %v961_v0 = vpop.f32.mrb[8].mxu0 }
 0x31b   :  { %v723_v3 = vadd.f32 %v722_v61, %v411_v60  ;;  %v5657_v6 = vpop.f32.mrb[9].mxu1  ;;  %v5681_v10 = vpop.f32.mrb[9].mxu0  ;;  %v962_v43 = vadd.f32 %v961_v0, %v411_v60 }
 0x31c   :  { %v725_v14 = vpop.f32.mrb[10].mxu1  ;;  %v964_v16 = vpop.f32.mrb[10].mxu0 }
 0x31d   :  { %v726_v19 = vadd.f32 %v725_v14, %v412_v2  ;;  %v5658_v20 = vpop.f32.mrb[11].mxu1  ;;  %v5682_v21 = vpop.f32.mrb[11].mxu0  ;;  %v730_v23 = vsel %vm729_vm10, %v723_v3, -inf  ;;  %v965_v24 = vadd.f32 %v964_v16, %v412_v2  ;;  %v968_v48 = vsel %vm729_vm10, %v962_v43, -inf }
 0x31e   :  { %731 = vmax.xlane.f32.xlu1 %v730_v23 }
 0x31f   :  { %v733_v25 = vsel %vm729_vm10, %v726_v19, -inf  ;;  %v971_v39 = vsel %vm729_vm10, %v965_v24, -inf }
 0x322   :  { %734 = vmax.xlane.f32.xlu1 %v733_v25  ;;  %v798_v26 = vpop.f32.mrb[12].mxu1  ;;  %v1082_v27 = vpop.f32.mrb[12].mxu0 }
 0x323   :  { %v799_v28 = vadd.f32 %v798_v26, %v411_v60  ;;  %v5663_v29 = vpop.f32.mrb[13].mxu1  ;;  %v5693_v30 = vpop.f32.mrb[13].mxu0  ;;  %v1083_v46 = vadd.f32 %v1082_v27, %v411_v60 }
 0x324   :  { %v801_v31 = vpop.f32.mrb[14].mxu1  ;;  %v1085_v32 = vpop.f32.mrb[14].mxu0 }
 0x325   :  { %v802_v33 = vadd.f32 %v801_v31, %v412_v2  ;;  %v1086_v34 = vadd.f32 %v1085_v32, %v412_v2  ;;  %v5664_v35 = vpop.f32.mrb[15].mxu1  ;;  %v5694_v36 = vpop.f32.mrb[15].mxu0  ;;  %v805_v37 = vsel %vm729_vm10, %v799_v28, -inf  ;;  %v1089_v51 = vsel %vm729_vm10, %v1083_v46, -inf }
 0x326   :  { %806 = vmax.xlane.f32.xlu0 %v805_v37  ;;  %972 = vmax.xlane.f32.xlu1 %v971_v39 }
 0x327   :  { %v808_v44 = vsel %vm729_vm10, %v802_v33, -inf  ;;  %v1092_v45 = vsel %vm729_vm10, %v1086_v34, -inf }
 0x32a   :  { %809 = vmax.xlane.f32.xlu0 %v808_v44  ;;  %1093 = vmax.xlane.f32.xlu1 %v1092_v45 }
 0x32e   :  { %969 = vmax.xlane.f32.xlu0 %v968_v48 }
 0x332   :  { %1090 = vmax.xlane.f32.xlu0 %v1089_v51 }
 0x3ab   :  { %v732_v52 = vpop.xlane.xlu1 %731 }
 0x3ac   :  { %v736_v54 = vsub.f32 %v723_v3, %v732_v52 }
 0x3ae   :  { %v738_v0 = vmul.f32 1.442695, %v736_v54  ;;  %v6155_v54 = vld [vmem:[%s6757_s27 + $0x8] sm:$0xff]  }
 0x3af   :  { %v735_v53 = vpop.xlane.xlu1 %734 }
 0x3b0   :  { %v737_v2 = vsub.f32 %v726_v19, %v735_v53  ;;  %v6154_v53 = vld [vmem:[%s6757_s27] sm:$0xff]  }
 0x3b1   :  { %5702 = vmatpush3.bf16.msra.mxu0 %v6154_v53 }
 0x3b2   :  { %v740_v60 = vmul.f32 1.442695, %v737_v2  ;;  %5703 = vmatprep.subr.bf16.mxu0 %v6642_v1  ;;  %v6160_v2 = vld [vmem:[%s6757_s27 + $0x30] sm:$0xff]  }
 0x3b3   :  { %v807_v55 = vpop.xlane.xlu0 %806  ;;  %v973_v61 = vpop.xlane.xlu1 %972 }
 0x3b4   :  { %v811_v56 = vsub.f32 %v799_v28, %v807_v55  ;;  %v975_v16 = vsub.f32 %v965_v24, %v973_v61  ;;  %v6156_v55 = vld [vmem:[%s6757_s27 + $0x10] sm:$0xff]   ;;  %v6158_v61 = vld [vmem:[%s6757_s27 + $0x20] sm:$0xff]  }
 0x3b5   :  { %5704 = vmatpush3.bf16.msra.mxu0 %v6155_v54 }
 0x3b6   :  { %v813_v6 = vmul.f32 1.442695, %v811_v56  ;;  %v978_v26 = vmul.f32 1.442695, %v975_v16  ;;  %5705 = vmatprep.subr.bf16.mxu0 %v6642_v1  ;;  %v6157_v56 = vld [vmem:[%s6757_s27 + $0x18] sm:$0xff]  }
 0x3b7   :  { %v810_v10 = vpop.xlane.xlu0 %809  ;;  %v1094_v21 = vpop.xlane.xlu1 %1093 }
 0x3b8   :  { %6370 = vpow2.f32 %v813_v6  ;;  %v812_v14 = vsub.f32 %v802_v33, %v810_v10  ;;  %v1096_v3 = vsub.f32 %v1086_v34, %v1094_v21 }
 0x3b9   :  { %6372 = vpow2.f32 %v738_v0  ;;  %5706 = vmatpush3.bf16.msra.mxu0 %v6156_v55  ;;  %v6159_v0 = vld [vmem:[%s6757_s27 + $0x28] sm:$0xff]   ;;  %s7896_s27 = sld [smem:[#allocation34_spill]] }
 0x3ba   :  { %v815_v20 = vmul.f32 1.442695, %v812_v14  ;;  %v1099_v30 = vmul.f32 1.442695, %v1096_v3  ;;  %5707 = vmatprep.subr.bf16.mxu0 %v6642_v1  ;;  %v6162_v55 = vld [vmem:[%s6682_s25] ss:$8 sps:$4 sm:$0xff]  }
 0x3bb   :  { %v970_v23 = vpop.xlane.xlu0 %969 }
 0x3bc   :  { %6374 = vpow2.f32 %v815_v20  ;;  %v974_v25 = vsub.f32 %v962_v43, %v970_v23 }
 0x3bd   :  { %6376 = vpow2.f32 %v740_v60  ;;  %5708 = vmatpush3.bf16.msra.mxu0 %v6157_v56  ;;  %v6164_v56 = vld [vmem:[%s6682_s25 + $0x4] ss:$8 sps:$4 sm:$0xff]  }
 0x3be   :  { %v976_v27 = vmul.f32 1.442695, %v974_v25  ;;  %5709 = vmatprep.subr.bf16.mxu0 %v6642_v1 }
 0x3bf   :  { %v1091_v28 = vpop.xlane.xlu0 %1090 }
 0x3c0   :  { %6378 = vpow2.f32 %v976_v27  ;;  %v1095_v29 = vsub.f32 %v1083_v46, %v1091_v28 }
 0x3c1   :  { %6380 = vpow2.f32 %v978_v26  ;;  %5710 = vmatpush3.bf16.msra.mxu0 %v6158_v61  ;;  %v6167_v61 = vld [vmem:[%s6682_s25 + $0x14] ss:$8 sps:$4 sm:$0xff]  }
 0x3c2   :  { %v6371_v19 = vpop.eup %6370  ;;  %v1097_v31 = vmul.f32 1.442695, %v1095_v29  ;;  %5711 = vmatprep.subr.bf16.mxu0 %v6642_v1 }
 0x3c3   :  { %v817_v32 = vsel %vm729_vm10, %v6371_v19, 0.0  ;;  %v7090_v33 = vpop.eup %6372 }
 0x3c4   :  { %6382 = vpow2.f32 %v1097_v31  ;;  %818 = vadd.xlane.f32.xlu0 %v817_v32  ;;  %v742_v35 = vsel %vm729_vm10, %v7090_v33, 0.0 }
 0x3c5   :  { %6384 = vpow2.f32 %v1099_v30  ;;  %5712 = vmatpush3.bf16.msra.mxu0 %v6159_v0  ;;  %v6168_v0 = vld [vmem:[%s6692_s3] sm:$0xff]  }
 0x3c6   :  { %v6375_v24 = vpop.eup %6374  ;;  %5713 = vmatprep.subr.bf16.mxu0 %v6642_v1 }
 0x3c7   :  { %v820_v34 = vsel %vm729_vm10, %v6375_v24, 0.0  ;;  %v6377_v36 = vpop.eup %6376 }
 0x3c8   :  { %743 = vadd.xlane.f32.xlu0 %v742_v35  ;;  %821 = vadd.xlane.f32.xlu1 %v820_v34  ;;  %v745_v43 = vsel %vm729_vm10, %v6377_v36, 0.0 }
 0x3c9   :  { %5714 = vmatpush3.bf16.msra.mxu0 %v6160_v2  ;;  %v6165_v2 = vld [vmem:[%s6682_s25 + $0x10] ss:$8 sps:$4 sm:$0xff]  }
 0x3ca   :  { %v7095_v37 = vpop.eup %6378  ;;  %5715 = vmatprep.subr.bf16.mxu0 %v6642_v1 }
 0x3cb   :  { %v980_v39 = vsel %vm729_vm10, %v7095_v37, 0.0  ;;  %v7100_v44 = vpop.eup %6380 }
 0x3cc   :  { %981 = vadd.xlane.f32.xlu0 %v980_v39  ;;  %746 = vadd.xlane.f32.xlu1 %v745_v43  ;;  %v983_v48 = vsel %vm729_vm10, %v7100_v44, 0.0  ;;  %v5179_v43 = vld [vmem:[%s6747_s19] ss:$0 sm:$0xff]  ;;  %s7889_s19 = sld [smem:[#allocation10_spill]] }
 0x3cd   :  { %5716 = vmatpush3.bf16.msra.mxu0 %v6161_v42 }
 0x3ce   :  { %v7102_v45 = vpop.eup %6382  ;;  %1539 = vmatprep.subr.bf16.mxu0 %v6164_v56  ;;  %v1447_v56 = vld [vmem:[%s7880_s0] sm:$0x3]  ;;  %s7910_s0 = sld [smem:[#allocation26_spill]] }
 0x3cf   :  { %v1101_v46 = vsel %vm729_vm10, %v7102_v45, 0.0  ;;  %v7108_v51 = vpop.eup %6384 }
 0x3d0   :  { %1102 = vadd.xlane.f32.xlu0 %v1101_v46  ;;  %984 = vadd.xlane.f32.xlu1 %v983_v48  ;;  %v1104_v52 = vsel %vm729_vm10, %v7108_v51, 0.0 }
 0x3d4   :  { %1105 = vadd.xlane.f32.xlu1 %v1104_v52 }
 0x451   :  { %v819_v6 = vpop.xlane.xlu0 %818 }
 0x452   :  { %6386 = vrcp.f32 %v819_v6  ;;  %v6172_v6 = vld [vmem:[%s6692_s3 + $0x8] sm:$0xff]  }
 0x455   :  { %v822_v10 = vpop.xlane.xlu1 %821  ;;  %v744_v60 = vpop.xlane.xlu0 %743 }
 0x456   :  { %6388 = vrcp.f32 %v822_v10  ;;  %v6171_v10 = vld [vmem:[%s6682_s25 + $0x24] ss:$8 sps:$4 sm:$0xff]  }
 0x459   :  { %v747_v14 = vpop.xlane.xlu1 %746  ;;  %v982_v27 = vpop.xlane.xlu0 %981 }
 0x45a   :  { %6390 = vrcp.f32 %v747_v14  ;;  %v6173_v14 = vld [vmem:[%s6682_s25 + $0x30] ss:$8 sps:$4 sm:$0xff]  }
 0x45b   :  { %6392 = vrcp.f32 %v744_v60 }
 0x45c   :  { %v6387_v16 = vpop.eup %6386 }
 0x45d   :  { %v825_v21 = vmul.f32 %v6387_v16, %v6371_v19  ;;  %v985_v26 = vpop.xlane.xlu1 %984 }
 0x45e   :  { %6394 = vrcp.f32 %v985_v26 }
 0x45f   :  { %6396 = vrcp.f32 %v982_v27  ;;  %v6176_v27 = vld [vmem:[%s6692_s3 + $0x10] sm:$0xff]  }
 0x460   :  { %v6389_v20 = vpop.eup %6388 }
 0x461   :  { %v826_v23 = vmul.f32 %v6389_v20, %v6375_v24  ;;  %v1106_v38 = vpop.xlane.xlu1 %1105 }
 0x462   :  { %6398 = vrcp.f32 %v1106_v38  ;;  %v6181_v38 = vld [vmem:[%s6682_s25 + $0x50] ss:$8 sps:$4 sm:$0xff]  }
 0x463   :  { %v827_v25 = vpack.c.bf16 %v826_v23, %v825_v21 }
 0x464   :  { %v6391_v3 = vpop.eup %6390 }
 0x465   :  { %5668 = vmatmul.mubr.msk.bf16.vlgmr.msra.gmra.mrb[16].mxu1 %vm729_vm10, %v827_v25  ;;  %v6393_v28 = vpop.eup %6392  ;;  %v751_v29 = vmul.f32 %v6391_v3, %v6377_v36 }
 0x466   :  { %5672 = vmatpush3.bf16.msra.mxu1 %v755_v57  ;;  %5673 = vmatprep.mubr.msk.bf16.mxu1 %vm6643_vm0, %v6642_v1  ;;  %v750_v19 = vmul.f32 %v6393_v28, %v7090_v33  ;;  %v1103_v57 = vpop.xlane.xlu0 %1102  ;;  %v6179_v28 = vld [vmem:[%s6682_s25 + $0x44] ss:$8 sps:$4 sm:$0xff]  }
 0x467   :  { %5683 = vmatprep.subr.bf16.mxu1 %v6642_v1  ;;  %6400 = vrcp.f32 %v1103_v57  ;;  %v6187_v57 = vld [vmem:[%s6682_s25 + $0x64] ss:$8 sps:$4 sm:$0xff]  }
 0x468   :  { %v752_v30 = vpack.c.bf16 %v751_v29, %v750_v19  ;;  %v6395_v47 = vpop.eup %6394  ;;  %v6177_v29 = vld [vmem:[%s6682_s25 + $0x40] ss:$8 sps:$4 sm:$0xff]   ;;  %v6180_v19 = vld [vmem:[%s6692_s3 + $0x18] sm:$0xff]  }
 0x469   :  { %v6397_v31 = vpop.eup %6396  ;;  %v989_v32 = vmul.f32 %v6395_v47, %v7100_v44  ;;  %v6184_v47 = vld [vmem:[%s6692_s3 + $0x20] sm:$0xff]  }
 0x46a   :  { %v988_v33 = vmul.f32 %v6397_v31, %v7095_v37  ;;  %v6185_v31 = vld [vmem:[%s6682_s25 + $0x60] ss:$8 sps:$4 sm:$0xff]  }
 0x46c   :  { %v990_v24 = vpack.c.bf16 %v989_v32, %v988_v33  ;;  %v6399_v40 = vpop.eup %6398  ;;  %v6188_v32 = vld [vmem:[%s6692_s3 + $0x28] sm:$0xff]   ;;  %v6191_v33 = vld [vmem:[%s6682_s25 + $0x74] ss:$8 sps:$4 sm:$0xff]  }
 0x471   :  { %5674 = vmatmul.mubr.msk.bf16.vlgmr.msra.gmra.mrb[16].mxu1 %vm729_vm10, %v752_v30  ;;  %v6401_v49 = vpop.eup %6400  ;;  %v6183_v30 = vld [vmem:[%s6682_s25 + $0x54] ss:$8 sps:$4 sm:$0xff]  }
 0x472   :  { %5684 = vmatpush3.bf16.msra.mxu1 %v993_v58  ;;  %5685 = vmatprep.mubr.msk.bf16.mxu1 %vm6643_vm0, %v6642_v1  ;;  %v1110_v58 = vmul.f32 %v6399_v40, %v7108_v51  ;;  %v1109_v35 = vmul.f32 %v6401_v49, %v7102_v45  ;;  %v6192_v40 = vld [vmem:[%s6692_s3 + $0x30] sm:$0xff]   ;;  %v410_v49 = vld [vmem:[%s6867_s24] sm:$0xff]  ;;  %s7890_s24 = sld [smem:[#allocation12_spill]] }
 0x473   :  { %5695 = vmatprep.subr.bf16.mxu1 %v6642_v1 }
 0x474   :  { %v1111_v34 = vpack.c.bf16 %v1110_v58, %v1109_v35  ;;  %v7190_v58 = vpack.c.bf16 %v410_v49, %v410_v49  ;;  %v6193_v35 = vld [vmem:[%s6692_s3 + $0x38] sm:$0xff]   ;;  %s7886_s3 = sld [smem:[#allocation15_spill]] }
 0x47d   :  { %5686 = vmatmul.mubr.msk.bf16.vlgmr.msra.gmra.mrb[16].mxu1 %vm729_vm10, %v990_v24  ;;  %v6189_v24 = vld [vmem:[%s6682_s25 + $0x70] ss:$8 sps:$4 sm:$0xff]  }
 0x47e   :  { %5696 = vmatpush3.bf16.msra.mxu1 %v1114_v59  ;;  %5697 = vmatprep.mubr.msk.bf16.mxu1 %vm6643_vm0, %v6642_v1 }
 0x47f   :  { %5721 = vmatprep.subr.bf16.mxu1 %v6642_v1 }
 0x489   :  { %5698 = vmatmul.mubr.msk.bf16.vlgmr.msra.gmra.mrb[16].mxu1 %vm729_vm10, %v1111_v34 }
 0x48a   :  { %5737 = vmatprep.mubr.msk.bf16.mxu1 %vm6643_vm0, %v6642_v1  ;;  %5722 = vmatpush3.bf16.msra.mxu1 %v6168_v0 }
 0x48b   :  { %5723 = vmatprep.subr.bf16.mxu1 %v6642_v1 }
 0x48e   :  { %5724 = vmatpush3.bf16.msra.mxu1 %v6172_v6 }
 0x48f   :  { %5725 = vmatprep.subr.bf16.mxu1 %v6642_v1 }
 0x492   :  { %5726 = vmatpush3.bf16.msra.mxu1 %v6176_v27 }
 0x493   :  { %5727 = vmatprep.subr.bf16.mxu1 %v6642_v1 }
 0x496   :  { %5728 = vmatpush3.bf16.msra.mxu1 %v6180_v19 }
 0x497   :  { %5729 = vmatprep.subr.bf16.mxu1 %v6642_v1 }
 0x49a   :  { %5730 = vmatpush3.bf16.msra.mxu1 %v6184_v47 }
 0x49b   :  { %5731 = vmatprep.subr.bf16.mxu1 %v6642_v1 }
 0x49e   :  { %5732 = vmatpush3.bf16.msra.mxu1 %v6188_v32 }
 0x49f   :  { %5733 = vmatprep.subr.bf16.mxu1 %v6642_v1 }
 0x4a2   :  { %5734 = vmatpush3.bf16.msra.mxu1 %v6192_v40 }
 0x4a3   :  { %5735 = vmatprep.subr.bf16.mxu1 %v6642_v1 }
 0x4a6   :  { %5736 = vmatpush3.bf16.msra.mxu1 %v6193_v35 }
 0x4a7   :  { %5741 = vmatprep.subr.bf16.mxu1 %v6642_v1 }
 0x55c   :  { %v1152_v50 = vpop.f32.mrb[16].mxu1 }
 0x55d   :  { %v5699_v59 = vpop.f32.mrb[17].mxu1 }
 0x55e   :  { %v1155_v36 = vpop.f32.mrb[18].mxu1 }
 0x55f   :  { %v1161_v37 = vpack.c.bf16 %v1155_v36, %v1152_v50  ;;  %v5700_v39 = vpop.f32.mrb[19].mxu1 }
 0x561   :  { %5718 = vmatmul.mubr.bf16.vlgmr.msra.gmra.mrb[16].mxu0 %v1161_v37 }
 0x562   :  { %1571 = vmatprep.mubr.bf16.mxu0 %v6644_v41  ;;  %1540 = vmatpush1.bf16.msra.mxu0 %v6162_v55 }
 0x563   :  { %1541 = vmatprep.subr.bf16.mxu0 %v6167_v61  ;;  %v1452_v61 = vrot.slane %v1447_v56, %v6997_v5 }
 0x566   :  { %1542 = vmatpush1.bf16.msra.mxu0 %v6165_v2 }
 0x567   :  { %1543 = vmatprep.subr.bf16.mxu0 %v6171_v10 }
 0x634   :  { %v1267_v44 = vpop.f32.mrb[16].mxu0 }
 0x635   :  { %v1268_v45 = vadd.f32 %v5179_v43, %v1267_v44  ;;  %v5719_v46 = vpop.f32.mrb[17].mxu0 }
 0x636   :  { %v1270_v48 = vpop.f32.mrb[18].mxu0 }
 0x637   :  { %v1271_v51 = vadd.f32 %v5179_v43, %v1270_v48  ;;  %v5720_v52 = vpop.f32.mrb[19].mxu0  ;;  %v1274_v53 = vadd.f32 %v1268_v45, %v6984_v62  ;;  %v6169_v62 = vld [vmem:[%s6682_s25 + $0x20] ss:$8 sps:$4 sm:$0xff]  }
 0x638   :  { %1544 = vmatpush1.bf16.msra.mxu0 %v6169_v62  ;;  %v5188_v43 = vld [vmem:[%s6722_s6] ss:$0 sm:$0xff]  ;;  %s7892_s6 = sld [smem:[#allocation17_spill]] }
 0x639   :  { %1276 = vadd.xlane.f32.xlu0 %v1274_v53  ;;  %v1275_v54 = vadd.f32 %v1271_v51, %v6986_v63  ;;  %v6175_v63 = vld [vmem:[%s6682_s25 + $0x34] ss:$8 sps:$4 sm:$0xff]   ;;  %v5189_v51 = vld [vmem:[%s6717_s30] ss:$0 sm:$0xff]  ;;  %s7884_s25 = sld [smem:[#allocation7_spill]]  ;;  %s7891_s30 = sld [smem:[#allocation37_spill]] }
 0x63a   :  { %1545 = vmatprep.subr.bf16.mxu0 %v6175_v63 }
 0x63b   :  { %1278 = vadd.xlane.f32.xlu1 %v1275_v54 }
 0x63c   :  { %1546 = vmatpush1.bf16.msra.mxu0 %v6173_v14  ;;  %v5190_v14 = vld [vmem:[%s7881_s5] ss:$0 sm:$0xff]  ;;  %s7911_s5 = sld [smem:[#allocation39_spill]] }
 0x63d   :  { %1547 = vmatprep.subr.bf16.mxu0 %v6179_v28 }
 0x640   :  { %1548 = vmatpush1.bf16.msra.mxu0 %v6177_v29 }
 0x641   :  { %1549 = vmatprep.subr.bf16.mxu0 %v6183_v30 }
 0x644   :  { %1550 = vmatpush1.bf16.msra.mxu0 %v6181_v38 }
 0x645   :  { %1551 = vmatprep.subr.bf16.mxu0 %v6187_v57 }
 0x648   :  { %1552 = vmatpush1.bf16.msra.mxu0 %v6185_v31 }
 0x649   :  { %1553 = vmatprep.subr.bf16.mxu0 %v6191_v33 }
 0x64c   :  { %1554 = vmatpush1.bf16.msra.mxu0 %v6189_v24 }
 0x64d   :  { %5765 = vmatprep.subr.bf16.mxu0 %v6642_v1 }
 0x64f   :  { %1572 = vmatmul.mubr.bf16.vlgmr.msra.gmra.mrb[20].mxu0 %v7190_v58 }
 0x650   :  { %5767 = vmatprep.mubr.msk.bf16.mxu0 %vm6643_vm0, %v6642_v1 }
 0x6c6   :  { %v1277_v60 = vpop.xlane.xlu0 %1276 }
 0x6c7   :  { %v1281_v16 = vmul.f32 0.0078125, %v1277_v60  ;;  %v1456_v60 = vrot.slane %v1447_v56, %v7005_v9 }
 0x6c8   :  { %v1279_v20 = vpop.xlane.xlu1 %1278 }
 0x6c9   :  { %v1283_v21 = vsub.f32 %v1274_v53, %v1281_v16  ;;  %v1282_v23 = vmul.f32 0.0078125, %v1279_v20 }
 0x6cb   :  { %v1284_v25 = vsub.f32 %v1275_v54, %v1282_v23  ;;  %v1285_v26 = vmul.f32 %v1283_v21, %v1283_v21 }
 0x6cd   :  { %1287 = vadd.xlane.f32.xlu0 %v1285_v26  ;;  %v1286_v3 = vmul.f32 %v1284_v25, %v1284_v25 }
 0x6cf   :  { %1289 = vadd.xlane.f32.xlu1 %v1286_v3 }
 0x722   :  { %v1573_v0 = vpop.f32.mrb[20].mxu0 }
 0x723   :  { %v1574_v2 = vadd.f32 %v1573_v0, %v1452_v61  ;;  %v1575_v6 = vpop.f32.mrb[21].mxu0 }
 0x724   :  { %v1577_v10 = vpop.f32.mrb[22].mxu0  ;;  %v7215_v26 = vadd.f32 %v1575_v6, %v1456_v60 }
 0x725   :  { %v1580_v62 = vpack.c.bf16 %v1574_v2, %v1574_v2  ;;  %v1578_v63 = vpop.f32.mrb[23].mxu0 }
 0x726   :  { %v1718_v40 = vmul.f32 %v7215_v26, %v7009_v11 }
 0x727   :  { %5766 = vmatpush3.bf16.xpose.msra.mxu0 %v1580_v62 }
 0x728   :  { %5777 = vmatprep.subr.bf16.mxu0 %v6642_v1  ;;  %v1719_v49 = vpack.c.bf16 %v1718_v40, %v1718_v40 }
 0x72a   :  { %v1725_v35 = vsel %vm1723_vm11, %v1719_v49, 0 }
 0x75a   :  { %v1288_v34 = vpop.xlane.xlu0 %1287 }
 0x75b   :  { %v1291_v42 = vmul.f32 0.0078125, %v1288_v34 }
 0x75c   :  { %v1290_v50 = vpop.xlane.xlu1 %1289 }
 0x75d   :  { %v1293_v59 = vadd.f32 1e-05, %v1291_v42  ;;  %v1292_v36 = vmul.f32 0.0078125, %v1290_v50 }
 0x75f   :  { %6402 = vrsqrt.f32 %v1293_v59  ;;  %v1294_v37 = vadd.f32 1e-05, %v1292_v36 }
 0x761   :  { %6404 = vrsqrt.f32 %v1294_v37 }
 0x769   :  { %v6403_v39 = vpop.eup %6402 }
 0x76a   :  { %v1297_v44 = vmul.f32 %v6403_v39, %v1283_v21 }
 0x76b   :  { %v6405_v45 = vpop.eup %6404 }
 0x76c   :  { %v1298_v46 = vmul.f32 %v6405_v45, %v1284_v25  ;;  %v1306_v48 = vmul.f32 %v5188_v43, %v1297_v44  ;;  %v413_v44 = vld [vmem:[%s7882_s9] sm:$0xff] }
 0x76e   :  { %v1307_v52 = vmul.f32 %v5188_v43, %v1298_v46  ;;  %v7201_v53 = vadd.f32 %v5189_v51, %v1306_v48 }
 0x770   :  { %v7203_v54 = vadd.f32 %v5189_v51, %v1307_v52 }
 0x772   :  { %v1317_v55 = vpack.c.bf16 %v7203_v54, %v7201_v53 }
 0x774   :  { %5738 = vmatmul.mubr.bf16.vlgmr.msra.gmra.mrb[20].mxu1 %v1317_v55  ;;  %v414_v55 = vld [vmem:[%s7882_s9 + $0x8] sm:$0xff] }
 0x775   :  { %5743 = vmatprep.mubr.msk.bf16.mxu1 %vm6643_vm0, %v6642_v1  ;;  %5742 = vmatpush3.bf16.xpose.msra.mxu1 %v1580_v62 }
 0x776   :  { %5747 = vmatprep.subr.bf16.mxu1 %v6642_v1 }
 0x847   :  { %v1423_v16 = vpop.f32.mrb[20].mxu1 }
 0x848   :  { %v1424_v20 = vadd.f32 %v5190_v14, %v1423_v16  ;;  %v5739_v21 = vpop.f32.mrb[21].mxu1 }
 0x849   :  { %v1426_v23 = vpop.f32.mrb[22].mxu1 }
 0x84a   :  { %v5740_v25 = vpop.f32.mrb[23].mxu1  ;;  %v1427_v3 = vadd.f32 %v5190_v14, %v1426_v23  ;;  %v1581_v27 = vmul.f32 %v1424_v20, %v7020_v15  ;;  %v1651_v28 = vmul.f32 %v1424_v20, %v7023_v17  ;;  %v1815_v29 = vmul.f32 %v1424_v20, %v7026_v18 }
 0x84b   :  { %v1933_v19 = vmul.f32 %v1424_v20, %v7030_v22 }
 0x84c   :  { %v1582_v30 = vmul.f32 %v1427_v3, %v7020_v15  ;;  %v1652_v38 = vmul.f32 %v1427_v3, %v7023_v17  ;;  %v1816_v47 = vmul.f32 %v1427_v3, %v7026_v18  ;;  %v1934_v57 = vmul.f32 %v1427_v3, %v7030_v22 }
 0x84e   :  { %v1583_v31 = vpack.c.bf16 %v1582_v30, %v1581_v27  ;;  %v1817_v32 = vpack.c.bf16 %v1816_v47, %v1815_v29  ;;  %v1653_v33 = vpack.c.bf16 %v1652_v38, %v1651_v28  ;;  %v1935_v24 = vpack.c.bf16 %v1934_v57, %v1933_v19 }
 0x850   :  { %5744 = vmatmul.mubr.bf16.vlgmr.msra.gmra.mrb[24].mxu1 %v1583_v31  ;;  %5768 = vmatmul.mubr.bf16.vlgmr.msra.gmra.mrb[24].mxu0 %v1817_v32 }
 0x851   :  { %5748 = vmatpush3.bf16.xpose.msra.mxu1 %v1580_v62  ;;  %5778 = vmatpush3.bf16.xpose.msra.mxu0 %v1580_v62 }
 0x852   :  { %5749 = vmatprep.mubr.msk.bf16.mxu1 %vm6643_vm0, %v6642_v1  ;;  %5753 = vmatprep.subr.bf16.mxu1 %v6642_v1 }
 0x853   :  { %5779 = vmatprep.mubr.msk.bf16.mxu0 %vm6643_vm0, %v6642_v1  ;;  %5789 = vmatprep.subr.bf16.mxu0 %v6642_v1 }
 0x858   :  { %5750 = vmatmul.mubr.bf16.vlgmr.msra.gmra.mrb[28].mxu1 %v1653_v33  ;;  %5780 = vmatmul.mubr.bf16.vlgmr.msra.gmra.mrb[28].mxu0 %v1935_v24 }
 0x859   :  { %5754 = vmatpush3.bf16.msra.mxu1 %v1725_v35  ;;  %5755 = vmatprep.mubr.msk.bf16.mxu1 %vm6643_vm0, %v6642_v1 }
 0x85a   :  { %5759 = vmatprep.subr.bf16.mxu1 %v6642_v1  ;;  %5805 = vmatprep.mubr.msk.bf16.mxu0 %vm6643_vm0, %v6642_v1 }
 0x923   :  { %v1618_v34 = vpop.f32.mrb[24].mxu1  ;;  %v1852_v42 = vpop.f32.mrb[24].mxu0 }
 0x924   :  { %v5745_v50 = vpop.f32.mrb[25].mxu1  ;;  %v5769_v59 = vpop.f32.mrb[25].mxu0  ;;  %v1619_v0 = vadd.f32 %v1618_v34, %v413_v44  ;;  %v1853_v60 = vadd.f32 %v1852_v42, %v413_v44 }
 0x925   :  { %v1621_v36 = vpop.f32.mrb[26].mxu1  ;;  %v1855_v37 = vpop.f32.mrb[26].mxu0 }
 0x926   :  { %v5746_v39 = vpop.f32.mrb[27].mxu1  ;;  %v5770_v43 = vpop.f32.mrb[27].mxu0  ;;  %v1622_v63 = vadd.f32 %v1621_v36, %v414_v55  ;;  %v1626_v16 = vsel %vm1625_vm12, %v1619_v0, -inf  ;;  %v1856_v20 = vadd.f32 %v1855_v37, %v414_v55  ;;  %v1859_v25 = vsel %vm1625_vm12, %v1853_v60, -inf }
 0x928   :  { %v1629_v21 = vsel %vm1625_vm12, %v1622_v63, -inf  ;;  %v1862_v27 = vsel %vm1625_vm12, %v1856_v20, -inf }
 0x92b   :  { %v1688_v45 = vpop.f32.mrb[28].mxu1  ;;  %v1970_v46 = vpop.f32.mrb[28].mxu0 }
 0x92c   :  { %v1689_v48 = vadd.f32 %v1688_v45, %v413_v44  ;;  %v5751_v51 = vpop.f32.mrb[29].mxu1  ;;  %v5781_v52 = vpop.f32.mrb[29].mxu0  ;;  %v1971_v23 = vadd.f32 %v1970_v46, %v413_v44 }
 0x92d   :  { %v1691_v56 = vpop.f32.mrb[30].mxu1  ;;  %v1973_v61 = vpop.f32.mrb[30].mxu0 }
 0x92e   :  { %v1692_v2 = vadd.f32 %v1691_v56, %v414_v55  ;;  %v5752_v6 = vpop.f32.mrb[31].mxu1  ;;  %v5782_v10 = vpop.f32.mrb[31].mxu0  ;;  %v1695_v62 = vsel %vm1625_vm12, %v1689_v48, -inf  ;;  %v1974_v3 = vadd.f32 %v1973_v61, %v414_v55  ;;  %v1977_v28 = vsel %vm1625_vm12, %v1971_v23, -inf }
 0x92f   :  { %1696 = vmax.xlane.f32.xlu0 %v1695_v62 }
 0x930   :  { %v1698_v14 = vsel %vm1625_vm12, %v1692_v2, -inf  ;;  %v1980_v29 = vsel %vm1625_vm12, %v1974_v3, -inf }
 0x931   :  { %1699 = vmax.xlane.f32.xlu1 %v1698_v14 }
 0x933   :  { %1627 = vmax.xlane.f32.xlu0 %v1626_v16 }
 0x935   :  { %1630 = vmax.xlane.f32.xlu1 %v1629_v21 }
 0x937   :  { %1860 = vmax.xlane.f32.xlu0 %v1859_v25  ;;  %v6195_v25 = vld [vmem:[%s7883_s21 + $0x8] sm:$0xff]  }
 0x939   :  { %1863 = vmax.xlane.f32.xlu1 %v1862_v27  ;;  %v6197_v27 = vld [vmem:[%s7883_s21 + $0x18] sm:$0xff]  }
 0x93b   :  { %1978 = vmax.xlane.f32.xlu0 %v1977_v28  ;;  %v6198_v28 = vld [vmem:[%s7883_s21 + $0x20] sm:$0xff]  }
 0x93d   :  { %1981 = vmax.xlane.f32.xlu1 %v1980_v29  ;;  %v6199_v29 = vld [vmem:[%s7883_s21 + $0x28] sm:$0xff]  }
 0x9bc   :  { %v1697_v19 = vpop.xlane.xlu0 %1696 }
 0x9bd   :  { %v1701_v30 = vsub.f32 %v1689_v48, %v1697_v19  ;;  %v6200_v19 = vld [vmem:[%s7883_s21 + $0x30] sm:$0xff]  }
 0x9be   :  { %v1700_v38 = vpop.xlane.xlu1 %1699 }
 0x9bf   :  { %v1703_v47 = vmul.f32 1.442695, %v1701_v30  ;;  %v1702_v57 = vsub.f32 %v1692_v2, %v1700_v38 }
 0x9c0   :  { %v1628_v31 = vpop.xlane.xlu0 %1627 }
 0x9c1   :  { %6406 = vpow2.f32 %v1703_v47  ;;  %v1705_v32 = vmul.f32 1.442695, %v1702_v57  ;;  %v1632_v33 = vsub.f32 %v1619_v0, %v1628_v31  ;;  %v1649_v31 = vmul.f32 %v7215_v26, %v7002_v8 }
 0x9c2   :  { %v1631_v24 = vpop.xlane.xlu1 %1630 }
 0x9c3   :  { %6408 = vpow2.f32 %v1705_v32  ;;  %v1634_v40 = vmul.f32 1.442695, %v1632_v33  ;;  %v1633_v49 = vsub.f32 %v1622_v63, %v1631_v24 }
 0x9c4   :  { %v1861_v35 = vpop.xlane.xlu0 %1860 }
 0x9c5   :  { %6410 = vpow2.f32 %v1634_v40  ;;  %v1636_v34 = vmul.f32 1.442695, %v1633_v49  ;;  %v1865_v42 = vsub.f32 %v1853_v60, %v1861_v35  ;;  %v1650_v49 = vpack.c.bf16 %v1649_v31, %v1649_v31 }
 0x9c6   :  { %v1864_v50 = vpop.xlane.xlu1 %1863 }
 0x9c7   :  { %6412 = vpow2.f32 %v1636_v34  ;;  %v1867_v59 = vmul.f32 1.442695, %v1865_v42  ;;  %v1866_v36 = vsub.f32 %v1856_v20, %v1864_v50  ;;  %v1772_v34 = vsel %vm1723_vm11, %v1650_v49, 0 }
 0x9c8   :  { %v1979_v37 = vpop.xlane.xlu0 %1978 }
 0x9c9   :  { %6414 = vpow2.f32 %v1867_v59  ;;  %v1869_v39 = vmul.f32 1.442695, %v1866_v36  ;;  %v1983_v43 = vsub.f32 %v1971_v23, %v1979_v37  ;;  %v6194_v23 = vld [vmem:[%s7883_s21] sm:$0xff]   ;;  %v1882_v36 = vmul.f32 %v7215_v26, %v7012_v12 }
 0x9ca   :  { %v1982_v44 = vpop.xlane.xlu1 %1981  ;;  %5790 = vmatpush3.bf16.msra.mxu0 %v6194_v23 }
 0x9cb   :  { %v6407_v45 = vpop.eup %6406  ;;  %6416 = vpow2.f32 %v1869_v39  ;;  %v1985_v46 = vmul.f32 1.442695, %v1983_v43  ;;  %v1984_v48 = vsub.f32 %v1974_v3, %v1982_v44  ;;  %5791 = vmatprep.subr.bf16.mxu0 %v6642_v1  ;;  %v6196_v3 = vld [vmem:[%s7883_s21 + $0x10] sm:$0xff]   ;;  %v1883_v44 = vpack.c.bf16 %v1882_v36, %v1882_v36  ;;  %v6210_v36 = vld [vmem:[%s7885_s29 + $0x24] ss:$8 sps:$4 sm:$0xff]  }
 0x9cc   :  { %v1707_v51 = vsel %vm1625_vm12, %v6407_v45, 0.0 }
 0x9cd   :  { %v6409_v52 = vpop.eup %6408  ;;  %6418 = vpow2.f32 %v1985_v46  ;;  %v1987_v55 = vmul.f32 1.442695, %v1984_v48  ;;  %1708 = vadd.xlane.f32.xlu0 %v1707_v51  ;;  %v1888_v46 = vsel %vm1723_vm11, %v1883_v44, 0  ;;  %v6216_v44 = vld [vmem:[%s7885_s29 + $0x44] ss:$8 sps:$4 sm:$0xff]  }
 0x9ce   :  { %v1710_v56 = vsel %vm1625_vm12, %v6409_v52, 0.0  ;;  %5792 = vmatpush3.bf16.msra.mxu0 %v6195_v25 }
 0x9cf   :  { %v7251_v61 = vpop.eup %6410  ;;  %6420 = vpow2.f32 %v1987_v55  ;;  %1711 = vadd.xlane.f32.xlu1 %v1710_v56  ;;  %5793 = vmatprep.subr.bf16.mxu0 %v6642_v1  ;;  %v2000_v55 = vmul.f32 %v7215_v26, %v7015_v13 }
 0x9d0   :  { %v1638_v0 = vsel %vm1625_vm12, %v7251_v61, 0.0 }
 0x9d1   :  { %v7255_v2 = vpop.eup %6412  ;;  %1639 = vadd.xlane.f32.xlu0 %v1638_v0 }
 0x9d2   :  { %v1641_v6 = vsel %vm1625_vm12, %v7255_v2, 0.0  ;;  %5794 = vmatpush3.bf16.msra.mxu0 %v6196_v3 }
 0x9d3   :  { %v7259_v10 = vpop.eup %6414  ;;  %1642 = vadd.xlane.f32.xlu1 %v1641_v6  ;;  %5795 = vmatprep.subr.bf16.mxu0 %v6642_v1 }
 0x9d4   :  { %v1871_v62 = vsel %vm1625_vm12, %v7259_v10, 0.0 }
 0x9d5   :  { %v7263_v63 = vpop.eup %6416  ;;  %1872 = vadd.xlane.f32.xlu0 %v1871_v62 }
 0x9d6   :  { %v1874_v14 = vsel %vm1625_vm12, %v7263_v63, 0.0  ;;  %5796 = vmatpush3.bf16.msra.mxu0 %v6197_v27 }
 0x9d7   :  { %v7267_v60 = vpop.eup %6418  ;;  %1875 = vadd.xlane.f32.xlu1 %v1874_v14  ;;  %5797 = vmatprep.subr.bf16.mxu0 %v6642_v1 }
 0x9d8   :  { %v1989_v16 = vsel %vm1625_vm12, %v7267_v60, 0.0 }
 0x9d9   :  { %v7271_v20 = vpop.eup %6420  ;;  %1990 = vadd.xlane.f32.xlu0 %v1989_v16 }
 0x9da   :  { %v1992_v21 = vsel %vm1625_vm12, %v7271_v20, 0.0  ;;  %5798 = vmatpush3.bf16.msra.mxu0 %v6198_v28 }
 0x9db   :  { %1993 = vadd.xlane.f32.xlu1 %v1992_v21  ;;  %5799 = vmatprep.subr.bf16.mxu0 %v6642_v1 }
 0x9de   :  { %5800 = vmatpush3.bf16.msra.mxu0 %v6199_v29  ;;  %v5219_v29 = vld [vmem:[%s7884_s25] ss:$0 sm:$0xff]  ;;  %s7914_s25 = sld [smem:[#allocation38_spill]] }
 0x9df   :  { %5801 = vmatprep.subr.bf16.mxu0 %v6642_v1 }
 0x9e2   :  { %5802 = vmatpush3.bf16.msra.mxu0 %v6200_v19 }
 0x9e3   :  { %5803 = vmatprep.subr.bf16.mxu0 %v6642_v1 }
 0xa5a   :  { %v1709_v30 = vpop.xlane.xlu0 %1708 }
 0xa5b   :  { %6422 = vrcp.f32 %v1709_v30 }
 0xa5c   :  { %v1712_v38 = vpop.xlane.xlu1 %1711 }
 0xa5d   :  { %6424 = vrcp.f32 %v1712_v38 }
 0xa5e   :  { %v1640_v57 = vpop.xlane.xlu0 %1639 }
 0xa60   :  { %v1643_v47 = vpop.xlane.xlu1 %1642 }
 0xa61   :  { %6426 = vrcp.f32 %v1643_v47 }
 0xa62   :  { %6428 = vrcp.f32 %v1640_v57  ;;  %v1873_v59 = vpop.xlane.xlu0 %1872 }
 0xa64   :  { %v1876_v42 = vpop.xlane.xlu1 %1875 }
 0xa65   :  { %v6423_v32 = vpop.eup %6422  ;;  %6430 = vrcp.f32 %v1876_v42 }
 0xa66   :  { %v1715_v24 = vmul.f32 %v6423_v32, %v6407_v45  ;;  %6432 = vrcp.f32 %v1873_v59  ;;  %v6202_v32 = vld [vmem:[%s7885_s29] ss:$8 sps:$4 sm:$0xff]  }
 0xa67   :  { %v6425_v33 = vpop.eup %6424 }
 0xa68   :  { %v1716_v40 = vmul.f32 %v6425_v33, %v6409_v52  ;;  %v1994_v48 = vpop.xlane.xlu1 %1993  ;;  %v1991_v52 = vpop.xlane.xlu0 %1990  ;;  %v6204_v33 = vld [vmem:[%s7885_s29 + $0x4] ss:$8 sps:$4 sm:$0xff]  }
 0xa69   :  { %6434 = vrcp.f32 %v1994_v48  ;;  %v6217_v48 = vld [vmem:[%s7885_s29 + $0x50] ss:$8 sps:$4 sm:$0xff]  }
 0xa6a   :  { %v1717_v35 = vpack.c.bf16 %v1716_v40, %v1715_v24  ;;  %6436 = vrcp.f32 %v1991_v52  ;;  %v6207_v24 = vld [vmem:[%s7885_s29 + $0x14] ss:$8 sps:$4 sm:$0xff]   ;;  %v6205_v40 = vld [vmem:[%s7885_s29 + $0x10] ss:$8 sps:$4 sm:$0xff]   ;;  %v6220_v52 = vld [vmem:[%s7885_s29 + $0x60] ss:$8 sps:$4 sm:$0xff]  }
 0xa6b   :  { %v6427_v50 = vpop.eup %6426 }
 0xa6c   :  { %5756 = vmatmul.mubr.msk.bf16.vlgmr.msra.gmra.mrb[32].mxu1 %vm1625_vm12, %v1717_v35  ;;  %v6429_v37 = vpop.eup %6428  ;;  %v1647_v39 = vmul.f32 %v6427_v50, %v7255_v2  ;;  %v2001_v2 = vpack.c.bf16 %v2000_v55, %v2000_v55  ;;  %v6225_v55 = vld [vmem:[%s7885_s29 + $0x74] ss:$8 sps:$4 sm:$0xff]  }
 0xa6d   :  { %5760 = vmatpush3.bf16.msra.mxu1 %v1772_v34  ;;  %5761 = vmatprep.mubr.msk.bf16.mxu1 %vm6643_vm0, %v6642_v1  ;;  %v1646_v43 = vmul.f32 %v6429_v37, %v7251_v61  ;;  %v6208_v37 = vld [vmem:[%s7885_s29 + $0x20] ss:$8 sps:$4 sm:$0xff]  }
 0xa6e   :  { %5771 = vmatprep.subr.bf16.mxu1 %v6642_v1  ;;  %v2006_v62 = vsel %vm1723_vm11, %v2001_v2, 0 }
 0xa6f   :  { %v1648_v45 = vpack.c.bf16 %v1647_v39, %v1646_v43  ;;  %v6431_v51 = vpop.eup %6430  ;;  %v6213_v39 = vld [vmem:[%s7885_s29 + $0x34] ss:$8 sps:$4 sm:$0xff]   ;;  %v6211_v43 = vld [vmem:[%s7885_s29 + $0x30] ss:$8 sps:$4 sm:$0xff]  }
 0xa70   :  { %v6433_v56 = vpop.eup %6432  ;;  %v1880_v61 = vmul.f32 %v6431_v51, %v7263_v63  ;;  %v6222_v51 = vld [vmem:[%s7885_s29 + $0x64] ss:$8 sps:$4 sm:$0xff]  }
 0xa71   :  { %v1879_v0 = vmul.f32 %v6433_v56, %v7259_v10  ;;  %v6201_v10 = vld [vmem:[%s7883_s21 + $0x38] sm:$0xff]   ;;  %s7913_s21 = sld [smem:[#allocation32_spill]] }
 0xa72   :  { %5804 = vmatpush3.bf16.msra.mxu0 %v6201_v10  ;;  %v6223_v56 = vld [vmem:[%s7885_s29 + $0x70] ss:$8 sps:$4 sm:$0xff]  }
 0xa73   :  { %v1881_v6 = vpack.c.bf16 %v1880_v61, %v1879_v0  ;;  %v6435_v26 = vpop.eup %6434 }
 0xa74   :  { %v6437_v14 = vpop.eup %6436  ;;  %v1998_v16 = vmul.f32 %v6435_v26, %v7271_v20 }
 0xa75   :  { %v1997_v63 = vmul.f32 %v6437_v14, %v7267_v60 }
 0xa77   :  { %v1999_v21 = vpack.c.bf16 %v1998_v16, %v1997_v63  ;;  %v5228_v16 = vld [vmem:[%s7886_s3] ss:$0 sm:$0xff] }
 0xa78   :  { %5762 = vmatmul.mubr.msk.bf16.vlgmr.msra.gmra.mrb[32].mxu1 %vm1625_vm12, %v1648_v45  ;;  %v6214_v45 = vld [vmem:[%s7885_s29 + $0x40] ss:$8 sps:$4 sm:$0xff]  }
 0xa79   :  { %5772 = vmatpush3.bf16.msra.mxu1 %v1888_v46  ;;  %5773 = vmatprep.mubr.msk.bf16.mxu1 %vm6643_vm0, %v6642_v1  ;;  %v6219_v46 = vld [vmem:[%s7885_s29 + $0x54] ss:$8 sps:$4 sm:$0xff]   ;;  %s6646_s29 = smov [#allocation2]  }
 0xa7a   :  { %5783 = vmatprep.subr.bf16.mxu1 %v6642_v1  ;;  %s5075_s3 = sshll.u32 %s6646_s29, 4  ;;  %s5076_s3 = int_to_ptr.vmem [resolvable:$true] %s5075_s3 }
 0xa7b   :  { %p6571_p1 = scmp.lt.s32.totalorder %s5076_s3, %s5076_s3 }
 0xa84   :  { %5774 = vmatmul.mubr.msk.bf16.vlgmr.msra.gmra.mrb[32].mxu1 %vm1625_vm12, %v1881_v6 }
 0xa85   :  { %5784 = vmatpush3.bf16.msra.mxu1 %v2006_v62  ;;  %5785 = vmatprep.mubr.msk.bf16.mxu1 %vm6643_vm0, %v6642_v1 }
 0xa86   :  { %2315 = vmatprep.subr.bf16.mxu1 %v6204_v33  ;;  %v6235_v33 = vld [vmem:[%s7888_s14 + $0x20] sm:$0xff]  }
 0xa90   :  { %5786 = vmatmul.mubr.msk.bf16.vlgmr.msra.gmra.mrb[32].mxu1 %vm1625_vm12, %v1999_v21 }
 0xa91   :  { %2347 = vmatprep.mubr.bf16.mxu1 %v6644_v41  ;;  %2316 = vmatpush1.bf16.msra.mxu1 %v6202_v32  ;;  %v6234_v32 = vld [vmem:[%s7888_s14 + $0x60] sm:$0xff]  }
 0xa92   :  { %2317 = vmatprep.subr.bf16.mxu1 %v6207_v24  ;;  %v6236_v24 = vld [vmem:[%s7888_s14 + $0x68] sm:$0xff]  }
 0xa95   :  { %2318 = vmatpush1.bf16.msra.mxu1 %v6205_v40  ;;  %v6237_v40 = vld [vmem:[%s7888_s14 + $0x28] sm:$0xff]  }
 0xa96   :  { %2319 = vmatprep.subr.bf16.mxu1 %v6210_v36 }
 0xa99   :  { %2320 = vmatpush1.bf16.msra.mxu1 %v6208_v37 }
 0xa9a   :  { %2321 = vmatprep.subr.bf16.mxu1 %v6213_v39 }
 0xa9d   :  { %2322 = vmatpush1.bf16.msra.mxu1 %v6211_v43 }
 0xa9e   :  { %2323 = vmatprep.subr.bf16.mxu1 %v6216_v44 }
 0xaa1   :  { %2324 = vmatpush1.bf16.msra.mxu1 %v6214_v45 }
 0xaa2   :  { %2325 = vmatprep.subr.bf16.mxu1 %v6219_v46 }
 0xaa5   :  { %2326 = vmatpush1.bf16.msra.mxu1 %v6217_v48 }
 0xaa6   :  { %2327 = vmatprep.subr.bf16.mxu1 %v6222_v51 }
 0xaa9   :  { %2328 = vmatpush1.bf16.msra.mxu1 %v6220_v52 }
 0xaaa   :  { %2329 = vmatprep.subr.bf16.mxu1 %v6225_v55 }
 0xaad   :  { %2330 = vmatpush1.bf16.msra.mxu1 %v6223_v56 }
 0xb63   :  { %v2042_v23 = vpop.f32.mrb[32].mxu1 }
 0xb64   :  { %v5787_v25 = vpop.f32.mrb[33].mxu1 }
 0xb65   :  { %v2045_v3 = vpop.f32.mrb[34].mxu1  ;;  %v5229_v25 = vld [vmem:[%s7887_s8] ss:$0 sm:$0xff]  ;;  %s6566_s8 = scalar_lea.vmem %s5076_s3, 256 }
 0xb66   :  { %v2051_v27 = vpack.c.bf16 %v2045_v3, %v2042_v23  ;;  %v5788_v28 = vpop.f32.mrb[35].mxu1  ;;  %p6567_p0 = scmp.ne.s32.totalorder %s5076_s3, %s6566_s8  ;;  %p6572_p2 = scmp.lt.s32.totalorder %s6566_s8, %s6566_s8 }
 0xb68   :  { %5806 = vmatmul.mubr.bf16.vlgmr.msra.gmra.mrb[32].mxu0 %v2051_v27  ;;  %p6573_p3 = por %p6572_p2, %p6571_p1 }
 0xb6a   :  { %p6574_p4 = pnand %p6573_p3, %p6567_p0 }
 0xc3b   :  { %v2157_v20 = vpop.f32.mrb[32].mxu0 }
 0xc3c   :  { %v2158_v60 = vadd.f32 %v5219_v29, %v2157_v20  ;;  %v5807_v19 = vpop.f32.mrb[33].mxu0  ;;  %v6226_v20 = vld [vmem:[%s7888_s14 + $0x40] sm:$0xff]  }
 0xc3d   :  { %v2160_v30 = vpop.f32.mrb[34].mxu0  ;;  %5484 = vmatprep.subr.bf16.mxu0 %v6226_v20  ;;  %v6228_v19 = vld [vmem:[%s7888_s14 + $0x48] sm:$0xff]  }
 0xc3e   :  { %v2161_v38 = vadd.f32 %v5219_v29, %v2160_v30  ;;  %v5808_v47 = vpop.f32.mrb[35].mxu0  ;;  %v2164_v57 = vadd.f32 %v2158_v60, %v7201_v53  ;;  %v6227_v60 = vld [vmem:[%s7888_s14] sm:$0xff]   ;;  %v6229_v30 = vld [vmem:[%s7888_s14 + $0x8] sm:$0xff]  }
 0xc3f   :  { %5485 = vmatpush3.bf16.msra.mxu0 %v6227_v60  ;;  %v6231_v47 = vld [vmem:[%s7888_s14 + $0x10] sm:$0xff]  }
 0xc40   :  { %2166 = vadd.xlane.f32.xlu0 %v2164_v57  ;;  %v2165_v31 = vadd.f32 %v2161_v38, %v7203_v54  ;;  %5486 = vmatprep.subr.bf16.mxu0 %v6228_v19  ;;  %v6230_v38 = vld [vmem:[%s7888_s14 + $0x50] sm:$0xff]  }
 0xc42   :  { %2168 = vadd.xlane.f32.xlu1 %v2165_v31 }
 0xc43   :  { %5487 = vmatpush3.bf16.msra.mxu0 %v6229_v30 }
 0xc44   :  { %5488 = vmatprep.subr.bf16.mxu0 %v6230_v38 }
 0xc47   :  { %5489 = vmatpush3.bf16.msra.mxu0 %v6231_v47 }
 0xccd   :  { %v2167_v49 = vpop.xlane.xlu0 %2166 }
 0xcce   :  { %v2170_v35 = vmul.f32 0.0078125, %v2167_v49  ;;  %v6238_v49 = vld [vmem:[%s7888_s14 + $0x70] sm:$0xff]  }
 0xccf   :  { %v2169_v34 = vpop.xlane.xlu1 %2168 }
 0xcd0   :  { %v2172_v53 = vsub.f32 %v2164_v57, %v2170_v35  ;;  %v2171_v54 = vmul.f32 0.0078125, %v2169_v34  ;;  %v6232_v57 = vld [vmem:[%s7888_s14 + $0x58] sm:$0xff]   ;;  %v6239_v35 = vld [vmem:[%s7888_s14 + $0x30] sm:$0xff]  }
 0xcd1   :  { %5490 = vmatprep.subr.bf16.mxu0 %v6232_v57  ;;  %v6240_v34 = vld [vmem:[%s7888_s14 + $0x78] sm:$0xff]  }
 0xcd2   :  { %v2173_v42 = vsub.f32 %v2165_v31, %v2171_v54  ;;  %v2174_v50 = vmul.f32 %v2172_v53, %v2172_v53  ;;  %v6233_v31 = vld [vmem:[%s7888_s14 + $0x18] sm:$0xff]   ;;  %v2223_v54 = vld [vmem:[%s7889_s19] sm:$0x3] }
 0xcd3   :  { %5491 = vmatpush3.bf16.msra.mxu0 %v6233_v31 }
 0xcd4   :  { %2176 = vadd.xlane.f32.xlu0 %v2174_v50  ;;  %v2175_v59 = vmul.f32 %v2173_v42, %v2173_v42  ;;  %5492 = vmatprep.subr.bf16.mxu0 %v6234_v32  ;;  %v2232_v50 = vrot.slane %v2223_v54, %v7005_v9 }
 0xcd6   :  { %2178 = vadd.xlane.f32.xlu1 %v2175_v59 }
 0xcd7   :  { %5493 = vmatpush3.bf16.msra.mxu0 %v6235_v33 }
 0xcd8   :  { %5494 = vmatprep.subr.bf16.mxu0 %v6236_v24 }
 0xcdb   :  { %5495 = vmatpush3.bf16.msra.mxu0 %v6237_v40 }
 0xcdc   :  { %5496 = vmatprep.subr.bf16.mxu0 %v6238_v49 }
 0xcdf   :  { %5497 = vmatpush3.bf16.msra.mxu0 %v6239_v35 }
 0xce0   :  { %5498 = vmatprep.subr.bf16.mxu0 %v6240_v34 }
 0xd61   :  { %v2177_v61 = vpop.xlane.xlu0 %2176 }
 0xd62   :  { %v2180_v0 = vmul.f32 0.0078125, %v2177_v61 }
 0xd63   :  { %v2179_v2 = vpop.xlane.xlu1 %2178 }
 0xd64   :  { %v2182_v6 = vadd.f32 1e-05, %v2180_v0  ;;  %v2181_v62 = vmul.f32 0.0078125, %v2179_v2 }
 0xd66   :  { %6438 = vrsqrt.f32 %v2182_v6  ;;  %v2183_v26 = vadd.f32 1e-05, %v2181_v62 }
 0xd68   :  { %6440 = vrsqrt.f32 %v2183_v26 }
 0xd70   :  { %v6439_v14 = vpop.eup %6438 }
 0xd71   :  { %v2186_v63 = vmul.f32 %v6439_v14, %v2172_v53  ;;  %v6241_v53 = vld [vmem:[%s7888_s14 + $0x38] sm:$0xff]  }
 0xd72   :  { %v6441_v21 = vpop.eup %6440  ;;  %5499 = vmatpush3.bf16.msra.mxu0 %v6241_v53 }
 0xd73   :  { %v2187_v10 = vmul.f32 %v6441_v21, %v2173_v42  ;;  %v2195_v23 = vmul.f32 %v5228_v16, %v2186_v63  ;;  %5809 = vmatprep.subr.bf16.mxu0 %v6642_v1  ;;  %v2228_v42 = vrot.slane %v2223_v54, %v6997_v5 }
 0xd75   :  { %v2196_v3 = vmul.f32 %v5228_v16, %v2187_v10  ;;  %v7339_v27 = vadd.f32 %v5229_v25, %v2195_v23 }
 0xd77   :  { %v7341_v28 = vadd.f32 %v5229_v25, %v2196_v3 }
 0xd79   :  { %v2206_v29 = vpack.c.bf16 %v7341_v28, %v7339_v27 }
 0xd7b   :  { %2348 = vmatmul.mubr.bf16.vlgmr.msra.gmra.mrb[36].mxu1 %v2206_v29 }
 0xd7c   :  { %2896 = vmatprep.mubr.bf16.mxu1 %v6644_v41 }
 0xe4e   :  { %v2349_v59 = vpop.f32.mrb[36].mxu1 }
 0xe4f   :  { %v7366_v36 = vadd.f32 %v2349_v59, %v2228_v42  ;;  %v2351_v37 = vpop.f32.mrb[37].mxu1 }
 0xe50   :  { %v7368_v39 = vadd.f32 %v2351_v37, %v2232_v50  ;;  %v2353_v43 = vpop.f32.mrb[38].mxu1 }
 0xe51   :  { %v2358_v44 = vand.u32 2147483647, %v7366_v36  ;;  %v7371_v45 = vadd.f32 %v2353_v43, %v2228_v42  ;;  %v2355_v46 = vpop.f32.mrb[39].mxu1  ;;  %vm2366_vm13 = vcmp.ge.f32.partialorder %v7366_v36, 0.0 }
 0xe52   :  { %v2359_v48 = vand.u32 2147483647, %v7368_v39  ;;  %v7375_v56 = vadd.f32 %v2355_v46, %v2232_v50  ;;  %vm2367_vm14 = vcmp.ge.f32.partialorder %v7368_v39, 0.0 }
 0xe53   :  { %v2362_v51 = vmul.f32 0.70710677, %v2358_v44  ;;  %v2360_v52 = vand.u32 2147483647, %v7371_v45  ;;  %vm2368_vm15 = vcmp.ge.f32.partialorder %v7371_v45, 0.0 }
 0xe54   :  { %v2363_v55 = vmul.f32 0.70710677, %v2359_v48  ;;  %v2361_v6 = vand.u32 2147483647, %v7375_v56  ;;  %vm2369_vm1 = vcmp.ge.f32.partialorder %v7375_v56, 0.0 }
 0xe55   :  { %v2374_v61 = vmul.f32 0.3275911, %v2362_v51  ;;  %v2364_v0 = vmul.f32 0.70710677, %v2360_v52  ;;  %v2426_v23 = vsub.f32 0.0, %v2362_v51 }
 0xe56   :  { %v2375_v2 = vmul.f32 0.3275911, %v2363_v55  ;;  %v2365_v16 = vmul.f32 0.70710677, %v2361_v6  ;;  %v2427_v25 = vsub.f32 0.0, %v2363_v55 }
 0xe57   :  { %v2378_v62 = vadd.f32 1.0, %v2374_v61  ;;  %v2376_v26 = vmul.f32 0.3275911, %v2364_v0  ;;  %v2430_v29 = vmul.f32 %v2426_v23, %v2362_v51  ;;  %v2428_v20 = vsub.f32 0.0, %v2364_v0 }
 0xe58   :  { %v2379_v14 = vadd.f32 1.0, %v2375_v2  ;;  %v2377_v21 = vmul.f32 0.3275911, %v2365_v16  ;;  %v2431_v30 = vmul.f32 %v2427_v25, %v2363_v55  ;;  %v2429_v47 = vsub.f32 0.0, %v2365_v16 }
 0xe59   :  { %6442 = vrcp.f32 %v2378_v62  ;;  %v2380_v63 = vadd.f32 1.0, %v2376_v26  ;;  %v2434_v32 = vmul.f32 1.442695, %v2430_v29  ;;  %v2432_v24 = vmul.f32 %v2428_v20, %v2364_v0 }
 0xe5a   :  { %6444 = vrcp.f32 %v2379_v14  ;;  %v2381_v10 = vadd.f32 1.0, %v2377_v21  ;;  %v2436_v49 = vmul.f32 1.442695, %v2431_v30  ;;  %v2433_v54 = vmul.f32 %v2429_v47, %v2365_v16 }
 0xe5b   :  { %6446 = vrcp.f32 %v2380_v63  ;;  %v2438_v43 = vmul.f32 1.442695, %v2432_v24 }
 0xe5c   :  { %6448 = vrcp.f32 %v2381_v10  ;;  %v2440_v52 = vmul.f32 1.442695, %v2433_v54 }
 0xe5d   :  { %6450 = vpow2.f32 %v2434_v32 }
 0xe5e   :  { %6452 = vpow2.f32 %v2436_v49 }
 0xe5f   :  { %6454 = vpow2.f32 %v2438_v43 }
 0xe60   :  { %6456 = vpow2.f32 %v2440_v52  ;;  %v2454_v52 = vmul.f32 0.5, %v7366_v36 }
 0xe63   :  { %v6443_v3 = vpop.eup %6442 }
 0xe64   :  { %v6445_v60 = vpop.eup %6444  ;;  %v2390_v19 = vmul.f32 1.0614054, %v6443_v3 }
 0xe65   :  { %v2391_v38 = vmul.f32 1.0614054, %v6445_v60  ;;  %v6447_v31 = vpop.eup %6446 }
 0xe66   :  { %v5246_v57 = vadd.f32 -1.4531521, %v2390_v19  ;;  %v2392_v35 = vmul.f32 1.0614054, %v6447_v31  ;;  %v6449_v34 = vpop.eup %6448 }
 0xe67   :  { %v5247_v33 = vadd.f32 -1.4531521, %v2391_v38  ;;  %v2393_v59 = vmul.f32 1.0614054, %v6449_v34  ;;  %v6451_v20 = vpop.eup %6450 }
 0xe68   :  { %v2398_v40 = vmul.f32 %v6443_v3, %v5246_v57  ;;  %v5248_v50 = vadd.f32 -1.4531521, %v2392_v35  ;;  %v6453_v30 = vpop.eup %6452  ;;  %v6645_v35 = vmov -1.0  }
 0xe69   :  { %v2399_v53 = vmul.f32 %v6445_v60, %v5247_v33  ;;  %v5249_v48 = vadd.f32 -1.4531521, %v2393_v59  ;;  %v6455_v49 = vpop.eup %6454  ;;  %v2371_v59 = vsel %vm2367_vm14, 1.0, %v6645_v35 }
 0xe6a   :  { %v2402_v42 = vadd.f32 1.4214138, %v2398_v40  ;;  %v2400_v46 = vmul.f32 %v6447_v31, %v5248_v50  ;;  %v6457_v50 = vpop.eup %6456 }
 0xe6b   :  { %v2403_v37 = vadd.f32 1.4214138, %v2399_v53  ;;  %v2401_v0 = vmul.f32 %v6449_v34, %v5249_v48 }
 0xe6c   :  { %v2406_v44 = vmul.f32 %v6443_v3, %v2402_v42  ;;  %v2404_v61 = vadd.f32 1.4214138, %v2400_v46 }
 0xe6d   :  { %v2407_v51 = vmul.f32 %v6445_v60, %v2403_v37  ;;  %v2405_v26 = vadd.f32 1.4214138, %v2401_v0 }
 0xe6e   :  { %v5250_v55 = vadd.f32 -0.28449672, %v2406_v44  ;;  %v2408_v62 = vmul.f32 %v6447_v31, %v2404_v61 }
 0xe6f   :  { %v5251_v2 = vadd.f32 -0.28449672, %v2407_v51  ;;  %v2409_v21 = vmul.f32 %v6449_v34, %v2405_v26 }
 0xe70   :  { %v2414_v6 = vmul.f32 %v6443_v3, %v5250_v55  ;;  %v5252_v63 = vadd.f32 -0.28449672, %v2408_v62  ;;  %v2373_v55 = vsel %vm2369_vm1, 1.0, %v6645_v35 }
 0xe71   :  { %v2415_v14 = vmul.f32 %v6445_v60, %v5251_v2  ;;  %v5253_v29 = vadd.f32 -0.28449672, %v2409_v21 }
 0xe72   :  { %v2418_v16 = vadd.f32 0.2548296, %v2414_v6  ;;  %v2416_v25 = vmul.f32 %v6447_v31, %v5252_v63  ;;  %v2455_v6 = vmul.f32 0.5, %v7368_v39  ;;  %v5254_v39 = vld [vmem:[%s7890_s24] ss:$0 sm:$0xff] }
 0xe73   :  { %v2419_v10 = vadd.f32 0.2548296, %v2415_v14  ;;  %v2417_v57 = vmul.f32 %v6449_v34, %v5253_v29  ;;  %v2457_v14 = vmul.f32 0.5, %v7375_v56 }
 0xe74   :  { %v2422_v23 = vmul.f32 %v6443_v3, %v2418_v16  ;;  %v2420_v47 = vadd.f32 0.2548296, %v2416_v25  ;;  %v2370_v3 = vsel %vm2366_vm13, 1.0, %v6645_v35 }
 0xe75   :  { %v2423_v19 = vmul.f32 %v6445_v60, %v2419_v10  ;;  %v2421_v40 = vadd.f32 0.2548296, %v2417_v57  ;;  %v6242_v57 = vld [vmem:[%s7891_s30] ss:$12 sps:$4 sm:$0xff]  }
 0xe76   :  { %v2442_v38 = vmul.f32 %v6451_v20, %v2422_v23  ;;  %v2424_v24 = vmul.f32 %v6447_v31, %v2420_v47  ;;  %v2372_v31 = vsel %vm2368_vm15, 1.0, %v6645_v35 }
 0xe77   :  { %v2443_v32 = vmul.f32 %v6453_v30, %v2423_v19  ;;  %v2425_v42 = vmul.f32 %v6449_v34, %v2421_v40  ;;  %v2456_v34 = vmul.f32 0.5, %v7371_v45  ;;  %v6249_v40 = vld [vmem:[%s7891_s30 + $0x20] ss:$12 sps:$4 sm:$0xff]  }
 0xe78   :  { %v2446_v33 = vsub.f32 1.0, %v2442_v38  ;;  %v2444_v60 = vmul.f32 %v6455_v49, %v2424_v24  ;;  %v6248_v24 = vld [vmem:[%s7891_s30 + $0x1c] ss:$12 sps:$4 sm:$0xff]   ;;  %v6246_v49 = vld [vmem:[%s7891_s30 + $0x18] ss:$12 sps:$4 sm:$0xff]  }
 0xe79   :  { %v2447_v53 = vsub.f32 1.0, %v2443_v32  ;;  %v2445_v44 = vmul.f32 %v6457_v50, %v2425_v42  ;;  %v6244_v32 = vld [vmem:[%s7891_s30 + $0x4] ss:$12 sps:$4 sm:$0xff]  }
 0xe7a   :  { %v2450_v54 = vmul.f32 %v2446_v33, %v2370_v3  ;;  %v2448_v43 = vsub.f32 1.0, %v2444_v60  ;;  %v6245_v33 = vld [vmem:[%s7891_s30 + $0x8] ss:$12 sps:$4 sm:$0xff]   ;;  %2864 = vmatprep.subr.bf16.mxu1 %v6244_v32  ;;  %v2719_v32 = vld [vmem:[%s7894_s20] sm:$0x7] }
 0xe7b   :  { %v2451_v37 = vmul.f32 %v2447_v53, %v2371_v59  ;;  %v2449_v51 = vsub.f32 1.0, %v2445_v44  ;;  %2865 = vmatpush1.bf16.msra.mxu1 %v6242_v57  ;;  %v6252_v59 = vld [vmem:[%s7891_s30 + $0x34] ss:$12 sps:$4 sm:$0xff]   ;;  %v6256_v44 = vld [vmem:[%s7891_s30 + $0x4c] ss:$12 sps:$4 sm:$0xff]  }
 0xe7c   :  { %v2458_v46 = vadd.f32 1.0, %v2450_v54  ;;  %v2452_v48 = vmul.f32 %v2448_v43, %v2372_v31  ;;  %2866 = vmatprep.subr.bf16.mxu1 %v6248_v24  ;;  %v6253_v43 = vld [vmem:[%s7891_s30 + $0x38] ss:$12 sps:$4 sm:$0xff]   ;;  %v6254_v31 = vld [vmem:[%s7891_s30 + $0x48] ss:$12 sps:$4 sm:$0xff]   ;;  %v2732_v24 = vrot.slane %v2719_v32, %v460_v7 }
 0xe7d   :  { %v2459_v61 = vadd.f32 1.0, %v2451_v37  ;;  %v2453_v2 = vmul.f32 %v2449_v51, %v2373_v55  ;;  %v6250_v37 = vld [vmem:[%s7891_s30 + $0x30] ss:$12 sps:$4 sm:$0xff]   ;;  %v6258_v51 = vld [vmem:[%s7891_s30 + $0x60] ss:$12 sps:$4 sm:$0xff]  }
 0xe7e   :  { %v2460_v0 = vadd.f32 1.0, %v2452_v48  ;;  %v2462_v62 = vmul.f32 %v2458_v46, %v2454_v52  ;;  %v6257_v46 = vld [vmem:[%s7891_s30 + $0x50] ss:$12 sps:$4 sm:$0xff]   ;;  %v6261_v52 = vld [vmem:[%s7891_s30 + $0x68] ss:$12 sps:$4 sm:$0xff]  }
 0xe7f   :  { %v2461_v16 = vadd.f32 1.0, %v2453_v2  ;;  %v2463_v63 = vmul.f32 %v2459_v61, %v2455_v6  ;;  %2867 = vmatpush1.bf16.msra.mxu1 %v6246_v49  ;;  %v6260_v48 = vld [vmem:[%s7891_s30 + $0x64] ss:$12 sps:$4 sm:$0xff]   ;;  %v6264_v55 = vld [vmem:[%s7891_s30 + $0x7c] ss:$12 sps:$4 sm:$0xff]  }
 0xe80   :  { %v2464_v26 = vmul.f32 %v2460_v0, %v2456_v34  ;;  %2868 = vmatprep.subr.bf16.mxu1 %v6252_v59  ;;  %v6262_v61 = vld [vmem:[%s7891_s30 + $0x78] ss:$12 sps:$4 sm:$0xff]   ;;  %v6265_v34 = vld [vmem:[%s7891_s30 + $0x80] ss:$12 sps:$4 sm:$0xff]   ;;  %v6266_v2 = vld [vmem:[%s7891_s30 + $0x90] ss:$12 sps:$4 sm:$0xff]  }
 0xe81   :  { %v2465_v21 = vmul.f32 %v2461_v16, %v2457_v14  ;;  %v6268_v0 = vld [vmem:[%s7891_s30 + $0x94] ss:$12 sps:$4 sm:$0xff]   ;;  %v6269_v6 = vld [vmem:[%s7891_s30 + $0x98] ss:$12 sps:$4 sm:$0xff]   ;;  %v6273_v14 = vld [vmem:[%s7891_s30 + $0xb0] ss:$12 sps:$4 sm:$0xff]  }
 0xe82   :  { %v2466_v10 = vpack.c.bf16 %v2464_v26, %v2462_v62  ;;  %v6272_v62 = vld [vmem:[%s7891_s30 + $0xac] ss:$12 sps:$4 sm:$0xff]   ;;  %v6270_v26 = vld [vmem:[%s7891_s30 + $0xa8] ss:$12 sps:$4 sm:$0xff]  }
 0xe83   :  { %v2467_v23 = vpack.c.bf16 %v2465_v21, %v2463_v63  ;;  %2869 = vmatpush1.bf16.msra.mxu1 %v6250_v37 }
 0xe84   :  { %2870 = vmatprep.subr.bf16.mxu1 %v6256_v44 }
 0xe85   :  { %2635 = vmatprep.mubr.bf16.mxu0 %v2467_v23 }
 0xe86   :  { %2636 = vmatmul.mubr.bf16.vlgmr.msra.gmra.mrb[36].mxu0 %v2466_v10 }
 0xe87   :  { %5825 = vmatprep.mubr.msk.bf16.mxu0 %vm6643_vm0, %v6642_v1  ;;  %5810 = vmatpush3.bf16.msra.mxu0 %v6245_v33  ;;  %v2724_v33 = vrot.slane %v2719_v32, %v6997_v5 }
 0xe88   :  { %5811 = vmatprep.subr.bf16.mxu0 %v6642_v1  ;;  %2871 = vmatpush1.bf16.msra.mxu1 %v6254_v31 }
 0xe89   :  { %2872 = vmatprep.subr.bf16.mxu1 %v6260_v48 }
 0xe8b   :  { %5812 = vmatpush3.bf16.msra.mxu0 %v6249_v40 }
 0xe8c   :  { %5813 = vmatprep.subr.bf16.mxu0 %v6642_v1  ;;  %2873 = vmatpush1.bf16.msra.mxu1 %v6258_v51 }
 0xe8d   :  { %2874 = vmatprep.subr.bf16.mxu1 %v6264_v55 }
 0xe8f   :  { %5814 = vmatpush3.bf16.msra.mxu0 %v6253_v43 }
 0xe90   :  { %5815 = vmatprep.subr.bf16.mxu0 %v6642_v1  ;;  %2875 = vmatpush1.bf16.msra.mxu1 %v6262_v61 }
 0xe91   :  { %2876 = vmatprep.subr.bf16.mxu1 %v6268_v0 }
 0xe93   :  { %5816 = vmatpush3.bf16.msra.mxu0 %v6257_v46 }
 0xe94   :  { %5817 = vmatprep.subr.bf16.mxu0 %v6642_v1  ;;  %2877 = vmatpush1.bf16.msra.mxu1 %v6266_v2 }
 0xe95   :  { %2878 = vmatprep.subr.bf16.mxu1 %v6272_v62 }
 0xe97   :  { %5818 = vmatpush3.bf16.msra.mxu0 %v6261_v52 }
 0xe98   :  { %5819 = vmatprep.subr.bf16.mxu0 %v6642_v1  ;;  %2879 = vmatpush1.bf16.msra.mxu1 %v6270_v26 }
 0xe99   :  { %5829 = vmatprep.subr.bf16.mxu1 %v6642_v1 }
 0xe9b   :  { %5820 = vmatpush3.bf16.msra.mxu0 %v6265_v34 }
 0xe9c   :  { %5821 = vmatprep.subr.bf16.mxu0 %v6642_v1 }
 0xe9f   :  { %5822 = vmatpush3.bf16.msra.mxu0 %v6269_v6 }
 0xea0   :  { %5823 = vmatprep.subr.bf16.mxu0 %v6642_v1 }
 0xea3   :  { %5824 = vmatpush3.bf16.msra.mxu0 %v6273_v14 }
 0xea4   :  { %5853 = vmatprep.subr.bf16.mxu0 %v6642_v1 }
 0xf59   :  { %v5500_v36 = vpop.f32.mrb[36].mxu0 }
 0xf5a   :  { %v5501_v45 = vpop.f32.mrb[37].mxu0 }
 0xf5b   :  { %v5502_v25 = vadd.f32 %v5501_v45, %v5500_v36  ;;  %v5503_v56 = vpop.f32.mrb[38].mxu0  ;;  %v5271_v45 = vld [vmem:[%s7892_s6] ss:$0 sm:$0xff] }
 0xf5c   :  { %v5504_v29 = vpop.f32.mrb[39].mxu0 }
 0xf5d   :  { %v2638_v20 = vadd.f32 %v5502_v25, %v5254_v39  ;;  %v5505_v19 = vadd.f32 %v5504_v29, %v5503_v56 }
 0xf5f   :  { %v2641_v30 = vadd.f32 %v5505_v19, %v5254_v39  ;;  %v2644_v38 = vadd.f32 %v2638_v20, %v7339_v27  ;;  %v5272_v19 = vld [vmem:[%s7893_s12] ss:$0 sm:$0xff] }
 0xf61   :  { %2646 = vadd.xlane.f32.xlu0 %v2644_v38  ;;  %v2645_v47 = vadd.f32 %v2641_v30, %v7341_v28 }
 0xf63   :  { %2648 = vadd.xlane.f32.xlu1 %v2645_v47 }
 0xfee   :  { %v2647_v27 = vpop.xlane.xlu0 %2646 }
 0xfef   :  { %v2650_v28 = vmul.f32 0.0078125, %v2647_v27  ;;  %v2728_v27 = vrot.slane %v2719_v32, %v7005_v9 }
 0xff0   :  { %v2649_v3 = vpop.xlane.xlu1 %2648 }
 0xff1   :  { %v2652_v53 = vsub.f32 %v2644_v38, %v2650_v28  ;;  %v2651_v54 = vmul.f32 0.0078125, %v2649_v3 }
 0xff3   :  { %v2653_v60 = vsub.f32 %v2645_v47, %v2651_v54  ;;  %v2654_v42 = vmul.f32 %v2652_v53, %v2652_v53 }
 0xff5   :  { %2656 = vadd.xlane.f32.xlu0 %v2654_v42  ;;  %v2655_v50 = vmul.f32 %v2653_v60, %v2653_v60 }
 0xff7   :  { %2658 = vadd.xlane.f32.xlu1 %v2655_v50 }
0x1082   :  { %v2657_v16 = vpop.xlane.xlu0 %2656 }
0x1083   :  { %v2660_v63 = vmul.f32 0.0078125, %v2657_v16 }
0x1084   :  { %v2659_v21 = vpop.xlane.xlu1 %2658 }
0x1085   :  { %v2662_v10 = vadd.f32 1e-05, %v2660_v63  ;;  %v2661_v23 = vmul.f32 0.0078125, %v2659_v21 }
0x1087   :  { %6458 = vrsqrt.f32 %v2662_v10  ;;  %v2663_v36 = vadd.f32 1e-05, %v2661_v23 }
0x1089   :  { %6460 = vrsqrt.f32 %v2663_v36 }
0x1091   :  { %v6459_v39 = vpop.eup %6458 }
0x1092   :  { %v2666_v25 = vmul.f32 %v6459_v39, %v2652_v53 }
0x1093   :  { %v6461_v56 = vpop.eup %6460 }
0x1094   :  { %v2667_v29 = vmul.f32 %v6461_v56, %v2653_v60  ;;  %v2675_v20 = vmul.f32 %v5271_v45, %v2666_v25 }
0x1096   :  { %v2676_v30 = vmul.f32 %v5271_v45, %v2667_v29  ;;  %v7430_v38 = vadd.f32 %v5272_v19, %v2675_v20 }
0x1098   :  { %v7432_v47 = vadd.f32 %v5272_v19, %v2676_v30 }
0x109a   :  { %v2686_v57 = vpack.c.bf16 %v7432_v47, %v7430_v38 }
0x109c   :  { %2897 = vmatmul.mubr.bf16.vlgmr.msra.gmra.mrb[40].mxu1 %v2686_v57  ;;  %5826 = vmatmul.mubr.bf16.vlgmr.msra.gmra.mrb[40].mxu0 %v2686_v57 }
0x109d   :  { %5831 = vmatprep.mubr.msk.bf16.mxu1 %vm6643_vm0, %v6642_v1  ;;  %5855 = vmatprep.mubr.msk.bf16.mxu0 %vm6643_vm0, %v6642_v1 }
0x116f   :  { %v2898_v40 = vpop.f32.mrb[40].mxu1  ;;  %v2941_v49 = vpop.f32.mrb[40].mxu0 }
0x1170   :  { %v2899_v28 = vadd.f32 %v2898_v40, %v2724_v33  ;;  %v2900_v3 = vpop.f32.mrb[41].mxu1  ;;  %v5827_v53 = vpop.f32.mrb[41].mxu0  ;;  %v2942_v54 = vadd.f32 %v2941_v49, %v2732_v24 }
0x1171   :  { %v2902_v60 = vpop.f32.mrb[42].mxu1  ;;  %v2944_v42 = vpop.f32.mrb[42].mxu0  ;;  %v2901_v4 = vadd.f32 %v2900_v3, %v2728_v27 }
0x1172   :  { %v2904_v50 = vpop.f32.mrb[43].mxu1  ;;  %v5828_v59 = vpop.f32.mrb[43].mxu0  ;;  %v2949_v37 = vmul.f32 %v2899_v28, %v7020_v15  ;;  %v3019_v43 = vmul.f32 %v2899_v28, %v7023_v17  ;;  %v3177_v44 = vmul.f32 %v2899_v28, %v7026_v18  ;;  %v3293_v7 = vmul.f32 %v2899_v28, %v7030_v22 }
0x1173   :  { %v2903_v31 = vadd.f32 %v2902_v60, %v2724_v33  ;;  %v2945_v46 = vadd.f32 %v2944_v42, %v2732_v24  ;;  %v2905_v48 = vadd.f32 %v2904_v50, %v2728_v27  ;;  %v7450_v51 = vmul.f32 %v2942_v54, %v7002_v8  ;;  %v6562_v27 = vld [vmem:[%s6887_s17] sm:$0xff]  ;;  %v6563_v50 = vld [vmem:[%s6887_s17 + $0x8] sm:$0xff]  ;;  %s7895_s17 = sld [smem:[#allocation36_spill]] }
0x1174   :  { %v3086_v52 = vmul.f32 %v2942_v54, %v7009_v11  ;;  %v7454_v55 = vmul.f32 %v2942_v54, %v7012_v12  ;;  %v7457_v61 = vmul.f32 %v2942_v54, %v7015_v13 }
0x1175   :  { %v2950_v34 = vmul.f32 %v2903_v31, %v7020_v15  ;;  %v3020_v0 = vmul.f32 %v2903_v31, %v7023_v17  ;;  %v3178_v2 = vmul.f32 %v2903_v31, %v7026_v18  ;;  %v3294_v6 = vmul.f32 %v2903_v31, %v7030_v22 }
0x1176   :  { %v7464_v62 = vmul.f32 %v2945_v46, %v7002_v8  ;;  %v3087_v26 = vmul.f32 %v2945_v46, %v7009_v11  ;;  %v7468_v14 = vmul.f32 %v2945_v46, %v7012_v12  ;;  %v7471_v16 = vmul.f32 %v2945_v46, %v7015_v13 }
0x1177   :  { %v2948_v63 = vpack.c.bf16 %v2905_v48, %v2901_v4  ;;  %v2951_v21 = vpack.c.bf16 %v2950_v34, %v2949_v37  ;;  %v3179_v10 = vpack.c.bf16 %v3178_v2, %v3177_v44  ;;  %v3021_v23 = vpack.c.bf16 %v3020_v0, %v3019_v43 }
0x1178   :  { %v3295_v36 = vpack.c.bf16 %v3294_v6, %v3293_v7  ;;  %v3088_v39 = vpack.c.bf16 %v3087_v26, %v3086_v52  ;;  %v3018_v45 = vpack.c.bf16 %v7464_v62, %v7450_v51  ;;  %v3246_v25 = vpack.c.bf16 %v7468_v14, %v7454_v55 }
0x1179   :  { %5830 = vmatpush3.bf16.xpose.msra.mxu1 %v2948_v63  ;;  %5854 = vmatpush3.bf16.xpose.msra.mxu0 %v2948_v63  ;;  %v3362_v56 = vpack.c.bf16 %v7471_v16, %v7457_v61  ;;  %v6281_v61 = vld [vmem:[%s7895_s17 + $0x38] sm:$0xff]  }
0x117a   :  { %5835 = vmatprep.subr.bf16.mxu1 %v6642_v1  ;;  %5865 = vmatprep.subr.bf16.mxu0 %v6642_v1 }
0x1180   :  { %5832 = vmatmul.mubr.bf16.vlgmr.msra.gmra.mrb[44].mxu1 %v2951_v21  ;;  %5856 = vmatmul.mubr.bf16.vlgmr.msra.gmra.mrb[44].mxu0 %v3179_v10 }
0x1181   :  { %5836 = vmatpush3.bf16.xpose.msra.mxu1 %v2948_v63  ;;  %5866 = vmatpush3.bf16.xpose.msra.mxu0 %v2948_v63 }
0x1182   :  { %5837 = vmatprep.mubr.msk.bf16.mxu1 %vm6643_vm0, %v6642_v1  ;;  %5867 = vmatprep.mubr.msk.bf16.mxu0 %vm6643_vm0, %v6642_v1 }
0x1183   :  { %5841 = vmatprep.subr.bf16.mxu1 %v6642_v1  ;;  %5877 = vmatprep.subr.bf16.mxu0 %v6642_v1 }
0x1188   :  { %5838 = vmatmul.mubr.bf16.vlgmr.msra.gmra.mrb[48].mxu1 %v3021_v23  ;;  %5868 = vmatmul.mubr.bf16.vlgmr.msra.gmra.mrb[48].mxu0 %v3295_v36 }
0x1189   :  { %5842 = vmatpush3.bf16.msra.mxu1 %v3088_v39  ;;  %5843 = vmatprep.mubr.msk.bf16.mxu1 %vm6643_vm0, %v6642_v1 }
0x118a   :  { %5847 = vmatprep.subr.bf16.mxu1 %v6642_v1  ;;  %5893 = vmatprep.mubr.msk.bf16.mxu0 %vm6643_vm0, %v6642_v1 }
0x1253   :  { %v2986_v29 = vpop.f32.mrb[44].mxu1  ;;  %v3214_v20 = vpop.f32.mrb[44].mxu0 }
0x1254   :  { %v5833_v19 = vpop.f32.mrb[45].mxu1  ;;  %v5857_v30 = vpop.f32.mrb[45].mxu0  ;;  %v2987_v42 = vadd.f32 %v6562_v27, %v2986_v29  ;;  %v3215_v31 = vadd.f32 %v6562_v27, %v3214_v20 }
0x1255   :  { %v2989_v57 = vpop.f32.mrb[46].mxu1  ;;  %v3217_v32 = vpop.f32.mrb[46].mxu0 }
0x1256   :  { %v5834_v33 = vpop.f32.mrb[47].mxu1  ;;  %v5858_v24 = vpop.f32.mrb[47].mxu0  ;;  %v2990_v4 = vadd.f32 %v6563_v50, %v2989_v57  ;;  %v2993_v46 = vsel %vm729_vm10, %v2987_v42, -inf  ;;  %v3218_v48 = vadd.f32 %v6563_v50, %v3217_v32  ;;  %v3221_v0 = vsel %vm729_vm10, %v3215_v31, -inf }
0x1258   :  { %v2996_v52 = vsel %vm729_vm10, %v2990_v4, -inf  ;;  %v3224_v6 = vsel %vm729_vm10, %v3218_v48, -inf }
0x125b   :  { %v3056_v40 = vpop.f32.mrb[48].mxu1  ;;  %v3330_v49 = vpop.f32.mrb[48].mxu0 }
0x125c   :  { %v3057_v28 = vadd.f32 %v6562_v27, %v3056_v40  ;;  %v5839_v3 = vpop.f32.mrb[49].mxu1  ;;  %v5869_v53 = vpop.f32.mrb[49].mxu0  ;;  %v3331_v34 = vadd.f32 %v6562_v27, %v3330_v49 }
0x125d   :  { %v3059_v54 = vpop.f32.mrb[50].mxu1  ;;  %v3333_v60 = vpop.f32.mrb[50].mxu0 }
0x125e   :  { %v3060_v59 = vadd.f32 %v6563_v50, %v3059_v54  ;;  %v5840_v37 = vpop.f32.mrb[51].mxu1  ;;  %v5870_v43 = vpop.f32.mrb[51].mxu0  ;;  %v3063_v44 = vsel %vm729_vm10, %v3057_v28, -inf  ;;  %v3334_v2 = vadd.f32 %v6563_v50, %v3333_v60  ;;  %v3337_v26 = vsel %vm729_vm10, %v3331_v34, -inf }
0x125f   :  { %3064 = vmax.xlane.f32.xlu0 %v3063_v44 }
0x1260   :  { %v3066_v7 = vsel %vm729_vm10, %v3060_v59, -inf  ;;  %v3340_v63 = vsel %vm729_vm10, %v3334_v2, -inf }
0x1261   :  { %3067 = vmax.xlane.f32.xlu1 %v3066_v7 }
0x1263   :  { %2994 = vmax.xlane.f32.xlu0 %v2993_v46 }
0x1265   :  { %2997 = vmax.xlane.f32.xlu1 %v2996_v52 }
0x1267   :  { %3222 = vmax.xlane.f32.xlu0 %v3221_v0 }
0x1269   :  { %3225 = vmax.xlane.f32.xlu1 %v3224_v6 }
0x126b   :  { %3338 = vmax.xlane.f32.xlu0 %v3337_v26 }
0x126d   :  { %3341 = vmax.xlane.f32.xlu1 %v3340_v63 }
0x12ec   :  { %v3065_v21 = vpop.xlane.xlu0 %3064 }
0x12ed   :  { %v3069_v10 = vsub.f32 %v3057_v28, %v3065_v21 }
0x12ee   :  { %v3068_v23 = vpop.xlane.xlu1 %3067 }
0x12ef   :  { %v3071_v36 = vmul.f32 1.442695, %v3069_v10  ;;  %v3070_v39 = vsub.f32 %v3060_v59, %v3068_v23  ;;  %v6274_v10 = vld [vmem:[%s7895_s17] sm:$0xff]   ;;  %v6275_v23 = vld [vmem:[%s7895_s17 + $0x8] sm:$0xff]  }
0x12f0   :  { %v2995_v29 = vpop.xlane.xlu0 %2994  ;;  %5878 = vmatpush3.bf16.msra.mxu0 %v6274_v10 }
0x12f1   :  { %6462 = vpow2.f32 %v3071_v36  ;;  %v3073_v20 = vmul.f32 1.442695, %v3070_v39  ;;  %v2999_v19 = vsub.f32 %v2987_v42, %v2995_v29  ;;  %5879 = vmatprep.subr.bf16.mxu0 %v6642_v1  ;;  %v6276_v36 = vld [vmem:[%s7895_s17 + $0x10] sm:$0xff]   ;;  %v6277_v39 = vld [vmem:[%s7895_s17 + $0x18] sm:$0xff]   ;;  %v6278_v29 = vld [vmem:[%s7895_s17 + $0x20] sm:$0xff]  }
0x12f2   :  { %v2998_v30 = vpop.xlane.xlu1 %2997 }
0x12f3   :  { %6464 = vpow2.f32 %v3073_v20  ;;  %v3001_v57 = vmul.f32 1.442695, %v2999_v19  ;;  %v3000_v32 = vsub.f32 %v2990_v4, %v2998_v30  ;;  %v6279_v20 = vld [vmem:[%s7895_s17 + $0x28] sm:$0xff]   ;;  %v6280_v19 = vld [vmem:[%s7895_s17 + $0x30] sm:$0xff]  }
0x12f4   :  { %v3223_v33 = vpop.xlane.xlu0 %3222  ;;  %5880 = vmatpush3.bf16.msra.mxu0 %v6275_v23 }
0x12f5   :  { %6466 = vpow2.f32 %v3001_v57  ;;  %v3003_v24 = vmul.f32 1.442695, %v3000_v32  ;;  %v3227_v40 = vsub.f32 %v3215_v31, %v3223_v33  ;;  %5881 = vmatprep.subr.bf16.mxu0 %v6642_v1 }
0x12f6   :  { %v3226_v49 = vpop.xlane.xlu1 %3225 }
0x12f7   :  { %6468 = vpow2.f32 %v3003_v24  ;;  %v3229_v27 = vmul.f32 1.442695, %v3227_v40  ;;  %v3228_v3 = vsub.f32 %v3218_v48, %v3226_v49 }
0x12f8   :  { %v3339_v28 = vpop.xlane.xlu0 %3338  ;;  %5882 = vmatpush3.bf16.msra.mxu0 %v6276_v36  ;;  %v6282_v36 = vld [vmem:[%s7897_s4] ss:$8 sps:$4 sm:$0xff]  }
0x12f9   :  { %6470 = vpow2.f32 %v3229_v27  ;;  %v3231_v53 = vmul.f32 1.442695, %v3228_v3  ;;  %v3343_v54 = vsub.f32 %v3331_v34, %v3339_v28  ;;  %5883 = vmatprep.subr.bf16.mxu0 %v6642_v1 }
0x12fa   :  { %v3342_v60 = vpop.xlane.xlu1 %3341 }
0x12fb   :  { %v6463_v50 = vpop.eup %6462  ;;  %6472 = vpow2.f32 %v3231_v53  ;;  %v3345_v42 = vmul.f32 1.442695, %v3343_v54  ;;  %v3344_v59 = vsub.f32 %v3334_v2, %v3342_v60 }
0x12fc   :  { %v3075_v37 = vsel %vm729_vm10, %v6463_v50, 0.0  ;;  %5884 = vmatpush3.bf16.msra.mxu0 %v6277_v39  ;;  %v6284_v39 = vld [vmem:[%s7897_s4 + $0x4] ss:$8 sps:$4 sm:$0xff]  }
0x12fd   :  { %v6465_v43 = vpop.eup %6464  ;;  %6474 = vpow2.f32 %v3345_v42  ;;  %v3347_v44 = vmul.f32 1.442695, %v3344_v59  ;;  %3076 = vadd.xlane.f32.xlu0 %v3075_v37  ;;  %5885 = vmatprep.subr.bf16.mxu0 %v6642_v1 }
0x12fe   :  { %v3078_v4 = vsel %vm729_vm10, %v6465_v43, 0.0 }
0x12ff   :  { %v7504_v7 = vpop.eup %6466  ;;  %6476 = vpow2.f32 %v3347_v44  ;;  %3079 = vadd.xlane.f32.xlu1 %v3078_v4 }
0x1300   :  { %v3005_v31 = vsel %vm729_vm10, %v7504_v7, 0.0  ;;  %5886 = vmatpush3.bf16.msra.mxu0 %v6278_v29  ;;  %v6287_v29 = vld [vmem:[%s7897_s4 + $0x14] ss:$8 sps:$4 sm:$0xff]  }
0x1301   :  { %v6469_v46 = vpop.eup %6468  ;;  %3006 = vadd.xlane.f32.xlu0 %v3005_v31  ;;  %5887 = vmatprep.subr.bf16.mxu0 %v6642_v1 }
0x1302   :  { %v3008_v48 = vsel %vm729_vm10, %v6469_v46, 0.0 }
0x1303   :  { %v7509_v52 = vpop.eup %6470  ;;  %3009 = vadd.xlane.f32.xlu1 %v3008_v48 }
0x1304   :  { %v3233_v34 = vsel %vm729_vm10, %v7509_v52, 0.0  ;;  %5888 = vmatpush3.bf16.msra.mxu0 %v6279_v20  ;;  %v6288_v20 = vld [vmem:[%s7898_s28] sm:$0xff]  }
0x1305   :  { %v7513_v0 = vpop.eup %6472  ;;  %3234 = vadd.xlane.f32.xlu0 %v3233_v34  ;;  %5889 = vmatprep.subr.bf16.mxu0 %v6642_v1  ;;  %v5301_v34 = vld [vmem:[%s7896_s27] ss:$0 sm:$0xff] }
0x1306   :  { %v3236_v2 = vsel %vm729_vm10, %v7513_v0, 0.0 }
0x1307   :  { %v7517_v6 = vpop.eup %6474  ;;  %3237 = vadd.xlane.f32.xlu1 %v3236_v2 }
0x1308   :  { %v3349_v26 = vsel %vm729_vm10, %v7517_v6, 0.0  ;;  %5890 = vmatpush3.bf16.msra.mxu0 %v6280_v19  ;;  %v6285_v19 = vld [vmem:[%s7897_s4 + $0x10] ss:$8 sps:$4 sm:$0xff]  }
0x1309   :  { %v7521_v63 = vpop.eup %6476  ;;  %3350 = vadd.xlane.f32.xlu0 %v3349_v26  ;;  %5891 = vmatprep.subr.bf16.mxu0 %v6642_v1 }
0x130a   :  { %v3352_v21 = vsel %vm729_vm10, %v7521_v63, 0.0 }
0x130b   :  { %3353 = vadd.xlane.f32.xlu1 %v3352_v21 }
0x130c   :  { %5892 = vmatpush3.bf16.msra.mxu0 %v6281_v61 }
0x130d   :  { %3785 = vmatprep.subr.bf16.mxu0 %v6284_v39 }
0x138a   :  { %v3077_v30 = vpop.xlane.xlu0 %3076 }
0x138b   :  { %6478 = vrcp.f32 %v3077_v30  ;;  %v6292_v30 = vld [vmem:[%s7898_s28 + $0x8] sm:$0xff]  }
0x138c   :  { %v3080_v57 = vpop.xlane.xlu1 %3079 }
0x138d   :  { %6480 = vrcp.f32 %v3080_v57  ;;  %v6291_v57 = vld [vmem:[%s7897_s4 + $0x24] ss:$8 sps:$4 sm:$0xff]  }
0x138e   :  { %v3007_v33 = vpop.xlane.xlu0 %3006 }
0x1390   :  { %v3010_v32 = vpop.xlane.xlu1 %3009 }
0x1391   :  { %6482 = vrcp.f32 %v3010_v32  ;;  %v6293_v32 = vld [vmem:[%s7897_s4 + $0x30] ss:$8 sps:$4 sm:$0xff]  }
0x1392   :  { %6484 = vrcp.f32 %v3007_v33  ;;  %v3235_v54 = vpop.xlane.xlu0 %3234 }
0x1394   :  { %v3238_v28 = vpop.xlane.xlu1 %3237 }
0x1395   :  { %v6479_v24 = vpop.eup %6478  ;;  %6486 = vrcp.f32 %v3238_v28 }
0x1396   :  { %v3083_v49 = vmul.f32 %v6479_v24, %v6463_v50  ;;  %6488 = vrcp.f32 %v3235_v54  ;;  %v6296_v54 = vld [vmem:[%s7898_s28 + $0x10] sm:$0xff]  }
0x1397   :  { %v6481_v40 = vpop.eup %6480 }
0x1398   :  { %v3084_v27 = vmul.f32 %v6481_v40, %v6465_v43  ;;  %v3354_v51 = vpop.xlane.xlu1 %3353 }
0x1399   :  { %6490 = vrcp.f32 %v3354_v51  ;;  %v6301_v51 = vld [vmem:[%s7897_s4 + $0x50] ss:$8 sps:$4 sm:$0xff]  }
0x139a   :  { %v3085_v3 = vpack.c.bf16 %v3084_v27, %v3083_v49 }
0x139b   :  { %v6483_v53 = vpop.eup %6482 }
0x139c   :  { %5844 = vmatmul.mubr.msk.bf16.vlgmr.msra.gmra.mrb[52].mxu1 %vm729_vm10, %v3085_v3  ;;  %v6485_v60 = vpop.eup %6484  ;;  %v3014_v42 = vmul.f32 %v6483_v53, %v6469_v46 }
0x139d   :  { %5848 = vmatpush3.bf16.msra.mxu1 %v3018_v45  ;;  %5849 = vmatprep.mubr.msk.bf16.mxu1 %vm6643_vm0, %v6642_v1  ;;  %v3013_v50 = vmul.f32 %v6485_v60, %v7504_v7  ;;  %v3351_v45 = vpop.xlane.xlu0 %3350  ;;  %v6299_v60 = vld [vmem:[%s7897_s4 + $0x44] ss:$8 sps:$4 sm:$0xff]  }
0x139e   :  { %5859 = vmatprep.subr.bf16.mxu1 %v6642_v1  ;;  %6492 = vrcp.f32 %v3351_v45  ;;  %v6307_v45 = vld [vmem:[%s7897_s4 + $0x64] ss:$8 sps:$4 sm:$0xff]  }
0x139f   :  { %v3015_v59 = vpack.c.bf16 %v3014_v42, %v3013_v50  ;;  %v6487_v62 = vpop.eup %6486  ;;  %v6297_v42 = vld [vmem:[%s7897_s4 + $0x40] ss:$8 sps:$4 sm:$0xff]   ;;  %v6300_v50 = vld [vmem:[%s7898_s28 + $0x18] sm:$0xff]  }
0x13a0   :  { %v6489_v37 = vpop.eup %6488  ;;  %v3242_v43 = vmul.f32 %v6487_v62, %v7513_v0  ;;  %v6304_v62 = vld [vmem:[%s7898_s28 + $0x20] sm:$0xff]  }
0x13a1   :  { %v3241_v44 = vmul.f32 %v6489_v37, %v7509_v52  ;;  %v6305_v37 = vld [vmem:[%s7897_s4 + $0x60] ss:$8 sps:$4 sm:$0xff]  }
0x13a3   :  { %v3243_v4 = vpack.c.bf16 %v3242_v43, %v3241_v44  ;;  %v6491_v55 = vpop.eup %6490  ;;  %v6308_v43 = vld [vmem:[%s7898_s28 + $0x28] sm:$0xff]   ;;  %v6311_v44 = vld [vmem:[%s7897_s4 + $0x74] ss:$8 sps:$4 sm:$0xff]  }
0x13a8   :  { %5850 = vmatmul.mubr.msk.bf16.vlgmr.msra.gmra.mrb[52].mxu1 %vm729_vm10, %v3015_v59  ;;  %v6493_v14 = vpop.eup %6492  ;;  %v6303_v59 = vld [vmem:[%s7897_s4 + $0x54] ss:$8 sps:$4 sm:$0xff]  }
0x13a9   :  { %5860 = vmatpush3.bf16.msra.mxu1 %v3246_v25  ;;  %5861 = vmatprep.mubr.msk.bf16.mxu1 %vm6643_vm0, %v6642_v1  ;;  %v3358_v25 = vmul.f32 %v6491_v55, %v7521_v63  ;;  %v3357_v7 = vmul.f32 %v6493_v14, %v7517_v6  ;;  %v6312_v55 = vld [vmem:[%s7898_s28 + $0x30] sm:$0xff]   ;;  %v6313_v14 = vld [vmem:[%s7898_s28 + $0x38] sm:$0xff]  }
0x13aa   :  { %5871 = vmatprep.subr.bf16.mxu1 %v6642_v1 }
0x13ab   :  { %v3359_v31 = vpack.c.bf16 %v3358_v25, %v3357_v7 }
0x13b4   :  { %5862 = vmatmul.mubr.msk.bf16.vlgmr.msra.gmra.mrb[52].mxu1 %vm729_vm10, %v3243_v4  ;;  %v6309_v4 = vld [vmem:[%s7897_s4 + $0x70] ss:$8 sps:$4 sm:$0xff]  }
0x13b5   :  { %5872 = vmatpush3.bf16.msra.mxu1 %v3362_v56  ;;  %5873 = vmatprep.mubr.msk.bf16.mxu1 %vm6643_vm0, %v6642_v1 }
0x13b6   :  { %5897 = vmatprep.subr.bf16.mxu1 %v6642_v1 }
0x13c0   :  { %5874 = vmatmul.mubr.msk.bf16.vlgmr.msra.gmra.mrb[52].mxu1 %vm729_vm10, %v3359_v31 }
0x13c1   :  { %5913 = vmatprep.mubr.msk.bf16.mxu1 %vm6643_vm0, %v6642_v1  ;;  %5898 = vmatpush3.bf16.msra.mxu1 %v6288_v20 }
0x13c2   :  { %5899 = vmatprep.subr.bf16.mxu1 %v6642_v1 }
0x13c5   :  { %5900 = vmatpush3.bf16.msra.mxu1 %v6292_v30 }
0x13c6   :  { %5901 = vmatprep.subr.bf16.mxu1 %v6642_v1 }
0x13c9   :  { %5902 = vmatpush3.bf16.msra.mxu1 %v6296_v54 }
0x13ca   :  { %5903 = vmatprep.subr.bf16.mxu1 %v6642_v1 }
0x13cd   :  { %5904 = vmatpush3.bf16.msra.mxu1 %v6300_v50 }
0x13ce   :  { %5905 = vmatprep.subr.bf16.mxu1 %v6642_v1 }
0x13d1   :  { %5906 = vmatpush3.bf16.msra.mxu1 %v6304_v62 }
0x13d2   :  { %5907 = vmatprep.subr.bf16.mxu1 %v6642_v1 }
0x13d5   :  { %5908 = vmatpush3.bf16.msra.mxu1 %v6308_v43 }
0x13d6   :  { %5909 = vmatprep.subr.bf16.mxu1 %v6642_v1 }
0x13d9   :  { %5910 = vmatpush3.bf16.msra.mxu1 %v6312_v55 }
0x13da   :  { %5911 = vmatprep.subr.bf16.mxu1 %v6642_v1 }
0x13dd   :  { %5912 = vmatpush3.bf16.msra.mxu1 %v6313_v14 }
0x13de   :  { %5917 = vmatprep.subr.bf16.mxu1 %v6642_v1 }
0x1493   :  { %v3400_v16 = vpop.f32.mrb[52].mxu1 }
0x1494   :  { %v5875_v56 = vpop.f32.mrb[53].mxu1 }
0x1495   :  { %v3403_v46 = vpop.f32.mrb[54].mxu1 }
0x1496   :  { %v3409_v48 = vpack.c.bf16 %v3403_v46, %v3400_v16  ;;  %v5876_v52 = vpop.f32.mrb[55].mxu1 }
0x1498   :  { %5894 = vmatmul.mubr.bf16.vlgmr.msra.gmra.mrb[52].mxu0 %v3409_v48 }
0x1499   :  { %3817 = vmatprep.mubr.bf16.mxu0 %v6644_v41  ;;  %3786 = vmatpush1.bf16.msra.mxu0 %v6282_v36 }
0x149a   :  { %3787 = vmatprep.subr.bf16.mxu0 %v6287_v29 }
0x149d   :  { %3788 = vmatpush1.bf16.msra.mxu0 %v6285_v19 }
0x149e   :  { %3789 = vmatprep.subr.bf16.mxu0 %v6291_v57  ;;  %v5312_v57 = vld [vmem:[%s7902_s10] ss:$0 sm:$0xff] }
0x156b   :  { %v3515_v0 = vpop.f32.mrb[52].mxu0 }
0x156c   :  { %v3516_v2 = vadd.f32 %v5301_v34, %v3515_v0  ;;  %v5895_v6 = vpop.f32.mrb[53].mxu0 }
0x156d   :  { %v3518_v26 = vpop.f32.mrb[54].mxu0 }
0x156e   :  { %v3519_v63 = vadd.f32 %v5301_v34, %v3518_v26  ;;  %v5896_v21 = vpop.f32.mrb[55].mxu0  ;;  %v3522_v10 = vadd.f32 %v3516_v2, %v7430_v38  ;;  %v6289_v38 = vld [vmem:[%s7897_s4 + $0x20] ss:$8 sps:$4 sm:$0xff]  }
0x156f   :  { %3790 = vmatpush1.bf16.msra.mxu0 %v6289_v38  ;;  %v5311_v2 = vld [vmem:[%s7900_s2] ss:$0 sm:$0xff] }
0x1570   :  { %3524 = vadd.xlane.f32.xlu0 %v3522_v10  ;;  %v3523_v23 = vadd.f32 %v3519_v63, %v7432_v47  ;;  %v6295_v47 = vld [vmem:[%s7897_s4 + $0x34] ss:$8 sps:$4 sm:$0xff]  }
0x1571   :  { %3791 = vmatprep.subr.bf16.mxu0 %v6295_v47 }
0x1572   :  { %3526 = vadd.xlane.f32.xlu1 %v3523_v23 }
0x1573   :  { %3792 = vmatpush1.bf16.msra.mxu0 %v6293_v32 }
0x1574   :  { %3793 = vmatprep.subr.bf16.mxu0 %v6299_v60 }
0x1577   :  { %3794 = vmatpush1.bf16.msra.mxu0 %v6297_v42 }
0x1578   :  { %3795 = vmatprep.subr.bf16.mxu0 %v6303_v59 }
0x157b   :  { %3796 = vmatpush1.bf16.msra.mxu0 %v6301_v51 }
0x157c   :  { %3797 = vmatprep.subr.bf16.mxu0 %v6307_v45 }
0x157f   :  { %3798 = vmatpush1.bf16.msra.mxu0 %v6305_v37 }
0x1580   :  { %3799 = vmatprep.subr.bf16.mxu0 %v6311_v44 }
0x1583   :  { %3800 = vmatpush1.bf16.msra.mxu0 %v6309_v4 }
0x1584   :  { %5941 = vmatprep.subr.bf16.mxu0 %v6642_v1 }
0x1586   :  { %3818 = vmatmul.mubr.bf16.vlgmr.msra.gmra.mrb[56].mxu0 %v7190_v58  ;;  %v5310_v58 = vld [vmem:[%s7899_s1] ss:$0 sm:$0xff] }
0x1587   :  { %5943 = vmatprep.mubr.msk.bf16.mxu0 %vm6643_vm0, %v6642_v1 }
0x15fd   :  { %v3525_v33 = vpop.xlane.xlu0 %3524 }
0x15fe   :  { %v3528_v24 = vmul.f32 0.0078125, %v3525_v33 }
0x15ff   :  { %v3527_v40 = vpop.xlane.xlu1 %3526 }
0x1600   :  { %v3530_v49 = vsub.f32 %v3522_v10, %v3528_v24  ;;  %v3529_v27 = vmul.f32 0.0078125, %v3527_v40  ;;  %v3693_v10 = vld [vmem:[%s7901_s7] sm:$0x3] }
0x1601   :  { %v3702_v38 = vrot.slane %v3693_v10, %v7005_v9 }
0x1602   :  { %v3531_v3 = vsub.f32 %v3523_v23, %v3529_v27  ;;  %v3532_v28 = vmul.f32 %v3530_v49, %v3530_v49  ;;  %v3698_v23 = vrot.slane %v3693_v10, %v6997_v5 }
0x1604   :  { %3534 = vadd.xlane.f32.xlu0 %v3532_v28  ;;  %v3533_v53 = vmul.f32 %v3531_v3, %v3531_v3 }
0x1606   :  { %3536 = vadd.xlane.f32.xlu1 %v3533_v53 }
0x1659   :  { %v3819_v36 = vpop.f32.mrb[56].mxu0 }
0x165a   :  { %v3820_v39 = vadd.f32 %v3819_v36, %v3698_v23  ;;  %v3821_v29 = vpop.f32.mrb[57].mxu0 }
0x165b   :  { %v3823_v20 = vpop.f32.mrb[58].mxu0 }
0x165c   :  { %v3826_v19 = vpack.c.bf16 %v3820_v39, %v3820_v39  ;;  %v3824_v30 = vpop.f32.mrb[59].mxu0 }
0x165e   :  { %5942 = vmatpush3.bf16.xpose.msra.mxu0 %v3826_v19 }
0x165f   :  { %5953 = vmatprep.subr.bf16.mxu0 %v6642_v1 }
0x1691   :  { %v3535_v25 = vpop.xlane.xlu0 %3534 }
0x1692   :  { %v3538_v7 = vmul.f32 0.0078125, %v3535_v25 }
0x1693   :  { %v3537_v31 = vpop.xlane.xlu1 %3536 }
0x1694   :  { %v3540_v61 = vadd.f32 1e-05, %v3538_v7  ;;  %v3539_v16 = vmul.f32 0.0078125, %v3537_v31 }
0x1696   :  { %6494 = vrsqrt.f32 %v3540_v61  ;;  %v3541_v56 = vadd.f32 1e-05, %v3539_v16  ;;  %v6564_v61 = vld [vmem:[%s7882_s9] sm:$0xff] }
0x1698   :  { %6496 = vrsqrt.f32 %v3541_v56 }
0x16a0   :  { %v6495_v46 = vpop.eup %6494 }
0x16a1   :  { %v3544_v48 = vmul.f32 %v6495_v46, %v3530_v49  ;;  %v7625_v49 = vadd.f32 %v3821_v29, %v3702_v38 }
0x16a2   :  { %v6497_v52 = vpop.eup %6496 }
0x16a3   :  { %v3545_v34 = vmul.f32 %v6497_v52, %v3531_v3  ;;  %v3553_v0 = vmul.f32 %v5310_v58, %v3544_v48  ;;  %v3963_v43 = vmul.f32 %v7625_v49, %v7009_v11 }
0x16a5   :  { %v3554_v6 = vmul.f32 %v5310_v58, %v3545_v34  ;;  %v7611_v26 = vadd.f32 %v5311_v2, %v3553_v0  ;;  %v6565_v34 = vld [vmem:[%s7882_s9 + $0x8] sm:$0xff]  ;;  %s7912_s9 = sld [smem:[#allocation33_spill]] }
0x16a7   :  { %v7613_v63 = vadd.f32 %v5311_v2, %v3554_v6 }
0x16a9   :  { %v3564_v21 = vpack.c.bf16 %v7613_v63, %v7611_v26 }
0x16ab   :  { %5914 = vmatmul.mubr.bf16.vlgmr.msra.gmra.mrb[56].mxu1 %v3564_v21 }
0x16ac   :  { %5919 = vmatprep.mubr.msk.bf16.mxu1 %vm6643_vm0, %v6642_v1  ;;  %5918 = vmatpush3.bf16.xpose.msra.mxu1 %v3826_v19 }
0x16ad   :  { %5923 = vmatprep.subr.bf16.mxu1 %v6642_v1 }
0x177e   :  { %v3670_v47 = vpop.f32.mrb[56].mxu1 }
0x177f   :  { %v3671_v32 = vadd.f32 %v5312_v57, %v3670_v47  ;;  %v5915_v33 = vpop.f32.mrb[57].mxu1 }
0x1780   :  { %v3673_v24 = vpop.f32.mrb[58].mxu1 }
0x1781   :  { %v5916_v40 = vpop.f32.mrb[59].mxu1  ;;  %v3674_v27 = vadd.f32 %v5312_v57, %v3673_v24  ;;  %v3827_v3 = vmul.f32 %v3671_v32, %v7020_v15  ;;  %v3896_v28 = vmul.f32 %v3671_v32, %v7023_v17  ;;  %v4059_v53 = vmul.f32 %v3671_v32, %v7026_v18 }
0x1782   :  { %v4177_v54 = vmul.f32 %v3671_v32, %v7030_v22 }
0x1783   :  { %v3828_v60 = vmul.f32 %v3674_v27, %v7020_v15  ;;  %v3897_v42 = vmul.f32 %v3674_v27, %v7023_v17  ;;  %v4060_v50 = vmul.f32 %v3674_v27, %v7026_v18  ;;  %v4178_v59 = vmul.f32 %v3674_v27, %v7030_v22 }
0x1784   :  { %v3964_v15 = vpack.c.bf16 %v3963_v43, %v3963_v43 }
0x1785   :  { %v3829_v51 = vpack.c.bf16 %v3828_v60, %v3827_v3  ;;  %v4061_v62 = vpack.c.bf16 %v4060_v50, %v4059_v53  ;;  %v3898_v45 = vpack.c.bf16 %v3897_v42, %v3896_v28  ;;  %v4179_v37 = vpack.c.bf16 %v4178_v59, %v4177_v54 }
0x1786   :  { %v3969_v17 = vsel %vm1723_vm11, %v3964_v15, 0 }
0x1787   :  { %5920 = vmatmul.mubr.bf16.vlgmr.msra.gmra.mrb[60].mxu1 %v3829_v51  ;;  %5944 = vmatmul.mubr.bf16.vlgmr.msra.gmra.mrb[60].mxu0 %v4061_v62 }
0x1788   :  { %5924 = vmatpush3.bf16.xpose.msra.mxu1 %v3826_v19  ;;  %5954 = vmatpush3.bf16.xpose.msra.mxu0 %v3826_v19 }
0x1789   :  { %5925 = vmatprep.mubr.msk.bf16.mxu1 %vm6643_vm0, %v6642_v1  ;;  %5929 = vmatprep.subr.bf16.mxu1 %v6642_v1 }
0x178a   :  { %5955 = vmatprep.mubr.msk.bf16.mxu0 %vm6643_vm0, %v6642_v1  ;;  %5965 = vmatprep.subr.bf16.mxu0 %v6642_v1 }
0x178f   :  { %5926 = vmatmul.mubr.bf16.vlgmr.msra.gmra.mrb[64].mxu1 %v3898_v45  ;;  %5956 = vmatmul.mubr.bf16.vlgmr.msra.gmra.mrb[64].mxu0 %v4179_v37 }
0x1790   :  { %5930 = vmatpush3.bf16.msra.mxu1 %v3969_v17  ;;  %5931 = vmatprep.mubr.msk.bf16.mxu1 %vm6643_vm0, %v6642_v1 }
0x1791   :  { %5935 = vmatprep.subr.bf16.mxu1 %v6642_v1  ;;  %5981 = vmatprep.mubr.msk.bf16.mxu0 %vm6643_vm0, %v6642_v1 }
0x185a   :  { %v3864_v11 = vpop.f32.mrb[60].mxu1  ;;  %v4096_v18 = vpop.f32.mrb[60].mxu0 }
0x185b   :  { %v5921_v22 = vpop.f32.mrb[61].mxu1  ;;  %v5945_v44 = vpop.f32.mrb[61].mxu0  ;;  %v3865_v52 = vadd.f32 %v6564_v61, %v3864_v11  ;;  %v4097_v36 = vadd.f32 %v6564_v61, %v4096_v18 }
0x185c   :  { %v3867_v4 = vpop.f32.mrb[62].mxu1  ;;  %v4099_v55 = vpop.f32.mrb[62].mxu0 }
0x185d   :  { %v5922_v14 = vpop.f32.mrb[63].mxu1  ;;  %v5946_v25 = vpop.f32.mrb[63].mxu0  ;;  %v3868_v10 = vadd.f32 %v6565_v34, %v3867_v4  ;;  %v3871_v39 = vsel %vm1625_vm12, %v3865_v52, -inf  ;;  %v4100_v29 = vadd.f32 %v6565_v34, %v4099_v55  ;;  %v4103_v30 = vsel %vm1625_vm12, %v4097_v36, -inf }
0x185f   :  { %v3874_v20 = vsel %vm1625_vm12, %v3868_v10, -inf  ;;  %v4106_v38 = vsel %vm1625_vm12, %v4100_v29, -inf }
0x1862   :  { %v3933_v7 = vpop.f32.mrb[64].mxu1  ;;  %v4214_v31 = vpop.f32.mrb[64].mxu0 }
0x1863   :  { %v3934_v16 = vadd.f32 %v6564_v61, %v3933_v7  ;;  %v5927_v56 = vpop.f32.mrb[65].mxu1  ;;  %v5957_v46 = vpop.f32.mrb[65].mxu0  ;;  %v4215_v19 = vadd.f32 %v6564_v61, %v4214_v31 }
0x1864   :  { %v3936_v58 = vpop.f32.mrb[66].mxu1  ;;  %v4217_v48 = vpop.f32.mrb[66].mxu0 }
0x1865   :  { %v3937_v0 = vadd.f32 %v6565_v34, %v3936_v58  ;;  %v5928_v2 = vpop.f32.mrb[67].mxu1  ;;  %v5958_v6 = vpop.f32.mrb[67].mxu0  ;;  %v3940_v21 = vsel %vm1625_vm12, %v3934_v16, -inf  ;;  %v4218_v57 = vadd.f32 %v6565_v34, %v4217_v48  ;;  %v4221_v47 = vsel %vm1625_vm12, %v4215_v19, -inf }
0x1866   :  { %3941 = vmax.xlane.f32.xlu0 %v3940_v21  ;;  %v6314_v21 = vld [vmem:[%s7903_s11] sm:$0xff]  }
0x1867   :  { %v3943_v23 = vsel %vm1625_vm12, %v3937_v0, -inf  ;;  %v4224_v32 = vsel %vm1625_vm12, %v4218_v57, -inf  ;;  %5966 = vmatpush3.bf16.msra.mxu0 %v6314_v21 }
0x1868   :  { %3944 = vmax.xlane.f32.xlu1 %v3943_v23  ;;  %5967 = vmatprep.subr.bf16.mxu0 %v6642_v1  ;;  %v6316_v23 = vld [vmem:[%s7903_s11 + $0x10] sm:$0xff]  }
0x186a   :  { %3872 = vmax.xlane.f32.xlu0 %v3871_v39  ;;  %v6318_v39 = vld [vmem:[%s7903_s11 + $0x20] sm:$0xff]  }
0x186c   :  { %3875 = vmax.xlane.f32.xlu1 %v3874_v20  ;;  %v6320_v20 = vld [vmem:[%s7903_s11 + $0x30] sm:$0xff]  }
0x186e   :  { %4104 = vmax.xlane.f32.xlu0 %v4103_v30 }
0x1870   :  { %4107 = vmax.xlane.f32.xlu1 %v4106_v38 }
0x1872   :  { %4222 = vmax.xlane.f32.xlu0 %v4221_v47  ;;  %v3894_v47 = vmul.f32 %v7625_v49, %v7002_v8 }
0x1874   :  { %4225 = vmax.xlane.f32.xlu1 %v4224_v32 }
0x18f3   :  { %v3942_v33 = vpop.xlane.xlu0 %3941 }
0x18f4   :  { %v3946_v24 = vsub.f32 %v3934_v16, %v3942_v33 }
0x18f5   :  { %v3945_v40 = vpop.xlane.xlu1 %3944 }
0x18f6   :  { %v3948_v27 = vmul.f32 1.442695, %v3946_v24  ;;  %v3947_v3 = vsub.f32 %v3937_v0, %v3945_v40 }
0x18f7   :  { %v3873_v28 = vpop.xlane.xlu0 %3872 }
0x18f8   :  { %6498 = vpow2.f32 %v3948_v27  ;;  %v3950_v53 = vmul.f32 1.442695, %v3947_v3  ;;  %v3877_v54 = vsub.f32 %v3865_v52, %v3873_v28  ;;  %v3895_v27 = vpack.c.bf16 %v3894_v47, %v3894_v47  ;;  %v6330_v47 = vld [vmem:[%s7905_s16 + $0x24] ss:$8 sps:$4 sm:$0xff]  }
0x18f9   :  { %v3876_v60 = vpop.xlane.xlu1 %3875 }
0x18fa   :  { %6500 = vpow2.f32 %v3950_v53  ;;  %v3879_v42 = vmul.f32 1.442695, %v3877_v54  ;;  %v3878_v50 = vsub.f32 %v3868_v10, %v3876_v60  ;;  %v6315_v10 = vld [vmem:[%s7903_s11 + $0x8] sm:$0xff]   ;;  %v4016_v28 = vsel %vm1723_vm11, %v3895_v27, 0 }
0x18fb   :  { %v4105_v59 = vpop.xlane.xlu0 %4104  ;;  %5968 = vmatpush3.bf16.msra.mxu0 %v6315_v10  ;;  %v4126_v60 = vmul.f32 %v7625_v49, %v7012_v12  ;;  %v6322_v10 = vld [vmem:[%s7905_s16] ss:$8 sps:$4 sm:$0xff]  }
0x18fc   :  { %6502 = vpow2.f32 %v3879_v42  ;;  %v3881_v51 = vmul.f32 1.442695, %v3878_v50  ;;  %v4109_v62 = vsub.f32 %v4097_v36, %v4105_v59  ;;  %5969 = vmatprep.subr.bf16.mxu0 %v6642_v1  ;;  %v6317_v36 = vld [vmem:[%s7903_s11 + $0x18] sm:$0xff]   ;;  %v6334_v27 = vld [vmem:[%s7905_s16 + $0x40] ss:$8 sps:$4 sm:$0xff]  }
0x18fd   :  { %v4108_v45 = vpop.xlane.xlu1 %4107 }
0x18fe   :  { %6504 = vpow2.f32 %v3881_v51  ;;  %v4111_v37 = vmul.f32 1.442695, %v4109_v62  ;;  %v4110_v43 = vsub.f32 %v4100_v29, %v4108_v45  ;;  %v6319_v29 = vld [vmem:[%s7903_s11 + $0x28] sm:$0xff]   ;;  %v4127_v51 = vpack.c.bf16 %v4126_v60, %v4126_v60  ;;  %v6343_v60 = vld [vmem:[%s7905_s16 + $0x70] ss:$8 sps:$4 sm:$0xff]  }
0x18ff   :  { %v4223_v15 = vpop.xlane.xlu0 %4222  ;;  %5970 = vmatpush3.bf16.msra.mxu0 %v6316_v23  ;;  %v6324_v23 = vld [vmem:[%s7905_s16 + $0x4] ss:$8 sps:$4 sm:$0xff]  }
0x1900   :  { %6506 = vpow2.f32 %v4111_v37  ;;  %v4113_v17 = vmul.f32 1.442695, %v4110_v43  ;;  %v4227_v11 = vsub.f32 %v4215_v19, %v4223_v15  ;;  %5971 = vmatprep.subr.bf16.mxu0 %v6642_v1  ;;  %v4132_v45 = vsel %vm1723_vm11, %v4127_v51, 0 }
0x1901   :  { %v4226_v18 = vpop.xlane.xlu1 %4225  ;;  %v4244_v15 = vmul.f32 %v7625_v49, %v7015_v13 }
0x1902   :  { %v6499_v22 = vpop.eup %6498  ;;  %6508 = vpow2.f32 %v4113_v17  ;;  %v4229_v44 = vmul.f32 1.442695, %v4227_v11  ;;  %v4228_v4 = vsub.f32 %v4218_v57, %v4226_v18 }
0x1903   :  { %v3952_v55 = vsel %vm1625_vm12, %v6499_v22, 0.0  ;;  %5972 = vmatpush3.bf16.msra.mxu0 %v6317_v36  ;;  %v6327_v36 = vld [vmem:[%s7905_s16 + $0x14] ss:$8 sps:$4 sm:$0xff]  }
0x1904   :  { %v6501_v14 = vpop.eup %6500  ;;  %6510 = vpow2.f32 %v4229_v44  ;;  %v4231_v25 = vmul.f32 1.442695, %v4228_v4  ;;  %3953 = vadd.xlane.f32.xlu0 %v3952_v55  ;;  %5973 = vmatprep.subr.bf16.mxu0 %v6642_v1 }
0x1905   :  { %v3955_v7 = vsel %vm1625_vm12, %v6501_v14, 0.0 }
0x1906   :  { %v7661_v31 = vpop.eup %6502  ;;  %6512 = vpow2.f32 %v4231_v25  ;;  %3956 = vadd.xlane.f32.xlu1 %v3955_v7  ;;  %v6321_v7 = vld [vmem:[%s7903_s11 + $0x38] sm:$0xff]  }
0x1907   :  { %v3883_v61 = vsel %vm1625_vm12, %v7661_v31, 0.0  ;;  %5974 = vmatpush3.bf16.msra.mxu0 %v6318_v39  ;;  %v6325_v39 = vld [vmem:[%s7905_s16 + $0x10] ss:$8 sps:$4 sm:$0xff]  }
0x1908   :  { %v7665_v16 = vpop.eup %6504  ;;  %3884 = vadd.xlane.f32.xlu0 %v3883_v61  ;;  %5975 = vmatprep.subr.bf16.mxu0 %v6642_v1 }
0x1909   :  { %v3886_v56 = vsel %vm1625_vm12, %v7665_v16, 0.0 }
0x190a   :  { %v7669_v46 = vpop.eup %6506  ;;  %3887 = vadd.xlane.f32.xlu1 %v3886_v56 }
0x190b   :  { %v4115_v58 = vsel %vm1625_vm12, %v7669_v46, 0.0  ;;  %5976 = vmatpush3.bf16.msra.mxu0 %v6319_v29 }
0x190c   :  { %v7673_v48 = vpop.eup %6508  ;;  %4116 = vadd.xlane.f32.xlu0 %v4115_v58  ;;  %5977 = vmatprep.subr.bf16.mxu0 %v6642_v1  ;;  %v5341_v58 = vld [vmem:[%s7904_s15] ss:$0 sm:$0xff] }
0x190d   :  { %v4118_v52 = vsel %vm1625_vm12, %v7673_v48, 0.0 }
0x190e   :  { %v7677_v34 = vpop.eup %6510  ;;  %4119 = vadd.xlane.f32.xlu1 %v4118_v52 }
0x190f   :  { %v4233_v0 = vsel %vm1625_vm12, %v7677_v34, 0.0  ;;  %5978 = vmatpush3.bf16.msra.mxu0 %v6320_v20 }
0x1910   :  { %v7681_v2 = vpop.eup %6512  ;;  %4234 = vadd.xlane.f32.xlu0 %v4233_v0  ;;  %5979 = vmatprep.subr.bf16.mxu0 %v6642_v1 }
0x1911   :  { %v4236_v6 = vsel %vm1625_vm12, %v7681_v2, 0.0 }
0x1912   :  { %4237 = vadd.xlane.f32.xlu1 %v4236_v6 }
0x1913   :  { %5980 = vmatpush3.bf16.msra.mxu0 %v6321_v7  ;;  %v6350_v7 = vld [vmem:[%s7908_s22 + $0x50] sm:$0xff]  }
0x1991   :  { %v3954_v19 = vpop.xlane.xlu0 %3953 }
0x1992   :  { %6514 = vrcp.f32 %v3954_v19 }
0x1993   :  { %v3957_v30 = vpop.xlane.xlu1 %3956 }
0x1994   :  { %6516 = vrcp.f32 %v3957_v30 }
0x1995   :  { %v3885_v38 = vpop.xlane.xlu0 %3884 }
0x1997   :  { %v3888_v57 = vpop.xlane.xlu1 %3887 }
0x1998   :  { %6518 = vrcp.f32 %v3888_v57 }
0x1999   :  { %6520 = vrcp.f32 %v3885_v38  ;;  %v4117_v54 = vpop.xlane.xlu0 %4116 }
0x199b   :  { %v4120_v53 = vpop.xlane.xlu1 %4119 }
0x199c   :  { %v6515_v32 = vpop.eup %6514  ;;  %6522 = vrcp.f32 %v4120_v53  ;;  %v6342_v53 = vld [vmem:[%s7905_s16 + $0x64] ss:$8 sps:$4 sm:$0xff]  }
0x199d   :  { %v3960_v24 = vmul.f32 %v6515_v32, %v6499_v22  ;;  %6524 = vrcp.f32 %v4117_v54  ;;  %v4235_v43 = vpop.xlane.xlu0 %4234  ;;  %v4245_v22 = vpack.c.bf16 %v4244_v15, %v4244_v15  ;;  %v6328_v32 = vld [vmem:[%s7905_s16 + $0x20] ss:$8 sps:$4 sm:$0xff]   ;;  %v6345_v54 = vld [vmem:[%s7905_s16 + $0x74] ss:$8 sps:$4 sm:$0xff]  }
0x199e   :  { %v6517_v33 = vpop.eup %6516 }
0x199f   :  { %v3961_v40 = vmul.f32 %v6517_v33, %v6501_v14  ;;  %v4238_v37 = vpop.xlane.xlu1 %4237  ;;  %v4250_v4 = vsel %vm1723_vm11, %v4245_v22, 0  ;;  %v6333_v33 = vld [vmem:[%s7905_s16 + $0x34] ss:$8 sps:$4 sm:$0xff]  }
0x19a0   :  { %6526 = vrcp.f32 %v4238_v37 }
0x19a1   :  { %v3962_v3 = vpack.c.bf16 %v3961_v40, %v3960_v24  ;;  %6528 = vrcp.f32 %v4235_v43  ;;  %v6331_v24 = vld [vmem:[%s7905_s16 + $0x30] ss:$8 sps:$4 sm:$0xff]   ;;  %v6336_v40 = vld [vmem:[%s7905_s16 + $0x44] ss:$8 sps:$4 sm:$0xff]  }
0x19a2   :  { %v6519_v8 = vpop.eup %6518 }
0x19a3   :  { %5932 = vmatmul.mubr.msk.bf16.vlgmr.msra.gmra.mrb[68].mxu1 %vm1625_vm12, %v3962_v3  ;;  %v6521_v42 = vpop.eup %6520  ;;  %v3892_v50 = vmul.f32 %v6519_v8, %v7665_v16  ;;  %v6339_v3 = vld [vmem:[%s7905_s16 + $0x54] ss:$8 sps:$4 sm:$0xff]   ;;  %v6340_v8 = vld [vmem:[%s7905_s16 + $0x60] ss:$8 sps:$4 sm:$0xff]  }
0x19a4   :  { %5936 = vmatpush3.bf16.msra.mxu1 %v4016_v28  ;;  %5937 = vmatprep.mubr.msk.bf16.mxu1 %vm6643_vm0, %v6642_v1  ;;  %v3891_v59 = vmul.f32 %v6521_v42, %v7661_v31  ;;  %v6337_v28 = vld [vmem:[%s7905_s16 + $0x50] ss:$8 sps:$4 sm:$0xff]  }
0x19a5   :  { %5947 = vmatprep.subr.bf16.mxu1 %v6642_v1 }
0x19a6   :  { %v3893_v62 = vpack.c.bf16 %v3892_v50, %v3891_v59  ;;  %v6523_v12 = vpop.eup %6522 }
0x19a7   :  { %v6525_v17 = vpop.eup %6524  ;;  %v4124_v11 = vmul.f32 %v6523_v12, %v7673_v48  ;;  %v5350_v12 = vld [vmem:[%s7906_s18] ss:$0 sm:$0xff] }
0x19a8   :  { %v4123_v18 = vmul.f32 %v6525_v17, %v7669_v46 }
0x19aa   :  { %v4125_v44 = vpack.c.bf16 %v4124_v11, %v4123_v18  ;;  %v6527_v13 = vpop.eup %6526  ;;  %v5351_v18 = vld [vmem:[%s7907_s23] ss:$0 sm:$0xff] }
0x19ab   :  { %v6529_v49 = vpop.eup %6528  ;;  %v4242_v55 = vmul.f32 %v6527_v13, %v7681_v2 }
0x19ac   :  { %v4241_v14 = vmul.f32 %v6529_v49, %v7677_v34  ;;  %v6346_v49 = vld [vmem:[%s7908_s22 + $0x40] sm:$0xff]  }
0x19ad   :  { %5574 = vmatprep.subr.bf16.mxu0 %v6346_v49 }
0x19ae   :  { %v4243_v25 = vpack.c.bf16 %v4242_v55, %v4241_v14  ;;  %v6347_v55 = vld [vmem:[%s7908_s22] sm:$0xff]   ;;  %v6348_v14 = vld [vmem:[%s7908_s22 + $0x48] sm:$0xff]  }
0x19af   :  { %5938 = vmatmul.mubr.msk.bf16.vlgmr.msra.gmra.mrb[68].mxu1 %vm1625_vm12, %v3893_v62 }
0x19b0   :  { %5948 = vmatpush3.bf16.msra.mxu1 %v4132_v45  ;;  %5949 = vmatprep.mubr.msk.bf16.mxu1 %vm6643_vm0, %v6642_v1 }
0x19b1   :  { %5959 = vmatprep.subr.bf16.mxu1 %v6642_v1 }
0x19bb   :  { %5950 = vmatmul.mubr.msk.bf16.vlgmr.msra.gmra.mrb[68].mxu1 %vm1625_vm12, %v4125_v44 }
0x19bc   :  { %5960 = vmatpush3.bf16.msra.mxu1 %v4250_v4  ;;  %5961 = vmatprep.mubr.msk.bf16.mxu1 %vm6643_vm0, %v6642_v1 }
0x19bd   :  { %4559 = vmatprep.subr.bf16.mxu1 %v6324_v23 }
0x19c7   :  { %5962 = vmatmul.mubr.msk.bf16.vlgmr.msra.gmra.mrb[68].mxu1 %vm1625_vm12, %v4243_v25  ;;  %v6349_v25 = vld [vmem:[%s7908_s22 + $0x8] sm:$0xff]  }
0x19c8   :  { %4591 = vmatprep.mubr.bf16.mxu1 %v6644_v41  ;;  %4560 = vmatpush1.bf16.msra.mxu1 %v6322_v10 }
0x19c9   :  { %4561 = vmatprep.subr.bf16.mxu1 %v6327_v36 }
0x19cc   :  { %4562 = vmatpush1.bf16.msra.mxu1 %v6325_v39 }
0x19cd   :  { %4563 = vmatprep.subr.bf16.mxu1 %v6330_v47 }
0x19d0   :  { %4564 = vmatpush1.bf16.msra.mxu1 %v6328_v32 }
0x19d1   :  { %4565 = vmatprep.subr.bf16.mxu1 %v6333_v33 }
0x19d4   :  { %4566 = vmatpush1.bf16.msra.mxu1 %v6331_v24 }
0x19d5   :  { %4567 = vmatprep.subr.bf16.mxu1 %v6336_v40 }
0x19d8   :  { %4568 = vmatpush1.bf16.msra.mxu1 %v6334_v27 }
0x19d9   :  { %4569 = vmatprep.subr.bf16.mxu1 %v6339_v3 }
0x19dc   :  { %4570 = vmatpush1.bf16.msra.mxu1 %v6337_v28 }
0x19dd   :  { %4571 = vmatprep.subr.bf16.mxu1 %v6342_v53 }
0x19e0   :  { %4572 = vmatpush1.bf16.msra.mxu1 %v6340_v8 }
0x19e1   :  { %4573 = vmatprep.subr.bf16.mxu1 %v6345_v54 }
0x19e4   :  { %4574 = vmatpush1.bf16.msra.mxu1 %v6343_v60 }
0x19e5   :  { %5985 = vmatprep.subr.bf16.mxu1 %v6642_v1 }
0x1a9a   :  { %v4286_v31 = vpop.f32.mrb[68].mxu1 }
0x1a9b   :  { %v5963_v61 = vpop.f32.mrb[69].mxu1 }
0x1a9c   :  { %v4289_v16 = vpop.f32.mrb[70].mxu1  ;;  %v6352_v61 = vld [vmem:[%s7908_s22 + $0x58] sm:$0xff]  }
0x1a9d   :  { %v4295_v56 = vpack.c.bf16 %v4289_v16, %v4286_v31  ;;  %v5964_v46 = vpop.f32.mrb[71].mxu1  ;;  %v6351_v31 = vld [vmem:[%s7908_s22 + $0x10] sm:$0xff]   ;;  %v6353_v16 = vld [vmem:[%s7908_s22 + $0x18] sm:$0xff]  }
0x1a9e   :  { %v6355_v46 = vld [vmem:[%s7908_s22 + $0x20] sm:$0xff]  }
0x1a9f   :  { %5982 = vmatmul.mubr.bf16.vlgmr.msra.gmra.mrb[68].mxu0 %v4295_v56  ;;  %v6354_v56 = vld [vmem:[%s7908_s22 + $0x60] sm:$0xff]  }
0x1aa0   :  { %5575 = vmatpush3.bf16.msra.mxu0 %v6347_v55 }
0x1aa1   :  { %5576 = vmatprep.subr.bf16.mxu0 %v6348_v14 }
0x1aa4   :  { %5577 = vmatpush3.bf16.msra.mxu0 %v6349_v25 }
0x1aa5   :  { %5578 = vmatprep.subr.bf16.mxu0 %v6350_v7 }
0x1aa8   :  { %5579 = vmatpush3.bf16.msra.mxu0 %v6351_v31 }
0x1aa9   :  { %5580 = vmatprep.subr.bf16.mxu0 %v6352_v61 }
0x1aac   :  { %5581 = vmatpush3.bf16.msra.mxu0 %v6353_v16 }
0x1aad   :  { %5582 = vmatprep.subr.bf16.mxu0 %v6354_v56 }
0x1ab0   :  { %5583 = vmatpush3.bf16.msra.mxu0 %v6355_v46 }
0x1b72   :  { %v4401_v48 = vpop.f32.mrb[68].mxu0 }
0x1b73   :  { %v4402_v52 = vadd.f32 %v5341_v58, %v4401_v48  ;;  %v5983_v34 = vpop.f32.mrb[69].mxu0  ;;  %v6357_v48 = vld [vmem:[%s7908_s22 + $0x28] sm:$0xff]  }
0x1b74   :  { %v4404_v0 = vpop.f32.mrb[70].mxu0  ;;  %v6359_v34 = vld [vmem:[%s7908_s22 + $0x30] sm:$0xff]  }
0x1b75   :  { %v4405_v2 = vadd.f32 %v5341_v58, %v4404_v0  ;;  %v5984_v6 = vpop.f32.mrb[71].mxu0  ;;  %v4408_v41 = vadd.f32 %v4402_v52, %v7611_v26  ;;  %v6356_v58 = vld [vmem:[%s7908_s22 + $0x68] sm:$0xff]   ;;  %v6358_v52 = vld [vmem:[%s7908_s22 + $0x70] sm:$0xff]   ;;  %v6360_v0 = vld [vmem:[%s7908_s22 + $0x78] sm:$0xff]  }
0x1b76   :  { %5584 = vmatprep.subr.bf16.mxu0 %v6356_v58  ;;  %v4467_v6 = vld [vmem:[%s7909_s26] sm:$0x3] }
0x1b77   :  { %4410 = vadd.xlane.f32.xlu0 %v4408_v41  ;;  %v4409_v21 = vadd.f32 %v4405_v2, %v7613_v63  ;;  %5585 = vmatpush3.bf16.msra.mxu0 %v6357_v48  ;;  %v6361_v2 = vld [vmem:[%s7908_s22 + $0x38] sm:$0xff]  }
0x1b78   :  { %5586 = vmatprep.subr.bf16.mxu0 %v6358_v52 }
0x1b79   :  { %4412 = vadd.xlane.f32.xlu1 %v4409_v21 }
0x1b7b   :  { %5587 = vmatpush3.bf16.msra.mxu0 %v6359_v34 }
0x1b7c   :  { %5588 = vmatprep.subr.bf16.mxu0 %v6360_v0 }
0x1b7f   :  { %5589 = vmatpush3.bf16.msra.mxu0 %v6361_v2 }
0x1c04   :  { %v4411_v29 = vpop.xlane.xlu0 %4410 }
0x1c05   :  { %v4414_v20 = vmul.f32 0.0078125, %v4411_v29 }
0x1c06   :  { %v4413_v19 = vpop.xlane.xlu1 %4412 }
0x1c07   :  { %v4416_v26 = vsub.f32 %v4408_v41, %v4414_v20  ;;  %v4415_v63 = vmul.f32 0.0078125, %v4413_v19  ;;  %v4472_v41 = vrot.slane %v4467_v6, %v6997_v5 }
0x1c09   :  { %v4417_v30 = vsub.f32 %v4409_v21, %v4415_v63  ;;  %v4418_v57 = vmul.f32 %v4416_v26, %v4416_v26  ;;  %v4476_v21 = vrot.slane %v4467_v6, %v7005_v9 }
0x1c0b   :  { %4420 = vadd.xlane.f32.xlu0 %v4418_v57  ;;  %v4419_v38 = vmul.f32 %v4417_v30, %v4417_v30 }
0x1c0d   :  { %4422 = vadd.xlane.f32.xlu1 %v4419_v38 }
0x1c98   :  { %v4421_v42 = vpop.xlane.xlu0 %4420 }
0x1c99   :  { %v4424_v50 = vmul.f32 0.0078125, %v4421_v42 }
0x1c9a   :  { %v4423_v59 = vpop.xlane.xlu1 %4422 }
0x1c9b   :  { %v4426_v51 = vadd.f32 1e-05, %v4424_v50  ;;  %v4425_v62 = vmul.f32 0.0078125, %v4423_v59 }
0x1c9d   :  { %6530 = vrsqrt.f32 %v4426_v51  ;;  %v4427_v45 = vadd.f32 1e-05, %v4425_v62 }
0x1c9f   :  { %6532 = vrsqrt.f32 %v4427_v45 }
0x1ca7   :  { %v6531_v37 = vpop.eup %6530 }
0x1ca8   :  { %v4430_v43 = vmul.f32 %v6531_v37, %v4416_v26 }
0x1ca9   :  { %v6533_v15 = vpop.eup %6532 }
0x1caa   :  { %v4431_v17 = vmul.f32 %v6533_v15, %v4417_v30  ;;  %v4439_v11 = vmul.f32 %v5350_v12, %v4430_v43 }
0x1cac   :  { %v4440_v22 = vmul.f32 %v5350_v12, %v4431_v17  ;;  %v7750_v44 = vadd.f32 %v5351_v18, %v4439_v11 }
0x1cae   :  { %v7752_v4 = vadd.f32 %v5351_v18, %v4440_v22 }
0x1cb0   :  { %v4450_v13 = vpack.c.bf16 %v7752_v4, %v7750_v44 }
0x1cb2   :  { %4592 = vmatmul.mubr.bf16.vlgmr.msra.gmra.mrb[72].mxu1 %v4450_v13 }
0x1cb3   :  { %6001 = vmatprep.mubr.msk.bf16.mxu1 %vm6643_vm0, %v6642_v1 }
0x1d85   :  { %v4593_v10 = vpop.f32.mrb[72].mxu1 }
0x1d86   :  { %v7777_v23 = vadd.f32 %v4593_v10, %v4472_v41  ;;  %v4595_v36 = vpop.f32.mrb[73].mxu1 }
0x1d87   :  { %v7779_v39 = vadd.f32 %v4595_v36, %v4476_v21  ;;  %v4597_v29 = vpop.f32.mrb[74].mxu1 }
0x1d88   :  { %v4602_v20 = vand.u32 2147483647, %v7777_v23  ;;  %v7782_v19 = vadd.f32 %v4597_v29, %v4472_v41  ;;  %v4599_v26 = vpop.f32.mrb[75].mxu1  ;;  %vm4610_vm0 = vcmp.ge.f32.partialorder %v7777_v23, 0.0 }
0x1d89   :  { %v4603_v63 = vand.u32 2147483647, %v7779_v39  ;;  %v7786_v38 = vadd.f32 %v4599_v26, %v4476_v21  ;;  %vm4611_vm2 = vcmp.ge.f32.partialorder %v7779_v39, 0.0 }
0x1d8a   :  { %v4606_v30 = vmul.f32 0.70710677, %v4602_v20  ;;  %v4604_v57 = vand.u32 2147483647, %v7782_v19  ;;  %vm4612_vm3 = vcmp.ge.f32.partialorder %v7782_v19, 0.0 }
0x1d8b   :  { %v4607_v5 = vmul.f32 0.70710677, %v4603_v63  ;;  %v4605_v33 = vand.u32 2147483647, %v7786_v38  ;;  %vm4613_vm4 = vcmp.ge.f32.partialorder %v7786_v38, 0.0 }
0x1d8c   :  { %v4618_v9 = vmul.f32 0.3275911, %v4606_v30  ;;  %v4608_v47 = vmul.f32 0.70710677, %v4604_v57  ;;  %v4670_v54 = vsub.f32 0.0, %v4606_v30 }
0x1d8d   :  { %v4619_v32 = vmul.f32 0.3275911, %v4607_v5  ;;  %v4609_v3 = vmul.f32 0.70710677, %v4605_v33  ;;  %v4671_v60 = vsub.f32 0.0, %v4607_v5 }
0x1d8e   :  { %v4622_v24 = vadd.f32 1.0, %v4618_v9  ;;  %v4620_v40 = vmul.f32 0.3275911, %v4608_v47  ;;  %v4674_v50 = vmul.f32 %v4670_v54, %v4606_v30  ;;  %v4672_v59 = vsub.f32 0.0, %v4608_v47 }
0x1d8f   :  { %v4623_v27 = vadd.f32 1.0, %v4619_v32  ;;  %v4621_v53 = vmul.f32 0.3275911, %v4609_v3  ;;  %v4675_v45 = vmul.f32 %v4671_v60, %v4607_v5  ;;  %v4673_v12 = vsub.f32 0.0, %v4609_v3 }
0x1d90   :  { %6534 = vrcp.f32 %v4622_v24  ;;  %v4624_v28 = vadd.f32 1.0, %v4620_v40  ;;  %v4678_v17 = vmul.f32 1.442695, %v4674_v50  ;;  %v4676_v18 = vmul.f32 %v4672_v59, %v4608_v47 }
0x1d91   :  { %6536 = vrcp.f32 %v4623_v27  ;;  %v4625_v8 = vadd.f32 1.0, %v4621_v53  ;;  %v4680_v13 = vmul.f32 1.442695, %v4675_v45  ;;  %v4677_v25 = vmul.f32 %v4673_v12, %v4609_v3 }
0x1d92   :  { %6538 = vrcp.f32 %v4624_v28  ;;  %v4682_v56 = vmul.f32 1.442695, %v4676_v18  ;;  %v4614_v60 = vsel %vm4610_vm0, 1.0, %v6645_v35  ;;  %v4615_v45 = vsel %vm4611_vm2, 1.0, %v6645_v35 }
0x1d93   :  { %6540 = vrcp.f32 %v4625_v8  ;;  %v4684_v34 = vmul.f32 1.442695, %v4677_v25 }
0x1d94   :  { %6542 = vpow2.f32 %v4678_v17 }
0x1d95   :  { %6544 = vpow2.f32 %v4680_v13  ;;  %v4617_v13 = vsel %vm4613_vm4, 1.0, %v6645_v35 }
0x1d96   :  { %6546 = vpow2.f32 %v4682_v56 }
0x1d97   :  { %6548 = vpow2.f32 %v4684_v34 }
0x1d9a   :  { %v6535_v42 = vpop.eup %6534 }
0x1d9b   :  { %v6537_v51 = vpop.eup %6536  ;;  %v4634_v62 = vmul.f32 1.0614054, %v6535_v42 }
0x1d9c   :  { %v4635_v37 = vmul.f32 1.0614054, %v6537_v51  ;;  %v6539_v15 = vpop.eup %6538 }
0x1d9d   :  { %v5368_v43 = vadd.f32 -1.4531521, %v4634_v62  ;;  %v4636_v49 = vmul.f32 1.0614054, %v6539_v15  ;;  %v6541_v55 = vpop.eup %6540 }
0x1d9e   :  { %v5369_v11 = vadd.f32 -1.4531521, %v4635_v37  ;;  %v4637_v61 = vmul.f32 1.0614054, %v6541_v55  ;;  %v6543_v47 = vpop.eup %6542 }
0x1d9f   :  { %v4642_v22 = vmul.f32 %v6535_v42, %v5368_v43  ;;  %v5370_v31 = vadd.f32 -1.4531521, %v4636_v49  ;;  %v6545_v33 = vpop.eup %6544 }
0x1da0   :  { %v4643_v14 = vmul.f32 %v6537_v51, %v5369_v11  ;;  %v5371_v48 = vadd.f32 -1.4531521, %v4637_v61  ;;  %v6547_v54 = vpop.eup %6546 }
0x1da1   :  { %v4646_v7 = vadd.f32 1.4214138, %v4642_v22  ;;  %v4644_v58 = vmul.f32 %v6539_v15, %v5370_v31  ;;  %v6549_v62 = vpop.eup %6548  ;;  %v4698_v22 = vmul.f32 0.5, %v7777_v23  ;;  %v5376_v23 = vld [vmem:[%s7910_s0] ss:$0 sm:$0xff] }
0x1da2   :  { %v4647_v16 = vadd.f32 1.4214138, %v4643_v14  ;;  %v4645_v6 = vmul.f32 %v6541_v55, %v5371_v48 }
0x1da3   :  { %v4650_v46 = vmul.f32 %v6535_v42, %v4646_v7  ;;  %v4648_v2 = vadd.f32 1.4214138, %v4644_v58  ;;  %v4699_v7 = vmul.f32 0.5, %v7779_v39 }
0x1da4   :  { %v4651_v52 = vmul.f32 %v6537_v51, %v4647_v16  ;;  %v4649_v36 = vadd.f32 1.4214138, %v4645_v6  ;;  %v4701_v16 = vmul.f32 0.5, %v7786_v38 }
0x1da5   :  { %v5372_v0 = vadd.f32 -0.28449672, %v4650_v46  ;;  %v4652_v10 = vmul.f32 %v6539_v15, %v4648_v2 }
0x1da6   :  { %v5373_v41 = vadd.f32 -0.28449672, %v4651_v52  ;;  %v4653_v63 = vmul.f32 %v6541_v55, %v4649_v36  ;;  %v6363_v36 = vld [vmem:[%s7911_s5 + $0x8] sm:$0xff]  }
0x1da7   :  { %v4658_v21 = vmul.f32 %v6535_v42, %v5372_v0  ;;  %v5374_v26 = vadd.f32 -0.28449672, %v4652_v10  ;;  %v6362_v10 = vld [vmem:[%s7911_s5] sm:$0xff]  }
0x1da8   :  { %v4659_v29 = vmul.f32 %v6537_v51, %v5373_v41  ;;  %v5375_v9 = vadd.f32 -0.28449672, %v4653_v63  ;;  %5986 = vmatpush3.bf16.msra.mxu1 %v6362_v10 }
0x1da9   :  { %v4662_v20 = vadd.f32 0.2548296, %v4658_v21  ;;  %v4660_v5 = vmul.f32 %v6539_v15, %v5374_v26  ;;  %5987 = vmatprep.subr.bf16.mxu1 %v6642_v1 }
0x1daa   :  { %v4663_v30 = vadd.f32 0.2548296, %v4659_v29  ;;  %v4661_v27 = vmul.f32 %v6541_v55, %v5375_v9  ;;  %v6365_v9 = vld [vmem:[%s7911_s5 + $0x18] sm:$0xff]  }
0x1dab   :  { %v4666_v57 = vmul.f32 %v6535_v42, %v4662_v20  ;;  %v4664_v40 = vadd.f32 0.2548296, %v4660_v5  ;;  %v6364_v5 = vld [vmem:[%s7911_s5 + $0x10] sm:$0xff]  }
0x1dac   :  { %v4667_v32 = vmul.f32 %v6537_v51, %v4663_v30  ;;  %v4665_v8 = vadd.f32 0.2548296, %v4661_v27  ;;  %5988 = vmatpush3.bf16.msra.mxu1 %v6363_v36 }
0x1dad   :  { %v4686_v24 = vmul.f32 %v6543_v47, %v4666_v57  ;;  %v4668_v53 = vmul.f32 %v6539_v15, %v4664_v40  ;;  %v4616_v15 = vsel %vm4612_vm3, 1.0, %v6645_v35  ;;  %5989 = vmatprep.subr.bf16.mxu1 %v6642_v1  ;;  %v6366_v47 = vld [vmem:[%s7911_s5 + $0x20] sm:$0xff]  }
0x1dae   :  { %v4687_v3 = vmul.f32 %v6545_v33, %v4667_v32  ;;  %v4669_v51 = vmul.f32 %v6541_v55, %v4665_v8  ;;  %v4700_v55 = vmul.f32 0.5, %v7782_v19  ;;  %v6367_v32 = vld [vmem:[%s7911_s5 + $0x28] sm:$0xff]   ;;  %v6368_v33 = vld [vmem:[%s7911_s5 + $0x30] sm:$0xff]  }
0x1daf   :  { %v4690_v28 = vsub.f32 1.0, %v4686_v24  ;;  %v4688_v59 = vmul.f32 %v6547_v54, %v4668_v53  ;;  %v6369_v24 = vld [vmem:[%s7911_s5 + $0x38] sm:$0xff]  }
0x1db0   :  { %v4691_v42 = vsub.f32 1.0, %v4687_v3  ;;  %v4689_v43 = vmul.f32 %v6549_v62, %v4669_v51  ;;  %5990 = vmatpush3.bf16.msra.mxu1 %v6364_v5  ;;  %v5394_v62 = vld [vmem:[%s7913_s21] ss:$0 sm:$0xff] }
0x1db1   :  { %v4694_v50 = vmul.f32 %v4690_v28, %v4614_v60  ;;  %v4692_v12 = vsub.f32 1.0, %v4688_v59  ;;  %5991 = vmatprep.subr.bf16.mxu1 %v6642_v1  ;;  %v5393_v60 = vld [vmem:[%s7912_s9] ss:$0 sm:$0xff] }
0x1db2   :  { %v4695_v37 = vmul.f32 %v4691_v42, %v4615_v45  ;;  %v4693_v18 = vsub.f32 1.0, %v4689_v43  ;;  %v5395_v43 = vld [vmem:[%s7914_s25] ss:$0 sm:$0xff] }
0x1db3   :  { %v4702_v17 = vadd.f32 1.0, %v4694_v50  ;;  %v4696_v11 = vmul.f32 %v4692_v12, %v4616_v15 }
0x1db4   :  { %v4703_v49 = vadd.f32 1.0, %v4695_v37  ;;  %v4697_v25 = vmul.f32 %v4693_v18, %v4617_v13  ;;  %5992 = vmatpush3.bf16.msra.mxu1 %v6365_v9 }
0x1db5   :  { %v4704_v14 = vadd.f32 1.0, %v4696_v11  ;;  %v4706_v31 = vmul.f32 %v4702_v17, %v4698_v22  ;;  %5993 = vmatprep.subr.bf16.mxu1 %v6642_v1 }
0x1db6   :  { %v4705_v56 = vadd.f32 1.0, %v4697_v25  ;;  %v4707_v46 = vmul.f32 %v4703_v49, %v4699_v7 }
0x1db7   :  { %v4708_v61 = vmul.f32 %v4704_v14, %v4700_v55 }
0x1db8   :  { %v4709_v58 = vmul.f32 %v4705_v56, %v4701_v16  ;;  %5994 = vmatpush3.bf16.msra.mxu1 %v6366_v47 }
0x1db9   :  { %v4710_v48 = vpack.c.bf16 %v4708_v61, %v4706_v31  ;;  %5995 = vmatprep.subr.bf16.mxu1 %v6642_v1 }
0x1dba   :  { %v4711_v52 = vpack.c.bf16 %v4709_v58, %v4707_v46 }
0x1dbc   :  { %4879 = vmatprep.mubr.bf16.mxu0 %v4711_v52  ;;  %5996 = vmatpush3.bf16.msra.mxu1 %v6367_v32 }
0x1dbd   :  { %4880 = vmatmul.mubr.bf16.vlgmr.msra.gmra.mrb[72].mxu0 %v4710_v48  ;;  %5997 = vmatprep.subr.bf16.mxu1 %v6642_v1 }
0x1dc0   :  { %5998 = vmatpush3.bf16.msra.mxu1 %v6368_v33 }
0x1dc1   :  { %5999 = vmatprep.subr.bf16.mxu1 %v6642_v1 }
0x1dc4   :  { %6000 = vmatpush3.bf16.msra.mxu1 %v6369_v24 }
0x1e90   :  { %v5590_v35 = vpop.f32.mrb[72].mxu0 }
0x1e91   :  { %v5591_v19 = vpop.f32.mrb[73].mxu0 }
0x1e92   :  { %v5592_v34 = vadd.f32 %v5591_v19, %v5590_v35  ;;  %v5593_v0 = vpop.f32.mrb[74].mxu0 }
0x1e93   :  { %v5594_v2 = vpop.f32.mrb[75].mxu0 }
0x1e94   :  { %v4882_v39 = vadd.f32 %v5592_v34, %v5376_v23  ;;  %v5595_v6 = vadd.f32 %v5594_v2, %v5593_v0 }
0x1e96   :  { %v4885_v41 = vadd.f32 %v5595_v6, %v5376_v23  ;;  %v4888_v38 = vadd.f32 %v4882_v39, %v7750_v44 }
0x1e98   :  { %4890 = vadd.xlane.f32.xlu0 %v4888_v38  ;;  %v4889_v21 = vadd.f32 %v4885_v41, %v7752_v4 }
0x1e9a   :  { %4892 = vadd.xlane.f32.xlu1 %v4889_v21 }
0x1f25   :  { %v4891_v29 = vpop.xlane.xlu0 %4890 }
0x1f26   :  { %v4894_v20 = vmul.f32 0.0078125, %v4891_v29 }
0x1f27   :  { %v4893_v26 = vpop.xlane.xlu1 %4892 }
0x1f28   :  { %v4896_v63 = vsub.f32 %v4888_v38, %v4894_v20  ;;  %v4895_v44 = vmul.f32 0.0078125, %v4893_v26 }
0x1f2a   :  { %v4897_v30 = vsub.f32 %v4889_v21, %v4895_v44  ;;  %v4898_v4 = vmul.f32 %v4896_v63, %v4896_v63 }
0x1f2c   :  { %4900 = vadd.xlane.f32.xlu0 %v4898_v4  ;;  %v4899_v57 = vmul.f32 %v4897_v30, %v4897_v30 }
0x1f2e   :  { %4902 = vadd.xlane.f32.xlu1 %v4899_v57 }
0x1fb9   :  { %v4901_v40 = vpop.xlane.xlu0 %4900 }
0x1fba   :  { %v4904_v27 = vmul.f32 0.0078125, %v4901_v40 }
0x1fbb   :  { %v4903_v3 = vpop.xlane.xlu1 %4902 }
0x1fbc   :  { %v4906_v28 = vadd.f32 1e-05, %v4904_v27  ;;  %v4905_v53 = vmul.f32 0.0078125, %v4903_v3 }
0x1fbe   :  { %6550 = vrsqrt.f32 %v4906_v28  ;;  %v4907_v8 = vadd.f32 1e-05, %v4905_v53 }
0x1fc0   :  { %6552 = vrsqrt.f32 %v4907_v8 }
0x1fc8   :  { %v6551_v54 = vpop.eup %6550 }
0x1fc9   :  { %v4910_v42 = vmul.f32 %v6551_v54, %v4896_v63 }
0x1fca   :  { %v6553_v50 = vpop.eup %6552 }
0x1fcb   :  { %v4911_v59 = vmul.f32 %v6553_v50, %v4897_v30  ;;  %v4919_v51 = vmul.f32 %v5393_v60, %v4910_v42 }
0x1fcd   :  { %v4920_v45 = vmul.f32 %v5393_v60, %v4911_v59  ;;  %v4928_v1 = vadd.f32 %v5394_v62, %v4919_v51 }
0x1fcf   :  { %v4929_v37 = vadd.f32 %v5394_v62, %v4920_v45 }
0x1fd1   :  { %v4930_v12 = vpack.c.bf16 %v4929_v37, %v4928_v1 }
0x1fd3   :  { %6002 = vmatmul.mubr.bf16.vlgmr.msra.gmra.mrb[76].mxu1 %v4930_v12 }
0x20a6   :  { %v5036_v15 = vpop.f32.mrb[76].mxu1 }
0x20a7   :  { %v5037_v17 = vadd.f32 %v5395_v43, %v5036_v15  ;;  %v6003_v11 = vpop.f32.mrb[77].mxu1 }
0x20a8   :  { %v5039_v18 = vpop.f32.mrb[78].mxu1 }
0x20a9   :  { %v5040_v22 = vadd.f32 %v5395_v43, %v5039_v18  ;;  %v6004_v13 = vpop.f32.mrb[79].mxu1  ;;  %v5044_v49 = vsel %vm5043_vm5, %v5037_v17, -inf }
0x20aa   :  { %5045 = vmax.xlane.f32.xlu0 %v5044_v49 }
0x20ab   :  { %v5047_v55 = vsel %vm5043_vm5, %v5040_v22, -inf }
0x20ac   :  { %5048 = vmax.xlane.f32.xlu1 %v5047_v55 }
0x2137   :  { %v5046_v14 = vpop.xlane.xlu0 %5045 }
0x2138   :  { %v5050_v25 = vsub.f32 %v5037_v17, %v5046_v14 }
0x2139   :  { %v5049_v7 = vpop.xlane.xlu1 %5048 }
0x213a   :  { %v5052_v31 = vmul.f32 1.442695, %v5050_v25  ;;  %v5051_v61 = vsub.f32 %v5040_v22, %v5049_v7 }
0x213c   :  { %6554 = vpow2.f32 %v5052_v31  ;;  %v5054_v16 = vmul.f32 1.442695, %v5051_v61 }
0x213e   :  { %6556 = vpow2.f32 %v5054_v16 }
0x2146   :  { %v6555_v56 = vpop.eup %6554 }
0x2147   :  { %v5056_v46 = vsel %vm5043_vm5, %v6555_v56, 0.0 }
0x2148   :  { %v6557_v58 = vpop.eup %6556  ;;  %5057 = vadd.xlane.f32.xlu0 %v5056_v46 }
0x2149   :  { %v5059_v48 = vsel %vm5043_vm5, %v6557_v58, 0.0 }
0x214a   :  { %5060 = vadd.xlane.f32.xlu1 %v5059_v48 }
0x21d5   :  { %v5058_v52 = vpop.xlane.xlu0 %5057 }
0x21d6   :  { %6558 = vlog2.f32 %v5058_v52 }
0x21d7   :  { %v5061_v35 = vpop.xlane.xlu1 %5060 }
0x21d8   :  { %6560 = vlog2.f32 %v5061_v35 }
0x21e0   :  { %v6559_v23 = vpop.eup %6558 }
0x21e1   :  { %v5063_v19 = vmul.f32 0.6931472, %v6559_v23 }
0x21e2   :  { %v6561_v34 = vpop.eup %6560 }
0x21e3   :  { %v5066_v0 = vsub.f32 %v5050_v25, %v5063_v19  ;;  %v5065_v2 = vmul.f32 0.6931472, %v6561_v34 }
0x21e5   :  { %5068 = vst.msk [vmem:[#allocation2] sm:$0xff] %vm5043_vm5, %v5066_v0  ;;  %v5067_v39 = vsub.f32 %v5051_v61, %v5065_v2 }
0x21e7   :  { %5069 = vst.msk [vmem:[#allocation2 + $0x8] sm:$0xff] %vm5043_vm5, %v5067_v39 }
0x21e8   :  { %6577 = shalt.err (!%p6574_p4)
}
0x21e9   :  { %s6578_s14 = scalar_lea.hbm %s6915_s13, 256 }
0x21ea   :  { %p6579_p5 = scmp.ne.s32.totalorder %s6915_s13, %s6578_s14  ;;  %p6582_p6 = scmp.lt.u32.totalorder %s6578_s14, %s6915_s13 }
0x21ec   :  { %p6584_p7 = pnand %p6582_p6, %p6579_p5 }
0x21ee   :  { %6587 = shalt.err (!%p6584_p7)
}
0x21ef   :  { %s6647_s19 = smov 128   ;;  %s6648_s24 = smov 8  }
0x21f0   :  { %5081 = dma.vmem_to_hbm [thread:$0]  %s5076_s3, 256, %s6915_s13, [#allocation3], %s6647_s19, %s6647_s19, %s6648_s24  }
0x21f1   :  { %6588 = dma.done.wait [#allocation3], 256  }
0x21f2   :  { %6589 = vsyncadd [#allocation3], 4294967040 }
0x21f3   :  { %5085 = vsyncpa [#allocation3], 1 }

</bundles_post_ra>
